<compile_context>
chip_gen: v5e
topology: v5e:2x2
jax: 0.10.0
libtpu: 0.0.40
codegen_flags: <defaults>
</compile_context>

<pallas_src>
import jax
import jax.numpy as jnp
from jax.experimental import pallas as pl
from jax.experimental.pallas import tpu as pltpu


def _make_fused_msd_kernel(width, dilations, d_max, C, H, W):
    """Fused MSDLayer kernel for one batch element.

    For every sub-layer j (dilation d_j): dilated 3x3 conv (in=C, out=1)
    + bias + ReLU, reading a single reflect-padded (pad=d_max) input tile and
    writing one row of the (width, H, W) output block.
    """

    def kernel(w_ref, b_ref, x_ref, o_ref):
        # w_ref: SMEM (width*C*9,)  flattened (width, C, 3, 3) weights
        # b_ref: SMEM (width,)
        # x_ref: VMEM (1, C, Hp, Wp) reflect-padded (d_max) input tile
        # o_ref: VMEM (1, width, H, W)

        # Load + cast each channel plane exactly once; every tap below is a
        # static slice of these in-register planes (no repeated ref loads).
        planes = [x_ref[0, c, :, :].astype(jnp.float32) for c in range(C)]

        for j in range(width):
            d = dilations[j]
            off = d_max - d  # offset of the d-pad window inside the d_max pad
            # One accumulator per kernel row -> 3 independent mul+add chains.
            accs = [jnp.zeros((H, W), jnp.float32) for _ in range(3)]
            for c in range(C):
                for kh in range(3):
                    ro = off + kh * d
                    slab = planes[c][ro:ro + H, :]        # (H, Wp) row slab
                    for kw in range(3):
                        co = off + kw * d
                        w = w_ref[((j * C + c) * 3 + kh) * 3 + kw]
                        accs[kh] = accs[kh] + slab[:, co:co + W] * w
            acc = (accs[0] + accs[1]) + (accs[2] + b_ref[j])
            o_ref[0, j, :, :] = jnp.maximum(acc, 0.0).astype(o_ref.dtype)

    return kernel


def msd_layer_pallas(x, weights, biases, dilations):
    """Fused MSDLayer.forward.

    x:         (N, C, H, W)
    weights:   (width, C, 3, 3)  stacked OIHW conv weights (O=1 per sub-layer)
    biases:    (width,)
    dilations: sequence of ints, one per sub-layer.
    Returns (N, width, H, W).
    """
    N, C, H, W = x.shape
    width = len(dilations)
    d_max = int(max(dilations))
    # Reflect padding (jnp.pad / PyTorch ReflectionPad2d) requires pad < size.
    assert d_max <= H - 1 and d_max <= W - 1, (
        f"reflect padding needs max dilation ({d_max}) < spatial dims ({H},{W})")

    # Pad ONCE with d_max; each dilation's window is a static offset inside it.
    xp = jnp.pad(x, ((0, 0), (0, 0), (d_max, d_max), (d_max, d_max)),
                 mode="reflect")
    Hp, Wp = H + 2 * d_max, W + 2 * d_max

    w_flat = weights.reshape(-1).astype(jnp.float32)   # (width*C*9,)
    b_flat = biases.reshape(-1).astype(jnp.float32)    # (width,)

    kernel = _make_fused_msd_kernel(
        width, tuple(int(d) for d in dilations), d_max, C, H, W)

    return pl.pallas_call(
        kernel,
        out_shape=jax.ShapeDtypeStruct((N, width, H, W), x.dtype),
        grid=(N,),
        in_specs=[
            pl.BlockSpec(memory_space=pltpu.MemorySpace.SMEM),     # weights
            pl.BlockSpec(memory_space=pltpu.MemorySpace.SMEM),     # biases
            pl.BlockSpec((1, C, Hp, Wp), lambda n: (n, 0, 0, 0)),  # padded x
        ],
        out_specs=pl.BlockSpec((1, width, H, W), lambda n: (n, 0, 0, 0)),
        compiler_params=pltpu.CompilerParams(
            dimension_semantics=("parallel",)),
    )(w_flat, b_flat, xp)


class MSDLayerPallas:
    """JAX/Pallas port of homura MSDLayer (fused forward)."""

    def __init__(self, input_channels, i, width, key):
        self.in_channels = i * width + input_channels
        self.width = width
        self.dilations = [(i * width + j) % 10 + 1 for j in range(1, width + 1)]
        self.params = []
        fan_in = self.in_channels * 9
        bound = 1.0 / (fan_in ** 0.5)   # PyTorch Conv2d default init bounds
        for _d in self.dilations:
            key, kw, kb = jax.random.split(key, 3)
            w = jax.random.uniform(kw, (1, self.in_channels, 3, 3),
                                   jnp.float32, -bound, bound)
            b = jax.random.uniform(kb, (1,), jnp.float32, -bound, bound)
            self.params.append((w, b))
        # Stacked parameters for the fused kernel.
        self.weights = jnp.concatenate([w for (w, _) in self.params], axis=0)
        self.biases = jnp.concatenate([b for (_, b) in self.params], axis=0)

    def __call__(self, x):
        return msd_layer_pallas(x, self.weights, self.biases, self.dilations)


def _ref_msd_base(x, weight, bias, d):
    """Pure-JAX reference (per sub-layer) for correctness checking."""
    xp = jnp.pad(x, ((0, 0), (0, 0), (d, d), (d, d)), mode="reflect")
    out = jax.lax.conv_general_dilated(
        xp, weight, window_strides=(1, 1), padding="VALID",
        rhs_dilation=(d, d), dimension_numbers=("NCHW", "OIHW", "NCHW"))
    return jnp.maximum(out + bias.reshape(1, -1, 1, 1), 0.0)


if __name__ == "__main__":
    key = jax.random.PRNGKey(0)
    key, kx, kp = jax.random.split(key, 3)

    # MSDLayer(input_channels=2, i=1, width=4) -> in_channels = 1*4 + 2 = 6,
    # dilations = [(4+j) % 10 + 1 for j in 1..4] = [6, 7, 8, 9]
    input_channels, i, width = 2, 1, 4
    N, H, W = 2, 16, 16
    layer = MSDLayerPallas(input_channels, i, width, kp)

    x = jax.random.normal(kx, (N, layer.in_channels, H, W), jnp.float32)

    out = jax.block_until_ready(layer(x))
    assert out.shape == (N, width, H, W), out.shape

    ref = jnp.concatenate(
        [_ref_msd_base(x, w, b, d)
         for (w, b), d in zip(layer.params, layer.dilations)], axis=1)
    assert jnp.allclose(out, ref, atol=1e-5, rtol=1e-5), \
        float(jnp.max(jnp.abs(out - ref)))

    print("KERNEL_OK")
</pallas_src>

<mosaic_0001>
module attributes {stable_mosaic.version = 11 : i64} {
  func.func @kernel(%arg0: i32, %arg1: memref<216xf32, #tpu.memory_space<smem>>, %arg2: memref<4xf32, #tpu.memory_space<smem>>, %arg3: memref<1x6x34x34xf32, #tpu.memory_space<vmem>>, %arg4: memref<1x4x16x16xf32, #tpu.memory_space<vmem>>) attributes {dimension_semantics = [#tpu.dimension_semantics<parallel>], iteration_bounds = array<i64: 2>, scalar_prefetch = 0 : i64, scratch_operands = 0 : i64, tpu.core_type = #tpu.core_type<tc>, window_params = [{transform_indices = @transform_0, window_bounds = array<i64: 216>}, {transform_indices = @transform_1, window_bounds = array<i64: 4>}, {transform_indices = @transform_2, window_bounds = array<i64: 1, 6, 34, 34>}, {transform_indices = @transform_3, window_bounds = array<i64: 1, 4, 16, 16>}]} {
    %c0 = arith.constant 0 : index
    %c0_0 = arith.constant 0 : index
    %c0_1 = arith.constant 0 : index
    %c0_2 = arith.constant 0 : index
    %0 = vector.load %arg3[%c0, %c0_0, %c0_1, %c0_2] : memref<1x6x34x34xf32, #tpu.memory_space<vmem>>, vector<1x1x34x34xf32>
    %1 = vector.shape_cast %0 : vector<1x1x34x34xf32> to vector<34x34xf32>
    %c0_3 = arith.constant 0 : index
    %c1 = arith.constant 1 : index
    %c0_4 = arith.constant 0 : index
    %c0_5 = arith.constant 0 : index
    %2 = vector.load %arg3[%c0_3, %c1, %c0_4, %c0_5] : memref<1x6x34x34xf32, #tpu.memory_space<vmem>>, vector<1x1x34x34xf32>
    %3 = vector.shape_cast %2 : vector<1x1x34x34xf32> to vector<34x34xf32>
    %c0_6 = arith.constant 0 : index
    %c2 = arith.constant 2 : index
    %c0_7 = arith.constant 0 : index
    %c0_8 = arith.constant 0 : index
    %4 = vector.load %arg3[%c0_6, %c2, %c0_7, %c0_8] : memref<1x6x34x34xf32, #tpu.memory_space<vmem>>, vector<1x1x34x34xf32>
    %5 = vector.shape_cast %4 : vector<1x1x34x34xf32> to vector<34x34xf32>
    %c0_9 = arith.constant 0 : index
    %c3 = arith.constant 3 : index
    %c0_10 = arith.constant 0 : index
    %c0_11 = arith.constant 0 : index
    %6 = vector.load %arg3[%c0_9, %c3, %c0_10, %c0_11] : memref<1x6x34x34xf32, #tpu.memory_space<vmem>>, vector<1x1x34x34xf32>
    %7 = vector.shape_cast %6 : vector<1x1x34x34xf32> to vector<34x34xf32>
    %c0_12 = arith.constant 0 : index
    %c4 = arith.constant 4 : index
    %c0_13 = arith.constant 0 : index
    %c0_14 = arith.constant 0 : index
    %8 = vector.load %arg3[%c0_12, %c4, %c0_13, %c0_14] : memref<1x6x34x34xf32, #tpu.memory_space<vmem>>, vector<1x1x34x34xf32>
    %9 = vector.shape_cast %8 : vector<1x1x34x34xf32> to vector<34x34xf32>
    %c0_15 = arith.constant 0 : index
    %c5 = arith.constant 5 : index
    %c0_16 = arith.constant 0 : index
    %c0_17 = arith.constant 0 : index
    %10 = vector.load %arg3[%c0_15, %c5, %c0_16, %c0_17] : memref<1x6x34x34xf32, #tpu.memory_space<vmem>>, vector<1x1x34x34xf32>
    %11 = vector.shape_cast %10 : vector<1x1x34x34xf32> to vector<34x34xf32>
    %cst = arith.constant 0.000000e+00 : f32
    %12 = vector.broadcast %cst : f32 to vector<16x16xf32>
    %cst_18 = arith.constant 0.000000e+00 : f32
    %13 = vector.broadcast %cst_18 : f32 to vector<16x16xf32>
    %cst_19 = arith.constant 0.000000e+00 : f32
    %14 = vector.broadcast %cst_19 : f32 to vector<16x16xf32>
    %15 = vector.extract_strided_slice %1 {offsets = [3, 0], sizes = [16, 34], strides = [1, 1]} : vector<34x34xf32> to vector<16x34xf32>
    %c0_20 = arith.constant 0 : index
    %16 = memref.load %arg1[%c0_20] : memref<216xf32, #tpu.memory_space<smem>>
    %17 = vector.extract_strided_slice %15 {offsets = [0, 3], sizes = [16, 16], strides = [1, 1]} : vector<16x34xf32> to vector<16x16xf32>
    %18 = vector.broadcast %16 : f32 to vector<16x16xf32>
    %19 = arith.mulf %17, %18 : vector<16x16xf32>
    %20 = arith.addf %12, %19 : vector<16x16xf32>
    %c1_21 = arith.constant 1 : index
    %21 = memref.load %arg1[%c1_21] : memref<216xf32, #tpu.memory_space<smem>>
    %22 = vector.extract_strided_slice %15 {offsets = [0, 9], sizes = [16, 16], strides = [1, 1]} : vector<16x34xf32> to vector<16x16xf32>
    %23 = vector.broadcast %21 : f32 to vector<16x16xf32>
    %24 = arith.mulf %22, %23 : vector<16x16xf32>
    %25 = arith.addf %20, %24 : vector<16x16xf32>
    %c2_22 = arith.constant 2 : index
    %26 = memref.load %arg1[%c2_22] : memref<216xf32, #tpu.memory_space<smem>>
    %27 = vector.extract_strided_slice %15 {offsets = [0, 15], sizes = [16, 16], strides = [1, 1]} : vector<16x34xf32> to vector<16x16xf32>
    %28 = vector.broadcast %26 : f32 to vector<16x16xf32>
    %29 = arith.mulf %27, %28 : vector<16x16xf32>
    %30 = arith.addf %25, %29 : vector<16x16xf32>
    %31 = vector.extract_strided_slice %1 {offsets = [9, 0], sizes = [16, 34], strides = [1, 1]} : vector<34x34xf32> to vector<16x34xf32>
    %c3_23 = arith.constant 3 : index
    %32 = memref.load %arg1[%c3_23] : memref<216xf32, #tpu.memory_space<smem>>
    %33 = vector.extract_strided_slice %31 {offsets = [0, 3], sizes = [16, 16], strides = [1, 1]} : vector<16x34xf32> to vector<16x16xf32>
    %34 = vector.broadcast %32 : f32 to vector<16x16xf32>
    %35 = arith.mulf %33, %34 : vector<16x16xf32>
    %36 = arith.addf %13, %35 : vector<16x16xf32>
    %c4_24 = arith.constant 4 : index
    %37 = memref.load %arg1[%c4_24] : memref<216xf32, #tpu.memory_space<smem>>
    %38 = vector.extract_strided_slice %31 {offsets = [0, 9], sizes = [16, 16], strides = [1, 1]} : vector<16x34xf32> to vector<16x16xf32>
    %39 = vector.broadcast %37 : f32 to vector<16x16xf32>
    %40 = arith.mulf %38, %39 : vector<16x16xf32>
    %41 = arith.addf %36, %40 : vector<16x16xf32>
    %c5_25 = arith.constant 5 : index
    %42 = memref.load %arg1[%c5_25] : memref<216xf32, #tpu.memory_space<smem>>
    %43 = vector.extract_strided_slice %31 {offsets = [0, 15], sizes = [16, 16], strides = [1, 1]} : vector<16x34xf32> to vector<16x16xf32>
    %44 = vector.broadcast %42 : f32 to vector<16x16xf32>
    %45 = arith.mulf %43, %44 : vector<16x16xf32>
    %46 = arith.addf %41, %45 : vector<16x16xf32>
    %47 = vector.extract_strided_slice %1 {offsets = [15, 0], sizes = [16, 34], strides = [1, 1]} : vector<34x34xf32> to vector<16x34xf32>
    %c6 = arith.constant 6 : index
    %48 = memref.load %arg1[%c6] : memref<216xf32, #tpu.memory_space<smem>>
    %49 = vector.extract_strided_slice %47 {offsets = [0, 3], sizes = [16, 16], strides = [1, 1]} : vector<16x34xf32> to vector<16x16xf32>
    %50 = vector.broadcast %48 : f32 to vector<16x16xf32>
    %51 = arith.mulf %49, %50 : vector<16x16xf32>
    %52 = arith.addf %14, %51 : vector<16x16xf32>
    %c7 = arith.constant 7 : index
    %53 = memref.load %arg1[%c7] : memref<216xf32, #tpu.memory_space<smem>>
    %54 = vector.extract_strided_slice %47 {offsets = [0, 9], sizes = [16, 16], strides = [1, 1]} : vector<16x34xf32> to vector<16x16xf32>
    %55 = vector.broadcast %53 : f32 to vector<16x16xf32>
    %56 = arith.mulf %54, %55 : vector<16x16xf32>
    %57 = arith.addf %52, %56 : vector<16x16xf32>
    %c8 = arith.constant 8 : index
    %58 = memref.load %arg1[%c8] : memref<216xf32, #tpu.memory_space<smem>>
    %59 = vector.extract_strided_slice %47 {offsets = [0, 15], sizes = [16, 16], strides = [1, 1]} : vector<16x34xf32> to vector<16x16xf32>
    %60 = vector.broadcast %58 : f32 to vector<16x16xf32>
    %61 = arith.mulf %59, %60 : vector<16x16xf32>
    %62 = arith.addf %57, %61 : vector<16x16xf32>
    %63 = vector.extract_strided_slice %3 {offsets = [3, 0], sizes = [16, 34], strides = [1, 1]} : vector<34x34xf32> to vector<16x34xf32>
    %c9 = arith.constant 9 : index
    %64 = memref.load %arg1[%c9] : memref<216xf32, #tpu.memory_space<smem>>
    %65 = vector.extract_strided_slice %63 {offsets = [0, 3], sizes = [16, 16], strides = [1, 1]} : vector<16x34xf32> to vector<16x16xf32>
    %66 = vector.broadcast %64 : f32 to vector<16x16xf32>
    %67 = arith.mulf %65, %66 : vector<16x16xf32>
    %68 = arith.addf %30, %67 : vector<16x16xf32>
    %c10 = arith.constant 10 : index
    %69 = memref.load %arg1[%c10] : memref<216xf32, #tpu.memory_space<smem>>
    %70 = vector.extract_strided_slice %63 {offsets = [0, 9], sizes = [16, 16], strides = [1, 1]} : vector<16x34xf32> to vector<16x16xf32>
    %71 = vector.broadcast %69 : f32 to vector<16x16xf32>
    %72 = arith.mulf %70, %71 : vector<16x16xf32>
    %73 = arith.addf %68, %72 : vector<16x16xf32>
    %c11 = arith.constant 11 : index
    %74 = memref.load %arg1[%c11] : memref<216xf32, #tpu.memory_space<smem>>
    %75 = vector.extract_strided_slice %63 {offsets = [0, 15], sizes = [16, 16], strides = [1, 1]} : vector<16x34xf32> to vector<16x16xf32>
    %76 = vector.broadcast %74 : f32 to vector<16x16xf32>
    %77 = arith.mulf %75, %76 : vector<16x16xf32>
    %78 = arith.addf %73, %77 : vector<16x16xf32>
    %79 = vector.extract_strided_slice %3 {offsets = [9, 0], sizes = [16, 34], strides = [1, 1]} : vector<34x34xf32> to vector<16x34xf32>
    %c12 = arith.constant 12 : index
    %80 = memref.load %arg1[%c12] : memref<216xf32, #tpu.memory_space<smem>>
    %81 = vector.extract_strided_slice %79 {offsets = [0, 3], sizes = [16, 16], strides = [1, 1]} : vector<16x34xf32> to vector<16x16xf32>
    %82 = vector.broadcast %80 : f32 to vector<16x16xf32>
    %83 = arith.mulf %81, %82 : vector<16x16xf32>
    %84 = arith.addf %46, %83 : vector<16x16xf32>
    %c13 = arith.constant 13 : index
    %85 = memref.load %arg1[%c13] : memref<216xf32, #tpu.memory_space<smem>>
    %86 = vector.extract_strided_slice %79 {offsets = [0, 9], sizes = [16, 16], strides = [1, 1]} : vector<16x34xf32> to vector<16x16xf32>
    %87 = vector.broadcast %85 : f32 to vector<16x16xf32>
    %88 = arith.mulf %86, %87 : vector<16x16xf32>
    %89 = arith.addf %84, %88 : vector<16x16xf32>
    %c14 = arith.constant 14 : index
    %90 = memref.load %arg1[%c14] : memref<216xf32, #tpu.memory_space<smem>>
    %91 = vector.extract_strided_slice %79 {offsets = [0, 15], sizes = [16, 16], strides = [1, 1]} : vector<16x34xf32> to vector<16x16xf32>
    %92 = vector.broadcast %90 : f32 to vector<16x16xf32>
    %93 = arith.mulf %91, %92 : vector<16x16xf32>
    %94 = arith.addf %89, %93 : vector<16x16xf32>
    %95 = vector.extract_strided_slice %3 {offsets = [15, 0], sizes = [16, 34], strides = [1, 1]} : vector<34x34xf32> to vector<16x34xf32>
    %c15 = arith.constant 15 : index
    %96 = memref.load %arg1[%c15] : memref<216xf32, #tpu.memory_space<smem>>
    %97 = vector.extract_strided_slice %95 {offsets = [0, 3], sizes = [16, 16], strides = [1, 1]} : vector<16x34xf32> to vector<16x16xf32>
    %98 = vector.broadcast %96 : f32 to vector<16x16xf32>
    %99 = arith.mulf %97, %98 : vector<16x16xf32>
    %100 = arith.addf %62, %99 : vector<16x16xf32>
    %c16 = arith.constant 16 : index
    %101 = memref.load %arg1[%c16] : memref<216xf32, #tpu.memory_space<smem>>
    %102 = vector.extract_strided_slice %95 {offsets = [0, 9], sizes = [16, 16], strides = [1, 1]} : vector<16x34xf32> to vector<16x16xf32>
    %103 = vector.broadcast %101 : f32 to vector<16x16xf32>
    %104 = arith.mulf %102, %103 : vector<16x16xf32>
    %105 = arith.addf %100, %104 : vector<16x16xf32>
    %c17 = arith.constant 17 : index
    %106 = memref.load %arg1[%c17] : memref<216xf32, #tpu.memory_space<smem>>
    %107 = vector.extract_strided_slice %95 {offsets = [0, 15], sizes = [16, 16], strides = [1, 1]} : vector<16x34xf32> to vector<16x16xf32>
    %108 = vector.broadcast %106 : f32 to vector<16x16xf32>
    %109 = arith.mulf %107, %108 : vector<16x16xf32>
    %110 = arith.addf %105, %109 : vector<16x16xf32>
    %111 = vector.extract_strided_slice %5 {offsets = [3, 0], sizes = [16, 34], strides = [1, 1]} : vector<34x34xf32> to vector<16x34xf32>
    %c18 = arith.constant 18 : index
    %112 = memref.load %arg1[%c18] : memref<216xf32, #tpu.memory_space<smem>>
    %113 = vector.extract_strided_slice %111 {offsets = [0, 3], sizes = [16, 16], strides = [1, 1]} : vector<16x34xf32> to vector<16x16xf32>
    %114 = vector.broadcast %112 : f32 to vector<16x16xf32>
    %115 = arith.mulf %113, %114 : vector<16x16xf32>
    %116 = arith.addf %78, %115 : vector<16x16xf32>
    %c19 = arith.constant 19 : index
    %117 = memref.load %arg1[%c19] : memref<216xf32, #tpu.memory_space<smem>>
    %118 = vector.extract_strided_slice %111 {offsets = [0, 9], sizes = [16, 16], strides = [1, 1]} : vector<16x34xf32> to vector<16x16xf32>
    %119 = vector.broadcast %117 : f32 to vector<16x16xf32>
    %120 = arith.mulf %118, %119 : vector<16x16xf32>
    %121 = arith.addf %116, %120 : vector<16x16xf32>
    %c20 = arith.constant 20 : index
    %122 = memref.load %arg1[%c20] : memref<216xf32, #tpu.memory_space<smem>>
    %123 = vector.extract_strided_slice %111 {offsets = [0, 15], sizes = [16, 16], strides = [1, 1]} : vector<16x34xf32> to vector<16x16xf32>
    %124 = vector.broadcast %122 : f32 to vector<16x16xf32>
    %125 = arith.mulf %123, %124 : vector<16x16xf32>
    %126 = arith.addf %121, %125 : vector<16x16xf32>
    %127 = vector.extract_strided_slice %5 {offsets = [9, 0], sizes = [16, 34], strides = [1, 1]} : vector<34x34xf32> to vector<16x34xf32>
    %c21 = arith.constant 21 : index
    %128 = memref.load %arg1[%c21] : memref<216xf32, #tpu.memory_space<smem>>
    %129 = vector.extract_strided_slice %127 {offsets = [0, 3], sizes = [16, 16], strides = [1, 1]} : vector<16x34xf32> to vector<16x16xf32>
    %130 = vector.broadcast %128 : f32 to vector<16x16xf32>
    %131 = arith.mulf %129, %130 : vector<16x16xf32>
    %132 = arith.addf %94, %131 : vector<16x16xf32>
    %c22 = arith.constant 22 : index
    %133 = memref.load %arg1[%c22] : memref<216xf32, #tpu.memory_space<smem>>
    %134 = vector.extract_strided_slice %127 {offsets = [0, 9], sizes = [16, 16], strides = [1, 1]} : vector<16x34xf32> to vector<16x16xf32>
    %135 = vector.broadcast %133 : f32 to vector<16x16xf32>
    %136 = arith.mulf %134, %135 : vector<16x16xf32>
    %137 = arith.addf %132, %136 : vector<16x16xf32>
    %c23 = arith.constant 23 : index
    %138 = memref.load %arg1[%c23] : memref<216xf32, #tpu.memory_space<smem>>
    %139 = vector.extract_strided_slice %127 {offsets = [0, 15], sizes = [16, 16], strides = [1, 1]} : vector<16x34xf32> to vector<16x16xf32>
    %140 = vector.broadcast %138 : f32 to vector<16x16xf32>
    %141 = arith.mulf %139, %140 : vector<16x16xf32>
    %142 = arith.addf %137, %141 : vector<16x16xf32>
    %143 = vector.extract_strided_slice %5 {offsets = [15, 0], sizes = [16, 34], strides = [1, 1]} : vector<34x34xf32> to vector<16x34xf32>
    %c24 = arith.constant 24 : index
    %144 = memref.load %arg1[%c24] : memref<216xf32, #tpu.memory_space<smem>>
    %145 = vector.extract_strided_slice %143 {offsets = [0, 3], sizes = [16, 16], strides = [1, 1]} : vector<16x34xf32> to vector<16x16xf32>
    %146 = vector.broadcast %144 : f32 to vector<16x16xf32>
    %147 = arith.mulf %145, %146 : vector<16x16xf32>
    %148 = arith.addf %110, %147 : vector<16x16xf32>
    %c25 = arith.constant 25 : index
    %149 = memref.load %arg1[%c25] : memref<216xf32, #tpu.memory_space<smem>>
    %150 = vector.extract_strided_slice %143 {offsets = [0, 9], sizes = [16, 16], strides = [1, 1]} : vector<16x34xf32> to vector<16x16xf32>
    %151 = vector.broadcast %149 : f32 to vector<16x16xf32>
    %152 = arith.mulf %150, %151 : vector<16x16xf32>
    %153 = arith.addf %148, %152 : vector<16x16xf32>
    %c26 = arith.constant 26 : index
    %154 = memref.load %arg1[%c26] : memref<216xf32, #tpu.memory_space<smem>>
    %155 = vector.extract_strided_slice %143 {offsets = [0, 15], sizes = [16, 16], strides = [1, 1]} : vector<16x34xf32> to vector<16x16xf32>
    %156 = vector.broadcast %154 : f32 to vector<16x16xf32>
    %157 = arith.mulf %155, %156 : vector<16x16xf32>
    %158 = arith.addf %153, %157 : vector<16x16xf32>
    %159 = vector.extract_strided_slice %7 {offsets = [3, 0], sizes = [16, 34], strides = [1, 1]} : vector<34x34xf32> to vector<16x34xf32>
    %c27 = arith.constant 27 : index
    %160 = memref.load %arg1[%c27] : memref<216xf32, #tpu.memory_space<smem>>
    %161 = vector.extract_strided_slice %159 {offsets = [0, 3], sizes = [16, 16], strides = [1, 1]} : vector<16x34xf32> to vector<16x16xf32>
    %162 = vector.broadcast %160 : f32 to vector<16x16xf32>
    %163 = arith.mulf %161, %162 : vector<16x16xf32>
    %164 = arith.addf %126, %163 : vector<16x16xf32>
    %c28 = arith.constant 28 : index
    %165 = memref.load %arg1[%c28] : memref<216xf32, #tpu.memory_space<smem>>
    %166 = vector.extract_strided_slice %159 {offsets = [0, 9], sizes = [16, 16], strides = [1, 1]} : vector<16x34xf32> to vector<16x16xf32>
    %167 = vector.broadcast %165 : f32 to vector<16x16xf32>
    %168 = arith.mulf %166, %167 : vector<16x16xf32>
    %169 = arith.addf %164, %168 : vector<16x16xf32>
    %c29 = arith.constant 29 : index
    %170 = memref.load %arg1[%c29] : memref<216xf32, #tpu.memory_space<smem>>
    %171 = vector.extract_strided_slice %159 {offsets = [0, 15], sizes = [16, 16], strides = [1, 1]} : vector<16x34xf32> to vector<16x16xf32>
    %172 = vector.broadcast %170 : f32 to vector<16x16xf32>
    %173 = arith.mulf %171, %172 : vector<16x16xf32>
    %174 = arith.addf %169, %173 : vector<16x16xf32>
    %175 = vector.extract_strided_slice %7 {offsets = [9, 0], sizes = [16, 34], strides = [1, 1]} : vector<34x34xf32> to vector<16x34xf32>
    %c30 = arith.constant 30 : index
    %176 = memref.load %arg1[%c30] : memref<216xf32, #tpu.memory_space<smem>>
    %177 = vector.extract_strided_slice %175 {offsets = [0, 3], sizes = [16, 16], strides = [1, 1]} : vector<16x34xf32> to vector<16x16xf32>
    %178 = vector.broadcast %176 : f32 to vector<16x16xf32>
    %179 = arith.mulf %177, %178 : vector<16x16xf32>
    %180 = arith.addf %142, %179 : vector<16x16xf32>
    %c31 = arith.constant 31 : index
    %181 = memref.load %arg1[%c31] : memref<216xf32, #tpu.memory_space<smem>>
    %182 = vector.extract_strided_slice %175 {offsets = [0, 9], sizes = [16, 16], strides = [1, 1]} : vector<16x34xf32> to vector<16x16xf32>
    %183 = vector.broadcast %181 : f32 to vector<16x16xf32>
    %184 = arith.mulf %182, %183 : vector<16x16xf32>
    %185 = arith.addf %180, %184 : vector<16x16xf32>
    %c32 = arith.constant 32 : index
    %186 = memref.load %arg1[%c32] : memref<216xf32, #tpu.memory_space<smem>>
    %187 = vector.extract_strided_slice %175 {offsets = [0, 15], sizes = [16, 16], strides = [1, 1]} : vector<16x34xf32> to vector<16x16xf32>
    %188 = vector.broadcast %186 : f32 to vector<16x16xf32>
    %189 = arith.mulf %187, %188 : vector<16x16xf32>
    %190 = arith.addf %185, %189 : vector<16x16xf32>
    %191 = vector.extract_strided_slice %7 {offsets = [15, 0], sizes = [16, 34], strides = [1, 1]} : vector<34x34xf32> to vector<16x34xf32>
    %c33 = arith.constant 33 : index
    %192 = memref.load %arg1[%c33] : memref<216xf32, #tpu.memory_space<smem>>
    %193 = vector.extract_strided_slice %191 {offsets = [0, 3], sizes = [16, 16], strides = [1, 1]} : vector<16x34xf32> to vector<16x16xf32>
    %194 = vector.broadcast %192 : f32 to vector<16x16xf32>
    %195 = arith.mulf %193, %194 : vector<16x16xf32>
    %196 = arith.addf %158, %195 : vector<16x16xf32>
    %c34 = arith.constant 34 : index
    %197 = memref.load %arg1[%c34] : memref<216xf32, #tpu.memory_space<smem>>
    %198 = vector.extract_strided_slice %191 {offsets = [0, 9], sizes = [16, 16], strides = [1, 1]} : vector<16x34xf32> to vector<16x16xf32>
    %199 = vector.broadcast %197 : f32 to vector<16x16xf32>
    %200 = arith.mulf %198, %199 : vector<16x16xf32>
    %201 = arith.addf %196, %200 : vector<16x16xf32>
    %c35 = arith.constant 35 : index
    %202 = memref.load %arg1[%c35] : memref<216xf32, #tpu.memory_space<smem>>
    %203 = vector.extract_strided_slice %191 {offsets = [0, 15], sizes = [16, 16], strides = [1, 1]} : vector<16x34xf32> to vector<16x16xf32>
    %204 = vector.broadcast %202 : f32 to vector<16x16xf32>
    %205 = arith.mulf %203, %204 : vector<16x16xf32>
    %206 = arith.addf %201, %205 : vector<16x16xf32>
    %207 = vector.extract_strided_slice %9 {offsets = [3, 0], sizes = [16, 34], strides = [1, 1]} : vector<34x34xf32> to vector<16x34xf32>
    %c36 = arith.constant 36 : index
    %208 = memref.load %arg1[%c36] : memref<216xf32, #tpu.memory_space<smem>>
    %209 = vector.extract_strided_slice %207 {offsets = [0, 3], sizes = [16, 16], strides = [1, 1]} : vector<16x34xf32> to vector<16x16xf32>
    %210 = vector.broadcast %208 : f32 to vector<16x16xf32>
    %211 = arith.mulf %209, %210 : vector<16x16xf32>
    %212 = arith.addf %174, %211 : vector<16x16xf32>
    %c37 = arith.constant 37 : index
    %213 = memref.load %arg1[%c37] : memref<216xf32, #tpu.memory_space<smem>>
    %214 = vector.extract_strided_slice %207 {offsets = [0, 9], sizes = [16, 16], strides = [1, 1]} : vector<16x34xf32> to vector<16x16xf32>
    %215 = vector.broadcast %213 : f32 to vector<16x16xf32>
    %216 = arith.mulf %214, %215 : vector<16x16xf32>
    %217 = arith.addf %212, %216 : vector<16x16xf32>
    %c38 = arith.constant 38 : index
    %218 = memref.load %arg1[%c38] : memref<216xf32, #tpu.memory_space<smem>>
    %219 = vector.extract_strided_slice %207 {offsets = [0, 15], sizes = [16, 16], strides = [1, 1]} : vector<16x34xf32> to vector<16x16xf32>
    %220 = vector.broadcast %218 : f32 to vector<16x16xf32>
    %221 = arith.mulf %219, %220 : vector<16x16xf32>
    %222 = arith.addf %217, %221 : vector<16x16xf32>
    %223 = vector.extract_strided_slice %9 {offsets = [9, 0], sizes = [16, 34], strides = [1, 1]} : vector<34x34xf32> to vector<16x34xf32>
    %c39 = arith.constant 39 : index
    %224 = memref.load %arg1[%c39] : memref<216xf32, #tpu.memory_space<smem>>
    %225 = vector.extract_strided_slice %223 {offsets = [0, 3], sizes = [16, 16], strides = [1, 1]} : vector<16x34xf32> to vector<16x16xf32>
    %226 = vector.broadcast %224 : f32 to vector<16x16xf32>
    %227 = arith.mulf %225, %226 : vector<16x16xf32>
    %228 = arith.addf %190, %227 : vector<16x16xf32>
    %c40 = arith.constant 40 : index
    %229 = memref.load %arg1[%c40] : memref<216xf32, #tpu.memory_space<smem>>
    %230 = vector.extract_strided_slice %223 {offsets = [0, 9], sizes = [16, 16], strides = [1, 1]} : vector<16x34xf32> to vector<16x16xf32>
    %231 = vector.broadcast %229 : f32 to vector<16x16xf32>
    %232 = arith.mulf %230, %231 : vector<16x16xf32>
    %233 = arith.addf %228, %232 : vector<16x16xf32>
    %c41 = arith.constant 41 : index
    %234 = memref.load %arg1[%c41] : memref<216xf32, #tpu.memory_space<smem>>
    %235 = vector.extract_strided_slice %223 {offsets = [0, 15], sizes = [16, 16], strides = [1, 1]} : vector<16x34xf32> to vector<16x16xf32>
    %236 = vector.broadcast %234 : f32 to vector<16x16xf32>
    %237 = arith.mulf %235, %236 : vector<16x16xf32>
    %238 = arith.addf %233, %237 : vector<16x16xf32>
    %239 = vector.extract_strided_slice %9 {offsets = [15, 0], sizes = [16, 34], strides = [1, 1]} : vector<34x34xf32> to vector<16x34xf32>
    %c42 = arith.constant 42 : index
    %240 = memref.load %arg1[%c42] : memref<216xf32, #tpu.memory_space<smem>>
    %241 = vector.extract_strided_slice %239 {offsets = [0, 3], sizes = [16, 16], strides = [1, 1]} : vector<16x34xf32> to vector<16x16xf32>
    %242 = vector.broadcast %240 : f32 to vector<16x16xf32>
    %243 = arith.mulf %241, %242 : vector<16x16xf32>
    %244 = arith.addf %206, %243 : vector<16x16xf32>
    %c43 = arith.constant 43 : index
    %245 = memref.load %arg1[%c43] : memref<216xf32, #tpu.memory_space<smem>>
    %246 = vector.extract_strided_slice %239 {offsets = [0, 9], sizes = [16, 16], strides = [1, 1]} : vector<16x34xf32> to vector<16x16xf32>
    %247 = vector.broadcast %245 : f32 to vector<16x16xf32>
    %248 = arith.mulf %246, %247 : vector<16x16xf32>
    %249 = arith.addf %244, %248 : vector<16x16xf32>
    %c44 = arith.constant 44 : index
    %250 = memref.load %arg1[%c44] : memref<216xf32, #tpu.memory_space<smem>>
    %251 = vector.extract_strided_slice %239 {offsets = [0, 15], sizes = [16, 16], strides = [1, 1]} : vector<16x34xf32> to vector<16x16xf32>
    %252 = vector.broadcast %250 : f32 to vector<16x16xf32>
    %253 = arith.mulf %251, %252 : vector<16x16xf32>
    %254 = arith.addf %249, %253 : vector<16x16xf32>
    %255 = vector.extract_strided_slice %11 {offsets = [3, 0], sizes = [16, 34], strides = [1, 1]} : vector<34x34xf32> to vector<16x34xf32>
    %c45 = arith.constant 45 : index
    %256 = memref.load %arg1[%c45] : memref<216xf32, #tpu.memory_space<smem>>
    %257 = vector.extract_strided_slice %255 {offsets = [0, 3], sizes = [16, 16], strides = [1, 1]} : vector<16x34xf32> to vector<16x16xf32>
    %258 = vector.broadcast %256 : f32 to vector<16x16xf32>
    %259 = arith.mulf %257, %258 : vector<16x16xf32>
    %260 = arith.addf %222, %259 : vector<16x16xf32>
    %c46 = arith.constant 46 : index
    %261 = memref.load %arg1[%c46] : memref<216xf32, #tpu.memory_space<smem>>
    %262 = vector.extract_strided_slice %255 {offsets = [0, 9], sizes = [16, 16], strides = [1, 1]} : vector<16x34xf32> to vector<16x16xf32>
    %263 = vector.broadcast %261 : f32 to vector<16x16xf32>
    %264 = arith.mulf %262, %263 : vector<16x16xf32>
    %265 = arith.addf %260, %264 : vector<16x16xf32>
    %c47 = arith.constant 47 : index
    %266 = memref.load %arg1[%c47] : memref<216xf32, #tpu.memory_space<smem>>
    %267 = vector.extract_strided_slice %255 {offsets = [0, 15], sizes = [16, 16], strides = [1, 1]} : vector<16x34xf32> to vector<16x16xf32>
    %268 = vector.broadcast %266 : f32 to vector<16x16xf32>
    %269 = arith.mulf %267, %268 : vector<16x16xf32>
    %270 = arith.addf %265, %269 : vector<16x16xf32>
    %271 = vector.extract_strided_slice %11 {offsets = [9, 0], sizes = [16, 34], strides = [1, 1]} : vector<34x34xf32> to vector<16x34xf32>
    %c48 = arith.constant 48 : index
    %272 = memref.load %arg1[%c48] : memref<216xf32, #tpu.memory_space<smem>>
    %273 = vector.extract_strided_slice %271 {offsets = [0, 3], sizes = [16, 16], strides = [1, 1]} : vector<16x34xf32> to vector<16x16xf32>
    %274 = vector.broadcast %272 : f32 to vector<16x16xf32>
    %275 = arith.mulf %273, %274 : vector<16x16xf32>
    %276 = arith.addf %238, %275 : vector<16x16xf32>
    %c49 = arith.constant 49 : index
    %277 = memref.load %arg1[%c49] : memref<216xf32, #tpu.memory_space<smem>>
    %278 = vector.extract_strided_slice %271 {offsets = [0, 9], sizes = [16, 16], strides = [1, 1]} : vector<16x34xf32> to vector<16x16xf32>
    %279 = vector.broadcast %277 : f32 to vector<16x16xf32>
    %280 = arith.mulf %278, %279 : vector<16x16xf32>
    %281 = arith.addf %276, %280 : vector<16x16xf32>
    %c50 = arith.constant 50 : index
    %282 = memref.load %arg1[%c50] : memref<216xf32, #tpu.memory_space<smem>>
    %283 = vector.extract_strided_slice %271 {offsets = [0, 15], sizes = [16, 16], strides = [1, 1]} : vector<16x34xf32> to vector<16x16xf32>
    %284 = vector.broadcast %282 : f32 to vector<16x16xf32>
    %285 = arith.mulf %283, %284 : vector<16x16xf32>
    %286 = arith.addf %281, %285 : vector<16x16xf32>
    %287 = vector.extract_strided_slice %11 {offsets = [15, 0], sizes = [16, 34], strides = [1, 1]} : vector<34x34xf32> to vector<16x34xf32>
    %c51 = arith.constant 51 : index
    %288 = memref.load %arg1[%c51] : memref<216xf32, #tpu.memory_space<smem>>
    %289 = vector.extract_strided_slice %287 {offsets = [0, 3], sizes = [16, 16], strides = [1, 1]} : vector<16x34xf32> to vector<16x16xf32>
    %290 = vector.broadcast %288 : f32 to vector<16x16xf32>
    %291 = arith.mulf %289, %290 : vector<16x16xf32>
    %292 = arith.addf %254, %291 : vector<16x16xf32>
    %c52 = arith.constant 52 : index
    %293 = memref.load %arg1[%c52] : memref<216xf32, #tpu.memory_space<smem>>
    %294 = vector.extract_strided_slice %287 {offsets = [0, 9], sizes = [16, 16], strides = [1, 1]} : vector<16x34xf32> to vector<16x16xf32>
    %295 = vector.broadcast %293 : f32 to vector<16x16xf32>
    %296 = arith.mulf %294, %295 : vector<16x16xf32>
    %297 = arith.addf %292, %296 : vector<16x16xf32>
    %c53 = arith.constant 53 : index
    %298 = memref.load %arg1[%c53] : memref<216xf32, #tpu.memory_space<smem>>
    %299 = vector.extract_strided_slice %287 {offsets = [0, 15], sizes = [16, 16], strides = [1, 1]} : vector<16x34xf32> to vector<16x16xf32>
    %300 = vector.broadcast %298 : f32 to vector<16x16xf32>
    %301 = arith.mulf %299, %300 : vector<16x16xf32>
    %302 = arith.addf %297, %301 : vector<16x16xf32>
    %303 = arith.addf %270, %286 : vector<16x16xf32>
    %c0_26 = arith.constant 0 : index
    %304 = memref.load %arg2[%c0_26] : memref<4xf32, #tpu.memory_space<smem>>
    %305 = vector.broadcast %304 : f32 to vector<16x16xf32>
    %306 = arith.addf %302, %305 : vector<16x16xf32>
    %307 = arith.addf %303, %306 : vector<16x16xf32>
    %cst_27 = arith.constant 0.000000e+00 : f32
    %308 = vector.broadcast %cst_27 : f32 to vector<16x16xf32>
    %309 = arith.maximumf %307, %308 : vector<16x16xf32>
    %c0_28 = arith.constant 0 : index
    %c0_29 = arith.constant 0 : index
    %c0_30 = arith.constant 0 : index
    %c0_31 = arith.constant 0 : index
    %310 = vector.load %arg4[%c0_28, %c0_29, %c0_30, %c0_31] : memref<1x4x16x16xf32, #tpu.memory_space<vmem>>, vector<1x1x16x16xf32>
    %311 = vector.shape_cast %310 : vector<1x1x16x16xf32> to vector<16x16xf32>
    %312 = vector.shape_cast %309 : vector<16x16xf32> to vector<1x1x16x16xf32>
    tpu.vector_store %arg4[%c0_28, %c0_29, %c0_30, %c0_31], %312 {strides = array<i32>} : memref<1x4x16x16xf32, #tpu.memory_space<vmem>>, vector<1x1x16x16xf32>,
    %cst_32 = arith.constant 0.000000e+00 : f32
    %313 = vector.broadcast %cst_32 : f32 to vector<16x16xf32>
    %cst_33 = arith.constant 0.000000e+00 : f32
    %314 = vector.broadcast %cst_33 : f32 to vector<16x16xf32>
    %cst_34 = arith.constant 0.000000e+00 : f32
    %315 = vector.broadcast %cst_34 : f32 to vector<16x16xf32>
    %316 = vector.extract_strided_slice %1 {offsets = [2, 0], sizes = [16, 34], strides = [1, 1]} : vector<34x34xf32> to vector<16x34xf32>
    %c54 = arith.constant 54 : index
    %317 = memref.load %arg1[%c54] : memref<216xf32, #tpu.memory_space<smem>>
    %318 = vector.extract_strided_slice %316 {offsets = [0, 2], sizes = [16, 16], strides = [1, 1]} : vector<16x34xf32> to vector<16x16xf32>
    %319 = vector.broadcast %317 : f32 to vector<16x16xf32>
    %320 = arith.mulf %318, %319 : vector<16x16xf32>
    %321 = arith.addf %313, %320 : vector<16x16xf32>
    %c55 = arith.constant 55 : index
    %322 = memref.load %arg1[%c55] : memref<216xf32, #tpu.memory_space<smem>>
    %323 = vector.extract_strided_slice %316 {offsets = [0, 9], sizes = [16, 16], strides = [1, 1]} : vector<16x34xf32> to vector<16x16xf32>
    %324 = vector.broadcast %322 : f32 to vector<16x16xf32>
    %325 = arith.mulf %323, %324 : vector<16x16xf32>
    %326 = arith.addf %321, %325 : vector<16x16xf32>
    %c56 = arith.constant 56 : index
    %327 = memref.load %arg1[%c56] : memref<216xf32, #tpu.memory_space<smem>>
    %328 = vector.extract_strided_slice %316 {offsets = [0, 16], sizes = [16, 16], strides = [1, 1]} : vector<16x34xf32> to vector<16x16xf32>
    %329 = vector.broadcast %327 : f32 to vector<16x16xf32>
    %330 = arith.mulf %328, %329 : vector<16x16xf32>
    %331 = arith.addf %326, %330 : vector<16x16xf32>
    %332 = vector.extract_strided_slice %1 {offsets = [9, 0], sizes = [16, 34], strides = [1, 1]} : vector<34x34xf32> to vector<16x34xf32>
    %c57 = arith.constant 57 : index
    %333 = memref.load %arg1[%c57] : memref<216xf32, #tpu.memory_space<smem>>
    %334 = vector.extract_strided_slice %332 {offsets = [0, 2], sizes = [16, 16], strides = [1, 1]} : vector<16x34xf32> to vector<16x16xf32>
    %335 = vector.broadcast %333 : f32 to vector<16x16xf32>
    %336 = arith.mulf %334, %335 : vector<16x16xf32>
    %337 = arith.addf %314, %336 : vector<16x16xf32>
    %c58 = arith.constant 58 : index
    %338 = memref.load %arg1[%c58] : memref<216xf32, #tpu.memory_space<smem>>
    %339 = vector.extract_strided_slice %332 {offsets = [0, 9], sizes = [16, 16], strides = [1, 1]} : vector<16x34xf32> to vector<16x16xf32>
    %340 = vector.broadcast %338 : f32 to vector<16x16xf32>
    %341 = arith.mulf %339, %340 : vector<16x16xf32>
    %342 = arith.addf %337, %341 : vector<16x16xf32>
    %c59 = arith.constant 59 : index
    %343 = memref.load %arg1[%c59] : memref<216xf32, #tpu.memory_space<smem>>
    %344 = vector.extract_strided_slice %332 {offsets = [0, 16], sizes = [16, 16], strides = [1, 1]} : vector<16x34xf32> to vector<16x16xf32>
    %345 = vector.broadcast %343 : f32 to vector<16x16xf32>
    %346 = arith.mulf %344, %345 : vector<16x16xf32>
    %347 = arith.addf %342, %346 : vector<16x16xf32>
    %348 = vector.extract_strided_slice %1 {offsets = [16, 0], sizes = [16, 34], strides = [1, 1]} : vector<34x34xf32> to vector<16x34xf32>
    %c60 = arith.constant 60 : index
    %349 = memref.load %arg1[%c60] : memref<216xf32, #tpu.memory_space<smem>>
    %350 = vector.extract_strided_slice %348 {offsets = [0, 2], sizes = [16, 16], strides = [1, 1]} : vector<16x34xf32> to vector<16x16xf32>
    %351 = vector.broadcast %349 : f32 to vector<16x16xf32>
    %352 = arith.mulf %350, %351 : vector<16x16xf32>
    %353 = arith.addf %315, %352 : vector<16x16xf32>
    %c61 = arith.constant 61 : index
    %354 = memref.load %arg1[%c61] : memref<216xf32, #tpu.memory_space<smem>>
    %355 = vector.extract_strided_slice %348 {offsets = [0, 9], sizes = [16, 16], strides = [1, 1]} : vector<16x34xf32> to vector<16x16xf32>
    %356 = vector.broadcast %354 : f32 to vector<16x16xf32>
    %357 = arith.mulf %355, %356 : vector<16x16xf32>
    %358 = arith.addf %353, %357 : vector<16x16xf32>
    %c62 = arith.constant 62 : index
    %359 = memref.load %arg1[%c62] : memref<216xf32, #tpu.memory_space<smem>>
    %360 = vector.extract_strided_slice %348 {offsets = [0, 16], sizes = [16, 16], strides = [1, 1]} : vector<16x34xf32> to vector<16x16xf32>
    %361 = vector.broadcast %359 : f32 to vector<16x16xf32>
    %362 = arith.mulf %360, %361 : vector<16x16xf32>
    %363 = arith.addf %358, %362 : vector<16x16xf32>
    %364 = vector.extract_strided_slice %3 {offsets = [2, 0], sizes = [16, 34], strides = [1, 1]} : vector<34x34xf32> to vector<16x34xf32>
    %c63 = arith.constant 63 : index
    %365 = memref.load %arg1[%c63] : memref<216xf32, #tpu.memory_space<smem>>
    %366 = vector.extract_strided_slice %364 {offsets = [0, 2], sizes = [16, 16], strides = [1, 1]} : vector<16x34xf32> to vector<16x16xf32>
    %367 = vector.broadcast %365 : f32 to vector<16x16xf32>
    %368 = arith.mulf %366, %367 : vector<16x16xf32>
    %369 = arith.addf %331, %368 : vector<16x16xf32>
    %c64 = arith.constant 64 : index
    %370 = memref.load %arg1[%c64] : memref<216xf32, #tpu.memory_space<smem>>
    %371 = vector.extract_strided_slice %364 {offsets = [0, 9], sizes = [16, 16], strides = [1, 1]} : vector<16x34xf32> to vector<16x16xf32>
    %372 = vector.broadcast %370 : f32 to vector<16x16xf32>
    %373 = arith.mulf %371, %372 : vector<16x16xf32>
    %374 = arith.addf %369, %373 : vector<16x16xf32>
    %c65 = arith.constant 65 : index
    %375 = memref.load %arg1[%c65] : memref<216xf32, #tpu.memory_space<smem>>
    %376 = vector.extract_strided_slice %364 {offsets = [0, 16], sizes = [16, 16], strides = [1, 1]} : vector<16x34xf32> to vector<16x16xf32>
    %377 = vector.broadcast %375 : f32 to vector<16x16xf32>
    %378 = arith.mulf %376, %377 : vector<16x16xf32>
    %379 = arith.addf %374, %378 : vector<16x16xf32>
    %380 = vector.extract_strided_slice %3 {offsets = [9, 0], sizes = [16, 34], strides = [1, 1]} : vector<34x34xf32> to vector<16x34xf32>
    %c66 = arith.constant 66 : index
    %381 = memref.load %arg1[%c66] : memref<216xf32, #tpu.memory_space<smem>>
    %382 = vector.extract_strided_slice %380 {offsets = [0, 2], sizes = [16, 16], strides = [1, 1]} : vector<16x34xf32> to vector<16x16xf32>
    %383 = vector.broadcast %381 : f32 to vector<16x16xf32>
    %384 = arith.mulf %382, %383 : vector<16x16xf32>
    %385 = arith.addf %347, %384 : vector<16x16xf32>
    %c67 = arith.constant 67 : index
    %386 = memref.load %arg1[%c67] : memref<216xf32, #tpu.memory_space<smem>>
    %387 = vector.extract_strided_slice %380 {offsets = [0, 9], sizes = [16, 16], strides = [1, 1]} : vector<16x34xf32> to vector<16x16xf32>
    %388 = vector.broadcast %386 : f32 to vector<16x16xf32>
    %389 = arith.mulf %387, %388 : vector<16x16xf32>
    %390 = arith.addf %385, %389 : vector<16x16xf32>
    %c68 = arith.constant 68 : index
    %391 = memref.load %arg1[%c68] : memref<216xf32, #tpu.memory_space<smem>>
    %392 = vector.extract_strided_slice %380 {offsets = [0, 16], sizes = [16, 16], strides = [1, 1]} : vector<16x34xf32> to vector<16x16xf32>
    %393 = vector.broadcast %391 : f32 to vector<16x16xf32>
    %394 = arith.mulf %392, %393 : vector<16x16xf32>
    %395 = arith.addf %390, %394 : vector<16x16xf32>
    %396 = vector.extract_strided_slice %3 {offsets = [16, 0], sizes = [16, 34], strides = [1, 1]} : vector<34x34xf32> to vector<16x34xf32>
    %c69 = arith.constant 69 : index
    %397 = memref.load %arg1[%c69] : memref<216xf32, #tpu.memory_space<smem>>
    %398 = vector.extract_strided_slice %396 {offsets = [0, 2], sizes = [16, 16], strides = [1, 1]} : vector<16x34xf32> to vector<16x16xf32>
    %399 = vector.broadcast %397 : f32 to vector<16x16xf32>
    %400 = arith.mulf %398, %399 : vector<16x16xf32>
    %401 = arith.addf %363, %400 : vector<16x16xf32>
    %c70 = arith.constant 70 : index
    %402 = memref.load %arg1[%c70] : memref<216xf32, #tpu.memory_space<smem>>
    %403 = vector.extract_strided_slice %396 {offsets = [0, 9], sizes = [16, 16], strides = [1, 1]} : vector<16x34xf32> to vector<16x16xf32>
    %404 = vector.broadcast %402 : f32 to vector<16x16xf32>
    %405 = arith.mulf %403, %404 : vector<16x16xf32>
    %406 = arith.addf %401, %405 : vector<16x16xf32>
    %c71 = arith.constant 71 : index
    %407 = memref.load %arg1[%c71] : memref<216xf32, #tpu.memory_space<smem>>
    %408 = vector.extract_strided_slice %396 {offsets = [0, 16], sizes = [16, 16], strides = [1, 1]} : vector<16x34xf32> to vector<16x16xf32>
    %409 = vector.broadcast %407 : f32 to vector<16x16xf32>
    %410 = arith.mulf %408, %409 : vector<16x16xf32>
    %411 = arith.addf %406, %410 : vector<16x16xf32>
    %412 = vector.extract_strided_slice %5 {offsets = [2, 0], sizes = [16, 34], strides = [1, 1]} : vector<34x34xf32> to vector<16x34xf32>
    %c72 = arith.constant 72 : index
    %413 = memref.load %arg1[%c72] : memref<216xf32, #tpu.memory_space<smem>>
    %414 = vector.extract_strided_slice %412 {offsets = [0, 2], sizes = [16, 16], strides = [1, 1]} : vector<16x34xf32> to vector<16x16xf32>
    %415 = vector.broadcast %413 : f32 to vector<16x16xf32>
    %416 = arith.mulf %414, %415 : vector<16x16xf32>
    %417 = arith.addf %379, %416 : vector<16x16xf32>
    %c73 = arith.constant 73 : index
    %418 = memref.load %arg1[%c73] : memref<216xf32, #tpu.memory_space<smem>>
    %419 = vector.extract_strided_slice %412 {offsets = [0, 9], sizes = [16, 16], strides = [1, 1]} : vector<16x34xf32> to vector<16x16xf32>
    %420 = vector.broadcast %418 : f32 to vector<16x16xf32>
    %421 = arith.mulf %419, %420 : vector<16x16xf32>
    %422 = arith.addf %417, %421 : vector<16x16xf32>
    %c74 = arith.constant 74 : index
    %423 = memref.load %arg1[%c74] : memref<216xf32, #tpu.memory_space<smem>>
    %424 = vector.extract_strided_slice %412 {offsets = [0, 16], sizes = [16, 16], strides = [1, 1]} : vector<16x34xf32> to vector<16x16xf32>
    %425 = vector.broadcast %423 : f32 to vector<16x16xf32>
    %426 = arith.mulf %424, %425 : vector<16x16xf32>
    %427 = arith.addf %422, %426 : vector<16x16xf32>
    %428 = vector.extract_strided_slice %5 {offsets = [9, 0], sizes = [16, 34], strides = [1, 1]} : vector<34x34xf32> to vector<16x34xf32>
    %c75 = arith.constant 75 : index
    %429 = memref.load %arg1[%c75] : memref<216xf32, #tpu.memory_space<smem>>
    %430 = vector.extract_strided_slice %428 {offsets = [0, 2], sizes = [16, 16], strides = [1, 1]} : vector<16x34xf32> to vector<16x16xf32>
    %431 = vector.broadcast %429 : f32 to vector<16x16xf32>
    %432 = arith.mulf %430, %431 : vector<16x16xf32>
    %433 = arith.addf %395, %432 : vector<16x16xf32>
    %c76 = arith.constant 76 : index
    %434 = memref.load %arg1[%c76] : memref<216xf32, #tpu.memory_space<smem>>
    %435 = vector.extract_strided_slice %428 {offsets = [0, 9], sizes = [16, 16], strides = [1, 1]} : vector<16x34xf32> to vector<16x16xf32>
    %436 = vector.broadcast %434 : f32 to vector<16x16xf32>
    %437 = arith.mulf %435, %436 : vector<16x16xf32>
    %438 = arith.addf %433, %437 : vector<16x16xf32>
    %c77 = arith.constant 77 : index
    %439 = memref.load %arg1[%c77] : memref<216xf32, #tpu.memory_space<smem>>
    %440 = vector.extract_strided_slice %428 {offsets = [0, 16], sizes = [16, 16], strides = [1, 1]} : vector<16x34xf32> to vector<16x16xf32>
    %441 = vector.broadcast %439 : f32 to vector<16x16xf32>
    %442 = arith.mulf %440, %441 : vector<16x16xf32>
    %443 = arith.addf %438, %442 : vector<16x16xf32>
    %444 = vector.extract_strided_slice %5 {offsets = [16, 0], sizes = [16, 34], strides = [1, 1]} : vector<34x34xf32> to vector<16x34xf32>
    %c78 = arith.constant 78 : index
    %445 = memref.load %arg1[%c78] : memref<216xf32, #tpu.memory_space<smem>>
    %446 = vector.extract_strided_slice %444 {offsets = [0, 2], sizes = [16, 16], strides = [1, 1]} : vector<16x34xf32> to vector<16x16xf32>
    %447 = vector.broadcast %445 : f32 to vector<16x16xf32>
    %448 = arith.mulf %446, %447 : vector<16x16xf32>
    %449 = arith.addf %411, %448 : vector<16x16xf32>
    %c79 = arith.constant 79 : index
    %450 = memref.load %arg1[%c79] : memref<216xf32, #tpu.memory_space<smem>>
    %451 = vector.extract_strided_slice %444 {offsets = [0, 9], sizes = [16, 16], strides = [1, 1]} : vector<16x34xf32> to vector<16x16xf32>
    %452 = vector.broadcast %450 : f32 to vector<16x16xf32>
    %453 = arith.mulf %451, %452 : vector<16x16xf32>
    %454 = arith.addf %449, %453 : vector<16x16xf32>
    %c80 = arith.constant 80 : index
    %455 = memref.load %arg1[%c80] : memref<216xf32, #tpu.memory_space<smem>>
    %456 = vector.extract_strided_slice %444 {offsets = [0, 16], sizes = [16, 16], strides = [1, 1]} : vector<16x34xf32> to vector<16x16xf32>
    %457 = vector.broadcast %455 : f32 to vector<16x16xf32>
    %458 = arith.mulf %456, %457 : vector<16x16xf32>
    %459 = arith.addf %454, %458 : vector<16x16xf32>
    %460 = vector.extract_strided_slice %7 {offsets = [2, 0], sizes = [16, 34], strides = [1, 1]} : vector<34x34xf32> to vector<16x34xf32>
    %c81 = arith.constant 81 : index
    %461 = memref.load %arg1[%c81] : memref<216xf32, #tpu.memory_space<smem>>
    %462 = vector.extract_strided_slice %460 {offsets = [0, 2], sizes = [16, 16], strides = [1, 1]} : vector<16x34xf32> to vector<16x16xf32>
    %463 = vector.broadcast %461 : f32 to vector<16x16xf32>
    %464 = arith.mulf %462, %463 : vector<16x16xf32>
    %465 = arith.addf %427, %464 : vector<16x16xf32>
    %c82 = arith.constant 82 : index
    %466 = memref.load %arg1[%c82] : memref<216xf32, #tpu.memory_space<smem>>
    %467 = vector.extract_strided_slice %460 {offsets = [0, 9], sizes = [16, 16], strides = [1, 1]} : vector<16x34xf32> to vector<16x16xf32>
    %468 = vector.broadcast %466 : f32 to vector<16x16xf32>
    %469 = arith.mulf %467, %468 : vector<16x16xf32>
    %470 = arith.addf %465, %469 : vector<16x16xf32>
    %c83 = arith.constant 83 : index
    %471 = memref.load %arg1[%c83] : memref<216xf32, #tpu.memory_space<smem>>
    %472 = vector.extract_strided_slice %460 {offsets = [0, 16], sizes = [16, 16], strides = [1, 1]} : vector<16x34xf32> to vector<16x16xf32>
    %473 = vector.broadcast %471 : f32 to vector<16x16xf32>
    %474 = arith.mulf %472, %473 : vector<16x16xf32>
    %475 = arith.addf %470, %474 : vector<16x16xf32>
    %476 = vector.extract_strided_slice %7 {offsets = [9, 0], sizes = [16, 34], strides = [1, 1]} : vector<34x34xf32> to vector<16x34xf32>
    %c84 = arith.constant 84 : index
    %477 = memref.load %arg1[%c84] : memref<216xf32, #tpu.memory_space<smem>>
    %478 = vector.extract_strided_slice %476 {offsets = [0, 2], sizes = [16, 16], strides = [1, 1]} : vector<16x34xf32> to vector<16x16xf32>
    %479 = vector.broadcast %477 : f32 to vector<16x16xf32>
    %480 = arith.mulf %478, %479 : vector<16x16xf32>
    %481 = arith.addf %443, %480 : vector<16x16xf32>
    %c85 = arith.constant 85 : index
    %482 = memref.load %arg1[%c85] : memref<216xf32, #tpu.memory_space<smem>>
    %483 = vector.extract_strided_slice %476 {offsets = [0, 9], sizes = [16, 16], strides = [1, 1]} : vector<16x34xf32> to vector<16x16xf32>
    %484 = vector.broadcast %482 : f32 to vector<16x16xf32>
    %485 = arith.mulf %483, %484 : vector<16x16xf32>
    %486 = arith.addf %481, %485 : vector<16x16xf32>
    %c86 = arith.constant 86 : index
    %487 = memref.load %arg1[%c86] : memref<216xf32, #tpu.memory_space<smem>>
    %488 = vector.extract_strided_slice %476 {offsets = [0, 16], sizes = [16, 16], strides = [1, 1]} : vector<16x34xf32> to vector<16x16xf32>
    %489 = vector.broadcast %487 : f32 to vector<16x16xf32>
    %490 = arith.mulf %488, %489 : vector<16x16xf32>
    %491 = arith.addf %486, %490 : vector<16x16xf32>
    %492 = vector.extract_strided_slice %7 {offsets = [16, 0], sizes = [16, 34], strides = [1, 1]} : vector<34x34xf32> to vector<16x34xf32>
    %c87 = arith.constant 87 : index
    %493 = memref.load %arg1[%c87] : memref<216xf32, #tpu.memory_space<smem>>
    %494 = vector.extract_strided_slice %492 {offsets = [0, 2], sizes = [16, 16], strides = [1, 1]} : vector<16x34xf32> to vector<16x16xf32>
    %495 = vector.broadcast %493 : f32 to vector<16x16xf32>
    %496 = arith.mulf %494, %495 : vector<16x16xf32>
    %497 = arith.addf %459, %496 : vector<16x16xf32>
    %c88 = arith.constant 88 : index
    %498 = memref.load %arg1[%c88] : memref<216xf32, #tpu.memory_space<smem>>
    %499 = vector.extract_strided_slice %492 {offsets = [0, 9], sizes = [16, 16], strides = [1, 1]} : vector<16x34xf32> to vector<16x16xf32>
    %500 = vector.broadcast %498 : f32 to vector<16x16xf32>
    %501 = arith.mulf %499, %500 : vector<16x16xf32>
    %502 = arith.addf %497, %501 : vector<16x16xf32>
    %c89 = arith.constant 89 : index
    %503 = memref.load %arg1[%c89] : memref<216xf32, #tpu.memory_space<smem>>
    %504 = vector.extract_strided_slice %492 {offsets = [0, 16], sizes = [16, 16], strides = [1, 1]} : vector<16x34xf32> to vector<16x16xf32>
    %505 = vector.broadcast %503 : f32 to vector<16x16xf32>
    %506 = arith.mulf %504, %505 : vector<16x16xf32>
    %507 = arith.addf %502, %506 : vector<16x16xf32>
    %508 = vector.extract_strided_slice %9 {offsets = [2, 0], sizes = [16, 34], strides = [1, 1]} : vector<34x34xf32> to vector<16x34xf32>
    %c90 = arith.constant 90 : index
    %509 = memref.load %arg1[%c90] : memref<216xf32, #tpu.memory_space<smem>>
    %510 = vector.extract_strided_slice %508 {offsets = [0, 2], sizes = [16, 16], strides = [1, 1]} : vector<16x34xf32> to vector<16x16xf32>
    %511 = vector.broadcast %509 : f32 to vector<16x16xf32>
    %512 = arith.mulf %510, %511 : vector<16x16xf32>
    %513 = arith.addf %475, %512 : vector<16x16xf32>
    %c91 = arith.constant 91 : index
    %514 = memref.load %arg1[%c91] : memref<216xf32, #tpu.memory_space<smem>>
    %515 = vector.extract_strided_slice %508 {offsets = [0, 9], sizes = [16, 16], strides = [1, 1]} : vector<16x34xf32> to vector<16x16xf32>
    %516 = vector.broadcast %514 : f32 to vector<16x16xf32>
    %517 = arith.mulf %515, %516 : vector<16x16xf32>
    %518 = arith.addf %513, %517 : vector<16x16xf32>
    %c92 = arith.constant 92 : index
    %519 = memref.load %arg1[%c92] : memref<216xf32, #tpu.memory_space<smem>>
    %520 = vector.extract_strided_slice %508 {offsets = [0, 16], sizes = [16, 16], strides = [1, 1]} : vector<16x34xf32> to vector<16x16xf32>
    %521 = vector.broadcast %519 : f32 to vector<16x16xf32>
    %522 = arith.mulf %520, %521 : vector<16x16xf32>
    %523 = arith.addf %518, %522 : vector<16x16xf32>
    %524 = vector.extract_strided_slice %9 {offsets = [9, 0], sizes = [16, 34], strides = [1, 1]} : vector<34x34xf32> to vector<16x34xf32>
    %c93 = arith.constant 93 : index
    %525 = memref.load %arg1[%c93] : memref<216xf32, #tpu.memory_space<smem>>
    %526 = vector.extract_strided_slice %524 {offsets = [0, 2], sizes = [16, 16], strides = [1, 1]} : vector<16x34xf32> to vector<16x16xf32>
    %527 = vector.broadcast %525 : f32 to vector<16x16xf32>
    %528 = arith.mulf %526, %527 : vector<16x16xf32>
    %529 = arith.addf %491, %528 : vector<16x16xf32>
    %c94 = arith.constant 94 : index
    %530 = memref.load %arg1[%c94] : memref<216xf32, #tpu.memory_space<smem>>
    %531 = vector.extract_strided_slice %524 {offsets = [0, 9], sizes = [16, 16], strides = [1, 1]} : vector<16x34xf32> to vector<16x16xf32>
    %532 = vector.broadcast %530 : f32 to vector<16x16xf32>
    %533 = arith.mulf %531, %532 : vector<16x16xf32>
    %534 = arith.addf %529, %533 : vector<16x16xf32>
    %c95 = arith.constant 95 : index
    %535 = memref.load %arg1[%c95] : memref<216xf32, #tpu.memory_space<smem>>
    %536 = vector.extract_strided_slice %524 {offsets = [0, 16], sizes = [16, 16], strides = [1, 1]} : vector<16x34xf32> to vector<16x16xf32>
    %537 = vector.broadcast %535 : f32 to vector<16x16xf32>
    %538 = arith.mulf %536, %537 : vector<16x16xf32>
    %539 = arith.addf %534, %538 : vector<16x16xf32>
    %540 = vector.extract_strided_slice %9 {offsets = [16, 0], sizes = [16, 34], strides = [1, 1]} : vector<34x34xf32> to vector<16x34xf32>
    %c96 = arith.constant 96 : index
    %541 = memref.load %arg1[%c96] : memref<216xf32, #tpu.memory_space<smem>>
    %542 = vector.extract_strided_slice %540 {offsets = [0, 2], sizes = [16, 16], strides = [1, 1]} : vector<16x34xf32> to vector<16x16xf32>
    %543 = vector.broadcast %541 : f32 to vector<16x16xf32>
    %544 = arith.mulf %542, %543 : vector<16x16xf32>
    %545 = arith.addf %507, %544 : vector<16x16xf32>
    %c97 = arith.constant 97 : index
    %546 = memref.load %arg1[%c97] : memref<216xf32, #tpu.memory_space<smem>>
    %547 = vector.extract_strided_slice %540 {offsets = [0, 9], sizes = [16, 16], strides = [1, 1]} : vector<16x34xf32> to vector<16x16xf32>
    %548 = vector.broadcast %546 : f32 to vector<16x16xf32>
    %549 = arith.mulf %547, %548 : vector<16x16xf32>
    %550 = arith.addf %545, %549 : vector<16x16xf32>
    %c98 = arith.constant 98 : index
    %551 = memref.load %arg1[%c98] : memref<216xf32, #tpu.memory_space<smem>>
    %552 = vector.extract_strided_slice %540 {offsets = [0, 16], sizes = [16, 16], strides = [1, 1]} : vector<16x34xf32> to vector<16x16xf32>
    %553 = vector.broadcast %551 : f32 to vector<16x16xf32>
    %554 = arith.mulf %552, %553 : vector<16x16xf32>
    %555 = arith.addf %550, %554 : vector<16x16xf32>
    %556 = vector.extract_strided_slice %11 {offsets = [2, 0], sizes = [16, 34], strides = [1, 1]} : vector<34x34xf32> to vector<16x34xf32>
    %c99 = arith.constant 99 : index
    %557 = memref.load %arg1[%c99] : memref<216xf32, #tpu.memory_space<smem>>
    %558 = vector.extract_strided_slice %556 {offsets = [0, 2], sizes = [16, 16], strides = [1, 1]} : vector<16x34xf32> to vector<16x16xf32>
    %559 = vector.broadcast %557 : f32 to vector<16x16xf32>
    %560 = arith.mulf %558, %559 : vector<16x16xf32>
    %561 = arith.addf %523, %560 : vector<16x16xf32>
    %c100 = arith.constant 100 : index
    %562 = memref.load %arg1[%c100] : memref<216xf32, #tpu.memory_space<smem>>
    %563 = vector.extract_strided_slice %556 {offsets = [0, 9], sizes = [16, 16], strides = [1, 1]} : vector<16x34xf32> to vector<16x16xf32>
    %564 = vector.broadcast %562 : f32 to vector<16x16xf32>
    %565 = arith.mulf %563, %564 : vector<16x16xf32>
    %566 = arith.addf %561, %565 : vector<16x16xf32>
    %c101 = arith.constant 101 : index
    %567 = memref.load %arg1[%c101] : memref<216xf32, #tpu.memory_space<smem>>
    %568 = vector.extract_strided_slice %556 {offsets = [0, 16], sizes = [16, 16], strides = [1, 1]} : vector<16x34xf32> to vector<16x16xf32>
    %569 = vector.broadcast %567 : f32 to vector<16x16xf32>
    %570 = arith.mulf %568, %569 : vector<16x16xf32>
    %571 = arith.addf %566, %570 : vector<16x16xf32>
    %572 = vector.extract_strided_slice %11 {offsets = [9, 0], sizes = [16, 34], strides = [1, 1]} : vector<34x34xf32> to vector<16x34xf32>
    %c102 = arith.constant 102 : index
    %573 = memref.load %arg1[%c102] : memref<216xf32, #tpu.memory_space<smem>>
    %574 = vector.extract_strided_slice %572 {offsets = [0, 2], sizes = [16, 16], strides = [1, 1]} : vector<16x34xf32> to vector<16x16xf32>
    %575 = vector.broadcast %573 : f32 to vector<16x16xf32>
    %576 = arith.mulf %574, %575 : vector<16x16xf32>
    %577 = arith.addf %539, %576 : vector<16x16xf32>
    %c103 = arith.constant 103 : index
    %578 = memref.load %arg1[%c103] : memref<216xf32, #tpu.memory_space<smem>>
    %579 = vector.extract_strided_slice %572 {offsets = [0, 9], sizes = [16, 16], strides = [1, 1]} : vector<16x34xf32> to vector<16x16xf32>
    %580 = vector.broadcast %578 : f32 to vector<16x16xf32>
    %581 = arith.mulf %579, %580 : vector<16x16xf32>
    %582 = arith.addf %577, %581 : vector<16x16xf32>
    %c104 = arith.constant 104 : index
    %583 = memref.load %arg1[%c104] : memref<216xf32, #tpu.memory_space<smem>>
    %584 = vector.extract_strided_slice %572 {offsets = [0, 16], sizes = [16, 16], strides = [1, 1]} : vector<16x34xf32> to vector<16x16xf32>
    %585 = vector.broadcast %583 : f32 to vector<16x16xf32>
    %586 = arith.mulf %584, %585 : vector<16x16xf32>
    %587 = arith.addf %582, %586 : vector<16x16xf32>
    %588 = vector.extract_strided_slice %11 {offsets = [16, 0], sizes = [16, 34], strides = [1, 1]} : vector<34x34xf32> to vector<16x34xf32>
    %c105 = arith.constant 105 : index
    %589 = memref.load %arg1[%c105] : memref<216xf32, #tpu.memory_space<smem>>
    %590 = vector.extract_strided_slice %588 {offsets = [0, 2], sizes = [16, 16], strides = [1, 1]} : vector<16x34xf32> to vector<16x16xf32>
    %591 = vector.broadcast %589 : f32 to vector<16x16xf32>
    %592 = arith.mulf %590, %591 : vector<16x16xf32>
    %593 = arith.addf %555, %592 : vector<16x16xf32>
    %c106 = arith.constant 106 : index
    %594 = memref.load %arg1[%c106] : memref<216xf32, #tpu.memory_space<smem>>
    %595 = vector.extract_strided_slice %588 {offsets = [0, 9], sizes = [16, 16], strides = [1, 1]} : vector<16x34xf32> to vector<16x16xf32>
    %596 = vector.broadcast %594 : f32 to vector<16x16xf32>
    %597 = arith.mulf %595, %596 : vector<16x16xf32>
    %598 = arith.addf %593, %597 : vector<16x16xf32>
    %c107 = arith.constant 107 : index
    %599 = memref.load %arg1[%c107] : memref<216xf32, #tpu.memory_space<smem>>
    %600 = vector.extract_strided_slice %588 {offsets = [0, 16], sizes = [16, 16], strides = [1, 1]} : vector<16x34xf32> to vector<16x16xf32>
    %601 = vector.broadcast %599 : f32 to vector<16x16xf32>
    %602 = arith.mulf %600, %601 : vector<16x16xf32>
    %603 = arith.addf %598, %602 : vector<16x16xf32>
    %604 = arith.addf %571, %587 : vector<16x16xf32>
    %c1_35 = arith.constant 1 : index
    %605 = memref.load %arg2[%c1_35] : memref<4xf32, #tpu.memory_space<smem>>
    %606 = vector.broadcast %605 : f32 to vector<16x16xf32>
    %607 = arith.addf %603, %606 : vector<16x16xf32>
    %608 = arith.addf %604, %607 : vector<16x16xf32>
    %cst_36 = arith.constant 0.000000e+00 : f32
    %609 = vector.broadcast %cst_36 : f32 to vector<16x16xf32>
    %610 = arith.maximumf %608, %609 : vector<16x16xf32>
    %c0_37 = arith.constant 0 : index
    %c1_38 = arith.constant 1 : index
    %c0_39 = arith.constant 0 : index
    %c0_40 = arith.constant 0 : index
    %611 = vector.load %arg4[%c0_37, %c1_38, %c0_39, %c0_40] : memref<1x4x16x16xf32, #tpu.memory_space<vmem>>, vector<1x1x16x16xf32>
    %612 = vector.shape_cast %611 : vector<1x1x16x16xf32> to vector<16x16xf32>
    %613 = vector.shape_cast %610 : vector<16x16xf32> to vector<1x1x16x16xf32>
    tpu.vector_store %arg4[%c0_37, %c1_38, %c0_39, %c0_40], %613 {strides = array<i32>} : memref<1x4x16x16xf32, #tpu.memory_space<vmem>>, vector<1x1x16x16xf32>,
    %cst_41 = arith.constant 0.000000e+00 : f32
    %614 = vector.broadcast %cst_41 : f32 to vector<16x16xf32>
    %cst_42 = arith.constant 0.000000e+00 : f32
    %615 = vector.broadcast %cst_42 : f32 to vector<16x16xf32>
    %cst_43 = arith.constant 0.000000e+00 : f32
    %616 = vector.broadcast %cst_43 : f32 to vector<16x16xf32>
    %617 = vector.extract_strided_slice %1 {offsets = [1, 0], sizes = [16, 34], strides = [1, 1]} : vector<34x34xf32> to vector<16x34xf32>
    %c108 = arith.constant 108 : index
    %618 = memref.load %arg1[%c108] : memref<216xf32, #tpu.memory_space<smem>>
    %619 = vector.extract_strided_slice %617 {offsets = [0, 1], sizes = [16, 16], strides = [1, 1]} : vector<16x34xf32> to vector<16x16xf32>
    %620 = vector.broadcast %618 : f32 to vector<16x16xf32>
    %621 = arith.mulf %619, %620 : vector<16x16xf32>
    %622 = arith.addf %614, %621 : vector<16x16xf32>
    %c109 = arith.constant 109 : index
    %623 = memref.load %arg1[%c109] : memref<216xf32, #tpu.memory_space<smem>>
    %624 = vector.extract_strided_slice %617 {offsets = [0, 9], sizes = [16, 16], strides = [1, 1]} : vector<16x34xf32> to vector<16x16xf32>
    %625 = vector.broadcast %623 : f32 to vector<16x16xf32>
    %626 = arith.mulf %624, %625 : vector<16x16xf32>
    %627 = arith.addf %622, %626 : vector<16x16xf32>
    %c110 = arith.constant 110 : index
    %628 = memref.load %arg1[%c110] : memref<216xf32, #tpu.memory_space<smem>>
    %629 = vector.extract_strided_slice %617 {offsets = [0, 17], sizes = [16, 16], strides = [1, 1]} : vector<16x34xf32> to vector<16x16xf32>
    %630 = vector.broadcast %628 : f32 to vector<16x16xf32>
    %631 = arith.mulf %629, %630 : vector<16x16xf32>
    %632 = arith.addf %627, %631 : vector<16x16xf32>
    %633 = vector.extract_strided_slice %1 {offsets = [9, 0], sizes = [16, 34], strides = [1, 1]} : vector<34x34xf32> to vector<16x34xf32>
    %c111 = arith.constant 111 : index
    %634 = memref.load %arg1[%c111] : memref<216xf32, #tpu.memory_space<smem>>
    %635 = vector.extract_strided_slice %633 {offsets = [0, 1], sizes = [16, 16], strides = [1, 1]} : vector<16x34xf32> to vector<16x16xf32>
    %636 = vector.broadcast %634 : f32 to vector<16x16xf32>
    %637 = arith.mulf %635, %636 : vector<16x16xf32>
    %638 = arith.addf %615, %637 : vector<16x16xf32>
    %c112 = arith.constant 112 : index
    %639 = memref.load %arg1[%c112] : memref<216xf32, #tpu.memory_space<smem>>
    %640 = vector.extract_strided_slice %633 {offsets = [0, 9], sizes = [16, 16], strides = [1, 1]} : vector<16x34xf32> to vector<16x16xf32>
    %641 = vector.broadcast %639 : f32 to vector<16x16xf32>
    %642 = arith.mulf %640, %641 : vector<16x16xf32>
    %643 = arith.addf %638, %642 : vector<16x16xf32>
    %c113 = arith.constant 113 : index
    %644 = memref.load %arg1[%c113] : memref<216xf32, #tpu.memory_space<smem>>
    %645 = vector.extract_strided_slice %633 {offsets = [0, 17], sizes = [16, 16], strides = [1, 1]} : vector<16x34xf32> to vector<16x16xf32>
    %646 = vector.broadcast %644 : f32 to vector<16x16xf32>
    %647 = arith.mulf %645, %646 : vector<16x16xf32>
    %648 = arith.addf %643, %647 : vector<16x16xf32>
    %649 = vector.extract_strided_slice %1 {offsets = [17, 0], sizes = [16, 34], strides = [1, 1]} : vector<34x34xf32> to vector<16x34xf32>
    %c114 = arith.constant 114 : index
    %650 = memref.load %arg1[%c114] : memref<216xf32, #tpu.memory_space<smem>>
    %651 = vector.extract_strided_slice %649 {offsets = [0, 1], sizes = [16, 16], strides = [1, 1]} : vector<16x34xf32> to vector<16x16xf32>
    %652 = vector.broadcast %650 : f32 to vector<16x16xf32>
    %653 = arith.mulf %651, %652 : vector<16x16xf32>
    %654 = arith.addf %616, %653 : vector<16x16xf32>
    %c115 = arith.constant 115 : index
    %655 = memref.load %arg1[%c115] : memref<216xf32, #tpu.memory_space<smem>>
    %656 = vector.extract_strided_slice %649 {offsets = [0, 9], sizes = [16, 16], strides = [1, 1]} : vector<16x34xf32> to vector<16x16xf32>
    %657 = vector.broadcast %655 : f32 to vector<16x16xf32>
    %658 = arith.mulf %656, %657 : vector<16x16xf32>
    %659 = arith.addf %654, %658 : vector<16x16xf32>
    %c116 = arith.constant 116 : index
    %660 = memref.load %arg1[%c116] : memref<216xf32, #tpu.memory_space<smem>>
    %661 = vector.extract_strided_slice %649 {offsets = [0, 17], sizes = [16, 16], strides = [1, 1]} : vector<16x34xf32> to vector<16x16xf32>
    %662 = vector.broadcast %660 : f32 to vector<16x16xf32>
    %663 = arith.mulf %661, %662 : vector<16x16xf32>
    %664 = arith.addf %659, %663 : vector<16x16xf32>
    %665 = vector.extract_strided_slice %3 {offsets = [1, 0], sizes = [16, 34], strides = [1, 1]} : vector<34x34xf32> to vector<16x34xf32>
    %c117 = arith.constant 117 : index
    %666 = memref.load %arg1[%c117] : memref<216xf32, #tpu.memory_space<smem>>
    %667 = vector.extract_strided_slice %665 {offsets = [0, 1], sizes = [16, 16], strides = [1, 1]} : vector<16x34xf32> to vector<16x16xf32>
    %668 = vector.broadcast %666 : f32 to vector<16x16xf32>
    %669 = arith.mulf %667, %668 : vector<16x16xf32>
    %670 = arith.addf %632, %669 : vector<16x16xf32>
    %c118 = arith.constant 118 : index
    %671 = memref.load %arg1[%c118] : memref<216xf32, #tpu.memory_space<smem>>
    %672 = vector.extract_strided_slice %665 {offsets = [0, 9], sizes = [16, 16], strides = [1, 1]} : vector<16x34xf32> to vector<16x16xf32>
    %673 = vector.broadcast %671 : f32 to vector<16x16xf32>
    %674 = arith.mulf %672, %673 : vector<16x16xf32>
    %675 = arith.addf %670, %674 : vector<16x16xf32>
    %c119 = arith.constant 119 : index
    %676 = memref.load %arg1[%c119] : memref<216xf32, #tpu.memory_space<smem>>
    %677 = vector.extract_strided_slice %665 {offsets = [0, 17], sizes = [16, 16], strides = [1, 1]} : vector<16x34xf32> to vector<16x16xf32>
    %678 = vector.broadcast %676 : f32 to vector<16x16xf32>
    %679 = arith.mulf %677, %678 : vector<16x16xf32>
    %680 = arith.addf %675, %679 : vector<16x16xf32>
    %681 = vector.extract_strided_slice %3 {offsets = [9, 0], sizes = [16, 34], strides = [1, 1]} : vector<34x34xf32> to vector<16x34xf32>
    %c120 = arith.constant 120 : index
    %682 = memref.load %arg1[%c120] : memref<216xf32, #tpu.memory_space<smem>>
    %683 = vector.extract_strided_slice %681 {offsets = [0, 1], sizes = [16, 16], strides = [1, 1]} : vector<16x34xf32> to vector<16x16xf32>
    %684 = vector.broadcast %682 : f32 to vector<16x16xf32>
    %685 = arith.mulf %683, %684 : vector<16x16xf32>
    %686 = arith.addf %648, %685 : vector<16x16xf32>
    %c121 = arith.constant 121 : index
    %687 = memref.load %arg1[%c121] : memref<216xf32, #tpu.memory_space<smem>>
    %688 = vector.extract_strided_slice %681 {offsets = [0, 9], sizes = [16, 16], strides = [1, 1]} : vector<16x34xf32> to vector<16x16xf32>
    %689 = vector.broadcast %687 : f32 to vector<16x16xf32>
    %690 = arith.mulf %688, %689 : vector<16x16xf32>
    %691 = arith.addf %686, %690 : vector<16x16xf32>
    %c122 = arith.constant 122 : index
    %692 = memref.load %arg1[%c122] : memref<216xf32, #tpu.memory_space<smem>>
    %693 = vector.extract_strided_slice %681 {offsets = [0, 17], sizes = [16, 16], strides = [1, 1]} : vector<16x34xf32> to vector<16x16xf32>
    %694 = vector.broadcast %692 : f32 to vector<16x16xf32>
    %695 = arith.mulf %693, %694 : vector<16x16xf32>
    %696 = arith.addf %691, %695 : vector<16x16xf32>
    %697 = vector.extract_strided_slice %3 {offsets = [17, 0], sizes = [16, 34], strides = [1, 1]} : vector<34x34xf32> to vector<16x34xf32>
    %c123 = arith.constant 123 : index
    %698 = memref.load %arg1[%c123] : memref<216xf32, #tpu.memory_space<smem>>
    %699 = vector.extract_strided_slice %697 {offsets = [0, 1], sizes = [16, 16], strides = [1, 1]} : vector<16x34xf32> to vector<16x16xf32>
    %700 = vector.broadcast %698 : f32 to vector<16x16xf32>
    %701 = arith.mulf %699, %700 : vector<16x16xf32>
    %702 = arith.addf %664, %701 : vector<16x16xf32>
    %c124 = arith.constant 124 : index
    %703 = memref.load %arg1[%c124] : memref<216xf32, #tpu.memory_space<smem>>
    %704 = vector.extract_strided_slice %697 {offsets = [0, 9], sizes = [16, 16], strides = [1, 1]} : vector<16x34xf32> to vector<16x16xf32>
    %705 = vector.broadcast %703 : f32 to vector<16x16xf32>
    %706 = arith.mulf %704, %705 : vector<16x16xf32>
    %707 = arith.addf %702, %706 : vector<16x16xf32>
    %c125 = arith.constant 125 : index
    %708 = memref.load %arg1[%c125] : memref<216xf32, #tpu.memory_space<smem>>
    %709 = vector.extract_strided_slice %697 {offsets = [0, 17], sizes = [16, 16], strides = [1, 1]} : vector<16x34xf32> to vector<16x16xf32>
    %710 = vector.broadcast %708 : f32 to vector<16x16xf32>
    %711 = arith.mulf %709, %710 : vector<16x16xf32>
    %712 = arith.addf %707, %711 : vector<16x16xf32>
    %713 = vector.extract_strided_slice %5 {offsets = [1, 0], sizes = [16, 34], strides = [1, 1]} : vector<34x34xf32> to vector<16x34xf32>
    %c126 = arith.constant 126 : index
    %714 = memref.load %arg1[%c126] : memref<216xf32, #tpu.memory_space<smem>>
    %715 = vector.extract_strided_slice %713 {offsets = [0, 1], sizes = [16, 16], strides = [1, 1]} : vector<16x34xf32> to vector<16x16xf32>
    %716 = vector.broadcast %714 : f32 to vector<16x16xf32>
    %717 = arith.mulf %715, %716 : vector<16x16xf32>
    %718 = arith.addf %680, %717 : vector<16x16xf32>
    %c127 = arith.constant 127 : index
    %719 = memref.load %arg1[%c127] : memref<216xf32, #tpu.memory_space<smem>>
    %720 = vector.extract_strided_slice %713 {offsets = [0, 9], sizes = [16, 16], strides = [1, 1]} : vector<16x34xf32> to vector<16x16xf32>
    %721 = vector.broadcast %719 : f32 to vector<16x16xf32>
    %722 = arith.mulf %720, %721 : vector<16x16xf32>
    %723 = arith.addf %718, %722 : vector<16x16xf32>
    %c128 = arith.constant 128 : index
    %724 = memref.load %arg1[%c128] : memref<216xf32, #tpu.memory_space<smem>>
    %725 = vector.extract_strided_slice %713 {offsets = [0, 17], sizes = [16, 16], strides = [1, 1]} : vector<16x34xf32> to vector<16x16xf32>
    %726 = vector.broadcast %724 : f32 to vector<16x16xf32>
    %727 = arith.mulf %725, %726 : vector<16x16xf32>
    %728 = arith.addf %723, %727 : vector<16x16xf32>
    %729 = vector.extract_strided_slice %5 {offsets = [9, 0], sizes = [16, 34], strides = [1, 1]} : vector<34x34xf32> to vector<16x34xf32>
    %c129 = arith.constant 129 : index
    %730 = memref.load %arg1[%c129] : memref<216xf32, #tpu.memory_space<smem>>
    %731 = vector.extract_strided_slice %729 {offsets = [0, 1], sizes = [16, 16], strides = [1, 1]} : vector<16x34xf32> to vector<16x16xf32>
    %732 = vector.broadcast %730 : f32 to vector<16x16xf32>
    %733 = arith.mulf %731, %732 : vector<16x16xf32>
    %734 = arith.addf %696, %733 : vector<16x16xf32>
    %c130 = arith.constant 130 : index
    %735 = memref.load %arg1[%c130] : memref<216xf32, #tpu.memory_space<smem>>
    %736 = vector.extract_strided_slice %729 {offsets = [0, 9], sizes = [16, 16], strides = [1, 1]} : vector<16x34xf32> to vector<16x16xf32>
    %737 = vector.broadcast %735 : f32 to vector<16x16xf32>
    %738 = arith.mulf %736, %737 : vector<16x16xf32>
    %739 = arith.addf %734, %738 : vector<16x16xf32>
    %c131 = arith.constant 131 : index
    %740 = memref.load %arg1[%c131] : memref<216xf32, #tpu.memory_space<smem>>
    %741 = vector.extract_strided_slice %729 {offsets = [0, 17], sizes = [16, 16], strides = [1, 1]} : vector<16x34xf32> to vector<16x16xf32>
    %742 = vector.broadcast %740 : f32 to vector<16x16xf32>
    %743 = arith.mulf %741, %742 : vector<16x16xf32>
    %744 = arith.addf %739, %743 : vector<16x16xf32>
    %745 = vector.extract_strided_slice %5 {offsets = [17, 0], sizes = [16, 34], strides = [1, 1]} : vector<34x34xf32> to vector<16x34xf32>
    %c132 = arith.constant 132 : index
    %746 = memref.load %arg1[%c132] : memref<216xf32, #tpu.memory_space<smem>>
    %747 = vector.extract_strided_slice %745 {offsets = [0, 1], sizes = [16, 16], strides = [1, 1]} : vector<16x34xf32> to vector<16x16xf32>
    %748 = vector.broadcast %746 : f32 to vector<16x16xf32>
    %749 = arith.mulf %747, %748 : vector<16x16xf32>
    %750 = arith.addf %712, %749 : vector<16x16xf32>
    %c133 = arith.constant 133 : index
    %751 = memref.load %arg1[%c133] : memref<216xf32, #tpu.memory_space<smem>>
    %752 = vector.extract_strided_slice %745 {offsets = [0, 9], sizes = [16, 16], strides = [1, 1]} : vector<16x34xf32> to vector<16x16xf32>
    %753 = vector.broadcast %751 : f32 to vector<16x16xf32>
    %754 = arith.mulf %752, %753 : vector<16x16xf32>
    %755 = arith.addf %750, %754 : vector<16x16xf32>
    %c134 = arith.constant 134 : index
    %756 = memref.load %arg1[%c134] : memref<216xf32, #tpu.memory_space<smem>>
    %757 = vector.extract_strided_slice %745 {offsets = [0, 17], sizes = [16, 16], strides = [1, 1]} : vector<16x34xf32> to vector<16x16xf32>
    %758 = vector.broadcast %756 : f32 to vector<16x16xf32>
    %759 = arith.mulf %757, %758 : vector<16x16xf32>
    %760 = arith.addf %755, %759 : vector<16x16xf32>
    %761 = vector.extract_strided_slice %7 {offsets = [1, 0], sizes = [16, 34], strides = [1, 1]} : vector<34x34xf32> to vector<16x34xf32>
    %c135 = arith.constant 135 : index
    %762 = memref.load %arg1[%c135] : memref<216xf32, #tpu.memory_space<smem>>
    %763 = vector.extract_strided_slice %761 {offsets = [0, 1], sizes = [16, 16], strides = [1, 1]} : vector<16x34xf32> to vector<16x16xf32>
    %764 = vector.broadcast %762 : f32 to vector<16x16xf32>
    %765 = arith.mulf %763, %764 : vector<16x16xf32>
    %766 = arith.addf %728, %765 : vector<16x16xf32>
    %c136 = arith.constant 136 : index
    %767 = memref.load %arg1[%c136] : memref<216xf32, #tpu.memory_space<smem>>
    %768 = vector.extract_strided_slice %761 {offsets = [0, 9], sizes = [16, 16], strides = [1, 1]} : vector<16x34xf32> to vector<16x16xf32>
    %769 = vector.broadcast %767 : f32 to vector<16x16xf32>
    %770 = arith.mulf %768, %769 : vector<16x16xf32>
    %771 = arith.addf %766, %770 : vector<16x16xf32>
    %c137 = arith.constant 137 : index
    %772 = memref.load %arg1[%c137] : memref<216xf32, #tpu.memory_space<smem>>
    %773 = vector.extract_strided_slice %761 {offsets = [0, 17], sizes = [16, 16], strides = [1, 1]} : vector<16x34xf32> to vector<16x16xf32>
    %774 = vector.broadcast %772 : f32 to vector<16x16xf32>
    %775 = arith.mulf %773, %774 : vector<16x16xf32>
    %776 = arith.addf %771, %775 : vector<16x16xf32>
    %777 = vector.extract_strided_slice %7 {offsets = [9, 0], sizes = [16, 34], strides = [1, 1]} : vector<34x34xf32> to vector<16x34xf32>
    %c138 = arith.constant 138 : index
    %778 = memref.load %arg1[%c138] : memref<216xf32, #tpu.memory_space<smem>>
    %779 = vector.extract_strided_slice %777 {offsets = [0, 1], sizes = [16, 16], strides = [1, 1]} : vector<16x34xf32> to vector<16x16xf32>
    %780 = vector.broadcast %778 : f32 to vector<16x16xf32>
    %781 = arith.mulf %779, %780 : vector<16x16xf32>
    %782 = arith.addf %744, %781 : vector<16x16xf32>
    %c139 = arith.constant 139 : index
    %783 = memref.load %arg1[%c139] : memref<216xf32, #tpu.memory_space<smem>>
    %784 = vector.extract_strided_slice %777 {offsets = [0, 9], sizes = [16, 16], strides = [1, 1]} : vector<16x34xf32> to vector<16x16xf32>
    %785 = vector.broadcast %783 : f32 to vector<16x16xf32>
    %786 = arith.mulf %784, %785 : vector<16x16xf32>
    %787 = arith.addf %782, %786 : vector<16x16xf32>
    %c140 = arith.constant 140 : index
    %788 = memref.load %arg1[%c140] : memref<216xf32, #tpu.memory_space<smem>>
    %789 = vector.extract_strided_slice %777 {offsets = [0, 17], sizes = [16, 16], strides = [1, 1]} : vector<16x34xf32> to vector<16x16xf32>
    %790 = vector.broadcast %788 : f32 to vector<16x16xf32>
    %791 = arith.mulf %789, %790 : vector<16x16xf32>
    %792 = arith.addf %787, %791 : vector<16x16xf32>
    %793 = vector.extract_strided_slice %7 {offsets = [17, 0], sizes = [16, 34], strides = [1, 1]} : vector<34x34xf32> to vector<16x34xf32>
    %c141 = arith.constant 141 : index
    %794 = memref.load %arg1[%c141] : memref<216xf32, #tpu.memory_space<smem>>
    %795 = vector.extract_strided_slice %793 {offsets = [0, 1], sizes = [16, 16], strides = [1, 1]} : vector<16x34xf32> to vector<16x16xf32>
    %796 = vector.broadcast %794 : f32 to vector<16x16xf32>
    %797 = arith.mulf %795, %796 : vector<16x16xf32>
    %798 = arith.addf %760, %797 : vector<16x16xf32>
    %c142 = arith.constant 142 : index
    %799 = memref.load %arg1[%c142] : memref<216xf32, #tpu.memory_space<smem>>
    %800 = vector.extract_strided_slice %793 {offsets = [0, 9], sizes = [16, 16], strides = [1, 1]} : vector<16x34xf32> to vector<16x16xf32>
    %801 = vector.broadcast %799 : f32 to vector<16x16xf32>
    %802 = arith.mulf %800, %801 : vector<16x16xf32>
    %803 = arith.addf %798, %802 : vector<16x16xf32>
    %c143 = arith.constant 143 : index
    %804 = memref.load %arg1[%c143] : memref<216xf32, #tpu.memory_space<smem>>
    %805 = vector.extract_strided_slice %793 {offsets = [0, 17], sizes = [16, 16], strides = [1, 1]} : vector<16x34xf32> to vector<16x16xf32>
    %806 = vector.broadcast %804 : f32 to vector<16x16xf32>
    %807 = arith.mulf %805, %806 : vector<16x16xf32>
    %808 = arith.addf %803, %807 : vector<16x16xf32>
    %809 = vector.extract_strided_slice %9 {offsets = [1, 0], sizes = [16, 34], strides = [1, 1]} : vector<34x34xf32> to vector<16x34xf32>
    %c144 = arith.constant 144 : index
    %810 = memref.load %arg1[%c144] : memref<216xf32, #tpu.memory_space<smem>>
    %811 = vector.extract_strided_slice %809 {offsets = [0, 1], sizes = [16, 16], strides = [1, 1]} : vector<16x34xf32> to vector<16x16xf32>
    %812 = vector.broadcast %810 : f32 to vector<16x16xf32>
    %813 = arith.mulf %811, %812 : vector<16x16xf32>
    %814 = arith.addf %776, %813 : vector<16x16xf32>
    %c145 = arith.constant 145 : index
    %815 = memref.load %arg1[%c145] : memref<216xf32, #tpu.memory_space<smem>>
    %816 = vector.extract_strided_slice %809 {offsets = [0, 9], sizes = [16, 16], strides = [1, 1]} : vector<16x34xf32> to vector<16x16xf32>
    %817 = vector.broadcast %815 : f32 to vector<16x16xf32>
    %818 = arith.mulf %816, %817 : vector<16x16xf32>
    %819 = arith.addf %814, %818 : vector<16x16xf32>
    %c146 = arith.constant 146 : index
    %820 = memref.load %arg1[%c146] : memref<216xf32, #tpu.memory_space<smem>>
    %821 = vector.extract_strided_slice %809 {offsets = [0, 17], sizes = [16, 16], strides = [1, 1]} : vector<16x34xf32> to vector<16x16xf32>
    %822 = vector.broadcast %820 : f32 to vector<16x16xf32>
    %823 = arith.mulf %821, %822 : vector<16x16xf32>
    %824 = arith.addf %819, %823 : vector<16x16xf32>
    %825 = vector.extract_strided_slice %9 {offsets = [9, 0], sizes = [16, 34], strides = [1, 1]} : vector<34x34xf32> to vector<16x34xf32>
    %c147 = arith.constant 147 : index
    %826 = memref.load %arg1[%c147] : memref<216xf32, #tpu.memory_space<smem>>
    %827 = vector.extract_strided_slice %825 {offsets = [0, 1], sizes = [16, 16], strides = [1, 1]} : vector<16x34xf32> to vector<16x16xf32>
    %828 = vector.broadcast %826 : f32 to vector<16x16xf32>
    %829 = arith.mulf %827, %828 : vector<16x16xf32>
    %830 = arith.addf %792, %829 : vector<16x16xf32>
    %c148 = arith.constant 148 : index
    %831 = memref.load %arg1[%c148] : memref<216xf32, #tpu.memory_space<smem>>
    %832 = vector.extract_strided_slice %825 {offsets = [0, 9], sizes = [16, 16], strides = [1, 1]} : vector<16x34xf32> to vector<16x16xf32>
    %833 = vector.broadcast %831 : f32 to vector<16x16xf32>
    %834 = arith.mulf %832, %833 : vector<16x16xf32>
    %835 = arith.addf %830, %834 : vector<16x16xf32>
    %c149 = arith.constant 149 : index
    %836 = memref.load %arg1[%c149] : memref<216xf32, #tpu.memory_space<smem>>
    %837 = vector.extract_strided_slice %825 {offsets = [0, 17], sizes = [16, 16], strides = [1, 1]} : vector<16x34xf32> to vector<16x16xf32>
    %838 = vector.broadcast %836 : f32 to vector<16x16xf32>
    %839 = arith.mulf %837, %838 : vector<16x16xf32>
    %840 = arith.addf %835, %839 : vector<16x16xf32>
    %841 = vector.extract_strided_slice %9 {offsets = [17, 0], sizes = [16, 34], strides = [1, 1]} : vector<34x34xf32> to vector<16x34xf32>
    %c150 = arith.constant 150 : index
    %842 = memref.load %arg1[%c150] : memref<216xf32, #tpu.memory_space<smem>>
    %843 = vector.extract_strided_slice %841 {offsets = [0, 1], sizes = [16, 16], strides = [1, 1]} : vector<16x34xf32> to vector<16x16xf32>
    %844 = vector.broadcast %842 : f32 to vector<16x16xf32>
    %845 = arith.mulf %843, %844 : vector<16x16xf32>
    %846 = arith.addf %808, %845 : vector<16x16xf32>
    %c151 = arith.constant 151 : index
    %847 = memref.load %arg1[%c151] : memref<216xf32, #tpu.memory_space<smem>>
    %848 = vector.extract_strided_slice %841 {offsets = [0, 9], sizes = [16, 16], strides = [1, 1]} : vector<16x34xf32> to vector<16x16xf32>
    %849 = vector.broadcast %847 : f32 to vector<16x16xf32>
    %850 = arith.mulf %848, %849 : vector<16x16xf32>
    %851 = arith.addf %846, %850 : vector<16x16xf32>
    %c152 = arith.constant 152 : index
    %852 = memref.load %arg1[%c152] : memref<216xf32, #tpu.memory_space<smem>>
    %853 = vector.extract_strided_slice %841 {offsets = [0, 17], sizes = [16, 16], strides = [1, 1]} : vector<16x34xf32> to vector<16x16xf32>
    %854 = vector.broadcast %852 : f32 to vector<16x16xf32>
    %855 = arith.mulf %853, %854 : vector<16x16xf32>
    %856 = arith.addf %851, %855 : vector<16x16xf32>
    %857 = vector.extract_strided_slice %11 {offsets = [1, 0], sizes = [16, 34], strides = [1, 1]} : vector<34x34xf32> to vector<16x34xf32>
    %c153 = arith.constant 153 : index
    %858 = memref.load %arg1[%c153] : memref<216xf32, #tpu.memory_space<smem>>
    %859 = vector.extract_strided_slice %857 {offsets = [0, 1], sizes = [16, 16], strides = [1, 1]} : vector<16x34xf32> to vector<16x16xf32>
    %860 = vector.broadcast %858 : f32 to vector<16x16xf32>
    %861 = arith.mulf %859, %860 : vector<16x16xf32>
    %862 = arith.addf %824, %861 : vector<16x16xf32>
    %c154 = arith.constant 154 : index
    %863 = memref.load %arg1[%c154] : memref<216xf32, #tpu.memory_space<smem>>
    %864 = vector.extract_strided_slice %857 {offsets = [0, 9], sizes = [16, 16], strides = [1, 1]} : vector<16x34xf32> to vector<16x16xf32>
    %865 = vector.broadcast %863 : f32 to vector<16x16xf32>
    %866 = arith.mulf %864, %865 : vector<16x16xf32>
    %867 = arith.addf %862, %866 : vector<16x16xf32>
    %c155 = arith.constant 155 : index
    %868 = memref.load %arg1[%c155] : memref<216xf32, #tpu.memory_space<smem>>
    %869 = vector.extract_strided_slice %857 {offsets = [0, 17], sizes = [16, 16], strides = [1, 1]} : vector<16x34xf32> to vector<16x16xf32>
    %870 = vector.broadcast %868 : f32 to vector<16x16xf32>
    %871 = arith.mulf %869, %870 : vector<16x16xf32>
    %872 = arith.addf %867, %871 : vector<16x16xf32>
    %873 = vector.extract_strided_slice %11 {offsets = [9, 0], sizes = [16, 34], strides = [1, 1]} : vector<34x34xf32> to vector<16x34xf32>
    %c156 = arith.constant 156 : index
    %874 = memref.load %arg1[%c156] : memref<216xf32, #tpu.memory_space<smem>>
    %875 = vector.extract_strided_slice %873 {offsets = [0, 1], sizes = [16, 16], strides = [1, 1]} : vector<16x34xf32> to vector<16x16xf32>
    %876 = vector.broadcast %874 : f32 to vector<16x16xf32>
    %877 = arith.mulf %875, %876 : vector<16x16xf32>
    %878 = arith.addf %840, %877 : vector<16x16xf32>
    %c157 = arith.constant 157 : index
    %879 = memref.load %arg1[%c157] : memref<216xf32, #tpu.memory_space<smem>>
    %880 = vector.extract_strided_slice %873 {offsets = [0, 9], sizes = [16, 16], strides = [1, 1]} : vector<16x34xf32> to vector<16x16xf32>
    %881 = vector.broadcast %879 : f32 to vector<16x16xf32>
    %882 = arith.mulf %880, %881 : vector<16x16xf32>
    %883 = arith.addf %878, %882 : vector<16x16xf32>
    %c158 = arith.constant 158 : index
    %884 = memref.load %arg1[%c158] : memref<216xf32, #tpu.memory_space<smem>>
    %885 = vector.extract_strided_slice %873 {offsets = [0, 17], sizes = [16, 16], strides = [1, 1]} : vector<16x34xf32> to vector<16x16xf32>
    %886 = vector.broadcast %884 : f32 to vector<16x16xf32>
    %887 = arith.mulf %885, %886 : vector<16x16xf32>
    %888 = arith.addf %883, %887 : vector<16x16xf32>
    %889 = vector.extract_strided_slice %11 {offsets = [17, 0], sizes = [16, 34], strides = [1, 1]} : vector<34x34xf32> to vector<16x34xf32>
    %c159 = arith.constant 159 : index
    %890 = memref.load %arg1[%c159] : memref<216xf32, #tpu.memory_space<smem>>
    %891 = vector.extract_strided_slice %889 {offsets = [0, 1], sizes = [16, 16], strides = [1, 1]} : vector<16x34xf32> to vector<16x16xf32>
    %892 = vector.broadcast %890 : f32 to vector<16x16xf32>
    %893 = arith.mulf %891, %892 : vector<16x16xf32>
    %894 = arith.addf %856, %893 : vector<16x16xf32>
    %c160 = arith.constant 160 : index
    %895 = memref.load %arg1[%c160] : memref<216xf32, #tpu.memory_space<smem>>
    %896 = vector.extract_strided_slice %889 {offsets = [0, 9], sizes = [16, 16], strides = [1, 1]} : vector<16x34xf32> to vector<16x16xf32>
    %897 = vector.broadcast %895 : f32 to vector<16x16xf32>
    %898 = arith.mulf %896, %897 : vector<16x16xf32>
    %899 = arith.addf %894, %898 : vector<16x16xf32>
    %c161 = arith.constant 161 : index
    %900 = memref.load %arg1[%c161] : memref<216xf32, #tpu.memory_space<smem>>
    %901 = vector.extract_strided_slice %889 {offsets = [0, 17], sizes = [16, 16], strides = [1, 1]} : vector<16x34xf32> to vector<16x16xf32>
    %902 = vector.broadcast %900 : f32 to vector<16x16xf32>
    %903 = arith.mulf %901, %902 : vector<16x16xf32>
    %904 = arith.addf %899, %903 : vector<16x16xf32>
    %905 = arith.addf %872, %888 : vector<16x16xf32>
    %c2_44 = arith.constant 2 : index
    %906 = memref.load %arg2[%c2_44] : memref<4xf32, #tpu.memory_space<smem>>
    %907 = vector.broadcast %906 : f32 to vector<16x16xf32>
    %908 = arith.addf %904, %907 : vector<16x16xf32>
    %909 = arith.addf %905, %908 : vector<16x16xf32>
    %cst_45 = arith.constant 0.000000e+00 : f32
    %910 = vector.broadcast %cst_45 : f32 to vector<16x16xf32>
    %911 = arith.maximumf %909, %910 : vector<16x16xf32>
    %c0_46 = arith.constant 0 : index
    %c2_47 = arith.constant 2 : index
    %c0_48 = arith.constant 0 : index
    %c0_49 = arith.constant 0 : index
    %912 = vector.load %arg4[%c0_46, %c2_47, %c0_48, %c0_49] : memref<1x4x16x16xf32, #tpu.memory_space<vmem>>, vector<1x1x16x16xf32>
    %913 = vector.shape_cast %912 : vector<1x1x16x16xf32> to vector<16x16xf32>
    %914 = vector.shape_cast %911 : vector<16x16xf32> to vector<1x1x16x16xf32>
    tpu.vector_store %arg4[%c0_46, %c2_47, %c0_48, %c0_49], %914 {strides = array<i32>} : memref<1x4x16x16xf32, #tpu.memory_space<vmem>>, vector<1x1x16x16xf32>,
    %cst_50 = arith.constant 0.000000e+00 : f32
    %915 = vector.broadcast %cst_50 : f32 to vector<16x16xf32>
    %cst_51 = arith.constant 0.000000e+00 : f32
    %916 = vector.broadcast %cst_51 : f32 to vector<16x16xf32>
    %cst_52 = arith.constant 0.000000e+00 : f32
    %917 = vector.broadcast %cst_52 : f32 to vector<16x16xf32>
    %918 = vector.extract_strided_slice %1 {offsets = [0, 0], sizes = [16, 34], strides = [1, 1]} : vector<34x34xf32> to vector<16x34xf32>
    %c162 = arith.constant 162 : index
    %919 = memref.load %arg1[%c162] : memref<216xf32, #tpu.memory_space<smem>>
    %920 = vector.extract_strided_slice %918 {offsets = [0, 0], sizes = [16, 16], strides = [1, 1]} : vector<16x34xf32> to vector<16x16xf32>
    %921 = vector.broadcast %919 : f32 to vector<16x16xf32>
    %922 = arith.mulf %920, %921 : vector<16x16xf32>
    %923 = arith.addf %915, %922 : vector<16x16xf32>
    %c163 = arith.constant 163 : index
    %924 = memref.load %arg1[%c163] : memref<216xf32, #tpu.memory_space<smem>>
    %925 = vector.extract_strided_slice %918 {offsets = [0, 9], sizes = [16, 16], strides = [1, 1]} : vector<16x34xf32> to vector<16x16xf32>
    %926 = vector.broadcast %924 : f32 to vector<16x16xf32>
    %927 = arith.mulf %925, %926 : vector<16x16xf32>
    %928 = arith.addf %923, %927 : vector<16x16xf32>
    %c164 = arith.constant 164 : index
    %929 = memref.load %arg1[%c164] : memref<216xf32, #tpu.memory_space<smem>>
    %930 = vector.extract_strided_slice %918 {offsets = [0, 18], sizes = [16, 16], strides = [1, 1]} : vector<16x34xf32> to vector<16x16xf32>
    %931 = vector.broadcast %929 : f32 to vector<16x16xf32>
    %932 = arith.mulf %930, %931 : vector<16x16xf32>
    %933 = arith.addf %928, %932 : vector<16x16xf32>
    %934 = vector.extract_strided_slice %1 {offsets = [9, 0], sizes = [16, 34], strides = [1, 1]} : vector<34x34xf32> to vector<16x34xf32>
    %c165 = arith.constant 165 : index
    %935 = memref.load %arg1[%c165] : memref<216xf32, #tpu.memory_space<smem>>
    %936 = vector.extract_strided_slice %934 {offsets = [0, 0], sizes = [16, 16], strides = [1, 1]} : vector<16x34xf32> to vector<16x16xf32>
    %937 = vector.broadcast %935 : f32 to vector<16x16xf32>
    %938 = arith.mulf %936, %937 : vector<16x16xf32>
    %939 = arith.addf %916, %938 : vector<16x16xf32>
    %c166 = arith.constant 166 : index
    %940 = memref.load %arg1[%c166] : memref<216xf32, #tpu.memory_space<smem>>
    %941 = vector.extract_strided_slice %934 {offsets = [0, 9], sizes = [16, 16], strides = [1, 1]} : vector<16x34xf32> to vector<16x16xf32>
    %942 = vector.broadcast %940 : f32 to vector<16x16xf32>
    %943 = arith.mulf %941, %942 : vector<16x16xf32>
    %944 = arith.addf %939, %943 : vector<16x16xf32>
    %c167 = arith.constant 167 : index
    %945 = memref.load %arg1[%c167] : memref<216xf32, #tpu.memory_space<smem>>
    %946 = vector.extract_strided_slice %934 {offsets = [0, 18], sizes = [16, 16], strides = [1, 1]} : vector<16x34xf32> to vector<16x16xf32>
    %947 = vector.broadcast %945 : f32 to vector<16x16xf32>
    %948 = arith.mulf %946, %947 : vector<16x16xf32>
    %949 = arith.addf %944, %948 : vector<16x16xf32>
    %950 = vector.extract_strided_slice %1 {offsets = [18, 0], sizes = [16, 34], strides = [1, 1]} : vector<34x34xf32> to vector<16x34xf32>
    %c168 = arith.constant 168 : index
    %951 = memref.load %arg1[%c168] : memref<216xf32, #tpu.memory_space<smem>>
    %952 = vector.extract_strided_slice %950 {offsets = [0, 0], sizes = [16, 16], strides = [1, 1]} : vector<16x34xf32> to vector<16x16xf32>
    %953 = vector.broadcast %951 : f32 to vector<16x16xf32>
    %954 = arith.mulf %952, %953 : vector<16x16xf32>
    %955 = arith.addf %917, %954 : vector<16x16xf32>
    %c169 = arith.constant 169 : index
    %956 = memref.load %arg1[%c169] : memref<216xf32, #tpu.memory_space<smem>>
    %957 = vector.extract_strided_slice %950 {offsets = [0, 9], sizes = [16, 16], strides = [1, 1]} : vector<16x34xf32> to vector<16x16xf32>
    %958 = vector.broadcast %956 : f32 to vector<16x16xf32>
    %959 = arith.mulf %957, %958 : vector<16x16xf32>
    %960 = arith.addf %955, %959 : vector<16x16xf32>
    %c170 = arith.constant 170 : index
    %961 = memref.load %arg1[%c170] : memref<216xf32, #tpu.memory_space<smem>>
    %962 = vector.extract_strided_slice %950 {offsets = [0, 18], sizes = [16, 16], strides = [1, 1]} : vector<16x34xf32> to vector<16x16xf32>
    %963 = vector.broadcast %961 : f32 to vector<16x16xf32>
    %964 = arith.mulf %962, %963 : vector<16x16xf32>
    %965 = arith.addf %960, %964 : vector<16x16xf32>
    %966 = vector.extract_strided_slice %3 {offsets = [0, 0], sizes = [16, 34], strides = [1, 1]} : vector<34x34xf32> to vector<16x34xf32>
    %c171 = arith.constant 171 : index
    %967 = memref.load %arg1[%c171] : memref<216xf32, #tpu.memory_space<smem>>
    %968 = vector.extract_strided_slice %966 {offsets = [0, 0], sizes = [16, 16], strides = [1, 1]} : vector<16x34xf32> to vector<16x16xf32>
    %969 = vector.broadcast %967 : f32 to vector<16x16xf32>
    %970 = arith.mulf %968, %969 : vector<16x16xf32>
    %971 = arith.addf %933, %970 : vector<16x16xf32>
    %c172 = arith.constant 172 : index
    %972 = memref.load %arg1[%c172] : memref<216xf32, #tpu.memory_space<smem>>
    %973 = vector.extract_strided_slice %966 {offsets = [0, 9], sizes = [16, 16], strides = [1, 1]} : vector<16x34xf32> to vector<16x16xf32>
    %974 = vector.broadcast %972 : f32 to vector<16x16xf32>
    %975 = arith.mulf %973, %974 : vector<16x16xf32>
    %976 = arith.addf %971, %975 : vector<16x16xf32>
    %c173 = arith.constant 173 : index
    %977 = memref.load %arg1[%c173] : memref<216xf32, #tpu.memory_space<smem>>
    %978 = vector.extract_strided_slice %966 {offsets = [0, 18], sizes = [16, 16], strides = [1, 1]} : vector<16x34xf32> to vector<16x16xf32>
    %979 = vector.broadcast %977 : f32 to vector<16x16xf32>
    %980 = arith.mulf %978, %979 : vector<16x16xf32>
    %981 = arith.addf %976, %980 : vector<16x16xf32>
    %982 = vector.extract_strided_slice %3 {offsets = [9, 0], sizes = [16, 34], strides = [1, 1]} : vector<34x34xf32> to vector<16x34xf32>
    %c174 = arith.constant 174 : index
    %983 = memref.load %arg1[%c174] : memref<216xf32, #tpu.memory_space<smem>>
    %984 = vector.extract_strided_slice %982 {offsets = [0, 0], sizes = [16, 16], strides = [1, 1]} : vector<16x34xf32> to vector<16x16xf32>
    %985 = vector.broadcast %983 : f32 to vector<16x16xf32>
    %986 = arith.mulf %984, %985 : vector<16x16xf32>
    %987 = arith.addf %949, %986 : vector<16x16xf32>
    %c175 = arith.constant 175 : index
    %988 = memref.load %arg1[%c175] : memref<216xf32, #tpu.memory_space<smem>>
    %989 = vector.extract_strided_slice %982 {offsets = [0, 9], sizes = [16, 16], strides = [1, 1]} : vector<16x34xf32> to vector<16x16xf32>
    %990 = vector.broadcast %988 : f32 to vector<16x16xf32>
    %991 = arith.mulf %989, %990 : vector<16x16xf32>
    %992 = arith.addf %987, %991 : vector<16x16xf32>
    %c176 = arith.constant 176 : index
    %993 = memref.load %arg1[%c176] : memref<216xf32, #tpu.memory_space<smem>>
    %994 = vector.extract_strided_slice %982 {offsets = [0, 18], sizes = [16, 16], strides = [1, 1]} : vector<16x34xf32> to vector<16x16xf32>
    %995 = vector.broadcast %993 : f32 to vector<16x16xf32>
    %996 = arith.mulf %994, %995 : vector<16x16xf32>
    %997 = arith.addf %992, %996 : vector<16x16xf32>
    %998 = vector.extract_strided_slice %3 {offsets = [18, 0], sizes = [16, 34], strides = [1, 1]} : vector<34x34xf32> to vector<16x34xf32>
    %c177 = arith.constant 177 : index
    %999 = memref.load %arg1[%c177] : memref<216xf32, #tpu.memory_space<smem>>
    %1000 = vector.extract_strided_slice %998 {offsets = [0, 0], sizes = [16, 16], strides = [1, 1]} : vector<16x34xf32> to vector<16x16xf32>
    %1001 = vector.broadcast %999 : f32 to vector<16x16xf32>
    %1002 = arith.mulf %1000, %1001 : vector<16x16xf32>
    %1003 = arith.addf %965, %1002 : vector<16x16xf32>
    %c178 = arith.constant 178 : index
    %1004 = memref.load %arg1[%c178] : memref<216xf32, #tpu.memory_space<smem>>
    %1005 = vector.extract_strided_slice %998 {offsets = [0, 9], sizes = [16, 16], strides = [1, 1]} : vector<16x34xf32> to vector<16x16xf32>
    %1006 = vector.broadcast %1004 : f32 to vector<16x16xf32>
    %1007 = arith.mulf %1005, %1006 : vector<16x16xf32>
    %1008 = arith.addf %1003, %1007 : vector<16x16xf32>
    %c179 = arith.constant 179 : index
    %1009 = memref.load %arg1[%c179] : memref<216xf32, #tpu.memory_space<smem>>
    %1010 = vector.extract_strided_slice %998 {offsets = [0, 18], sizes = [16, 16], strides = [1, 1]} : vector<16x34xf32> to vector<16x16xf32>
    %1011 = vector.broadcast %1009 : f32 to vector<16x16xf32>
    %1012 = arith.mulf %1010, %1011 : vector<16x16xf32>
    %1013 = arith.addf %1008, %1012 : vector<16x16xf32>
    %1014 = vector.extract_strided_slice %5 {offsets = [0, 0], sizes = [16, 34], strides = [1, 1]} : vector<34x34xf32> to vector<16x34xf32>
    %c180 = arith.constant 180 : index
    %1015 = memref.load %arg1[%c180] : memref<216xf32, #tpu.memory_space<smem>>
    %1016 = vector.extract_strided_slice %1014 {offsets = [0, 0], sizes = [16, 16], strides = [1, 1]} : vector<16x34xf32> to vector<16x16xf32>
    %1017 = vector.broadcast %1015 : f32 to vector<16x16xf32>
    %1018 = arith.mulf %1016, %1017 : vector<16x16xf32>
    %1019 = arith.addf %981, %1018 : vector<16x16xf32>
    %c181 = arith.constant 181 : index
    %1020 = memref.load %arg1[%c181] : memref<216xf32, #tpu.memory_space<smem>>
    %1021 = vector.extract_strided_slice %1014 {offsets = [0, 9], sizes = [16, 16], strides = [1, 1]} : vector<16x34xf32> to vector<16x16xf32>
    %1022 = vector.broadcast %1020 : f32 to vector<16x16xf32>
    %1023 = arith.mulf %1021, %1022 : vector<16x16xf32>
    %1024 = arith.addf %1019, %1023 : vector<16x16xf32>
    %c182 = arith.constant 182 : index
    %1025 = memref.load %arg1[%c182] : memref<216xf32, #tpu.memory_space<smem>>
    %1026 = vector.extract_strided_slice %1014 {offsets = [0, 18], sizes = [16, 16], strides = [1, 1]} : vector<16x34xf32> to vector<16x16xf32>
    %1027 = vector.broadcast %1025 : f32 to vector<16x16xf32>
    %1028 = arith.mulf %1026, %1027 : vector<16x16xf32>
    %1029 = arith.addf %1024, %1028 : vector<16x16xf32>
    %1030 = vector.extract_strided_slice %5 {offsets = [9, 0], sizes = [16, 34], strides = [1, 1]} : vector<34x34xf32> to vector<16x34xf32>
    %c183 = arith.constant 183 : index
    %1031 = memref.load %arg1[%c183] : memref<216xf32, #tpu.memory_space<smem>>
    %1032 = vector.extract_strided_slice %1030 {offsets = [0, 0], sizes = [16, 16], strides = [1, 1]} : vector<16x34xf32> to vector<16x16xf32>
    %1033 = vector.broadcast %1031 : f32 to vector<16x16xf32>
    %1034 = arith.mulf %1032, %1033 : vector<16x16xf32>
    %1035 = arith.addf %997, %1034 : vector<16x16xf32>
    %c184 = arith.constant 184 : index
    %1036 = memref.load %arg1[%c184] : memref<216xf32, #tpu.memory_space<smem>>
    %1037 = vector.extract_strided_slice %1030 {offsets = [0, 9], sizes = [16, 16], strides = [1, 1]} : vector<16x34xf32> to vector<16x16xf32>
    %1038 = vector.broadcast %1036 : f32 to vector<16x16xf32>
    %1039 = arith.mulf %1037, %1038 : vector<16x16xf32>
    %1040 = arith.addf %1035, %1039 : vector<16x16xf32>
    %c185 = arith.constant 185 : index
    %1041 = memref.load %arg1[%c185] : memref<216xf32, #tpu.memory_space<smem>>
    %1042 = vector.extract_strided_slice %1030 {offsets = [0, 18], sizes = [16, 16], strides = [1, 1]} : vector<16x34xf32> to vector<16x16xf32>
    %1043 = vector.broadcast %1041 : f32 to vector<16x16xf32>
    %1044 = arith.mulf %1042, %1043 : vector<16x16xf32>
    %1045 = arith.addf %1040, %1044 : vector<16x16xf32>
    %1046 = vector.extract_strided_slice %5 {offsets = [18, 0], sizes = [16, 34], strides = [1, 1]} : vector<34x34xf32> to vector<16x34xf32>
    %c186 = arith.constant 186 : index
    %1047 = memref.load %arg1[%c186] : memref<216xf32, #tpu.memory_space<smem>>
    %1048 = vector.extract_strided_slice %1046 {offsets = [0, 0], sizes = [16, 16], strides = [1, 1]} : vector<16x34xf32> to vector<16x16xf32>
    %1049 = vector.broadcast %1047 : f32 to vector<16x16xf32>
    %1050 = arith.mulf %1048, %1049 : vector<16x16xf32>
    %1051 = arith.addf %1013, %1050 : vector<16x16xf32>
    %c187 = arith.constant 187 : index
    %1052 = memref.load %arg1[%c187] : memref<216xf32, #tpu.memory_space<smem>>
    %1053 = vector.extract_strided_slice %1046 {offsets = [0, 9], sizes = [16, 16], strides = [1, 1]} : vector<16x34xf32> to vector<16x16xf32>
    %1054 = vector.broadcast %1052 : f32 to vector<16x16xf32>
    %1055 = arith.mulf %1053, %1054 : vector<16x16xf32>
    %1056 = arith.addf %1051, %1055 : vector<16x16xf32>
    %c188 = arith.constant 188 : index
    %1057 = memref.load %arg1[%c188] : memref<216xf32, #tpu.memory_space<smem>>
    %1058 = vector.extract_strided_slice %1046 {offsets = [0, 18], sizes = [16, 16], strides = [1, 1]} : vector<16x34xf32> to vector<16x16xf32>
    %1059 = vector.broadcast %1057 : f32 to vector<16x16xf32>
    %1060 = arith.mulf %1058, %1059 : vector<16x16xf32>
    %1061 = arith.addf %1056, %1060 : vector<16x16xf32>
    %1062 = vector.extract_strided_slice %7 {offsets = [0, 0], sizes = [16, 34], strides = [1, 1]} : vector<34x34xf32> to vector<16x34xf32>
    %c189 = arith.constant 189 : index
    %1063 = memref.load %arg1[%c189] : memref<216xf32, #tpu.memory_space<smem>>
    %1064 = vector.extract_strided_slice %1062 {offsets = [0, 0], sizes = [16, 16], strides = [1, 1]} : vector<16x34xf32> to vector<16x16xf32>
    %1065 = vector.broadcast %1063 : f32 to vector<16x16xf32>
    %1066 = arith.mulf %1064, %1065 : vector<16x16xf32>
    %1067 = arith.addf %1029, %1066 : vector<16x16xf32>
    %c190 = arith.constant 190 : index
    %1068 = memref.load %arg1[%c190] : memref<216xf32, #tpu.memory_space<smem>>
    %1069 = vector.extract_strided_slice %1062 {offsets = [0, 9], sizes = [16, 16], strides = [1, 1]} : vector<16x34xf32> to vector<16x16xf32>
    %1070 = vector.broadcast %1068 : f32 to vector<16x16xf32>
    %1071 = arith.mulf %1069, %1070 : vector<16x16xf32>
    %1072 = arith.addf %1067, %1071 : vector<16x16xf32>
    %c191 = arith.constant 191 : index
    %1073 = memref.load %arg1[%c191] : memref<216xf32, #tpu.memory_space<smem>>
    %1074 = vector.extract_strided_slice %1062 {offsets = [0, 18], sizes = [16, 16], strides = [1, 1]} : vector<16x34xf32> to vector<16x16xf32>
    %1075 = vector.broadcast %1073 : f32 to vector<16x16xf32>
    %1076 = arith.mulf %1074, %1075 : vector<16x16xf32>
    %1077 = arith.addf %1072, %1076 : vector<16x16xf32>
    %1078 = vector.extract_strided_slice %7 {offsets = [9, 0], sizes = [16, 34], strides = [1, 1]} : vector<34x34xf32> to vector<16x34xf32>
    %c192 = arith.constant 192 : index
    %1079 = memref.load %arg1[%c192] : memref<216xf32, #tpu.memory_space<smem>>
    %1080 = vector.extract_strided_slice %1078 {offsets = [0, 0], sizes = [16, 16], strides = [1, 1]} : vector<16x34xf32> to vector<16x16xf32>
    %1081 = vector.broadcast %1079 : f32 to vector<16x16xf32>
    %1082 = arith.mulf %1080, %1081 : vector<16x16xf32>
    %1083 = arith.addf %1045, %1082 : vector<16x16xf32>
    %c193 = arith.constant 193 : index
    %1084 = memref.load %arg1[%c193] : memref<216xf32, #tpu.memory_space<smem>>
    %1085 = vector.extract_strided_slice %1078 {offsets = [0, 9], sizes = [16, 16], strides = [1, 1]} : vector<16x34xf32> to vector<16x16xf32>
    %1086 = vector.broadcast %1084 : f32 to vector<16x16xf32>
    %1087 = arith.mulf %1085, %1086 : vector<16x16xf32>
    %1088 = arith.addf %1083, %1087 : vector<16x16xf32>
    %c194 = arith.constant 194 : index
    %1089 = memref.load %arg1[%c194] : memref<216xf32, #tpu.memory_space<smem>>
    %1090 = vector.extract_strided_slice %1078 {offsets = [0, 18], sizes = [16, 16], strides = [1, 1]} : vector<16x34xf32> to vector<16x16xf32>
    %1091 = vector.broadcast %1089 : f32 to vector<16x16xf32>
    %1092 = arith.mulf %1090, %1091 : vector<16x16xf32>
    %1093 = arith.addf %1088, %1092 : vector<16x16xf32>
    %1094 = vector.extract_strided_slice %7 {offsets = [18, 0], sizes = [16, 34], strides = [1, 1]} : vector<34x34xf32> to vector<16x34xf32>
    %c195 = arith.constant 195 : index
    %1095 = memref.load %arg1[%c195] : memref<216xf32, #tpu.memory_space<smem>>
    %1096 = vector.extract_strided_slice %1094 {offsets = [0, 0], sizes = [16, 16], strides = [1, 1]} : vector<16x34xf32> to vector<16x16xf32>
    %1097 = vector.broadcast %1095 : f32 to vector<16x16xf32>
    %1098 = arith.mulf %1096, %1097 : vector<16x16xf32>
    %1099 = arith.addf %1061, %1098 : vector<16x16xf32>
    %c196 = arith.constant 196 : index
    %1100 = memref.load %arg1[%c196] : memref<216xf32, #tpu.memory_space<smem>>
    %1101 = vector.extract_strided_slice %1094 {offsets = [0, 9], sizes = [16, 16], strides = [1, 1]} : vector<16x34xf32> to vector<16x16xf32>
    %1102 = vector.broadcast %1100 : f32 to vector<16x16xf32>
    %1103 = arith.mulf %1101, %1102 : vector<16x16xf32>
    %1104 = arith.addf %1099, %1103 : vector<16x16xf32>
    %c197 = arith.constant 197 : index
    %1105 = memref.load %arg1[%c197] : memref<216xf32, #tpu.memory_space<smem>>
    %1106 = vector.extract_strided_slice %1094 {offsets = [0, 18], sizes = [16, 16], strides = [1, 1]} : vector<16x34xf32> to vector<16x16xf32>
    %1107 = vector.broadcast %1105 : f32 to vector<16x16xf32>
    %1108 = arith.mulf %1106, %1107 : vector<16x16xf32>
    %1109 = arith.addf %1104, %1108 : vector<16x16xf32>
    %1110 = vector.extract_strided_slice %9 {offsets = [0, 0], sizes = [16, 34], strides = [1, 1]} : vector<34x34xf32> to vector<16x34xf32>
    %c198 = arith.constant 198 : index
    %1111 = memref.load %arg1[%c198] : memref<216xf32, #tpu.memory_space<smem>>
    %1112 = vector.extract_strided_slice %1110 {offsets = [0, 0], sizes = [16, 16], strides = [1, 1]} : vector<16x34xf32> to vector<16x16xf32>
    %1113 = vector.broadcast %1111 : f32 to vector<16x16xf32>
    %1114 = arith.mulf %1112, %1113 : vector<16x16xf32>
    %1115 = arith.addf %1077, %1114 : vector<16x16xf32>
    %c199 = arith.constant 199 : index
    %1116 = memref.load %arg1[%c199] : memref<216xf32, #tpu.memory_space<smem>>
    %1117 = vector.extract_strided_slice %1110 {offsets = [0, 9], sizes = [16, 16], strides = [1, 1]} : vector<16x34xf32> to vector<16x16xf32>
    %1118 = vector.broadcast %1116 : f32 to vector<16x16xf32>
    %1119 = arith.mulf %1117, %1118 : vector<16x16xf32>
    %1120 = arith.addf %1115, %1119 : vector<16x16xf32>
    %c200 = arith.constant 200 : index
    %1121 = memref.load %arg1[%c200] : memref<216xf32, #tpu.memory_space<smem>>
    %1122 = vector.extract_strided_slice %1110 {offsets = [0, 18], sizes = [16, 16], strides = [1, 1]} : vector<16x34xf32> to vector<16x16xf32>
    %1123 = vector.broadcast %1121 : f32 to vector<16x16xf32>
    %1124 = arith.mulf %1122, %1123 : vector<16x16xf32>
    %1125 = arith.addf %1120, %1124 : vector<16x16xf32>
    %1126 = vector.extract_strided_slice %9 {offsets = [9, 0], sizes = [16, 34], strides = [1, 1]} : vector<34x34xf32> to vector<16x34xf32>
    %c201 = arith.constant 201 : index
    %1127 = memref.load %arg1[%c201] : memref<216xf32, #tpu.memory_space<smem>>
    %1128 = vector.extract_strided_slice %1126 {offsets = [0, 0], sizes = [16, 16], strides = [1, 1]} : vector<16x34xf32> to vector<16x16xf32>
    %1129 = vector.broadcast %1127 : f32 to vector<16x16xf32>
    %1130 = arith.mulf %1128, %1129 : vector<16x16xf32>
    %1131 = arith.addf %1093, %1130 : vector<16x16xf32>
    %c202 = arith.constant 202 : index
    %1132 = memref.load %arg1[%c202] : memref<216xf32, #tpu.memory_space<smem>>
    %1133 = vector.extract_strided_slice %1126 {offsets = [0, 9], sizes = [16, 16], strides = [1, 1]} : vector<16x34xf32> to vector<16x16xf32>
    %1134 = vector.broadcast %1132 : f32 to vector<16x16xf32>
    %1135 = arith.mulf %1133, %1134 : vector<16x16xf32>
    %1136 = arith.addf %1131, %1135 : vector<16x16xf32>
    %c203 = arith.constant 203 : index
    %1137 = memref.load %arg1[%c203] : memref<216xf32, #tpu.memory_space<smem>>
    %1138 = vector.extract_strided_slice %1126 {offsets = [0, 18], sizes = [16, 16], strides = [1, 1]} : vector<16x34xf32> to vector<16x16xf32>
    %1139 = vector.broadcast %1137 : f32 to vector<16x16xf32>
    %1140 = arith.mulf %1138, %1139 : vector<16x16xf32>
    %1141 = arith.addf %1136, %1140 : vector<16x16xf32>
    %1142 = vector.extract_strided_slice %9 {offsets = [18, 0], sizes = [16, 34], strides = [1, 1]} : vector<34x34xf32> to vector<16x34xf32>
    %c204 = arith.constant 204 : index
    %1143 = memref.load %arg1[%c204] : memref<216xf32, #tpu.memory_space<smem>>
    %1144 = vector.extract_strided_slice %1142 {offsets = [0, 0], sizes = [16, 16], strides = [1, 1]} : vector<16x34xf32> to vector<16x16xf32>
    %1145 = vector.broadcast %1143 : f32 to vector<16x16xf32>
    %1146 = arith.mulf %1144, %1145 : vector<16x16xf32>
    %1147 = arith.addf %1109, %1146 : vector<16x16xf32>
    %c205 = arith.constant 205 : index
    %1148 = memref.load %arg1[%c205] : memref<216xf32, #tpu.memory_space<smem>>
    %1149 = vector.extract_strided_slice %1142 {offsets = [0, 9], sizes = [16, 16], strides = [1, 1]} : vector<16x34xf32> to vector<16x16xf32>
    %1150 = vector.broadcast %1148 : f32 to vector<16x16xf32>
    %1151 = arith.mulf %1149, %1150 : vector<16x16xf32>
    %1152 = arith.addf %1147, %1151 : vector<16x16xf32>
    %c206 = arith.constant 206 : index
    %1153 = memref.load %arg1[%c206] : memref<216xf32, #tpu.memory_space<smem>>
    %1154 = vector.extract_strided_slice %1142 {offsets = [0, 18], sizes = [16, 16], strides = [1, 1]} : vector<16x34xf32> to vector<16x16xf32>
    %1155 = vector.broadcast %1153 : f32 to vector<16x16xf32>
    %1156 = arith.mulf %1154, %1155 : vector<16x16xf32>
    %1157 = arith.addf %1152, %1156 : vector<16x16xf32>
    %1158 = vector.extract_strided_slice %11 {offsets = [0, 0], sizes = [16, 34], strides = [1, 1]} : vector<34x34xf32> to vector<16x34xf32>
    %c207 = arith.constant 207 : index
    %1159 = memref.load %arg1[%c207] : memref<216xf32, #tpu.memory_space<smem>>
    %1160 = vector.extract_strided_slice %1158 {offsets = [0, 0], sizes = [16, 16], strides = [1, 1]} : vector<16x34xf32> to vector<16x16xf32>
    %1161 = vector.broadcast %1159 : f32 to vector<16x16xf32>
    %1162 = arith.mulf %1160, %1161 : vector<16x16xf32>
    %1163 = arith.addf %1125, %1162 : vector<16x16xf32>
    %c208 = arith.constant 208 : index
    %1164 = memref.load %arg1[%c208] : memref<216xf32, #tpu.memory_space<smem>>
    %1165 = vector.extract_strided_slice %1158 {offsets = [0, 9], sizes = [16, 16], strides = [1, 1]} : vector<16x34xf32> to vector<16x16xf32>
    %1166 = vector.broadcast %1164 : f32 to vector<16x16xf32>
    %1167 = arith.mulf %1165, %1166 : vector<16x16xf32>
    %1168 = arith.addf %1163, %1167 : vector<16x16xf32>
    %c209 = arith.constant 209 : index
    %1169 = memref.load %arg1[%c209] : memref<216xf32, #tpu.memory_space<smem>>
    %1170 = vector.extract_strided_slice %1158 {offsets = [0, 18], sizes = [16, 16], strides = [1, 1]} : vector<16x34xf32> to vector<16x16xf32>
    %1171 = vector.broadcast %1169 : f32 to vector<16x16xf32>
    %1172 = arith.mulf %1170, %1171 : vector<16x16xf32>
    %1173 = arith.addf %1168, %1172 : vector<16x16xf32>
    %1174 = vector.extract_strided_slice %11 {offsets = [9, 0], sizes = [16, 34], strides = [1, 1]} : vector<34x34xf32> to vector<16x34xf32>
    %c210 = arith.constant 210 : index
    %1175 = memref.load %arg1[%c210] : memref<216xf32, #tpu.memory_space<smem>>
    %1176 = vector.extract_strided_slice %1174 {offsets = [0, 0], sizes = [16, 16], strides = [1, 1]} : vector<16x34xf32> to vector<16x16xf32>
    %1177 = vector.broadcast %1175 : f32 to vector<16x16xf32>
    %1178 = arith.mulf %1176, %1177 : vector<16x16xf32>
    %1179 = arith.addf %1141, %1178 : vector<16x16xf32>
    %c211 = arith.constant 211 : index
    %1180 = memref.load %arg1[%c211] : memref<216xf32, #tpu.memory_space<smem>>
    %1181 = vector.extract_strided_slice %1174 {offsets = [0, 9], sizes = [16, 16], strides = [1, 1]} : vector<16x34xf32> to vector<16x16xf32>
    %1182 = vector.broadcast %1180 : f32 to vector<16x16xf32>
    %1183 = arith.mulf %1181, %1182 : vector<16x16xf32>
    %1184 = arith.addf %1179, %1183 : vector<16x16xf32>
    %c212 = arith.constant 212 : index
    %1185 = memref.load %arg1[%c212] : memref<216xf32, #tpu.memory_space<smem>>
    %1186 = vector.extract_strided_slice %1174 {offsets = [0, 18], sizes = [16, 16], strides = [1, 1]} : vector<16x34xf32> to vector<16x16xf32>
    %1187 = vector.broadcast %1185 : f32 to vector<16x16xf32>
    %1188 = arith.mulf %1186, %1187 : vector<16x16xf32>
    %1189 = arith.addf %1184, %1188 : vector<16x16xf32>
    %1190 = vector.extract_strided_slice %11 {offsets = [18, 0], sizes = [16, 34], strides = [1, 1]} : vector<34x34xf32> to vector<16x34xf32>
    %c213 = arith.constant 213 : index
    %1191 = memref.load %arg1[%c213] : memref<216xf32, #tpu.memory_space<smem>>
    %1192 = vector.extract_strided_slice %1190 {offsets = [0, 0], sizes = [16, 16], strides = [1, 1]} : vector<16x34xf32> to vector<16x16xf32>
    %1193 = vector.broadcast %1191 : f32 to vector<16x16xf32>
    %1194 = arith.mulf %1192, %1193 : vector<16x16xf32>
    %1195 = arith.addf %1157, %1194 : vector<16x16xf32>
    %c214 = arith.constant 214 : index
    %1196 = memref.load %arg1[%c214] : memref<216xf32, #tpu.memory_space<smem>>
    %1197 = vector.extract_strided_slice %1190 {offsets = [0, 9], sizes = [16, 16], strides = [1, 1]} : vector<16x34xf32> to vector<16x16xf32>
    %1198 = vector.broadcast %1196 : f32 to vector<16x16xf32>
    %1199 = arith.mulf %1197, %1198 : vector<16x16xf32>
    %1200 = arith.addf %1195, %1199 : vector<16x16xf32>
    %c215 = arith.constant 215 : index
    %1201 = memref.load %arg1[%c215] : memref<216xf32, #tpu.memory_space<smem>>
    %1202 = vector.extract_strided_slice %1190 {offsets = [0, 18], sizes = [16, 16], strides = [1, 1]} : vector<16x34xf32> to vector<16x16xf32>
    %1203 = vector.broadcast %1201 : f32 to vector<16x16xf32>
    %1204 = arith.mulf %1202, %1203 : vector<16x16xf32>
    %1205 = arith.addf %1200, %1204 : vector<16x16xf32>
    %1206 = arith.addf %1173, %1189 : vector<16x16xf32>
    %c3_53 = arith.constant 3 : index
    %1207 = memref.load %arg2[%c3_53] : memref<4xf32, #tpu.memory_space<smem>>
    %1208 = vector.broadcast %1207 : f32 to vector<16x16xf32>
    %1209 = arith.addf %1205, %1208 : vector<16x16xf32>
    %1210 = arith.addf %1206, %1209 : vector<16x16xf32>
    %cst_54 = arith.constant 0.000000e+00 : f32
    %1211 = vector.broadcast %cst_54 : f32 to vector<16x16xf32>
    %1212 = arith.maximumf %1210, %1211 : vector<16x16xf32>
    %c0_55 = arith.constant 0 : index
    %c3_56 = arith.constant 3 : index
    %c0_57 = arith.constant 0 : index
    %c0_58 = arith.constant 0 : index
    %1213 = vector.load %arg4[%c0_55, %c3_56, %c0_57, %c0_58] : memref<1x4x16x16xf32, #tpu.memory_space<vmem>>, vector<1x1x16x16xf32>
    %1214 = vector.shape_cast %1213 : vector<1x1x16x16xf32> to vector<16x16xf32>
    %1215 = vector.shape_cast %1212 : vector<16x16xf32> to vector<1x1x16x16xf32>
    tpu.vector_store %arg4[%c0_55, %c3_56, %c0_57, %c0_58], %1215 {strides = array<i32>} : memref<1x4x16x16xf32, #tpu.memory_space<vmem>>, vector<1x1x16x16xf32>,
    return
  }
  func.func @transform_0(%arg0: i32) -> i32 {
    %c0_i32 = arith.constant 0 : i32
    %c0_i32_0 = arith.constant 0 : i32
    return %c0_i32 : i32
  }
  func.func @transform_1(%arg0: i32) -> i32 {
    %c0_i32 = arith.constant 0 : i32
    %c0_i32_0 = arith.constant 0 : i32
    return %c0_i32 : i32
  }
  func.func @transform_2(%arg0: i32) -> (i32, i32, i32, i32) {
    %c0_i32 = arith.constant 0 : i32
    %c0_i32_0 = arith.constant 0 : i32
    %c0_i32_1 = arith.constant 0 : i32
    %c0_i32_2 = arith.constant 0 : i32
    return %arg0, %c0_i32, %c0_i32_0, %c0_i32_1 : i32, i32, i32, i32
  }
  func.func @transform_3(%arg0: i32) -> (i32, i32, i32, i32) {
    %c0_i32 = arith.constant 0 : i32
    %c0_i32_0 = arith.constant 0 : i32
    %c0_i32_1 = arith.constant 0 : i32
    %c0_i32_2 = arith.constant 0 : i32
    return %arg0, %c0_i32, %c0_i32_0, %c0_i32_1 : i32, i32, i32, i32
  }
}

</mosaic_0001>

<bundles_post_ra>
// kernel: tpu_custom_call.1
= control target key start
LH: loop header
LB: loop body
LE: loop exit
PB: predicated region body
PF: predicated region fallthrough
CT: control target
= control target key end

     0   :  { %8 = vsyncpa [#allocation4], 0  ;;  %s7067_s0 = inlined_call_operand.vmem [shape: f32[216], index: 0, kind: input, shape index: {}]   ;;  %s7068_s1 = inlined_call_operand.vmem [shape: f32[4], index: 1, kind: input, shape index: {}]   ;;  %s7069_s2 = inlined_call_operand.vmem [shape: f32[2,6,34,34], index: 2, kind: input, shape index: {}]   ;;  %s7070_s3 = inlined_call_operand.hbm [shape: f32[2,4,16,16], index: 3, kind: output, shape index: {}]  }
   0x1   :  { %9 = vsyncpa [#allocation6], 0 }
   0x2   :  { %10 = vsyncpa [#allocation3], 0 }
   0x3   :  { %12 = vsyncpa [#allocation3 + $0x1], 0  ;;  %s4350_s12 = smov 0   ;;  %s4352_s13 = smov 0  }
   0x4   :  { %s4354_s14 = smov 0   ;;  %s4356_s15 = smov 0  }
   0x5 LB: > { %s4371_s16 = sadd.s32 4294967295, %s4313_s15   ;;  %s3794_s17 = sadd.s32 4294967294, %s4313_s15   ;;  %s4313_s15 = sphi %s4356_s15, %s7432_s15   ;;  %s4309_s14 = sphi %s4354_s14, %s7431_s14   ;;  %s4305_s13 = sphi %s4352_s13, %s7430_s13   ;;  %s4301_s12 = sphi %s4350_s12, %s7429_s12  }
   0x6   : > { %s4375_s18 = sadd.s32 1, %s4313_s15   ;;  %s93_s19 = sadd.s32 1, %s4309_s14 }
   0x7   : > { %s90_s20 = ssub.s32 %s4313_s15, %s4375_s18  ;;  %p103_p0 = scmp.ne.s32.totalorder %s4309_s14, %s4305_s13 }
   0x8   : > { %p91_p1 = scmp.eq.s32.totalorder %s90_s20, 0  ;;  %p104_p2 = scmp.eq.s32.totalorder %s4371_s16, 1 }
   0x9   : > { %p109_p3 = scmp.ne.s32.totalorder %s4305_s13, %s4301_s12  ;;  %p110_p4 = scmp.eq.s32.totalorder %s3794_s17, 1 }
   0xa   : > { %s4386_s21 = scalar_select %p91_p1, %s4309_s14, %s93_s19  }
   0xb   : > { %p4388_p5 = por %p104_p2, %p103_p0  ;;  %p4392_p6 = por %p110_p4, %p109_p3 }
   0xc   : > { %p3795_p7 = scmp.ge.s32.totalorder %s4313_s15, 1  ;;  %p117_p8 = scmp.lt.s32.totalorder %s4313_s15, 3 }
   0xd   : > { %p4083_p9 = scmp.eq.s32.totalorder %s4371_s16, 0  ;;  %s129_s26 = sshll.u32 %s7067_s0, 4  ;;  %s130_s26 = int_to_ptr.vmem [resolvable:$true] %s129_s26 }
   0xe   : > { %p118_p10 = pnand %p3795_p7, %p117_p8  ;;  %s139_s29 = sshll.u32 %s7068_s1, 4  ;;  %s140_s29 = int_to_ptr.vmem [resolvable:$true] %s139_s29 }
   0xf   : > { %s4315_s30 = smov [#allocation2]   ;;  %s4316_s4 = smov [#allocation5]  }
  0x10   : > { %p4072_p11 = pneg %p118_p10 }
  0x11   : > { %160 = sbr.rel (%p118_p10) target bundleno = 1622 (0x656), region = 32 }
  0x12   : > { %p4073_p12 = pnand %p4083_p9, %p4072_p11 }
  0x14   : > { %4075 = dma.vmem_to_smem (!%p4073_p12), %s130_s26, 32, %s4315_s30, [#allocation4]  }
  0x15   : > { %4078 = dma.vmem_to_smem (!%p4073_p12), %s140_s29, 16, %s4316_s4, [#allocation6]  }
  0x16   : > { %4288 = dma.done.wait (%p4083_p9), [#allocation4], 32  }
  0x17   : > { %4290 = vsyncadd (%p4083_p9), [#allocation4], 4294967264 }
  0x18   : > { %4292 = dma.done.wait (%p4083_p9), [#allocation6], 16  }
  0x19   : > { %4294 = vsyncadd (%p4083_p9), [#allocation6], 4294967280 }
  0x1a   : > { %172 = sfence }
  0x1b   : > { %p191_p13 = scmp.lt.s32.totalorder %s4371_s16, 1  ;;  %s3829_s5 = sld [smem:[#allocation2 + $0x1]]  ;;  %vm1098_vm0 = vcmask 1041408   ;;  %vm1118_vm1 = vcmask 1043456   ;;  %vm1149_vm2 = vcmask 124928   ;;  %vm1147_vm3 = vcmask 130048  }
  0x1c   : > { %s3830_s6 = sld [smem:[#allocation2 + $0x2]]  ;;  %s4317_s17 = smov 122   ;;  %vm1145_vm4 = vcmask 130051   ;;  %vm1934_vm5 = vcmask 1040384   ;;  %vm1980_vm6 = vcmask 123904   ;;  %vm1977_vm7 = vcmask 130050  }
  0x1d   : > { %s192_s7 = scalar_select %p191_p13, %s4371_s16, 1  ;;  %vm2876_vm8 = vcmask 122880   ;;  %vm2873_vm9 = vcmask 130049   ;;  %vm3661_vm10 = vcmask 1046528   ;;  %vm3679_vm11 = vcmask 1045504  }
  0x1e   : > { %s4318_s19 = smov 116   ;;  %s3832_s20 = sld [smem:[#allocation2 + $0x4]] }
  0x1f   : > { %s4061_s8 = smul.u32 240, %s192_s7  ;;  %s3833_s24 = sld [smem:[#allocation2 + $0x5]] }
  0x20   : > { %s3835_s25 = sld [smem:[#allocation2 + $0x7]] }
  0x21   : > { %s4420_s11 = scalar_lea.vmem %s7069_s2, %s4061_s8  ;;  %v240_v0 = vstv %s3829_s5  ;;  %s3836_s26 = sld [smem:[#allocation2 + $0x8]] }
  0x22   : > { %v4423_v1 = vld [vmem:[%s4420_s11 + $0x10] sm:$0xff]  ;;  %v4426_v2 = vld [vmem:[%s4420_s11 + $0x8] sm:$0xff]  ;;  %v260_v3 = vstv %s3830_s6  ;;  %v4429_v4 = vld [vmem:[%s4420_s11] sm:$0xff]  ;;  %s3838_s27 = sld [smem:[#allocation2 + $0xa]] }
  0x23   : > { %v243_v5 = vmul.f32 %v240_v0, %v4423_v1  ;;  %v262_v6 = vmul.f32 %v260_v3, %v4426_v2  ;;  %v241_v7 = vmul.f32 %v240_v0, %v4429_v4  ;;  %v263_v8 = vmul.f32 %v260_v3, %v4423_v1  ;;  %v4444_v11 = vld [vmem:[%s4420_s11 + $0x18] sm:$0xff]  ;;  %v4474_v30 = vld [vmem:[%s4420_s11 + $0x30] sm:$0xff]  ;;  %s3839_s28 = sld [smem:[#allocation2 + $0xb]]  ;;  %v4477_v31 = vld [vmem:[%s4420_s11 + $0x28] sm:$0xff] }
  0x24   : > { %v261_v9 = vmul.f32 %v260_v3, %v4429_v4  ;;  %v242_v10 = vmul.f32 %v240_v0, %v4426_v2  ;;  %v288_v12 = vstv %s3832_s20  ;;  %v4471_v28 = vld [vmem:[%s4420_s11 + $0x38] sm:$0xff]  ;;  %s3841_s29 = sld [smem:[#allocation2 + $0xd]]  ;;  %v4492_v39 = vld [vmem:[%s4420_s11 + $0x40] sm:$0xff]  ;;  %v4527_v60 = vld [vmem:[%s4420_s11 + $0x50] sm:$0xff] }
  0x25   : > { %251 = vrot.lane.b32.xlu1 %v243_v5, %s4317_s17  ;;  %269 = vrot.lane.b32.xlu2 %v262_v6, %s4318_s19  ;;  %v291_v13 = vmul.f32 %v288_v12, %v4444_v11  ;;  %v290_v14 = vmul.f32 %v288_v12, %v4423_v1  ;;  %v289_v15 = vmul.f32 %v288_v12, %v4426_v2  ;;  %v308_v16 = vstv %s3833_s24  ;;  %s3842_s30 = sld [smem:[#allocation2 + $0xe]]  ;;  %v4519_v56 = vld [vmem:[%s4420_s11 + $0x60] sm:$0xff] }
  0x26   : > { %247 = vrot.lane.b32.xlu0 %v241_v7, %s4317_s17  ;;  %v311_v17 = vmul.f32 %v308_v16, %v4444_v11  ;;  %v310_v18 = vmul.f32 %v308_v16, %v4423_v1  ;;  %v309_v19 = vmul.f32 %v308_v16, %v4426_v2  ;;  %v336_v20 = vstv %s3835_s25  ;;  %s3844_s4 = sld [smem:[#allocation2 + $0x10]]  ;;  %v4522_v58 = vld [vmem:[%s4420_s11 + $0x58] sm:$0xff] }
  0x27   : > { %v339_v21 = vmul.f32 %v336_v20, %v4444_v11  ;;  %v338_v22 = vmul.f32 %v336_v20, %v4423_v1  ;;  %v337_v23 = vmul.f32 %v336_v20, %v4426_v2  ;;  %v356_v24 = vstv %s3836_s26  ;;  %s3845_s5 = sld [smem:[#allocation2 + $0x11]] }
  0x28   : > { %v359_v25 = vmul.f32 %v356_v24, %v4444_v11  ;;  %v358_v26 = vmul.f32 %v356_v24, %v4423_v1  ;;  %v357_v27 = vmul.f32 %v356_v24, %v4426_v2  ;;  %v384_v29 = vstv %s3838_s27  ;;  %s3847_s6 = sld [smem:[#allocation2 + $0x13]] }
  0x29   : > { %v387_v32 = vmul.f32 %v4471_v28, %v384_v29  ;;  %v386_v33 = vmul.f32 %v4474_v30, %v384_v29  ;;  %v385_v34 = vmul.f32 %v4477_v31, %v384_v29  ;;  %v404_v35 = vstv %s3839_s28  ;;  %s3848_s7 = sld [smem:[#allocation2 + $0x14]] }
  0x2a   : > { %v407_v36 = vmul.f32 %v4471_v28, %v404_v35  ;;  %v406_v37 = vmul.f32 %v4474_v30, %v404_v35  ;;  %v405_v38 = vmul.f32 %v4477_v31, %v404_v35  ;;  %v432_v40 = vstv %s3841_s29  ;;  %s3850_s8 = sld [smem:[#allocation2 + $0x16]] }
  0x2b   : > { %v435_v41 = vmul.f32 %v4492_v39, %v432_v40  ;;  %v434_v42 = vmul.f32 %v4471_v28, %v432_v40  ;;  %v433_v43 = vmul.f32 %v4474_v30, %v432_v40  ;;  %v452_v44 = vstv %s3842_s30  ;;  %s3851_s9 = sld [smem:[#allocation2 + $0x17]]  ;;  %v4591_v40 = vld [vmem:[%s4420_s11 + $0x88] sm:$0xff] }
  0x2c   : > { %v455_v45 = vmul.f32 %v4492_v39, %v452_v44  ;;  %v454_v46 = vmul.f32 %v4471_v28, %v452_v44  ;;  %v453_v47 = vmul.f32 %v4474_v30, %v452_v44  ;;  %v480_v48 = vstv %s3844_s4  ;;  %s3853_s10 = sld [smem:[#allocation2 + $0x19]]  ;;  %7127 = vst [vmem:[#allocation11_spill] sm:$0xff] %v4591_v40 }
  0x2d   : > { %271 = vrot.lane.b32.xlu2 %v263_v8, %s4318_s19  ;;  %267 = vrot.lane.b32.xlu1 %v261_v9, %s4318_s19  ;;  %v483_v49 = vmul.f32 %v4492_v39, %v480_v48  ;;  %v482_v50 = vmul.f32 %v4471_v28, %v480_v48  ;;  %v481_v51 = vmul.f32 %v4474_v30, %v480_v48  ;;  %v500_v52 = vstv %s3845_s5  ;;  %v4544_v8 = vld [vmem:[%s4420_s11 + $0x68] sm:$0xff]  ;;  %s3854_s20 = sld [smem:[#allocation2 + $0x1a]] }
  0x2e   : > { %249 = vrot.lane.b32.xlu0 %v242_v10, %s4317_s17  ;;  %v503_v53 = vmul.f32 %v4492_v39, %v500_v52  ;;  %v502_v54 = vmul.f32 %v4471_v28, %v500_v52  ;;  %v501_v55 = vmul.f32 %v4474_v30, %v500_v52  ;;  %v528_v57 = vstv %s3847_s6  ;;  %s3856_s24 = sld [smem:[#allocation2 + $0x1c]] }
  0x2f   : > { %v531_v61 = vmul.f32 %v4519_v56, %v528_v57  ;;  %v530_v62 = vmul.f32 %v4522_v58, %v528_v57  ;;  %v529_v63 = vmul.f32 %v4527_v60, %v528_v57  ;;  %v548_v0 = vstv %s3848_s7  ;;  %s3857_s25 = sld [smem:[#allocation2 + $0x1d]] }
  0x30   : > { %v551_v5 = vmul.f32 %v4519_v56, %v548_v0  ;;  %v550_v6 = vmul.f32 %v4522_v58, %v548_v0  ;;  %v549_v7 = vmul.f32 %v4527_v60, %v548_v0  ;;  %v576_v9 = vstv %s3850_s8  ;;  %s3859_s26 = sld [smem:[#allocation2 + $0x1f]] }
  0x31   : > { %v579_v12 = vmul.f32 %v4544_v8, %v576_v9  ;;  %s3860_s27 = sld [smem:[#allocation2 + $0x20]] }
  0x32   : > { %s3862_s28 = sld [smem:[#allocation2 + $0x22]] }
  0x33   : > { %s3863_s29 = sld [smem:[#allocation2 + $0x23]] }
  0x34   : > { %s3865_s30 = sld [smem:[#allocation2 + $0x25]] }
  0x35   : > { %299 = vrot.lane.b32.xlu2 %v291_v13, %s4317_s17  ;;  %297 = vrot.lane.b32.xlu1 %v290_v14, %s4317_s17  ;;  %v578_v13 = vmul.f32 %v4519_v56, %v576_v9  ;;  %v577_v14 = vmul.f32 %v4522_v58, %v576_v9  ;;  %s3866_s4 = sld [smem:[#allocation2 + $0x26]] }
  0x36   : > { %295 = vrot.lane.b32.xlu0 %v289_v15, %s4317_s17  ;;  %v596_v15 = vstv %s3851_s9  ;;  %s3868_s5 = sld [smem:[#allocation2 + $0x28]] }
  0x37   : > { %v598_v20 = vmul.f32 %v4519_v56, %v596_v15  ;;  %s3869_s6 = sld [smem:[#allocation2 + $0x29]] }
  0x38   : > { %s3871_s7 = sld [smem:[#allocation2 + $0x2b]] }
  0x39   : > { %s3872_s8 = sld [smem:[#allocation2 + $0x2c]] }
  0x3a   : > { %s3874_s9 = sld [smem:[#allocation2 + $0x2e]] }
  0x3d   : > { %319 = vrot.lane.b32.xlu2 %v311_v17, %s4318_s19  ;;  %317 = vrot.lane.b32.xlu1 %v310_v18, %s4318_s19 }
  0x3e   : > { %315 = vrot.lane.b32.xlu0 %v309_v19, %s4318_s19  ;;  %v599_v19 = vmul.f32 %v4544_v8, %v596_v15 }
  0x45   : > { %347 = vrot.lane.b32.xlu2 %v339_v21, %s4317_s17  ;;  %345 = vrot.lane.b32.xlu1 %v338_v22, %s4317_s17  ;;  %v597_v21 = vmul.f32 %v4522_v58, %v596_v15  ;;  %v624_v22 = vstv %s3853_s10  ;;  %s3875_s10 = sld [smem:[#allocation2 + $0x2f]] }
  0x46   : > { %343 = vrot.lane.b32.xlu0 %v337_v23, %s4317_s17  ;;  %v625_v29 = vmul.f32 %v4522_v58, %v624_v22 }
  0x4d   : > { %367 = vrot.lane.b32.xlu2 %v359_v25, %s4318_s19  ;;  %365 = vrot.lane.b32.xlu1 %v358_v26, %s4318_s19  ;;  %v627_v26 = vmul.f32 %v4544_v8, %v624_v22 }
  0x4e   : > { %363 = vrot.lane.b32.xlu0 %v357_v27, %s4318_s19  ;;  %v626_v27 = vmul.f32 %v4519_v56, %v624_v22  ;;  %v768_v22 = vstv %s3862_s28  ;;  %s3837_s28 = sld [smem:[#allocation2 + $0x9]] }
  0x55   : > { %395 = vrot.lane.b32.xlu2 %v387_v32, %s4317_s17  ;;  %393 = vrot.lane.b32.xlu1 %v386_v33, %s4317_s17  ;;  %v644_v32 = vstv %s3854_s20  ;;  %s3877_s20 = sld [smem:[#allocation2 + $0x31]] }
  0x56   : > { %391 = vrot.lane.b32.xlu0 %v385_v34, %s4317_s17 }
  0x5d   : > { %415 = vrot.lane.b32.xlu2 %v407_v36, %s4318_s19  ;;  %413 = vrot.lane.b32.xlu1 %v406_v37, %s4318_s19  ;;  %v647_v36 = vmul.f32 %v4544_v8, %v644_v32  ;;  %v646_v37 = vmul.f32 %v4519_v56, %v644_v32 }
  0x5e   : > { %411 = vrot.lane.b32.xlu0 %v405_v38, %s4318_s19  ;;  %v645_v38 = vmul.f32 %v4522_v58, %v644_v32 }
  0x65   : > { %443 = vrot.lane.b32.xlu2 %v435_v41, %s4317_s17  ;;  %441 = vrot.lane.b32.xlu1 %v434_v42, %s4317_s17  ;;  %v672_v41 = vstv %s3856_s24  ;;  %v4594_v42 = vld [vmem:[%s4420_s11 + $0x80] sm:$0xff]  ;;  %s3878_s24 = sld [smem:[#allocation2 + $0x32]] }
  0x66   : > { %439 = vrot.lane.b32.xlu0 %v433_v43, %s4317_s17  ;;  %7128 = vst [vmem:[#allocation12_spill] sm:$0xff] %v4594_v42  ;;  %v674_v48 = vmul.f32 %v4594_v42, %v672_v41 }
  0x6d   : > { %463 = vrot.lane.b32.xlu2 %v455_v45, %s4318_s19  ;;  %461 = vrot.lane.b32.xlu1 %v454_v46, %s4318_s19  ;;  %v4601_v45 = vld [vmem:[%s4420_s11 + $0x78] sm:$0xff] }
  0x6e   : > { %459 = vrot.lane.b32.xlu0 %v453_v47, %s4318_s19  ;;  %7129 = vst [vmem:[#allocation13_spill] sm:$0xff] %v4601_v45  ;;  %v675_v47 = vmul.f32 %v4591_v40, %v672_v41 }
  0x75   : > { %491 = vrot.lane.b32.xlu2 %v483_v49, %s4317_s17  ;;  %489 = vrot.lane.b32.xlu1 %v482_v50, %s4317_s17  ;;  %v673_v49 = vmul.f32 %v4601_v45, %v672_v41  ;;  %v692_v50 = vstv %s3857_s25  ;;  %s3880_s25 = sld [smem:[#allocation2 + $0x34]] }
  0x76   : > { %487 = vrot.lane.b32.xlu0 %v481_v51, %s4317_s17  ;;  %v693_v57 = vmul.f32 %v4601_v45, %v692_v50 }
  0x7d   : > { %511 = vrot.lane.b32.xlu2 %v503_v53, %s4318_s19  ;;  %509 = vrot.lane.b32.xlu1 %v502_v54, %s4318_s19  ;;  %v695_v54 = vmul.f32 %v4591_v40, %v692_v50 }
  0x7e   : > { %507 = vrot.lane.b32.xlu0 %v501_v55, %s4318_s19  ;;  %v694_v55 = vmul.f32 %v4594_v42, %v692_v50 }
  0x7f   : > { %v4524_v59 = vpop.permute.xlu2 %269 }
  0x85   : > { %539 = vrot.lane.b32.xlu2 %v531_v61, %s4317_s17  ;;  %537 = vrot.lane.b32.xlu1 %v530_v62, %s4317_s17  ;;  %v4624_v61 = vld [vmem:[%s4420_s11 + $0x90] sm:$0xff]  ;;  %v720_v62 = vstv %s3859_s26  ;;  %s3881_s26 = sld [smem:[#allocation2 + $0x35]] }
  0x86   : > { %535 = vrot.lane.b32.xlu0 %v529_v63, %s4317_s17  ;;  %v721_v9 = vmul.f32 %v4594_v42, %v720_v62  ;;  %v771_v32 = vmul.f32 %v4624_v61, %v768_v22 }
  0x87   : > { %v4535_v3 = vpop.permute.xlu2 %271 }
  0x8d   : > { %559 = vrot.lane.b32.xlu2 %v551_v5, %s4318_s19  ;;  %557 = vrot.lane.b32.xlu1 %v550_v6, %s4318_s19  ;;  %v723_v6 = vmul.f32 %v4624_v61, %v720_v62 }
  0x8e   : > { %555 = vrot.lane.b32.xlu0 %v549_v7, %s4318_s19  ;;  %v722_v7 = vmul.f32 %v4591_v40, %v720_v62  ;;  %v4678_v62 = vld [vmem:[%s4420_s11 + $0xa8] sm:$0xff] }
  0x8f   : > { %v4546_v10 = vpop.permute.xlu2 %299  ;;  %7133 = vst [vmem:[#allocation17_spill] sm:$0xff] %v4678_v62 }
  0x95   : > { %587 = vrot.lane.b32.xlu2 %v579_v12, %s4317_s17  ;;  %585 = vrot.lane.b32.xlu1 %v578_v13, %s4317_s17  ;;  %v740_v12 = vstv %s3860_s27  ;;  %s231_s27 = sld [smem:[#allocation2]] }
  0x96   : > { %583 = vrot.lane.b32.xlu0 %v577_v14, %s4317_s17 }
  0x97   : > { %v4554_v16 = vpop.permute.xlu1 %251  ;;  %v4556_v17 = vpop.permute.xlu2 %319 }
  0x98   : > { %v4558_v18 = vpop.permute.xlu0 %247 }
  0x9d   : > { %607 = vrot.lane.b32.xlu2 %v599_v19, %s4318_s19  ;;  %605 = vrot.lane.b32.xlu1 %v598_v20, %s4318_s19  ;;  %v743_v19 = vmul.f32 %v4624_v61, %v740_v12  ;;  %v742_v20 = vmul.f32 %v4591_v40, %v740_v12 }
  0x9e   : > { %603 = vrot.lane.b32.xlu0 %v597_v21, %s4318_s19  ;;  %v741_v21 = vmul.f32 %v4594_v42, %v740_v12 }
  0x9f   : > { %v4566_v23 = vpop.permute.xlu2 %347  ;;  %v4568_v24 = vpop.permute.xlu1 %267 }
  0xa0   : > { %v4570_v25 = vpop.permute.xlu0 %249 }
  0xa5   : > { %635 = vrot.lane.b32.xlu2 %v627_v26, %s4317_s17  ;;  %633 = vrot.lane.b32.xlu1 %v626_v27, %s4317_s17 }
  0xa6   : > { %631 = vrot.lane.b32.xlu0 %v625_v29, %s4317_s17 }
  0xa7   : > { %v4578_v33 = vpop.permute.xlu2 %367  ;;  %v4580_v34 = vpop.permute.xlu1 %297 }
  0xa8   : > { %v4582_v35 = vpop.permute.xlu0 %295 }
  0xad   : > { %655 = vrot.lane.b32.xlu2 %v647_v36, %s4318_s19  ;;  %653 = vrot.lane.b32.xlu1 %v646_v37, %s4318_s19  ;;  %v770_v36 = vmul.f32 %v4591_v40, %v768_v22  ;;  %v769_v37 = vmul.f32 %v4594_v42, %v768_v22  ;;  %v836_v22 = vstv %s3866_s4  ;;  %s3846_s4 = sld [smem:[#allocation2 + $0x12]] }
  0xae   : > { %651 = vrot.lane.b32.xlu0 %v645_v38, %s4318_s19  ;;  %v788_v38 = vstv %s3863_s29  ;;  %s3843_s29 = sld [smem:[#allocation2 + $0xf]] }
  0xaf   : > { %v4596_v43 = vpop.permute.xlu2 %395  ;;  %v4598_v44 = vpop.permute.xlu1 %317  ;;  %v790_v50 = vmul.f32 %v4591_v40, %v788_v38 }
  0xb0   : > { %v4603_v46 = vpop.permute.xlu0 %315 }
  0xb4   : > { %v472_v40 = vstv %s3843_s29  ;;  %s3884_s29 = sld [smem:[#allocation2 + $0x38]] }
  0xb5   : > { %683 = vrot.lane.b32.xlu2 %v675_v47, %s4317_s17  ;;  %681 = vrot.lane.b32.xlu1 %v674_v48, %s4317_s17 }
  0xb6   : > { %679 = vrot.lane.b32.xlu0 %v673_v49, %s4317_s17  ;;  %v791_v49 = vmul.f32 %v4624_v61, %v788_v38 }
  0xb7   : > { %v4611_v51 = vpop.permute.xlu2 %415  ;;  %v4613_v52 = vpop.permute.xlu1 %345 }
  0xb8   : > { %v4615_v53 = vpop.permute.xlu0 %343 }
  0xbd   : > { %703 = vrot.lane.b32.xlu2 %v695_v54, %s4318_s19  ;;  %701 = vrot.lane.b32.xlu1 %v694_v55, %s4318_s19  ;;  %v789_v54 = vmul.f32 %v4594_v42, %v788_v38  ;;  %v4675_v55 = vld [vmem:[%s4420_s11 + $0xb0] sm:$0xff] }
  0xbe   : > { %699 = vrot.lane.b32.xlu0 %v693_v57, %s4318_s19  ;;  %7132 = vst [vmem:[#allocation16_spill] sm:$0xff] %v4675_v55  ;;  %v816_v57 = vstv %s3865_s30  ;;  %v839_v38 = vmul.f32 %v4675_v55, %v836_v22  ;;  %s3840_s30 = sld [smem:[#allocation2 + $0xc]] }
  0xbf   : > { %v4626_v63 = vpop.permute.xlu2 %443  ;;  %v4628_v0 = vpop.permute.xlu1 %365 }
  0xc0   : > { %v4630_v5 = vpop.permute.xlu0 %363 }
  0xc5   : > { %731 = vrot.lane.b32.xlu2 %v723_v6, %s4317_s17  ;;  %729 = vrot.lane.b32.xlu1 %v722_v7, %s4317_s17 }
  0xc6   : > { %727 = vrot.lane.b32.xlu0 %v721_v9, %s4317_s17  ;;  %v4685_v9 = vld [vmem:[%s4420_s11 + $0xa0] sm:$0xff] }
  0xc7   : > { %v4638_v13 = vpop.permute.xlu2 %463  ;;  %v4640_v14 = vpop.permute.xlu1 %393  ;;  %7135 = vst [vmem:[#allocation19_spill] sm:$0xff] %v4685_v9 }
  0xc8   : > { %v4642_v15 = vpop.permute.xlu0 %391 }
  0xcd   : > { %751 = vrot.lane.b32.xlu2 %v743_v19, %s4318_s19  ;;  %749 = vrot.lane.b32.xlu1 %v742_v20, %s4318_s19  ;;  %v819_v19 = vmul.f32 %v4675_v55, %v816_v57  ;;  %v818_v20 = vmul.f32 %v4678_v62, %v816_v57 }
  0xce   : > { %747 = vrot.lane.b32.xlu0 %v741_v21, %s4318_s19  ;;  %v817_v21 = vmul.f32 %v4685_v9, %v816_v57  ;;  %v864_v57 = vstv %s3868_s5  ;;  %s3852_s5 = sld [smem:[#allocation2 + $0x18]] }
  0xcf   : > { %v4650_v26 = vpop.permute.xlu2 %491  ;;  %v4652_v27 = vpop.permute.xlu1 %413 }
  0xd0   : > { %v4654_v29 = vpop.permute.xlu0 %411 }
  0xd1   : > { %7130 = vst [vmem:[#allocation14_spill] sm:$0xff] %v4654_v29 }
  0xd5   : > { %779 = vrot.lane.b32.xlu2 %v771_v32, %s4317_s17  ;;  %777 = vrot.lane.b32.xlu1 %v770_v36, %s4317_s17 }
  0xd6   : > { %775 = vrot.lane.b32.xlu0 %v769_v37, %s4317_s17 }
  0xd7   : > { %v4662_v41 = vpop.permute.xlu2 %511  ;;  %v4664_v47 = vpop.permute.xlu1 %441 }
  0xd8   : > { %v4666_v48 = vpop.permute.xlu0 %439 }
  0xd9   : > { %7131 = vst [vmem:[#allocation15_spill] sm:$0xff] %v4666_v48  ;;  %v424_v48 = vstv %s3840_s30  ;;  %s4320_s30 = smov 121  }
  0xdd   : > { %799 = vrot.lane.b32.xlu2 %v791_v49, %s4318_s19  ;;  %797 = vrot.lane.b32.xlu1 %v790_v50, %s4318_s19  ;;  %v838_v49 = vmul.f32 %v4678_v62, %v836_v22  ;;  %v837_v50 = vmul.f32 %v4685_v9, %v836_v22  ;;  %v866_v22 = vmul.f32 %v4675_v55, %v864_v57 }
  0xde   : > { %795 = vrot.lane.b32.xlu0 %v789_v54, %s4318_s19  ;;  %v4708_v54 = vld [vmem:[%s4420_s11 + $0xb8] sm:$0xff] }
  0xdf   : > { %v4680_v6 = vpop.permute.xlu2 %539  ;;  %v4682_v7 = vpop.permute.xlu1 %461  ;;  %7140 = vst [vmem:[#allocation24_spill] sm:$0xff] %v4708_v54  ;;  %v867_v45 = vmul.f32 %v4708_v54, %v864_v57 }
  0xe0   : > { %7134 = vst [vmem:[#allocation18_spill] sm:$0xff] %v4680_v6  ;;  %v4687_v12 = vpop.permute.xlu0 %459 }
  0xe1   : > { %7136 = vst [vmem:[#allocation20_spill] sm:$0xff] %v4687_v12 }
  0xe5   : > { %827 = vrot.lane.b32.xlu2 %v819_v19, %s4317_s17  ;;  %825 = vrot.lane.b32.xlu1 %v818_v20, %s4317_s17 }
  0xe6   : > { %823 = vrot.lane.b32.xlu0 %v817_v21, %s4317_s17 }
  0xe7   : > { %v4695_v32 = vpop.permute.xlu2 %559  ;;  %v4697_v36 = vpop.permute.xlu1 %489 }
  0xe8   : > { %7137 = vst [vmem:[#allocation21_spill] sm:$0xff] %v4695_v32  ;;  %v4699_v37 = vpop.permute.xlu0 %487 }
  0xe9   : > { %7138 = vst [vmem:[#allocation22_spill] sm:$0xff] %v4697_v36 }
  0xea   : > { %7139 = vst [vmem:[#allocation23_spill] sm:$0xff] %v4699_v37  ;;  %v4762_v37 = vld [vmem:[%s4420_s11 + $0xd0] sm:$0xff] }
  0xeb   : > { %7149 = vst [vmem:[#allocation33_spill] sm:$0xff] %v4762_v37 }
  0xed   : > { %847 = vrot.lane.b32.xlu2 %v839_v38, %s4318_s19  ;;  %845 = vrot.lane.b32.xlu1 %v838_v49, %s4318_s19  ;;  %v865_v38 = vmul.f32 %v4678_v62, %v864_v57  ;;  %v884_v49 = vstv %s3869_s6  ;;  %s4892_s6 = sld [smem:[#allocation2 + $0x15]] }
  0xee   : > { %843 = vrot.lane.b32.xlu0 %v837_v50, %s4318_s19  ;;  %v885_v57 = vmul.f32 %v4678_v62, %v884_v49 }
  0xef   : > { %v4710_v19 = vpop.permute.xlu2 %587  ;;  %v4712_v20 = vpop.permute.xlu1 %509 }
  0xf0   : > { %7141 = vst [vmem:[#allocation25_spill] sm:$0xff] %v4712_v20  ;;  %v4714_v21 = vpop.permute.xlu0 %507  ;;  %v886_v20 = vmul.f32 %v4675_v55, %v884_v49 }
  0xf1   : > { %7142 = vst [vmem:[#allocation26_spill] sm:$0xff] %v4714_v21  ;;  %v887_v21 = vmul.f32 %v4708_v54, %v884_v49 }
  0xf5   : > { %875 = vrot.lane.b32.xlu2 %v867_v45, %s4317_s17  ;;  %873 = vrot.lane.b32.xlu1 %v866_v22, %s4317_s17  ;;  %v912_v45 = vstv %s3871_s7  ;;  %s4920_s7 = sld [smem:[#allocation2 + $0x21]] }
  0xf6   : > { %871 = vrot.lane.b32.xlu0 %v865_v38, %s4317_s17  ;;  %v914_v32 = vmul.f32 %v4675_v55, %v912_v45  ;;  %v913_v49 = vmul.f32 %v4678_v62, %v912_v45 }
  0xf7   : > { %v4722_v50 = vpop.permute.xlu2 %607  ;;  %v4724_v9 = vpop.permute.xlu1 %537 }
  0xf8   : > { %7143 = vst [vmem:[#allocation27_spill] sm:$0xff] %v4724_v9  ;;  %v4726_v42 = vpop.permute.xlu0 %535 }
  0xf9   : > { %7144 = vst [vmem:[#allocation28_spill] sm:$0xff] %v4726_v42  ;;  %v915_v42 = vmul.f32 %v4708_v54, %v912_v45 }
  0xfd   : > { %895 = vrot.lane.b32.xlu2 %v887_v21, %s4318_s19  ;;  %893 = vrot.lane.b32.xlu1 %v886_v20, %s4318_s19  ;;  %v932_v20 = vstv %s3872_s8  ;;  %s4926_s8 = sld [smem:[#allocation2 + $0x1e]] }
  0xfe   : > { %891 = vrot.lane.b32.xlu0 %v885_v57, %s4318_s19  ;;  %v934_v45 = vmul.f32 %v4675_v55, %v932_v20 }
  0xff   : > { %v4734_v22 = vpop.permute.xlu2 %635  ;;  %v4736_v38 = vpop.permute.xlu1 %557 }
 0x100   : > { %7145 = vst [vmem:[#allocation29_spill] sm:$0xff] %v4736_v38  ;;  %v4738_v9 = vpop.permute.xlu0 %555  ;;  %v935_v38 = vmul.f32 %v4708_v54, %v932_v20  ;;  %v4769_v54 = vld [vmem:[%s4420_s11 + $0xc8] sm:$0xff] }
 0x101   : > { %7146 = vst [vmem:[#allocation30_spill] sm:$0xff] %v4738_v9 }
 0x102   : > { %7152 = vst [vmem:[#allocation36_spill] sm:$0xff] %v4769_v54 }
 0x105   : > { %923 = vrot.lane.b32.xlu2 %v915_v42, %s4317_s17  ;;  %921 = vrot.lane.b32.xlu1 %v914_v32, %s4317_s17  ;;  %v933_v42 = vmul.f32 %v4678_v62, %v932_v20  ;;  %v4759_v32 = vld [vmem:[%s4420_s11 + $0xd8] sm:$0xff] }
 0x106   : > { %919 = vrot.lane.b32.xlu0 %v913_v49, %s4317_s17  ;;  %7148 = vst [vmem:[#allocation32_spill] sm:$0xff] %v4759_v32  ;;  %v960_v49 = vstv %s3874_s9  ;;  %s4931_s9 = sld [smem:[#allocation2 + $0x1b]] }
 0x107   : > { %v4746_v21 = vpop.permute.xlu2 %655  ;;  %v4748_v57 = vpop.permute.xlu1 %585  ;;  %v962_v20 = vmul.f32 %v4762_v37, %v960_v49 }
 0x108   : > { %v4750_v9 = vpop.permute.xlu0 %583 }
 0x109   : > { %7147 = vst [vmem:[#allocation31_spill] sm:$0xff] %v4750_v9 }
 0x10d   : > { %943 = vrot.lane.b32.xlu2 %v935_v38, %s4318_s19  ;;  %941 = vrot.lane.b32.xlu1 %v934_v45, %s4318_s19  ;;  %v963_v38 = vmul.f32 %v4759_v32, %v960_v49  ;;  %v961_v45 = vmul.f32 %v4769_v54, %v960_v49 }
 0x10e   : > { %939 = vrot.lane.b32.xlu0 %v933_v42, %s4318_s19  ;;  %v980_v42 = vstv %s3875_s10  ;;  %s4960_s10 = sld [smem:[#allocation2 + $0x2a]] }
 0x10f   : > { %v4764_v36 = vpop.permute.xlu2 %683  ;;  %v4766_v9 = vpop.permute.xlu1 %605  ;;  %v983_v12 = vmul.f32 %v4759_v32, %v980_v42  ;;  %v982_v6 = vmul.f32 %v4762_v37, %v980_v42  ;;  %v981_v49 = vmul.f32 %v4769_v54, %v980_v42 }
 0x110   : > { %7150 = vst [vmem:[#allocation34_spill] sm:$0xff] %v4764_v36  ;;  %v4771_v55 = vpop.permute.xlu0 %603 }
 0x111   : > { %7151 = vst [vmem:[#allocation35_spill] sm:$0xff] %v4766_v9 }
 0x112   : > { %7153 = vst [vmem:[#allocation37_spill] sm:$0xff] %v4771_v55 }
 0x115   : > { %971 = vrot.lane.b32.xlu2 %v963_v38, %s4317_s17  ;;  %969 = vrot.lane.b32.xlu1 %v962_v20, %s4317_s17  ;;  %v4792_v38 = vld [vmem:[%s4420_s11 + $0xe0] sm:$0xff]  ;;  %v1008_v20 = vstv %s3877_s20  ;;  %s4966_s20 = sld [smem:[#allocation2 + $0x27]] }
 0x116   : > { %967 = vrot.lane.b32.xlu0 %v961_v45, %s4317_s17  ;;  %7157 = vst [vmem:[#allocation41_spill] sm:$0xff] %v4792_v38  ;;  %v1010_v42 = vmul.f32 %v4759_v32, %v1008_v20 }
 0x117   : > { %v4779_v62 = vpop.permute.xlu2 %703  ;;  %v4781_v36 = vpop.permute.xlu1 %633 }
 0x118   : > { %7154 = vst [vmem:[#allocation38_spill] sm:$0xff] %v4779_v62  ;;  %v4783_v55 = vpop.permute.xlu0 %631  ;;  %v1011_v62 = vmul.f32 %v4792_v38, %v1008_v20 }
 0x119   : > { %7155 = vst [vmem:[#allocation39_spill] sm:$0xff] %v4781_v36 }
 0x11a   : > { %7156 = vst [vmem:[#allocation40_spill] sm:$0xff] %v4783_v55 }
 0x11d   : > { %991 = vrot.lane.b32.xlu2 %v983_v12, %s4318_s19  ;;  %989 = vrot.lane.b32.xlu1 %v982_v6, %s4318_s19  ;;  %v1009_v12 = vmul.f32 %v4762_v37, %v1008_v20  ;;  %v1028_v6 = vstv %s3878_s24  ;;  %s4982_s24 = sld [smem:[#allocation2 + $0x24]] }
 0x11e   : > { %987 = vrot.lane.b32.xlu0 %v981_v49, %s4318_s19  ;;  %v1029_v20 = vmul.f32 %v4762_v37, %v1028_v6 }
 0x11f   : > { %v4794_v45 = vpop.permute.xlu2 %731  ;;  %v4796_v36 = vpop.permute.xlu1 %653 }
 0x120   : > { %7158 = vst [vmem:[#allocation42_spill] sm:$0xff] %v4794_v45  ;;  %v4798_v55 = vpop.permute.xlu0 %651  ;;  %v1030_v45 = vmul.f32 %v4759_v32, %v1028_v6 }
 0x121   : > { %7159 = vst [vmem:[#allocation43_spill] sm:$0xff] %v4796_v36 }
 0x122   : > { %7160 = vst [vmem:[#allocation44_spill] sm:$0xff] %v4798_v55  ;;  %v1031_v55 = vmul.f32 %v4792_v38, %v1028_v6 }
 0x125   : > { %1019 = vrot.lane.b32.xlu2 %v1011_v62, %s4317_s17  ;;  %1017 = vrot.lane.b32.xlu1 %v1010_v42, %s4317_s17  ;;  %v1056_v62 = vstv %s3880_s25  ;;  %s5003_s25 = sld [smem:[#allocation2 + $0x33]] }
 0x126   : > { %1015 = vrot.lane.b32.xlu0 %v1009_v12, %s4317_s17  ;;  %v1057_v6 = vmul.f32 %v4762_v37, %v1056_v62 }
 0x127   : > { %v4806_v49 = vpop.permute.xlu2 %751  ;;  %v4808_v54 = vpop.permute.xlu1 %681 }
 0x128   : > { %7161 = vst [vmem:[#allocation45_spill] sm:$0xff] %v4806_v49  ;;  %v4810_v36 = vpop.permute.xlu0 %679  ;;  %v1058_v49 = vmul.f32 %v4759_v32, %v1056_v62 }
 0x129   : > { %7162 = vst [vmem:[#allocation46_spill] sm:$0xff] %v4808_v54 }
 0x12a   : > { %7163 = vst [vmem:[#allocation47_spill] sm:$0xff] %v4810_v36  ;;  %v1059_v36 = vmul.f32 %v4792_v38, %v1056_v62 }
 0x12d   : > { %1039 = vrot.lane.b32.xlu2 %v1031_v55, %s4318_s19  ;;  %1037 = vrot.lane.b32.xlu1 %v1030_v45, %s4318_s19  ;;  %v1076_v55 = vstv %s3881_s26  ;;  %s5010_s26 = sld [smem:[#allocation2 + $0x30]] }
 0x12e   : > { %1035 = vrot.lane.b32.xlu0 %v1029_v20, %s4318_s19  ;;  %v1077_v9 = vmul.f32 %v4762_v37, %v1076_v55 }
 0x12f   : > { %v4818_v42 = vpop.permute.xlu2 %779  ;;  %v4820_v12 = vpop.permute.xlu1 %701 }
 0x130   : > { %7164 = vst [vmem:[#allocation48_spill] sm:$0xff] %v4818_v42  ;;  %v4822_v54 = vpop.permute.xlu0 %699  ;;  %v1078_v42 = vmul.f32 %v4759_v32, %v1076_v55 }
 0x131   : > { %7165 = vst [vmem:[#allocation49_spill] sm:$0xff] %v4820_v12 }
 0x132   : > { %7166 = vst [vmem:[#allocation50_spill] sm:$0xff] %v4822_v54  ;;  %v1079_v54 = vmul.f32 %v4792_v38, %v1076_v55 }
 0x135   : > { %1067 = vrot.lane.b32.xlu2 %v1059_v36, %s4317_s17  ;;  %1065 = vrot.lane.b32.xlu1 %v1058_v49, %s4317_s17 }
 0x136   : > { %1063 = vrot.lane.b32.xlu0 %v1057_v6, %s4317_s17  ;;  %s3831_s17 = sld [smem:[#allocation2 + $0x3]] }
 0x137   : > { %v4830_v45 = vpop.permute.xlu2 %799  ;;  %v4832_v20 = vpop.permute.xlu1 %729 }
 0x138   : > { %7167 = vst [vmem:[#allocation51_spill] sm:$0xff] %v4830_v45  ;;  %v4834_v12 = vpop.permute.xlu0 %727 }
 0x139   : > { %7168 = vst [vmem:[#allocation52_spill] sm:$0xff] %v4832_v20 }
 0x13a   : > { %7169 = vst [vmem:[#allocation53_spill] sm:$0xff] %v4834_v12 }
 0x13d   : > { %1087 = vrot.lane.b32.xlu2 %v1079_v54, %s4318_s19  ;;  %1085 = vrot.lane.b32.xlu1 %v1078_v42, %s4318_s19 }
 0x13e   : > { %1083 = vrot.lane.b32.xlu0 %v1077_v9, %s4318_s19  ;;  %s3834_s19 = sld [smem:[#allocation2 + $0x6]] }
 0x13f   : > { %v4842_v36 = vpop.permute.xlu2 %827  ;;  %v4844_v49 = vpop.permute.xlu1 %749 }
 0x140   : > { %7170 = vst [vmem:[#allocation54_spill] sm:$0xff] %v4842_v36  ;;  %v4846_v62 = vpop.permute.xlu0 %747 }
 0x141   : > { %7171 = vst [vmem:[#allocation55_spill] sm:$0xff] %v4844_v49 }
 0x142   : > { %7172 = vst [vmem:[#allocation56_spill] sm:$0xff] %v4846_v62 }
 0x147   : > { %v4848_v6 = vpop.permute.xlu2 %847  ;;  %v4850_v12 = vpop.permute.xlu1 %777 }
 0x148   : > { %7173 = vst [vmem:[#allocation57_spill] sm:$0xff] %v4848_v6  ;;  %v4852_v38 = vpop.permute.xlu0 %775 }
 0x149   : > { %7174 = vst [vmem:[#allocation58_spill] sm:$0xff] %v4850_v12  ;;  %v328_v12 = vstv %s3834_s19  ;;  %s5063_s19 = sld [smem:[#allocation5]] }
 0x14a   : > { %7175 = vst [vmem:[#allocation59_spill] sm:$0xff] %v4852_v38 }
 0x14f   : > { %v4854_v32 = vpop.permute.xlu2 %875  ;;  %v4856_v55 = vpop.permute.xlu1 %797 }
 0x150   : > { %7176 = vst [vmem:[#allocation60_spill] sm:$0xff] %v4854_v32  ;;  %v4858_v54 = vpop.permute.xlu0 %795 }
 0x151   : > { %7177 = vst [vmem:[#allocation61_spill] sm:$0xff] %v4856_v55 }
 0x152   : > { %7178 = vst [vmem:[#allocation62_spill] sm:$0xff] %v4858_v54 }
 0x157   : > { %v4860_v42 = vpop.permute.xlu2 %895  ;;  %v4862_v9 = vpop.permute.xlu1 %825 }
 0x158   : > { %7179 = vst [vmem:[#allocation63_spill] sm:$0xff] %v4860_v42  ;;  %v4864_v37 = vpop.permute.xlu0 %823  ;;  %v331_v42 = vmul.f32 %v328_v12, %v4444_v11 }
 0x159   : > { %7180 = vst [vmem:[#allocation64_spill] sm:$0xff] %v4862_v9  ;;  %v280_v9 = vstv %s3831_s17  ;;  %s5034_s17 = sld [smem:[#allocation2 + $0x2d]] }
 0x15a   : > { %7181 = vst [vmem:[#allocation65_spill] sm:$0xff] %v4864_v37  ;;  %v232_v37 = vstv %s231_s27  ;;  %v282_v45 = vmul.f32 %v280_v9, %v4423_v1  ;;  %v281_v29 = vmul.f32 %v280_v9, %v4426_v2  ;;  %s3883_s27 = sld [smem:[#allocation2 + $0x37]] }
 0x15f   : > { %v4866_v36 = vpop.permute.xlu2 %923  ;;  %v4868_v62 = vpop.permute.xlu1 %845 }
 0x160   : > { %7182 = vst [vmem:[#allocation66_spill] sm:$0xff] %v4866_v36  ;;  %v4870_v6 = vpop.permute.xlu0 %843 }
 0x161   : > { %7183 = vst [vmem:[#allocation67_spill] sm:$0xff] %v4868_v62  ;;  %v283_v62 = vmul.f32 %v280_v9, %v4444_v11  ;;  %v234_v11 = vmul.f32 %v232_v37, %v4426_v2 }
 0x162   : > { %7184 = vst [vmem:[#allocation68_spill] sm:$0xff] %v4870_v6  ;;  %v235_v6 = vmul.f32 %v232_v37, %v4423_v1 }
 0x163   : > { %v306_v49 = vadd.f32 %v4546_v10, %v283_v62  ;;  %v305_v62 = vadd.f32 %v4580_v34, %v282_v45  ;;  %v426_v34 = vmul.f32 %v4471_v28, %v424_v48 }
 0x164   : > { %v258_v20 = vadd.f32 %v4554_v16, %v235_v6  ;;  %v427_v6 = vmul.f32 %v4492_v39, %v424_v48 }
 0x165   : > { %v326_v16 = vadd.f32 %v4556_v17, %v306_v49 }
 0x166   : > { %v278_v10 = vadd.f32 %v4535_v3, %v258_v20  ;;  %v325_v3 = vadd.f32 %v4598_v44, %v305_v62  ;;  %v520_v20 = vstv %s3846_s4  ;;  %v568_v62 = vstv %s4892_s6  ;;  %s3886_s4 = sld [smem:[#allocation2 + $0x3a]] }
 0x167   : > { %v4872_v38 = vpop.permute.xlu2 %943  ;;  %v4874_v55 = vpop.permute.xlu1 %873  ;;  %s3887_s6 = sld [smem:[#allocation2 + $0x3b]] }
 0x168   : > { %7185 = vst [vmem:[#allocation69_spill] sm:$0xff] %v4872_v38  ;;  %v4876_v54 = vpop.permute.xlu0 %871 }
 0x169   : > { %7186 = vst [vmem:[#allocation70_spill] sm:$0xff] %v4874_v55  ;;  %v376_v55 = vstv %s3837_s28  ;;  %s4319_s28 = smov 125  }
 0x16a   : > { %7187 = vst [vmem:[#allocation71_spill] sm:$0xff] %v4876_v54  ;;  %v354_v54 = vadd.f32 %v4566_v23, %v331_v42  ;;  %v379_v23 = vmul.f32 %v4471_v28, %v376_v55  ;;  %v475_v42 = vmul.f32 %v4492_v39, %v472_v40  ;;  %v378_v17 = vmul.f32 %v4474_v30, %v376_v55 }
 0x16c   : > { %v382_v9 = vadd.f32 %v379_v23, %v278_v10 }
 0x16f   : > { %v4881_v32 = vpop.permute.xlu2 %971  ;;  %v4883_v36 = vpop.permute.xlu1 %893 }
 0x170   : > { %7188 = vst [vmem:[#allocation72_spill] sm:$0xff] %v4881_v32  ;;  %v4885_v38 = vpop.permute.xlu0 %891  ;;  %v233_v32 = vmul.f32 %v232_v37, %v4429_v4  ;;  %v377_v4 = vmul.f32 %v4477_v31, %v376_v55  ;;  %v425_v31 = vmul.f32 %v4474_v30, %v424_v48  ;;  %v329_v48 = vmul.f32 %v328_v12, %v4426_v2 }
 0x171   : > { %7189 = vst [vmem:[#allocation73_spill] sm:$0xff] %v4883_v36  ;;  %v257_v36 = vadd.f32 %v4570_v25, %v234_v11  ;;  %v330_v25 = vmul.f32 %v328_v12, %v4423_v1  ;;  %v430_v11 = vadd.f32 %v427_v6, %v326_v16  ;;  %v402_v1 = vadd.f32 %v4596_v43, %v382_v9 }
 0x172   : > { %7190 = vst [vmem:[#allocation74_spill] sm:$0xff] %v4885_v38  ;;  %v374_v38 = vadd.f32 %v4578_v33, %v354_v54  ;;  %v256_v54 = vadd.f32 %v4558_v18, %v233_v32  ;;  %v4918_v18 = vstv %s3852_s5  ;;  %v304_v32 = vadd.f32 %v4582_v35, %v281_v29  ;;  %s4321_s5 = smov 114  }
 0x173   : > { %v277_v44 = vadd.f32 %v4524_v59, %v257_v36  ;;  %v523_v35 = vmul.f32 %v4519_v56, %v520_v20  ;;  %v422_v29 = vadd.f32 %v4611_v51, %v402_v1  ;;  %v353_v16 = vadd.f32 %v4613_v52, %v330_v25 }
 0x174   : > { %v478_v45 = vadd.f32 %v475_v42, %v374_v38  ;;  %v276_v49 = vadd.f32 %v4568_v24, %v256_v54  ;;  %v450_v24 = vadd.f32 %v4626_v63, %v430_v11  ;;  %v429_v38 = vadd.f32 %v426_v34, %v325_v3  ;;  %v7191_v11 = vld [vmem:[#allocation14_spill] sm:$0xff] }
 0x175   : > { %v324_v23 = vadd.f32 %v4603_v46, %v304_v32  ;;  %v571_v63 = vmul.f32 %v4544_v8, %v568_v62  ;;  %v381_v12 = vadd.f32 %v378_v17, %v277_v44  ;;  %v474_v42 = vmul.f32 %v4471_v28, %v472_v40  ;;  %v7192_v32 = vld [vmem:[#allocation15_spill] sm:$0xff] }
 0x176   : > { %v498_v55 = vadd.f32 %v4650_v26, %v478_v45  ;;  %v619_v26 = vmul.f32 %v4544_v8, %v4918_v18  ;;  %v470_v43 = vadd.f32 %v4638_v13, %v450_v24  ;;  %v449_v2 = vadd.f32 %v4664_v47, %v429_v38 }
 0x177   : > { %v4905_v37 = vpop.permute.xlu2 %991  ;;  %v4907_v33 = vpop.permute.xlu1 %921  ;;  %v380_v36 = vadd.f32 %v377_v4, %v276_v49  ;;  %v473_v46 = vmul.f32 %v4474_v30, %v472_v40  ;;  %v522_v13 = vmul.f32 %v4522_v58, %v520_v20  ;;  %v570_v8 = vmul.f32 %v4519_v56, %v568_v62 }
 0x178   : > { %v4913_v39 = vpop.permute.xlu0 %919  ;;  %v518_v59 = vadd.f32 %v4662_v41, %v498_v55  ;;  %v469_v51 = vadd.f32 %v4682_v7, %v449_v2  ;;  %v352_v28 = vadd.f32 %v4615_v53, %v329_v48  ;;  %v428_v6 = vadd.f32 %v425_v31, %v324_v23  ;;  %v7194_v48 = vld [vmem:[#allocation35_spill] sm:$0xff]  ;;  %v7195_v23 = vld [vmem:[#allocation18_spill] sm:$0xff] }
 0x179   : > { %v521_v30 = vmul.f32 %v4527_v60, %v520_v20  ;;  %v373_v4 = vadd.f32 %v4628_v0, %v353_v16  ;;  %v526_v54 = vadd.f32 %v523_v35, %v422_v29  ;;  %v574_v52 = vadd.f32 %v571_v63, %v470_v43  ;;  %v7196_v35 = vld [vmem:[#allocation20_spill] sm:$0xff]  ;;  %v7197_v2 = vld [vmem:[#allocation22_spill] sm:$0xff] }
 0x17a   : > { %v622_v40 = vadd.f32 %v619_v26, %v518_v59  ;;  %v4958_v3 = vstv %s4920_s7  ;;  %v372_v7 = vadd.f32 %v4630_v5, %v352_v28  ;;  %v401_v17 = vadd.f32 %v4640_v14, %v381_v12  ;;  %v7198_v12 = vld [vmem:[#allocation23_spill] sm:$0xff]  ;;  %v7200_v16 = vld [vmem:[#allocation48_spill] sm:$0xff]  ;;  %s5164_s7 = sld [smem:[#allocation2 + $0x3e]] }
 0x17b   : > { %v712_v53 = vstv %s4926_s8  ;;  %v594_v60 = vadd.f32 %v4710_v19, %v574_v52  ;;  %v573_v25 = vadd.f32 %v570_v8, %v469_v51  ;;  %v569_v0 = vmul.f32 %v4522_v58, %v568_v62  ;;  %s3892_s8 = sld [smem:[#allocation2 + $0x40]] }
 0x17c   : > { %v642_v34 = vadd.f32 %v4734_v22, %v622_v40  ;;  %v664_v45 = vstv %s4931_s9  ;;  %v400_v31 = vadd.f32 %v4642_v15, %v380_v36  ;;  %v421_v20 = vadd.f32 %v4652_v27, %v401_v17  ;;  %v7193_v15 = vld [vmem:[#allocation11_spill] sm:$0xff]  ;;  %v7204_v17 = vld [vmem:[#allocation12_spill] sm:$0xff]  ;;  %s3889_s9 = sld [smem:[#allocation2 + $0x3d]] }
 0x17d   : > { %v763_v5 = vmul.f32 %v4624_v61, %v4958_v3  ;;  %v477_v14 = vadd.f32 %v474_v42, %v373_v4  ;;  %v614_v22 = vadd.f32 %v4722_v50, %v594_v60  ;;  %v593_v9 = vadd.f32 %v4748_v57, %v573_v25  ;;  %v7203_v4 = vld [vmem:[#allocation42_spill] sm:$0xff]  ;;  %v7205_v60 = vld [vmem:[#allocation51_spill] sm:$0xff] }
 0x17e   : > { %v662_v49 = vadd.f32 %v4746_v21, %v642_v34  ;;  %v715_v19 = vmul.f32 %v4624_v61, %v712_v53  ;;  %v420_v44 = vadd.f32 %v7191_v11, %v400_v31  ;;  %v448_v55 = vadd.f32 %v7192_v32, %v428_v6  ;;  %v7202_v6 = vld [vmem:[#allocation26_spill] sm:$0xff]  ;;  %v7210_v11 = vld [vmem:[#allocation31_spill] sm:$0xff] }
 0x17f   : > { %v4944_v41 = vpop.permute.xlu2 %1019  ;;  %v4946_v10 = vpop.permute.xlu1 %941  ;;  %v476_v62 = vadd.f32 %v473_v46, %v372_v7  ;;  %v667_v1 = vmul.f32 %v7193_v15, %v664_v45  ;;  %v613_v50 = vadd.f32 %v7194_v48, %v593_v9  ;;  %v618_v57 = vmul.f32 %v4519_v56, %v4918_v18 }
 0x180   : > { %v4952_v47 = vpop.permute.xlu0 %939  ;;  %v617_v61 = vmul.f32 %v4522_v58, %v4918_v18  ;;  %v714_v24 = vmul.f32 %v7193_v15, %v712_v53  ;;  %v546_v59 = vadd.f32 %v7195_v23, %v526_v54  ;;  %v468_v26 = vadd.f32 %v7196_v35, %v448_v55  ;;  %v7199_v58 = vld [vmem:[#allocation21_spill] sm:$0xff] }
 0x181   : > { %v525_v29 = vadd.f32 %v522_v13, %v421_v20  ;;  %v766_v43 = vadd.f32 %v763_v5, %v662_v49  ;;  %v497_v63 = vadd.f32 %v7197_v2, %v477_v14  ;;  %v496_v36 = vadd.f32 %v7198_v12, %v476_v62  ;;  %v7201_v13 = vld [vmem:[#allocation25_spill] sm:$0xff] }
 0x182   : > { %v718_v42 = vadd.f32 %v715_v19, %v614_v22  ;;  %v5001_v56 = vstv %s4960_s10  ;;  %v566_v18 = vadd.f32 %v7199_v58, %v546_v59  ;;  %v524_v46 = vadd.f32 %v521_v30, %v420_v44  ;;  %v7206_v30 = vld [vmem:[#allocation24_spill] sm:$0xff]  ;;  %v7207_v20 = vld [vmem:[#allocation45_spill] sm:$0xff]  ;;  %s3893_s10 = sld [smem:[#allocation2 + $0x41]] }
 0x183   : > { %v786_v51 = vadd.f32 %v7200_v16, %v766_v43  ;;  %v5008_v8 = vstv %s4966_s20  ;;  %v517_v28 = vadd.f32 %v7201_v13, %v497_v63  ;;  %v516_v40 = vadd.f32 %v7202_v6, %v496_v36  ;;  %v7208_v5 = vld [vmem:[#allocation13_spill] sm:$0xff]  ;;  %v7209_v22 = vld [vmem:[#allocation52_spill] sm:$0xff]  ;;  %v7214_v43 = vld [vmem:[#allocation34_spill] sm:$0xff]  ;;  %s3895_s20 = sld [smem:[#allocation2 + $0x43]] }
 0x184   : > { %v738_v54 = vadd.f32 %v7203_v4, %v718_v42  ;;  %v717_v52 = vadd.f32 %v714_v24, %v613_v50  ;;  %v572_v7 = vadd.f32 %v569_v0, %v468_v26  ;;  %v666_v34 = vmul.f32 %v7204_v17, %v664_v45  ;;  %v7211_v24 = vld [vmem:[#allocation55_spill] sm:$0xff]  ;;  %v7215_v63 = vld [vmem:[#allocation37_spill] sm:$0xff]  ;;  %v7218_v13 = vld [vmem:[#allocation38_spill] sm:$0xff] }
 0x185   : > { %v806_v25 = vadd.f32 %v7205_v60, %v786_v51  ;;  %v907_v31 = vmul.f32 %v7206_v30, %v5001_v56  ;;  %v665_v14 = vmul.f32 %v7208_v5, %v664_v45  ;;  %v859_v19 = vmul.f32 %v7206_v30, %v5008_v8  ;;  %v7212_v45 = vld [vmem:[#allocation16_spill] sm:$0xff]  ;;  %v7217_v16 = vld [vmem:[#allocation29_spill] sm:$0xff]  ;;  %v7219_v6 = vld [vmem:[#allocation66_spill] sm:$0xff] }
 0x186   : > { %v758_v49 = vadd.f32 %v7207_v20, %v738_v54  ;;  %v737_v9 = vadd.f32 %v7209_v22, %v717_v52  ;;  %v592_v44 = vadd.f32 %v7210_v11, %v572_v7  ;;  %v670_v32 = vadd.f32 %v667_v1, %v566_v18  ;;  %v7213_v1 = vld [vmem:[#allocation27_spill] sm:$0xff]  ;;  %v7220_v4 = vld [vmem:[#allocation30_spill] sm:$0xff]  ;;  %v7221_v7 = vld [vmem:[#allocation60_spill] sm:$0xff] }
 0x187   : > { %v4984_v27 = vpop.permute.xlu2 %1039  ;;  %v4986_v21 = vpop.permute.xlu1 %969  ;;  %v713_v0 = vmul.f32 %v7204_v17, %v712_v53  ;;  %v5027_v55 = vstv %s4982_s24  ;;  %v621_v48 = vadd.f32 %v618_v57, %v517_v28  ;;  %v620_v50 = vadd.f32 %v617_v61, %v516_v40  ;;  %v7216_v57 = vld [vmem:[#allocation28_spill] sm:$0xff]  ;;  %v7223_v20 = vld [vmem:[#allocation69_spill] sm:$0xff]  ;;  %v7226_v11 = vld [vmem:[#allocation63_spill] sm:$0xff]  ;;  %s3896_s24 = sld [smem:[#allocation2 + $0x44]] }
 0x188   : > { %v4994_v38 = vpop.permute.xlu0 %967  ;;  %v757_v23 = vadd.f32 %v7211_v24, %v737_v9  ;;  %v858_v59 = vmul.f32 %v7212_v45, %v5008_v8  ;;  %v545_v53 = vadd.f32 %v7213_v1, %v525_v29  ;;  %v690_v2 = vadd.f32 %v7214_v43, %v670_v32  ;;  %v7224_v5 = vld [vmem:[#allocation41_spill] sm:$0xff]  ;;  %v7225_v9 = vld [vmem:[#allocation40_spill] sm:$0xff]  ;;  %v7227_v32 = vld [vmem:[#allocation70_spill] sm:$0xff] }
 0x189   : > { %v612_v12 = vadd.f32 %v7215_v63, %v592_v44  ;;  %v910_v36 = vadd.f32 %v907_v31, %v806_v25  ;;  %v544_v61 = vadd.f32 %v7216_v57, %v524_v46  ;;  %v811_v42 = vmul.f32 %v7212_v45, %v5027_v55  ;;  %v7222_v25 = vld [vmem:[#allocation39_spill] sm:$0xff]  ;;  %v7229_v1 = vld [vmem:[#allocation53_spill] sm:$0xff]  ;;  %v7232_v57 = vld [vmem:[#allocation32_spill] sm:$0xff] }
 0x18a   : > { %v862_v58 = vadd.f32 %v859_v19, %v758_v49  ;;  %v5045_v18 = vstv %s5003_s25  ;;  %v565_v51 = vadd.f32 %v7217_v16, %v545_v53  ;;  %v710_v28 = vadd.f32 %v7218_v13, %v690_v2  ;;  %v7230_v2 = vld [vmem:[#allocation44_spill] sm:$0xff]  ;;  %v7233_v16 = vld [vmem:[#allocation54_spill] sm:$0xff]  ;;  %s5206_s25 = sld [smem:[#allocation2 + $0x46]] }
 0x18b   : > { %v930_v40 = vadd.f32 %v7219_v6, %v910_v36  ;;  %v1000_v29 = vstv %s5010_s26  ;;  %v564_v54 = vadd.f32 %v7220_v4, %v544_v61  ;;  %v762_v52 = vmul.f32 %v7193_v15, %v4958_v3  ;;  %v7234_v6 = vld [vmem:[#allocation56_spill] sm:$0xff]  ;;  %v7235_v4 = vld [vmem:[#allocation17_spill] sm:$0xff]  ;;  %s3901_s26 = sld [smem:[#allocation2 + $0x49]] }
 0x18c   : > { %v882_v46 = vadd.f32 %v7221_v7, %v862_v58  ;;  %v861_v60 = vadd.f32 %v858_v59, %v757_v23  ;;  %v641_v30 = vadd.f32 %v7222_v25, %v621_v48  ;;  %v716_v31 = vadd.f32 %v713_v0, %v612_v12  ;;  %v7228_v23 = vld [vmem:[#allocation43_spill] sm:$0xff]  ;;  %v7231_v12 = vld [vmem:[#allocation73_spill] sm:$0xff] }
 0x18d   : > { %v950_v49 = vadd.f32 %v7223_v20, %v930_v40  ;;  %v1051_v22 = vmul.f32 %v7224_v5, %v5045_v18  ;;  %v640_v19 = vadd.f32 %v7225_v9, %v620_v50  ;;  %v1003_v15 = vmul.f32 %v7224_v5, %v1000_v29 }
 0x18e   : > { %v902_v44 = vadd.f32 %v7226_v11, %v882_v46  ;;  %v881_v24 = vadd.f32 %v7227_v32, %v861_v60  ;;  %v661_v59 = vadd.f32 %v7228_v23, %v641_v30  ;;  %v736_v48 = vadd.f32 %v7229_v1, %v716_v31  ;;  %v7236_v46 = vld [vmem:[#allocation57_spill] sm:$0xff] }
 0x18f   : > { %v5029_v62 = vpop.permute.xlu1 %989  ;;  %v1068_v35 = vpop.permute.xlu2 %1067  ;;  %v814_v0 = vadd.f32 %v811_v42, %v710_v28  ;;  %v761_v53 = vmul.f32 %v7204_v17, %v4958_v3  ;;  %v660_v63 = vadd.f32 %v7230_v2, %v640_v19  ;;  %v5071_v50 = vstv %s5034_s17  ;;  %v7237_v19 = vld [vmem:[#allocation46_spill] sm:$0xff]  ;;  %s3902_s17 = sld [smem:[#allocation2 + $0x4a]] }
 0x190   : > { %v5036_v26 = vpop.permute.xlu0 %987  ;;  %v901_v36 = vadd.f32 %v7231_v12, %v881_v24  ;;  %v1002_v61 = vmul.f32 %v7232_v57, %v1000_v29  ;;  %v756_v40 = vadd.f32 %v7234_v6, %v736_v48  ;;  %v857_v42 = vmul.f32 %v7235_v4, %v5008_v8  ;;  %v7242_v48 = vld [vmem:[#allocation71_spill] sm:$0xff]  ;;  %v7244_v12 = vld [vmem:[#allocation72_spill] sm:$0xff]  ;;  %v7246_v6 = vld [vmem:[#allocation33_spill] sm:$0xff] }
 0x191   : > { %v834_v13 = vadd.f32 %v7233_v16, %v814_v0  ;;  %v1054_v28 = vadd.f32 %v1051_v22, %v950_v49  ;;  %v1006_v7 = vadd.f32 %v1003_v15, %v902_v44  ;;  %v669_v17 = vadd.f32 %v666_v34, %v565_v51  ;;  %v7238_v22 = vld [vmem:[#allocation58_spill] sm:$0xff]  ;;  %v7239_v15 = vld [vmem:[#allocation47_spill] sm:$0xff] }
 0x192   : > { %v955_v25 = vmul.f32 %v7232_v57, %v5071_v50  ;;  %v668_v31 = vadd.f32 %v665_v14, %v564_v54  ;;  %v765_v20 = vadd.f32 %v762_v52, %v661_v59  ;;  %v1005_v9 = vadd.f32 %v1002_v61, %v901_v36  ;;  %v7241_v59 = vld [vmem:[#allocation61_spill] sm:$0xff] }
 0x193   : > { %v854_v60 = vadd.f32 %v7236_v46, %v834_v13  ;;  %v1074_v30 = vadd.f32 %v1068_v35, %v1054_v28  ;;  %v1026_v5 = vadd.f32 %v4944_v41, %v1006_v7  ;;  %v689_v11 = vadd.f32 %v7237_v19, %v669_v17  ;;  %v7240_v35 = vld [vmem:[#allocation59_spill] sm:$0xff]  ;;  %v7247_v28 = vld [vmem:[#allocation49_spill] sm:$0xff]  ;;  %v7248_v17 = vld [vmem:[#allocation50_spill] sm:$0xff] }
 0x194   : > { %v764_v32 = vadd.f32 %v761_v53, %v660_v63  ;;  %v860_v8 = vadd.f32 %v857_v42, %v756_v40  ;;  %v785_v44 = vadd.f32 %v7238_v22, %v765_v20  ;;  %v5087_v51 = vstv %s5063_s19  ;;  %s188_s19 = sand.u32 1, %s4305_s13  }
 0x195   : > { %v1046_v34 = vadd.f32 %v4984_v27, %v1026_v5  ;;  %v688_v23 = vadd.f32 %v7239_v15, %v668_v31  ;;  %v958_v54 = vadd.f32 %v955_v25, %v854_v60  ;;  %v906_v41 = vmul.f32 %v7212_v45, %v5001_v56  ;;  %v7245_v45 = vld [vmem:[#allocation74_spill] sm:$0xff]  ;;  %v7249_v60 = vld [vmem:[#allocation19_spill] sm:$0xff] }
 0x196   : > { %v784_v14 = vadd.f32 %v7240_v35, %v764_v32  ;;  %v805_v1 = vadd.f32 %v7241_v59, %v785_v44  ;;  %v880_v0 = vadd.f32 %v7242_v48, %v860_v8  ;;  %v905_v53 = vmul.f32 %v7235_v4, %v5001_v56  ;;  %v7251_v35 = vld [vmem:[#allocation65_spill] sm:$0xff] }
 0x197   : > { %v1018_v43 = vpop.permute.xlu1 %1017  ;;  %v1088_v3 = vpop.permute.xlu2 %1087  ;;  %v978_v36 = vadd.f32 %v7244_v12, %v958_v54  ;;  %v1102_v13 = vrot.slane %v1046_v34, 6  ;;  %v1001_v40 = vmul.f32 %v7246_v6, %v1000_v29  ;;  %v709_v56 = vadd.f32 %v7247_v28, %v689_v11  ;;  %v7250_v34 = vld [vmem:[#allocation64_spill] sm:$0xff]  ;;  %v7252_v54 = vld [vmem:[#allocation67_spill] sm:$0xff] }
 0x198   : > { %v1016_v58 = vpop.permute.xlu0 %1015  ;;  %v1094_v49 = vadd.f32 %v1088_v3, %v1074_v30  ;;  %v1025_v24 = vadd.f32 %v1018_v43, %v1005_v9  ;;  %v7243_v43 = vld [vmem:[#allocation62_spill] sm:$0xff]  ;;  %v900_v16 = vadd.f32 %v7245_v45, %v880_v0  ;;  %v810_v7 = vmul.f32 %v7235_v4, %v5027_v55 }
 0x199   : > { %v804_v63 = vadd.f32 %v7243_v43, %v784_v14  ;;  %v998_v3 = vadd.f32 %v4905_v37, %v978_v36  ;;  %v708_v46 = vadd.f32 %v7248_v17, %v688_v23  ;;  %v809_v25 = vmul.f32 %v7249_v60, %v5027_v55  ;;  %v5134_v43 = vld [vmem:[%s4420_s11 + $0x10] sm:$0xff] }
 0x19a   : > { %v5102_v61 = vadd.f32 %v5087_v51, %v1094_v49  ;;  %v909_v30 = vadd.f32 %v906_v41, %v805_v1  ;;  %v1004_v19 = vadd.f32 %v1001_v40, %v900_v16  ;;  %v813_v11 = vadd.f32 %v810_v7, %v709_v56 }
 0x19b   : > { %v908_v20 = vadd.f32 %v905_v53, %v804_v63  ;;  %v812_v8 = vadd.f32 %v809_v25, %v708_v46  ;;  %v1050_v22 = vmul.f32 %v7232_v57, %v5045_v18  ;;  %v7253_v57 = vld [vmem:[#allocation68_spill] sm:$0xff] }
 0x19c   : > { %v1122_v29 = vrot.slane %v5102_v61, 4  ;;  %v929_v9 = vadd.f32 %v4907_v33, %v909_v30  ;;  %v1024_v55 = vadd.f32 %v1016_v58, %v1004_v19  ;;  %v1049_v33 = vmul.f32 %v7246_v6, %v5045_v18 }
 0x19d   : > { %v928_v4 = vadd.f32 %v4913_v39, %v908_v20  ;;  %v832_v39 = vadd.f32 %v7251_v35, %v812_v8  ;;  %v1160_v18 = vstv %s3883_s27  ;;  %v1268_v8 = vstv %s5164_s7  ;;  %s3802_s27 = sshll.u32 %s188_s19, 6  ;;  %s5256_s7 = sld [smem:[#allocation2 + $0x4f]] }
 0x19e   : > { %v949_v49 = vadd.f32 %v4946_v10, %v929_v9  ;;  %v954_v10 = vmul.f32 %v7246_v6, %v5071_v50  ;;  %v1163_v63 = vmul.f32 %v5134_v43, %v1160_v18  ;;  %v5158_v9 = vld [vmem:[%s4420_s11] sm:$0xff]  ;;  %v1310_v35 = vstv %s3893_s10  ;;  %s3911_s10 = sld [smem:[#allocation2 + $0x53]] }
 0x19f   : > { %v1038_v52 = vpop.permute.xlu1 %1037  ;;  %v948_v15 = vadd.f32 %v4952_v47, %v928_v4  ;;  %v852_v58 = vadd.f32 %v7253_v57, %v832_v39  ;;  %v7254_v47 = vld [vmem:[#allocation36_spill] sm:$0xff]  ;;  %v1161_v19 = vmul.f32 %v5158_v9, %v1160_v18 }
 0x1a0   : > { %v5097_v27 = vadd.f32 %v1038_v52, %v1025_v24  ;;  %v1036_v2 = vpop.permute.xlu0 %1035  ;;  %v833_v24 = vadd.f32 %v7250_v34, %v813_v11  ;;  %v953_v52 = vmul.f32 %v7254_v47, %v5071_v50  ;;  %v1053_v59 = vadd.f32 %v1050_v22, %v949_v49 }
 0x1a1   : > { %v1044_v14 = vadd.f32 %v1036_v2, %v1024_v55  ;;  %v1052_v1 = vadd.f32 %v1049_v33, %v948_v15  ;;  %v1228_v11 = vstv %s3887_s6  ;;  %v1269_v55 = vmul.f32 %v5134_v43, %v1268_v8  ;;  %s3905_s6 = sld [smem:[#allocation2 + $0x4d]] }
 0x1a2   : > { %v1100_v42 = vrot.slane %v5097_v27, 6  ;;  %v853_v41 = vadd.f32 %v7252_v54, %v833_v24  ;;  %v956_v12 = vadd.f32 %v953_v52, %v852_v58  ;;  %v1230_v34 = vmul.f32 %v5134_v43, %v1228_v11  ;;  %v5181_v24 = vld [vmem:[%s4420_s11 + $0x30] sm:$0xff]  ;;  %v5199_v58 = vld [vmem:[%s4420_s11 + $0x38] sm:$0xff] }
 0x1a3   : > { %v1099_v48 = vrot.slane %v1044_v14, 6  ;;  %v1312_v14 = vmul.f32 %v5181_v24, %v1310_v35 }
 0x1a4   : > { %v1103_v31 = vsel %vm1098_vm0, %v1100_v42, %v1102_v13  ;;  %v957_v53 = vadd.f32 %v954_v10, %v853_v41  ;;  %v976_v50 = vadd.f32 %v4994_v38, %v956_v12  ;;  %v1338_v41 = vstv %s3895_s20  ;;  %v5195_v10 = vld [vmem:[%s4420_s11 + $0x28] sm:$0xff]  ;;  %s3913_s20 = sld [smem:[#allocation2 + $0x55]] }
 0x1a5   : > { %v1109_v5 = vadd.f32 %v1103_v31, %v998_v3  ;;  %v1101_v13 = vsel %vm1098_vm0, %v1099_v48, %v1100_v42  ;;  %v1180_v3 = vstv %s3884_s29  ;;  %v5150_v31 = vld [vmem:[%s4420_s11 + $0x8] sm:$0xff]  ;;  %v1340_v47 = vmul.f32 %v5199_v58, %v1338_v41  ;;  %s3904_s29 = sld [smem:[#allocation2 + $0x4c]] }
 0x1a6   : > { %v977_v45 = vadd.f32 %v4986_v21, %v957_v53  ;;  %v996_v56 = vadd.f32 %v5036_v26, %v976_v50  ;;  %v1208_v26 = vstv %s3886_s4  ;;  %v1162_v20 = vmul.f32 %v5150_v31, %v1160_v18  ;;  %s5236_s4 = scalar_lea.vmem [#allocation7], %s3802_s27  ;;  %s3920_s27 = sld [smem:[#allocation2 + $0x5c]] }
 0x1a7   : > { %v1066_v37 = vpop.permute.xlu1 %1065  ;;  %v1129_v32 = vadd.f32 %v1122_v29, %v1109_v5  ;;  %v1182_v4 = vmul.f32 %v5150_v31, %v1180_v3  ;;  %v1210_v49 = vmul.f32 %v5134_v43, %v1208_v26  ;;  %v1209_v22 = vmul.f32 %v5150_v31, %v1208_v26 }
 0x1a8   : > { %v1064_v44 = vpop.permute.xlu0 %1063  ;;  %v1073_v0 = vadd.f32 %v1066_v37, %v1053_v59  ;;  %v997_v40 = vadd.f32 %v5029_v62, %v977_v45  ;;  %v1107_v17 = vadd.f32 %v1099_v48, %v996_v56  ;;  %v1229_v33 = vmul.f32 %v5150_v31, %v1228_v11 }
 0x1a9   : > { %v1132_v23 = vmax.f32 %v1129_v32, 0.0  ;;  %v1072_v27 = vadd.f32 %v1064_v44, %v1052_v1  ;;  %v1181_v32 = vmul.f32 %v5158_v9, %v1180_v3  ;;  %v1290_v44 = vstv %s3892_s8  ;;  %s5270_s8 = sld [smem:[#allocation2 + $0x50]] }
 0x1aa   : > { %v1108_v38 = vadd.f32 %v1101_v13, %v997_v40  ;;  %v1292_v15 = vmul.f32 %v5181_v24, %v1290_v44  ;;  %v1291_v57 = vmul.f32 %v5195_v10, %v1290_v44  ;;  %v1358_v59 = vstv %s3896_s24  ;;  %s3914_s24 = sld [smem:[#allocation2 + $0x56]] }
 0x1ab   : > { %1140 = vrot.lane.b32.xlu2 %v1132_v23, %s4319_s28  ;;  %v1254_v23 = vstv %s3889_s9  ;;  %v1311_v18 = vmul.f32 %v5195_v10, %v1310_v35  ;;  %v1360_v1 = vmul.f32 %v5199_v58, %v1358_v59  ;;  %v1293_v48 = vmul.f32 %v5199_v58, %v1290_v44  ;;  %s3910_s9 = sld [smem:[#allocation2 + $0x52]] }
 0x1ac   : > { %v1255_v54 = vmul.f32 %v5134_v43, %v1254_v23  ;;  %v1339_v53 = vmul.f32 %v5181_v24, %v1338_v41  ;;  %v1420_v12 = vstv %s3901_s26  ;;  %v1440_v50 = vstv %s3902_s17  ;;  %s3919_s26 = sld [smem:[#allocation2 + $0x5b]] }
 0x1ad   : > { %s3916_s17 = sld [smem:[#allocation2 + $0x58]] }
 0x1af   : > { %v1086_v2 = vpop.permute.xlu1 %1085 }
 0x1b0   : > { %v1093_v36 = vadd.f32 %v1086_v2, %v1073_v0  ;;  %v1084_v61 = vpop.permute.xlu0 %1083  ;;  %v1384_v0 = vstv %s5206_s25  ;;  %s5339_s25 = sld [smem:[#allocation2 + $0x59]] }
 0x1b1   : > { %v1092_v16 = vadd.f32 %v1084_v61, %v1072_v27  ;;  %v5217_v27 = vld [vmem:[%s4420_s11 + $0x40] sm:$0xff]  ;;  %v5227_v61 = vld [vmem:[%s4420_s11 + $0x50] sm:$0xff] }
 0x1b2   : > { %v1113_v6 = vadd.f32 %v5087_v51, %v1093_v36  ;;  %v1386_v2 = vmul.f32 %v5217_v27, %v1384_v0  ;;  %v1359_v36 = vmul.f32 %v5181_v24, %v1358_v59  ;;  %v1421_v45 = vmul.f32 %v5227_v61, %v1420_v12 }
 0x1b3   : > { %v1112_v28 = vadd.f32 %v5087_v51, %v1092_v16  ;;  %1171 = vrot.lane.b32.xlu2 %v1163_v63, %s4320_s30  ;;  %v1183_v51 = vmul.f32 %v5134_v43, %v1180_v3  ;;  %v1313_v63 = vmul.f32 %v5199_v58, %v1310_v35  ;;  %v1341_v16 = vmul.f32 %v5217_v27, %v1338_v41 }
 0x1b4   : > { %v1120_v7 = vrot.slane %v1113_v6, 4  ;;  %v1385_v6 = vmul.f32 %v5199_v58, %v1384_v0  ;;  %v1441_v40 = vmul.f32 %v5227_v61, %v1440_v50 }
 0x1b5   : > { %v1119_v21 = vrot.slane %v1112_v28, 4  ;;  %v1361_v28 = vmul.f32 %v5217_v27, %v1358_v59 }
 0x1b6   : > { %v1123_v42 = vsel %vm1118_vm1, %v1120_v7, %v1122_v29  ;;  %v5154_v29 = vld [vmem:[%s4420_s11 + $0x18] sm:$0xff] }
 0x1b7   : > { %v1128_v46 = vadd.f32 %v1123_v42, %v1108_v38  ;;  %v1121_v62 = vsel %vm1118_vm1, %v1119_v21, %v1120_v7  ;;  %v1211_v5 = vmul.f32 %v5154_v29, %v1208_v26  ;;  %v1231_v37 = vmul.f32 %v5154_v29, %v1228_v11  ;;  %v5249_v38 = vld [vmem:[%s4420_s11 + $0x58] sm:$0xff] }
 0x1b8   : > { %v1127_v60 = vadd.f32 %v1121_v62, %v1107_v17  ;;  %v1256_v39 = vmul.f32 %v5154_v29, %v1254_v23  ;;  %v1270_v52 = vmul.f32 %v5154_v29, %v1268_v8  ;;  %v1468_v7 = vstv %s3904_s29  ;;  %v5299_v23 = vld [vmem:[%s4420_s11 + $0x88] sm:$0xff]  ;;  %s3923_s29 = sld [smem:[#allocation2 + $0x5f]] }
 0x1b9   : > { %v1131_v25 = vmax.f32 %v1128_v46, 0.0  ;;  %v1469_v17 = vmul.f32 %v5249_v38, %v1468_v7  ;;  %v1488_v46 = vstv %s3905_s6  ;;  %v1514_v26 = vstv %s5256_s7  ;;  %7255 = vst [vmem:[#allocation14_spill] sm:$0xff] %v5299_v23  ;;  %s5411_s6 = sld [smem:[#allocation2 + $0x61]] }
 0x1ba   : > { %v1130_v30 = vmax.f32 %v1127_v60, 0.0  ;;  %v1442_v11 = vmul.f32 %v5249_v38, %v1440_v50  ;;  %s3928_s7 = sld [smem:[#allocation2 + $0x64]] }
 0x1bb   : > { %1138 = vrot.lane.b32.xlu1 %v1131_v25, %s4319_s28  ;;  %1191 = vrot.lane.b32.xlu2 %v1183_v51, %s4321_s5  ;;  %v5261_v51 = vld [vmem:[%s4420_s11 + $0x60] sm:$0xff]  ;;  %v1489_v25 = vmul.f32 %v5249_v38, %v1488_v46 }
 0x1bc   : > { %1136 = vrot.lane.b32.xlu0 %v1130_v30, %s4319_s28  ;;  %s3899_s28 = sld [smem:[#allocation2 + $0x47]]  ;;  %v1423_v60 = vmul.f32 %v5261_v51, %v1420_v12  ;;  %v1422_v30 = vmul.f32 %v5249_v38, %v1420_v12 }
 0x1c2   : > { %v1398_v56 = vstv %s3899_s28  ;;  %s3922_s28 = sld [smem:[#allocation2 + $0x5e]] }
 0x1c3   : > { %1169 = vrot.lane.b32.xlu1 %v1162_v20, %s4320_s30  ;;  %1219 = vrot.lane.b32.xlu2 %v1211_v5, %s4320_s30  ;;  %v1400_v21 = vmul.f32 %v5217_v27, %v1398_v56  ;;  %v1399_v42 = vmul.f32 %v5199_v58, %v1398_v56  ;;  %v1443_v5 = vmul.f32 %v5261_v51, %v1440_v50 }
 0x1c4   : > { %1167 = vrot.lane.b32.xlu0 %v1161_v19, %s4320_s30  ;;  %v1515_v19 = vmul.f32 %v5261_v51, %v1514_v26 }
 0x1cb   : > { %1189 = vrot.lane.b32.xlu1 %v1182_v4, %s4321_s5  ;;  %1239 = vrot.lane.b32.xlu2 %v1231_v37, %s4321_s5  ;;  %v1528_v4 = vstv %s5270_s8  ;;  %s3929_s8 = sld [smem:[#allocation2 + $0x65]] }
 0x1cc   : > { %1187 = vrot.lane.b32.xlu0 %v1181_v32, %s4321_s5  ;;  %v5284_v32 = vld [vmem:[%s4420_s11 + $0x68] sm:$0xff] }
 0x1cd   : > { %v1471_v8 = vmul.f32 %v5284_v32, %v1468_v7  ;;  %v1516_v59 = vmul.f32 %v5284_v32, %v1514_v26 }
 0x1d3   : > { %1217 = vrot.lane.b32.xlu1 %v1210_v49, %s4320_s30  ;;  %1273 = vrot.lane.b32.xlu2 %v1269_v55, %s4321_s5  ;;  %v1530_v49 = vmul.f32 %v5284_v32, %v1528_v4  ;;  %v1470_v55 = vmul.f32 %v5261_v51, %v1468_v7  ;;  %v1658_v7 = vstv %s5339_s25  ;;  %s3935_s25 = sld [smem:[#allocation2 + $0x6b]] }
 0x1d4   : > { %1215 = vrot.lane.b32.xlu0 %v1209_v22, %s4320_s30  ;;  %v1550_v22 = vstv %s3910_s9  ;;  %s3926_s9 = sld [smem:[#allocation2 + $0x62]] }
 0x1d5   : > { %v1553_v35 = vmul.f32 %v5299_v23, %v1550_v22 }
 0x1db   : > { %1237 = vrot.lane.b32.xlu1 %v1230_v34, %s4321_s5  ;;  %1299 = vrot.lane.b32.xlu2 %v1292_v15, %s4320_s30 }
 0x1dc   : > { %1235 = vrot.lane.b32.xlu0 %v1229_v33, %s4321_s5  ;;  %v1491_v33 = vmul.f32 %v5284_v32, %v1488_v46 }
 0x1e3   : > { %1261 = vrot.lane.b32.xlu1 %v1256_v39, %s4320_s30  ;;  %1319 = vrot.lane.b32.xlu2 %v1312_v14, %s4321_s5  ;;  %v1490_v39 = vmul.f32 %v5261_v51, %v1488_v46  ;;  %v1570_v14 = vstv %s3911_s10  ;;  %s3931_s10 = sld [smem:[#allocation2 + $0x67]] }
 0x1e4   : > { %1259 = vrot.lane.b32.xlu0 %v1255_v54, %s4320_s30 }
 0x1eb   : > { %1297 = vrot.lane.b32.xlu1 %v1291_v57, %s4320_s30  ;;  %1347 = vrot.lane.b32.xlu2 %v1340_v47, %s4320_s30  ;;  %v1529_v47 = vmul.f32 %v5261_v51, %v1528_v4  ;;  %v5374_v4 = vld [vmem:[%s4420_s11 + $0xa8] sm:$0xff] }
 0x1ec   : > { %1275 = vrot.lane.b32.xlu0 %v1270_v52, %s4321_s5  ;;  %v1573_v52 = vmul.f32 %v5299_v23, %v1570_v14  ;;  %7259 = vst [vmem:[#allocation18_spill] sm:$0xff] %v5374_v4 }
 0x1f3   : > { %1317 = vrot.lane.b32.xlu1 %v1311_v18, %s4321_s5  ;;  %1367 = vrot.lane.b32.xlu2 %v1360_v1, %s4321_s5  ;;  %v1598_v18 = vstv %s3913_s20  ;;  %s3932_s20 = sld [smem:[#allocation2 + $0x68]] }
 0x1f4   : > { %1301 = vrot.lane.b32.xlu0 %v1293_v48, %s4320_s30  ;;  %v1600_v46 = vmul.f32 %v5299_v23, %v1598_v18 }
 0x1fb   : > { %1345 = vrot.lane.b32.xlu1 %v1339_v53, %s4320_s30  ;;  %1391 = vrot.lane.b32.xlu2 %v1386_v2, %s4320_s30  ;;  %v5325_v53 = vld [vmem:[%s4420_s11 + $0x80] sm:$0xff] }
 0x1fc   : > { %1321 = vrot.lane.b32.xlu0 %v1313_v63, %s4321_s5  ;;  %v1552_v2 = vmul.f32 %v5325_v53, %v1550_v22  ;;  %v5329_v63 = vld [vmem:[%s4420_s11 + $0x90] sm:$0xff] }
 0x1fd   : > { %7257 = vst [vmem:[#allocation11_spill] sm:$0xff] %v5329_v63  ;;  %v1601_v12 = vmul.f32 %v5329_v63, %v1598_v18 }
 0x203   : > { %1365 = vrot.lane.b32.xlu1 %v1359_v36, %s4321_s5  ;;  %1427 = vrot.lane.b32.xlu2 %v1421_v45, %s4320_s30  ;;  %v5333_v36 = vld [vmem:[%s4420_s11 + $0x78] sm:$0xff] }
 0x204   : > { %1349 = vrot.lane.b32.xlu0 %v1341_v16, %s4320_s30  ;;  %7258 = vst [vmem:[#allocation35_spill] sm:$0xff] %v5333_v36  ;;  %v1551_v45 = vmul.f32 %v5333_v36, %v1550_v22  ;;  %v1618_v16 = vstv %s3914_s24  ;;  %v1571_v56 = vmul.f32 %v5333_v36, %v1570_v14  ;;  %v1700_v22 = vstv %s3920_s27  ;;  %s5481_s24 = sld [smem:[#allocation2 + $0x6a]] }
 0x205   : > { %v1141_v13 = vpop.permute.xlu2 %1140  ;;  %s3891_s27 = sld [smem:[#allocation2 + $0x3f]] }
 0x206   : > { %1150 = vst.msk [vmem:[%s5236_s4 + $0xd] sm:$0x7] %vm1149_vm2, %v1141_v13 }
 0x20b   : > { %1389 = vrot.lane.b32.xlu1 %v1385_v6, %s4320_s30  ;;  %1447 = vrot.lane.b32.xlu2 %v1441_v40, %s4321_s5  ;;  %v1572_v40 = vmul.f32 %v5325_v53, %v1570_v14 }
 0x20c   : > { %1369 = vrot.lane.b32.xlu0 %v1361_v28, %s4321_s5  ;;  %v1621_v28 = vmul.f32 %v5329_v63, %v1618_v16 }
 0x20d   : > { %v5245_v3 = vpop.permute.xlu2 %1171 }
 0x213   : > { %1405 = vrot.lane.b32.xlu1 %v1400_v21, %s4321_s5  ;;  %1475 = vrot.lane.b32.xlu2 %v1469_v17, %s4320_s30 }
 0x214   : > { %1403 = vrot.lane.b32.xlu0 %v1399_v42, %s4321_s5 }
 0x215   : > { %v5258_v62 = vpop.permute.xlu2 %1191 }
 0x21b   : > { %1431 = vrot.lane.b32.xlu1 %v1423_v60, %s4320_s30  ;;  %1495 = vrot.lane.b32.xlu2 %v1489_v25, %s4321_s5  ;;  %v1659_v60 = vmul.f32 %v5299_v23, %v1658_v7  ;;  %v1599_v25 = vmul.f32 %v5325_v53, %v1598_v18  ;;  %v5398_v18 = vld [vmem:[%s4420_s11 + $0xa0] sm:$0xff] }
 0x21c   : > { %1429 = vrot.lane.b32.xlu0 %v1422_v30, %s4320_s30  ;;  %v1680_v30 = vstv %s3919_s26  ;;  %7260 = vst [vmem:[#allocation20_spill] sm:$0xff] %v5398_v18  ;;  %s5578_s26 = sld [smem:[#allocation2 + $0x3c]] }
 0x21d   : > { %v5272_v20 = vpop.permute.xlu2 %1219 }
 0x223   : > { %1451 = vrot.lane.b32.xlu1 %v1443_v5, %s4321_s5  ;;  %1519 = vrot.lane.b32.xlu2 %v1515_v19, %s4320_s30 }
 0x224   : > { %1449 = vrot.lane.b32.xlu0 %v1442_v11, %s4321_s5  ;;  %v1620_v11 = vmul.f32 %v5299_v23, %v1618_v16 }
 0x225   : > { %v5281_v37 = vpop.permute.xlu2 %1239 }
 0x22b   : > { %1479 = vrot.lane.b32.xlu1 %v1471_v8, %s4320_s30  ;;  %1535 = vrot.lane.b32.xlu2 %v1530_v49, %s4321_s5  ;;  %v1682_v8 = vmul.f32 %v5374_v4, %v1680_v30  ;;  %v1619_v49 = vmul.f32 %v5325_v53, %v1618_v16  ;;  %v1660_v16 = vmul.f32 %v5329_v63, %v1658_v7 }
 0x22c   : > { %1477 = vrot.lane.b32.xlu0 %v1470_v55, %s4320_s30  ;;  %v1644_v55 = vstv %s3916_s17  ;;  %s3894_s17 = sld [smem:[#allocation2 + $0x42]] }
 0x22d   : > { %v1139_v44 = vpop.permute.xlu1 %1138  ;;  %v5292_v34 = vpop.permute.xlu2 %1273  ;;  %v1645_v14 = vmul.f32 %v5299_v23, %v1644_v55 }
 0x22e   : > { %1148 = vst.msk [vmem:[%s5236_s4 + $0x5] sm:$0xff] %vm1147_vm3, %v1139_v44  ;;  %v1137_v15 = vpop.permute.xlu0 %1136 }
 0x22f   : > { %1146 = vst.msk [vmem:[%s5236_s4 - $0x3] sm:$0xf8] %vm1145_vm4, %v1137_v15 }
 0x233   : > { %1499 = vrot.lane.b32.xlu1 %v1491_v33, %s4321_s5  ;;  %1561 = vrot.lane.b32.xlu2 %v1553_v35, %s4320_s30  ;;  %v1646_v33 = vmul.f32 %v5329_v63, %v1644_v55  ;;  %v1702_v35 = vmul.f32 %v5374_v4, %v1700_v22 }
 0x234   : > { %1497 = vrot.lane.b32.xlu0 %v1490_v39, %s4321_s5 }
 0x235   : > { %v5306_v54 = vpop.permute.xlu1 %1169  ;;  %v5308_v41 = vpop.permute.xlu2 %1299 }
 0x236   : > { %v5310_v57 = vpop.permute.xlu0 %1167 }
 0x23b   : > { %1533 = vrot.lane.b32.xlu1 %v1529_v47, %s4321_s5  ;;  %1581 = vrot.lane.b32.xlu2 %v1573_v52, %s4321_s5  ;;  %v1728_v47 = vstv %s3922_s28  ;;  %s5587_s28 = sld [smem:[#allocation2 + $0x45]] }
 0x23c   : > { %1521 = vrot.lane.b32.xlu0 %v1516_v59, %s4320_s30 }
 0x23d   : > { %v5318_v1 = vpop.permute.xlu1 %1189  ;;  %v5320_v48 = vpop.permute.xlu2 %1319 }
 0x23e   : > { %7256 = vst [vmem:[#allocation15_spill] sm:$0xff] %v5320_v48  ;;  %v5322_v0 = vpop.permute.xlu0 %1187 }
 0x243   : > { %1559 = vrot.lane.b32.xlu1 %v1552_v2, %s4320_s30  ;;  %1609 = vrot.lane.b32.xlu2 %v1601_v12, %s4320_s30  ;;  %v1681_v2 = vmul.f32 %v5398_v18, %v1680_v30  ;;  %v5402_v12 = vld [vmem:[%s4420_s11 + $0xb0] sm:$0xff] }
 0x244   : > { %1557 = vrot.lane.b32.xlu0 %v1551_v45, %s4320_s30  ;;  %7261 = vst [vmem:[#allocation22_spill] sm:$0xff] %v5402_v12  ;;  %v1730_v45 = vmul.f32 %v5402_v12, %v1728_v47 }
 0x245   : > { %v5341_v50 = vpop.permute.xlu1 %1217  ;;  %v5343_v13 = vpop.permute.xlu2 %1347 }
 0x246   : > { %v5345_v6 = vpop.permute.xlu0 %1215 }
 0x24b   : > { %1579 = vrot.lane.b32.xlu1 %v1572_v40, %s4321_s5  ;;  %1629 = vrot.lane.b32.xlu2 %v1621_v28, %s4321_s5  ;;  %v1748_v28 = vstv %s3923_s29  ;;  %s3903_s29 = sld [smem:[#allocation2 + $0x4b]] }
 0x24c   : > { %1577 = vrot.lane.b32.xlu0 %v1571_v56, %s4321_s5  ;;  %v1750_v7 = vmul.f32 %v5402_v12, %v1748_v28 }
 0x24d   : > { %v5354_v21 = vpop.permute.xlu1 %1237  ;;  %v5356_v17 = vpop.permute.xlu2 %1367 }
 0x24e   : > { %v5358_v42 = vpop.permute.xlu0 %1235 }
 0x253   : > { %1607 = vrot.lane.b32.xlu1 %v1600_v46, %s4320_s30  ;;  %1663 = vrot.lane.b32.xlu2 %v1659_v60, %s4321_s5  ;;  %v1701_v60 = vmul.f32 %v5398_v18, %v1700_v22 }
 0x254   : > { %1605 = vrot.lane.b32.xlu0 %v1599_v25, %s4320_s30  ;;  %v1683_v25 = vmul.f32 %v5402_v12, %v1680_v30 }
 0x255   : > { %v5366_v26 = vpop.permute.xlu1 %1261  ;;  %v5370_v19 = vpop.permute.xlu2 %1391 }
 0x256   : > { %v5368_v5 = vpop.permute.xlu0 %1259 }
 0x25b   : > { %1627 = vrot.lane.b32.xlu1 %v1620_v11, %s4321_s5  ;;  %1689 = vrot.lane.b32.xlu2 %v1682_v8, %s4320_s30  ;;  %v1774_v8 = vstv %s5411_s6  ;;  %s5608_s6 = sld [smem:[#allocation2 + $0x48]] }
 0x25c   : > { %1625 = vrot.lane.b32.xlu0 %v1619_v49, %s4321_s5 }
 0x25d   : > { %v5381_v44 = vpop.permute.xlu1 %1297  ;;  %v5387_v39 = vpop.permute.xlu2 %1427 }
 0x25e   : > { %v5383_v15 = vpop.permute.xlu0 %1275 }
 0x263   : > { %1651 = vrot.lane.b32.xlu1 %v1646_v33, %s4320_s30  ;;  %1709 = vrot.lane.b32.xlu2 %v1702_v35, %s4321_s5  ;;  %v1729_v33 = vmul.f32 %v5374_v4, %v1728_v47  ;;  %v5432_v35 = vld [vmem:[%s4420_s11 + $0xb8] sm:$0xff] }
 0x264   : > { %1649 = vrot.lane.b32.xlu0 %v1645_v14, %s4320_s30  ;;  %7263 = vst [vmem:[#allocation21_spill] sm:$0xff] %v5432_v35  ;;  %v1776_v30 = vmul.f32 %v5432_v35, %v1774_v8  ;;  %v1703_v14 = vmul.f32 %v5402_v12, %v1700_v22 }
 0x265   : > { %v5393_v52 = vpop.permute.xlu1 %1317  ;;  %v5406_v40 = vpop.permute.xlu2 %1447 }
 0x266   : > { %v5395_v59 = vpop.permute.xlu0 %1301  ;;  %7262 = vst [vmem:[#allocation23_spill] sm:$0xff] %v5406_v40 }
 0x26b   : > { %1687 = vrot.lane.b32.xlu1 %v1681_v2, %s4320_s30  ;;  %1737 = vrot.lane.b32.xlu2 %v1730_v45, %s4320_s30  ;;  %v1810_v2 = vstv %s3928_s7  ;;  %s5615_s7 = sld [smem:[#allocation2 + $0x4e]] }
 0x26c   : > { %1665 = vrot.lane.b32.xlu0 %v1660_v16, %s4321_s5 }
 0x26d   : > { %v5413_v56 = vpop.permute.xlu1 %1345  ;;  %v5422_v11 = vpop.permute.xlu2 %1475 }
 0x26e   : > { %v5415_v46 = vpop.permute.xlu0 %1321 }
 0x273   : > { %1707 = vrot.lane.b32.xlu1 %v1701_v60, %s4321_s5  ;;  %1757 = vrot.lane.b32.xlu2 %v1750_v7, %s4321_s5  ;;  %v1749_v7 = vmul.f32 %v5374_v4, %v1748_v28  ;;  %v1775_v4 = vmul.f32 %v5402_v12, %v1774_v8 }
 0x274   : > { %1691 = vrot.lane.b32.xlu0 %v1683_v25, %s4320_s30  ;;  %v5447_v25 = vld [vmem:[%s4420_s11 + $0xc8] sm:$0xff] }
 0x275   : > { %v5426_v49 = vpop.permute.xlu1 %1365  ;;  %v5441_v16 = vpop.permute.xlu2 %1495  ;;  %7264 = vst [vmem:[#allocation48_spill] sm:$0xff] %v5447_v25  ;;  %v1811_v22 = vmul.f32 %v5447_v25, %v1810_v2 }
 0x276   : > { %v5428_v55 = vpop.permute.xlu0 %1349 }
 0x27b   : > { %1735 = vrot.lane.b32.xlu1 %v1729_v33, %s4320_s30  ;;  %1781 = vrot.lane.b32.xlu2 %v1776_v30, %s4320_s30  ;;  %v1731_v33 = vmul.f32 %v5432_v35, %v1728_v47  ;;  %v1830_v30 = vstv %s3929_s8  ;;  %v1751_v47 = vmul.f32 %v5432_v35, %v1748_v28  ;;  %s5630_s8 = sld [smem:[#allocation2 + $0x54]] }
 0x27c   : > { %1711 = vrot.lane.b32.xlu0 %v1703_v14, %s4321_s5  ;;  %v1831_v40 = vmul.f32 %v5447_v25, %v1830_v30  ;;  %v5472_v25 = vld [vmem:[%s4420_s11 + $0xd0] sm:$0xff] }
 0x27d   : > { %v5439_v45 = vpop.permute.xlu1 %1389  ;;  %v5460_v36 = vpop.permute.xlu2 %1519  ;;  %7269 = vst [vmem:[#allocation51_spill] sm:$0xff] %v5472_v25 }
 0x27e   : > { %v5443_v60 = vpop.permute.xlu0 %1369  ;;  %7266 = vst [vmem:[#allocation26_spill] sm:$0xff] %v5460_v36 }
 0x283   : > { %1755 = vrot.lane.b32.xlu1 %v1749_v7, %s4321_s5  ;;  %1817 = vrot.lane.b32.xlu2 %v1811_v22, %s4320_s30  ;;  %v1788_v7 = vstv %s3926_s9  ;;  %v1858_v22 = vstv %s3931_s10  ;;  %s3909_s9 = sld [smem:[#allocation2 + $0x51]] }
 0x284   : > { %1739 = vrot.lane.b32.xlu0 %v1731_v33, %s4320_s30  ;;  %v1790_v8 = vmul.f32 %v5432_v35, %v1788_v7  ;;  %v1859_v28 = vmul.f32 %v5472_v25, %v1858_v22  ;;  %s5657_s10 = sld [smem:[#allocation2 + $0x57]] }
 0x285   : > { %v5454_v14 = vpop.permute.xlu1 %1405  ;;  %v5476_v36 = vpop.permute.xlu2 %1535 }
 0x286   : > { %7265 = vst [vmem:[#allocation25_spill] sm:$0xff] %v5454_v14  ;;  %v5456_v18 = vpop.permute.xlu0 %1403 }
 0x287   : > { %7270 = vst [vmem:[#allocation24_spill] sm:$0xff] %v5476_v36 }
 0x28b   : > { %1779 = vrot.lane.b32.xlu1 %v1775_v4, %s4320_s30  ;;  %1837 = vrot.lane.b32.xlu2 %v1831_v40, %s4321_s5  ;;  %v1789_v4 = vmul.f32 %v5402_v12, %v1788_v7  ;;  %v1878_v40 = vstv %s3932_s20  ;;  %s5675_s20 = sld [smem:[#allocation2 + $0x5d]] }
 0x28c   : > { %1759 = vrot.lane.b32.xlu0 %v1751_v47, %s4321_s5  ;;  %v1879_v36 = vmul.f32 %v5472_v25, %v1878_v40 }
 0x28d   : > { %v5466_v33 = vpop.permute.xlu1 %1431 }
 0x28e   : > { %7267 = vst [vmem:[#allocation42_spill] sm:$0xff] %v5466_v33  ;;  %v5468_v48 = vpop.permute.xlu0 %1429 }
 0x28f   : > { %7268 = vst [vmem:[#allocation12_spill] sm:$0xff] %v5468_v48  ;;  %v5488_v48 = vld [vmem:[%s4420_s11 + $0xd8] sm:$0xff] }
 0x290   : > { %7273 = vst [vmem:[#allocation52_spill] sm:$0xff] %v5488_v48  ;;  %v1813_v7 = vmul.f32 %v5488_v48, %v1810_v2  ;;  %v1860_v23 = vmul.f32 %v5488_v48, %v1858_v22 }
 0x293   : > { %1795 = vrot.lane.b32.xlu1 %v1790_v8, %s4321_s5  ;;  %1865 = vrot.lane.b32.xlu2 %v1859_v28, %s4320_s30  ;;  %v1812_v8 = vmul.f32 %v5472_v25, %v1810_v2  ;;  %v5495_v28 = vpop.permute.xlu2 %1561  ;;  %v1832_v2 = vmul.f32 %v5472_v25, %v1830_v30  ;;  %v1918_v25 = vstv %s3935_s25  ;;  %s5697_s25 = sld [smem:[#allocation2 + $0x5a]] }
 0x294   : > { %1793 = vrot.lane.b32.xlu0 %v1789_v4, %s4321_s5  ;;  %7274 = vst [vmem:[#allocation31_spill] sm:$0xff] %v5495_v28  ;;  %v1904_v4 = vstv %s5481_s24  ;;  %v5516_v28 = vld [vmem:[%s4420_s11 + $0xe0] sm:$0xff]  ;;  %s5693_s24 = sld [smem:[#allocation2 + $0x60]] }
 0x295   : > { %v5483_v47 = vpop.permute.xlu1 %1451  ;;  %v1905_v33 = vmul.f32 %v5488_v48, %v1904_v4  ;;  %7278 = vst [vmem:[#allocation34_spill] sm:$0xff] %v5516_v28  ;;  %v1861_v63 = vmul.f32 %v5516_v28, %v1858_v22 }
 0x296   : > { %7271 = vst [vmem:[#allocation45_spill] sm:$0xff] %v5483_v47  ;;  %v5485_v35 = vpop.permute.xlu0 %1449  ;;  %v1833_v47 = vmul.f32 %v5488_v48, %v1830_v30 }
 0x297   : > { %7272 = vst [vmem:[#allocation13_spill] sm:$0xff] %v5485_v35 }
 0x29b   : > { %1821 = vrot.lane.b32.xlu1 %v1813_v7, %s4320_s30  ;;  %1885 = vrot.lane.b32.xlu2 %v1879_v36, %s4321_s5  ;;  %v5511_v7 = vpop.permute.xlu2 %1581 }
 0x29c   : > { %1819 = vrot.lane.b32.xlu0 %v1812_v8, %s4320_s30  ;;  %7276 = vst [vmem:[#allocation16_spill] sm:$0xff] %v5511_v7  ;;  %v1880_v7 = vmul.f32 %v5488_v48, %v1878_v40 }
 0x29d   : > { %v5499_v12 = vpop.permute.xlu1 %1479 }
 0x29e   : > { %v5501_v35 = vpop.permute.xlu0 %1477 }
 0x2a3   : > { %1841 = vrot.lane.b32.xlu1 %v1833_v47, %s4321_s5  ;;  %1909 = vrot.lane.b32.xlu2 %v1905_v33, %s4320_s30  ;;  %v1881_v47 = vmul.f32 %v5516_v28, %v1878_v40 }
 0x2a4   : > { %1839 = vrot.lane.b32.xlu0 %v1832_v2, %s4321_s5  ;;  %v5527_v2 = vpop.permute.xlu2 %1609 }
 0x2a5   : > { %v5509_v36 = vpop.permute.xlu1 %1499  ;;  %7281 = vst [vmem:[#allocation29_spill] sm:$0xff] %v5527_v2 }
 0x2a6   : > { %7275 = vst [vmem:[#allocation55_spill] sm:$0xff] %v5509_v36  ;;  %v5513_v8 = vpop.permute.xlu0 %1497 }
 0x2a7   : > { %7277 = vst [vmem:[#allocation27_spill] sm:$0xff] %v5513_v8 }
 0x2ab   : > { %1869 = vrot.lane.b32.xlu1 %v1861_v63, %s4320_s30  ;;  %v1920_v63 = vmul.f32 %v5516_v28, %v1918_v25 }
 0x2ac   : > { %1867 = vrot.lane.b32.xlu0 %v1860_v23, %s4320_s30  ;;  %v5540_v2 = vpop.permute.xlu2 %1629 }
 0x2ad   : > { %v5522_v30 = vpop.permute.xlu1 %1533  ;;  %1925 = vrot.lane.b32.xlu2 %v1920_v63, %s4321_s5  ;;  %7284 = vst [vmem:[#allocation30_spill] sm:$0xff] %v5540_v2 }
 0x2ae   : > { %7279 = vst [vmem:[#allocation37_spill] sm:$0xff] %v5522_v30  ;;  %v5524_v33 = vpop.permute.xlu0 %1521  ;;  %v1906_v30 = vmul.f32 %v5516_v28, %v1904_v4 }
 0x2af   : > { %7280 = vst [vmem:[#allocation28_spill] sm:$0xff] %v5524_v33  ;;  %v1919_v33 = vmul.f32 %v5488_v48, %v1918_v25 }
 0x2b3   : > { %1889 = vrot.lane.b32.xlu1 %v1881_v47, %s4321_s5 }
 0x2b4   : > { %1887 = vrot.lane.b32.xlu0 %v1880_v7, %s4321_s5  ;;  %v5548_v47 = vpop.permute.xlu2 %1663 }
 0x2b5   : > { %v5533_v22 = vpop.permute.xlu1 %1559  ;;  %7287 = vst [vmem:[#allocation69_spill] sm:$0xff] %v5548_v47 }
 0x2b6   : > { %7282 = vst [vmem:[#allocation38_spill] sm:$0xff] %v5533_v22  ;;  %v5535_v23 = vpop.permute.xlu0 %1557 }
 0x2b7   : > { %7283 = vst [vmem:[#allocation66_spill] sm:$0xff] %v5535_v23 }
 0x2bb   : > { %1923 = vrot.lane.b32.xlu1 %v1919_v33, %s4321_s5  ;;  %s3882_s5 = sld [smem:[#allocation2 + $0x36]] }
 0x2bc   : > { %1911 = vrot.lane.b32.xlu0 %v1906_v30, %s4320_s30  ;;  %v5556_v25 = vpop.permute.xlu2 %1689  ;;  %s3885_s30 = sld [smem:[#allocation2 + $0x39]] }
 0x2bd   : > { %v5544_v40 = vpop.permute.xlu1 %1579  ;;  %7291 = vst [vmem:[#allocation70_spill] sm:$0xff] %v5556_v25 }
 0x2be   : > { %7285 = vst [vmem:[#allocation60_spill] sm:$0xff] %v5544_v40  ;;  %v5546_v7 = vpop.permute.xlu0 %1577 }
 0x2bf   : > { %7286 = vst [vmem:[#allocation39_spill] sm:$0xff] %v5546_v7 }
 0x2c4   : > { %v5564_v30 = vpop.permute.xlu2 %1709 }
 0x2c5   : > { %v5550_v22 = vpop.permute.xlu1 %1607  ;;  %7295 = vst [vmem:[#allocation73_spill] sm:$0xff] %v5564_v30 }
 0x2c6   : > { %7288 = vst [vmem:[#allocation41_spill] sm:$0xff] %v5550_v22  ;;  %v5552_v23 = vpop.permute.xlu0 %1605  ;;  %v1330_v22 = vstv %s3894_s17  ;;  %s5765_s17 = sld [smem:[#allocation5 + $0x1]] }
 0x2c7   : > { %7289 = vst [vmem:[#allocation40_spill] sm:$0xff] %v5552_v23  ;;  %v1332_v8 = vmul.f32 %v5199_v58, %v1330_v22 }
 0x2cc   : > { %v5570_v47 = vpop.permute.xlu2 %1737 }
 0x2cd   : > { %v5554_v63 = vpop.permute.xlu1 %1627  ;;  %7298 = vst [vmem:[#allocation56_spill] sm:$0xff] %v5570_v47 }
 0x2ce   : > { %7290 = vst [vmem:[#allocation63_spill] sm:$0xff] %v5554_v63  ;;  %v5558_v4 = vpop.permute.xlu0 %1625 }
 0x2cf   : > { %7292 = vst [vmem:[#allocation43_spill] sm:$0xff] %v5558_v4 }
 0x2d4   : > { %v5576_v25 = vpop.permute.xlu2 %1757 }
 0x2d5   : > { %v5560_v28 = vpop.permute.xlu1 %1651  ;;  %7301 = vst [vmem:[#allocation46_spill] sm:$0xff] %v5576_v25 }
 0x2d6   : > { %7293 = vst [vmem:[#allocation53_spill] sm:$0xff] %v5560_v28  ;;  %v5562_v33 = vpop.permute.xlu0 %1649 }
 0x2d7   : > { %7294 = vst [vmem:[#allocation44_spill] sm:$0xff] %v5562_v33 }
 0x2dd   : > { %v5566_v48 = vpop.permute.xlu1 %1687 }
 0x2de   : > { %7296 = vst [vmem:[#allocation32_spill] sm:$0xff] %v5566_v48  ;;  %v5568_v40 = vpop.permute.xlu0 %1665  ;;  %v1200_v48 = vstv %s3885_s30  ;;  %s5711_s30 = sld [smem:[#allocation2 + $0x66]] }
 0x2df   : > { %7297 = vst [vmem:[#allocation54_spill] sm:$0xff] %v5568_v40  ;;  %v1152_v40 = vstv %s3882_s5  ;;  %v1202_v47 = vmul.f32 %v5134_v43, %v1200_v48  ;;  %v1203_v25 = vmul.f32 %v5154_v29, %v1200_v48  ;;  %s5727_s5 = sld [smem:[#allocation2 + $0x69]] }
 0x2e0   : > { %v1153_v4 = vmul.f32 %v5158_v9, %v1152_v40  ;;  %v1331_v9 = vmul.f32 %v5181_v24, %v1330_v22 }
 0x2e1   : > { %v1225_v63 = vadd.f32 %v5341_v50, %v1202_v47  ;;  %v1154_v50 = vmul.f32 %v5150_v31, %v1152_v40 }
 0x2e5   : > { %v5572_v7 = vpop.permute.xlu1 %1707 }
 0x2e6   : > { %7299 = vst [vmem:[#allocation17_spill] sm:$0xff] %v5572_v7  ;;  %v5574_v2 = vpop.permute.xlu0 %1691  ;;  %v1201_v7 = vmul.f32 %v5150_v31, %v1200_v48 }
 0x2e7   : > { %7300 = vst [vmem:[#allocation57_spill] sm:$0xff] %v5574_v2  ;;  %v1248_v2 = vstv %s5578_s26  ;;  %s5734_s26 = sld [smem:[#allocation2 + $0x63]] }
 0x2e8   : > { %v1224_v23 = vadd.f32 %v5345_v6, %v1201_v7  ;;  %v1249_v36 = vmul.f32 %v5134_v43, %v1248_v2  ;;  %v1176_v6 = vadd.f32 %v5310_v57, %v1153_v4  ;;  %v1282_v7 = vstv %s3891_s27  ;;  %s3941_s27 = sld [smem:[#allocation2 + $0x6d]] }
 0x2ea   : > { %v1244_v48 = vadd.f32 %v5358_v42, %v1224_v23  ;;  %v1196_v47 = vadd.f32 %v5322_v0, %v1176_v6  ;;  %v1265_v14 = vadd.f32 %v5368_v5, %v1249_v36  ;;  %v1250_v23 = vmul.f32 %v5154_v29, %v1248_v2 }
 0x2eb   : > { %v1333_v0 = vmul.f32 %v5217_v27, %v1330_v22  ;;  %v1460_v36 = vstv %s3903_s29  ;;  %s3942_s29 = sld [smem:[#allocation2 + $0x6e]] }
 0x2ec   : > { %v1279_v2 = vadd.f32 %v5292_v34, %v1265_v14  ;;  %v1285_v14 = vmul.f32 %v5199_v58, %v1282_v7 }
 0x2ed   : > { %v5580_v28 = vpop.permute.xlu1 %1735 }
 0x2ee   : > { %7302 = vst [vmem:[#allocation58_spill] sm:$0xff] %v5580_v28  ;;  %v5582_v30 = vpop.permute.xlu0 %1711  ;;  %v5593_v28 = vpop.permute.xlu2 %1781 }
 0x2ef   : > { %7303 = vst [vmem:[#allocation47_spill] sm:$0xff] %v5582_v30 }
 0x2f0   : > { %7305 = vst [vmem:[#allocation61_spill] sm:$0xff] %v5593_v28  ;;  %v1155_v28 = vmul.f32 %v5134_v43, %v1152_v40  ;;  %v1334_v43 = vadd.f32 %v1331_v9, %v1244_v48  ;;  %v1177_v40 = vadd.f32 %v5306_v54, %v1154_v50  ;;  %v1508_v50 = vstv %s5615_s7  ;;  %s3944_s7 = sld [smem:[#allocation2 + $0x70]] }
 0x2f2   : > { %v1178_v31 = vadd.f32 %v5245_v3, %v1155_v28  ;;  %v1354_v29 = vadd.f32 %v5413_v56, %v1334_v43  ;;  %v1266_v28 = vadd.f32 %v5366_v26, %v1250_v23  ;;  %v1462_v26 = vmul.f32 %v5261_v51, %v1460_v36 }
 0x2f4   : > { %v1374_v56 = vadd.f32 %v5426_v49, %v1354_v29 }
 0x2f5   : > { %v5589_v33 = vpop.permute.xlu1 %1755 }
 0x2f6   : > { %7304 = vst [vmem:[#allocation59_spill] sm:$0xff] %v5589_v33  ;;  %v5595_v30 = vpop.permute.xlu0 %1739  ;;  %v1245_v33 = vadd.f32 %v5354_v21, %v1225_v63  ;;  %v1283_v21 = vmul.f32 %v5195_v10, %v1282_v7  ;;  %v1378_v63 = vstv %s5587_s28  ;;  %v1284_v10 = vmul.f32 %v5181_v24, %v1282_v7  ;;  %s4322_s28 = smov 126  }
 0x2f7   : > { %7306 = vst [vmem:[#allocation71_spill] sm:$0xff] %v5595_v30  ;;  %v1226_v30 = vadd.f32 %v5272_v20, %v1203_v25  ;;  %v1379_v3 = vmul.f32 %v5199_v58, %v1378_v63  ;;  %v1461_v24 = vmul.f32 %v5249_v38, %v1460_v36  ;;  %v1380_v4 = vmul.f32 %v5217_v27, %v1378_v63 }
 0x2f8   : > { %v1335_v42 = vadd.f32 %v1332_v8, %v1245_v33  ;;  %v1197_v8 = vadd.f32 %v5318_v1, %v1177_v40  ;;  %v1286_v25 = vadd.f32 %v1283_v21, %v1196_v47  ;;  %v1198_v1 = vadd.f32 %v5258_v62, %v1178_v31 }
 0x2f9   : > { %v1246_v57 = vadd.f32 %v5281_v37, %v1226_v30  ;;  %v5632_v37 = vpop.permute.xlu2 %1817  ;;  %v1280_v33 = vadd.f32 %v5383_v15, %v1266_v28  ;;  %v1381_v48 = vadd.f32 %v1379_v3, %v1279_v2  ;;  %v1464_v9 = vadd.f32 %v1461_v24, %v1374_v56  ;;  %v7308_v2 = vld [vmem:[#allocation27_spill] sm:$0xff] }
 0x2fa   : > { %v1355_v54 = vadd.f32 %v5343_v13, %v1335_v42  ;;  %v1306_v34 = vadd.f32 %v5381_v44, %v1286_v25  ;;  %v1412_v13 = vstv %s5608_s6  ;;  %v1287_v44 = vadd.f32 %v1284_v10, %v1197_v8  ;;  %v7307_v8 = vld [vmem:[#allocation25_spill] sm:$0xff]  ;;  %v7309_v25 = vld [vmem:[#allocation14_spill] sm:$0xff]  ;;  %v7312_v56 = vld [vmem:[#allocation15_spill] sm:$0xff]  ;;  %s4323_s6 = smov 120  }
 0x2fb   : > { %v1336_v22 = vadd.f32 %v1333_v0, %v1246_v57  ;;  %v1413_v30 = vmul.f32 %v5227_v61, %v1412_v13  ;;  %v1395_v27 = vadd.f32 %v5439_v45, %v1381_v48  ;;  %v1463_v7 = vmul.f32 %v5284_v32, %v1460_v36 }
 0x2fc   : > { %v1326_v49 = vadd.f32 %v5393_v52, %v1306_v34  ;;  %v1375_v58 = vadd.f32 %v5356_v17, %v1355_v54  ;;  %v1382_v52 = vadd.f32 %v1380_v4, %v1280_v33  ;;  %v1288_v47 = vadd.f32 %v1285_v14, %v1198_v1  ;;  %v7310_v54 = vld [vmem:[#allocation11_spill] sm:$0xff]  ;;  %v7313_v14 = vld [vmem:[#allocation26_spill] sm:$0xff] }
 0x2fd   : > { %v5617_v20 = vpop.permute.xlu1 %1779  ;;  %v1356_v62 = vadd.f32 %v5428_v55, %v1336_v22  ;;  %v1509_v21 = vmul.f32 %v5261_v51, %v1508_v50  ;;  %v1409_v17 = vadd.f32 %v5456_v18, %v1395_v27  ;;  %v1590_v42 = vstv %s5630_s8  ;;  %v7314_v4 = vld [vmem:[#allocation35_spill] sm:$0xff]  ;;  %s4324_s8 = smov 112  }
 0x2fe   : > { %v5623_v5 = vpop.permute.xlu0 %1759  ;;  %v1416_v55 = vadd.f32 %v1413_v30, %v1326_v49  ;;  %v1307_v23 = vadd.f32 %v5308_v41, %v1287_v44  ;;  %v1484_v45 = vadd.f32 %v5422_v11, %v1464_v9  ;;  %v1465_v63 = vadd.f32 %v1462_v26, %v1375_v58  ;;  %v7315_v26 = vld [vmem:[#allocation23_spill] sm:$0xff]  ;;  %v7316_v44 = vld [vmem:[#allocation42_spill] sm:$0xff] }
 0x2ff   : > { %v1376_v15 = vadd.f32 %v5443_v60, %v1356_v62  ;;  %v1308_v60 = vadd.f32 %v5395_v59, %v1288_v47  ;;  %v1415_v43 = vmul.f32 %v5261_v51, %v1412_v13  ;;  %v1542_v31 = vstv %s3909_s9  ;;  %s3945_s9 = sld [smem:[#allocation2 + $0x71]] }
 0x300   : > { %v1396_v0 = vadd.f32 %v5370_v19, %v1382_v52  ;;  %v1485_v10 = vadd.f32 %v5501_v35, %v1465_v63  ;;  %v1510_v18 = vmul.f32 %v5284_v32, %v1508_v50  ;;  %v1591_v29 = vmul.f32 %v5325_v53, %v1590_v42  ;;  %v7317_v50 = vld [vmem:[#allocation37_spill] sm:$0xff] }
 0x301   : > { %v1466_v57 = vadd.f32 %v1463_v7, %v1376_v15  ;;  %v5666_v40 = vpop.permute.xlu2 %1837  ;;  %v1436_v41 = vadd.f32 %v5387_v39, %v1416_v55  ;;  %v1328_v11 = vadd.f32 %v5415_v46, %v1308_v60  ;;  %v1511_v59 = vadd.f32 %v1509_v21, %v1409_v17  ;;  %v7311_v39 = vld [vmem:[#allocation55_spill] sm:$0xff]  ;;  %v7318_v15 = vld [vmem:[#allocation28_spill] sm:$0xff]  ;;  %v7319_v52 = vld [vmem:[#allocation41_spill] sm:$0xff] }
 0x302   : > { %v1504_v36 = vadd.f32 %v5441_v16, %v1484_v45  ;;  %v1410_v19 = vadd.f32 %v7307_v8, %v1396_v0  ;;  %v1505_v35 = vadd.f32 %v7308_v2, %v1485_v10  ;;  %v1592_v32 = vmul.f32 %v7309_v25, %v1590_v42  ;;  %v7320_v21 = vld [vmem:[#allocation45_spill] sm:$0xff]  ;;  %v7322_v60 = vld [vmem:[#allocation12_spill] sm:$0xff]  ;;  %v7323_v0 = vld [vmem:[#allocation22_spill] sm:$0xff] }
 0x303   : > { %v1486_v51 = vadd.f32 %v5499_v12, %v1466_v57  ;;  %v1593_v28 = vmul.f32 %v7310_v54, %v1590_v42  ;;  %v1327_v12 = vadd.f32 %v7312_v56, %v1307_v23  ;;  %v1414_v1 = vmul.f32 %v5249_v38, %v1412_v13  ;;  %v7321_v42 = vld [vmem:[#allocation40_spill] sm:$0xff] }
 0x304   : > { %v1638_v34 = vstv %s5657_s10  ;;  %v1418_v16 = vadd.f32 %v1415_v43, %v1328_v11  ;;  %v1525_v22 = vadd.f32 %v7313_v14, %v1511_v59  ;;  %v1543_v33 = vmul.f32 %v7314_v4, %v1542_v31  ;;  %v7325_v11 = vld [vmem:[#allocation29_spill] sm:$0xff]  ;;  %v7331_v14 = vld [vmem:[#allocation66_spill] sm:$0xff]  ;;  %s3947_s10 = sld [smem:[#allocation2 + $0x73]] }
 0x305   : > { %v5650_v6 = vpop.permute.xlu1 %1795  ;;  %v1506_v24 = vadd.f32 %v7311_v39, %v1486_v51  ;;  %v1456_v30 = vadd.f32 %v7315_v26, %v1436_v41  ;;  %v1512_v49 = vadd.f32 %v1510_v18, %v1410_v19  ;;  %v1595_v62 = vadd.f32 %v1592_v32, %v1505_v35  ;;  %v7324_v18 = vld [vmem:[#allocation63_spill] sm:$0xff]  ;;  %v7327_v19 = vld [vmem:[#allocation18_spill] sm:$0xff] }
 0x306   : > { %v5655_v61 = vpop.permute.xlu0 %1793  ;;  %v1594_v48 = vadd.f32 %v1591_v29, %v1504_v36  ;;  %v1438_v58 = vadd.f32 %v7316_v44, %v1418_v16  ;;  %v1539_v27 = vadd.f32 %v7317_v50, %v1525_v22  ;;  %v1639_v38 = vmul.f32 %v7309_v25, %v1638_v34  ;;  %v7326_v51 = vld [vmem:[#allocation43_spill] sm:$0xff]  ;;  %v7332_v26 = vld [vmem:[#allocation30_spill] sm:$0xff] }
 0x307   : > { %v1596_v9 = vadd.f32 %v1593_v28, %v1506_v24  ;;  %v1417_v13 = vadd.f32 %v1414_v1, %v1327_v12  ;;  %v1526_v7 = vadd.f32 %v7318_v15, %v1512_v49  ;;  %v1615_v47 = vadd.f32 %v7319_v52, %v1595_v62  ;;  %v7329_v28 = vld [vmem:[#allocation24_spill] sm:$0xff]  ;;  %v7336_v50 = vld [vmem:[#allocation31_spill] sm:$0xff]  ;;  %v7338_v15 = vld [vmem:[#allocation58_spill] sm:$0xff] }
 0x308   : > { %v1545_v55 = vmul.f32 %v7309_v25, %v1542_v31  ;;  %v1458_v17 = vadd.f32 %v7320_v21, %v1438_v58  ;;  %v1614_v23 = vadd.f32 %v7321_v42, %v1594_v48  ;;  %v1720_v45 = vstv %s5675_s20  ;;  %v7328_v25 = vld [vmem:[#allocation13_spill] sm:$0xff]  ;;  %v7330_v1 = vld [vmem:[#allocation44_spill] sm:$0xff]  ;;  %s3948_s20 = sld [smem:[#allocation2 + $0x74]] }
 0x309   : > { %v5706_v63 = vpop.permute.xlu2 %1865  ;;  %v1437_v43 = vadd.f32 %v7322_v60, %v1417_v13  ;;  %v1546_v57 = vadd.f32 %v1543_v33, %v1456_v30  ;;  %v1722_v10 = vmul.f32 %v7323_v0, %v1720_v45  ;;  %v1635_v29 = vadd.f32 %v7324_v18, %v1615_v47  ;;  %v7333_v48 = vld [vmem:[#allocation21_spill] sm:$0xff]  ;;  %v7339_v47 = vld [vmem:[#allocation38_spill] sm:$0xff]  ;;  %v7340_v21 = vld [vmem:[#allocation56_spill] sm:$0xff] }
 0x30a   : > { %v1616_v59 = vadd.f32 %v7325_v11, %v1596_v9  ;;  %v1634_v36 = vadd.f32 %v7326_v51, %v1614_v23  ;;  %v1641_v8 = vadd.f32 %v1639_v38, %v1539_v27  ;;  %v1721_v2 = vmul.f32 %v7327_v19, %v1720_v45  ;;  %v7337_v38 = vld [vmem:[#allocation69_spill] sm:$0xff]  ;;  %v7343_v18 = vld [vmem:[#allocation59_spill] sm:$0xff] }
 0x30b   : > { %v1457_v32 = vadd.f32 %v7328_v25, %v1437_v43  ;;  %v1540_v39 = vadd.f32 %v7329_v28, %v1526_v7  ;;  %v1544_v24 = vmul.f32 %v5325_v53, %v1542_v31  ;;  %v1640_v56 = vmul.f32 %v7310_v54, %v1638_v34  ;;  %v7334_v53 = vld [vmem:[#allocation39_spill] sm:$0xff]  ;;  %v7335_v34 = vld [vmem:[#allocation20_spill] sm:$0xff]  ;;  %v7341_v42 = vld [vmem:[#allocation53_spill] sm:$0xff] }
 0x30c   : > { %v1548_v12 = vadd.f32 %v1545_v55, %v1458_v17  ;;  %v1655_v16 = vadd.f32 %v7330_v1, %v1641_v8  ;;  %v1566_v22 = vadd.f32 %v7331_v14, %v1546_v57  ;;  %v1725_v4 = vadd.f32 %v1722_v10, %v1635_v29  ;;  %v7342_v57 = vld [vmem:[#allocation51_spill] sm:$0xff] }
 0x30d   : > { %v5681_v3 = vpop.permute.xlu1 %1821  ;;  %v1768_v33 = vstv %s5693_s24  ;;  %v1636_v30 = vadd.f32 %v7332_v26, %v1616_v59  ;;  %v1672_v49 = vstv %s5697_s25  ;;  %v1724_v62 = vadd.f32 %v1721_v2, %v1634_v36  ;;  %v7344_v36 = vld [vmem:[#allocation60_spill] sm:$0xff]  ;;  %s3950_s24 = sld [smem:[#allocation2 + $0x76]] }
 0x30e   : > { %v5685_v46 = vpop.permute.xlu0 %1819  ;;  %v1723_v44 = vmul.f32 %v7333_v48, %v1720_v45  ;;  %v1547_v58 = vadd.f32 %v1544_v24, %v1457_v32  ;;  %v1586_v31 = vadd.f32 %v7334_v53, %v1566_v22  ;;  %v1642_v54 = vadd.f32 %v1640_v56, %v1540_v39  ;;  %v7345_v32 = vld [vmem:[#allocation54_spill] sm:$0xff]  ;;  %v7346_v24 = vld [vmem:[#allocation71_spill] sm:$0xff]  ;;  %s3951_s25 = sld [smem:[#allocation2 + $0x77]] }
 0x30f   : > { %v1673_v9 = vmul.f32 %v7335_v34, %v1672_v49  ;;  %v1568_v27 = vadd.f32 %v7336_v50, %v1548_v12  ;;  %v1669_v13 = vadd.f32 %v7337_v38, %v1655_v16  ;;  %v1744_v7 = vadd.f32 %v7338_v15, %v1724_v62  ;;  %v7347_v12 = vld [vmem:[#allocation46_spill] sm:$0xff]  ;;  %v7348_v16 = vld [vmem:[#allocation32_spill] sm:$0xff] }
 0x310   : > { %v1769_v52 = vmul.f32 %v7323_v0, %v1768_v33  ;;  %v1567_v55 = vadd.f32 %v7339_v47, %v1547_v58  ;;  %v1745_v17 = vadd.f32 %v7340_v21, %v1725_v4  ;;  %v1656_v23 = vadd.f32 %v7341_v42, %v1642_v54  ;;  %v7349_v4 = vld [vmem:[#allocation52_spill] sm:$0xff]  ;;  %v7354_v47 = vld [vmem:[#allocation70_spill] sm:$0xff] }
 0x311   : > { %v1850_v45 = vstv %s5711_s30  ;;  %v1674_v43 = vmul.f32 %v7327_v19, %v1672_v49  ;;  %v1764_v29 = vadd.f32 %v7343_v18, %v1744_v7  ;;  %v1726_v11 = vadd.f32 %v1723_v44, %v1636_v30  ;;  %v1886_v59 = vpop.permute.xlu2 %1885  ;;  %v7351_v58 = vld [vmem:[#allocation16_spill] sm:$0xff]  ;;  %s3953_s30 = sld [smem:[#allocation2 + $0x79]] }
 0x312   : > { %v1851_v10 = vmul.f32 %v7342_v57, %v1850_v45  ;;  %v1587_v8 = vadd.f32 %v7344_v36, %v1567_v55  ;;  %v1676_v2 = vadd.f32 %v1673_v9, %v1586_v31  ;;  %v1770_v25 = vmul.f32 %v7333_v48, %v1768_v33  ;;  %v7350_v48 = vld [vmem:[#allocation34_spill] sm:$0xff]  ;;  %v7352_v54 = vld [vmem:[#allocation48_spill] sm:$0xff]  ;;  %v7353_v9 = vld [vmem:[#allocation17_spill] sm:$0xff] }
 0x313   : > { %v1670_v28 = vadd.f32 %v7345_v32, %v1656_v23  ;;  %v1675_v39 = vmul.f32 %v7323_v0, %v1672_v49  ;;  %v1746_v56 = vadd.f32 %v7346_v24, %v1726_v11  ;;  %v1771_v19 = vadd.f32 %v1769_v52, %v1669_v13 }
 0x314   : > { %v1765_v1 = vadd.f32 %v7347_v12, %v1745_v17  ;;  %v1696_v14 = vadd.f32 %v7348_v16, %v1676_v2  ;;  %v1898_v22 = vstv %s5727_s5  ;;  %v1852_v26 = vmul.f32 %v7349_v4, %v1850_v45  ;;  %v7355_v17 = vld [vmem:[#allocation61_spill] sm:$0xff]  ;;  %v7357_v2 = vld [vmem:[#allocation47_spill] sm:$0xff]  ;;  %s3954_s5 = sld [smem:[#allocation2 + $0x7a]] }
 0x315   : > { %v5713_v41 = vpop.permute.xlu1 %1841  ;;  %v1854_v30 = vadd.f32 %v1851_v10, %v1764_v29  ;;  %v1785_v62 = vadd.f32 %v5617_v20, %v1771_v19  ;;  %v1766_v33 = vadd.f32 %v5623_v5, %v1746_v56  ;;  %v1853_v44 = vmul.f32 %v7350_v48, %v1850_v45  ;;  %v7356_v10 = vld [vmem:[#allocation57_spill] sm:$0xff] }
 0x316   : > { %v5718_v35 = vpop.permute.xlu0 %1839  ;;  %v1588_v53 = vadd.f32 %v7351_v58, %v1568_v27  ;;  %v1677_v0 = vadd.f32 %v1674_v43, %v1587_v8  ;;  %v1772_v49 = vadd.f32 %v1770_v25, %v1670_v28  ;;  %v1802_v31 = vstv %s5734_s26  ;;  %v7358_v28 = vld [vmem:[#allocation73_spill] sm:$0xff]  ;;  %s3956_s26 = sld [smem:[#allocation2 + $0x7c]] }
 0x317   : > { %v1803_v34 = vmul.f32 %v7352_v54, %v1802_v31  ;;  %v1716_v50 = vadd.f32 %v7353_v9, %v1696_v14  ;;  %v1799_v38 = vadd.f32 %v5655_v61, %v1785_v62  ;;  %v1899_v13 = vmul.f32 %v7349_v4, %v1898_v22 }
 0x318   : > { %v1874_v20 = vadd.f32 %v5706_v63, %v1854_v30  ;;  %v1856_v7 = vadd.f32 %v1853_v44, %v1766_v33  ;;  %v1855_v52 = vadd.f32 %v1852_v26, %v1765_v1  ;;  %v1697_v55 = vadd.f32 %v7354_v47, %v1677_v0 }
 0x319   : > { %v1910_v5 = vpop.permute.xlu2 %1909  ;;  %v1678_v21 = vadd.f32 %v1675_v39, %v1588_v53  ;;  %v1786_v42 = vadd.f32 %v7355_v17, %v1772_v49  ;;  %v1806_v23 = vadd.f32 %v1803_v34, %v1716_v50  ;;  %v1901_v45 = vadd.f32 %v1899_v13, %v1799_v38 }
 0x31a   : > { %v1900_v63 = vmul.f32 %v7350_v48, %v1898_v22  ;;  %v1894_v11 = vadd.f32 %v1886_v59, %v1874_v20  ;;  %v1805_v32 = vmul.f32 %v7349_v4, %v1802_v31  ;;  %v1717_v39 = vadd.f32 %v7358_v28, %v1697_v55 }
 0x31b   : > { %v1698_v18 = vadd.f32 %v7356_v10, %v1678_v21  ;;  %v1800_v29 = vadd.f32 %v5650_v6, %v1786_v42  ;;  %v1826_v24 = vadd.f32 %v5632_v37, %v1806_v23  ;;  %v1915_v56 = vadd.f32 %v1910_v5, %v1901_v45 }
 0x31c   : > { %v1935_v6 = vrot.slane %v1894_v11, 7  ;;  %v2011_v55 = vstv %s3942_s29  ;;  %v2039_v23 = vstv %s3944_s7  ;;  %v2107_v28 = vstv %s3948_s20  ;;  %s3962_s29 = sld [smem:[#allocation2 + $0x82]] }
 0x31d   : > { %v1870_v60 = vpop.permute.xlu1 %1869  ;;  %v1718_v25 = vadd.f32 %v7357_v2, %v1698_v18  ;;  %v1902_v12 = vadd.f32 %v1900_v63, %v1800_v29  ;;  %v1846_v4 = vadd.f32 %v5666_v40, %v1826_v24  ;;  %v2059_v18 = vstv %s3945_s9  ;;  %v5823_v2 = vld [vmem:[%s4420_s11 + $0x20] sm:$0x3]  ;;  %s3963_s7 = sld [smem:[#allocation2 + $0x83]] }
 0x31e   : > { %v1868_v51 = vpop.permute.xlu0 %1867  ;;  %v1876_v61 = vadd.f32 %v1870_v60, %v1856_v7  ;;  %v1804_v60 = vmul.f32 %v7342_v57, %v1802_v31  ;;  %v5790_v7 = vld [vmem:[%s4420_s11 + $0x10] sm:$0xff]  ;;  %v2110_v24 = vmul.f32 %v2107_v28, %v5823_v2  ;;  %s3965_s9 = sld [smem:[#allocation2 + $0x85]] }
 0x31f   : > { %v1875_v43 = vadd.f32 %v1868_v51, %v1855_v52  ;;  %v1947_v51 = vstv %s5765_s17  ;;  %v1808_v26 = vadd.f32 %v1805_v32, %v1718_v25  ;;  %v1943_v57 = vadd.f32 %v1935_v6, %v1846_v4  ;;  %s3957_s17 = sld [smem:[#allocation2 + $0x7d]] }
 0x320   : > { %v1807_v62 = vadd.f32 %v1804_v60, %v1717_v39  ;;  %v2014_v17 = vmul.f32 %v5790_v7, %v2011_v55  ;;  %v2041_v10 = vmul.f32 %v5790_v7, %v2039_v23  ;;  %v2061_v11 = vmul.f32 %v5790_v7, %v2059_v18  ;;  %s3968_s20 = sld [smem:[#allocation2 + $0x88]] }
 0x321   : > { %v1926_v22 = vpop.permute.xlu2 %1925  ;;  %v1828_v37 = vadd.f32 %v5681_v3, %v1808_v26  ;;  %v2108_v39 = vmul.f32 %v5790_v7, %v2107_v28  ;;  %v2135_v60 = vstv %s3950_s24  ;;  %s3969_s24 = sld [smem:[#allocation2 + $0x89]] }
 0x322   : > { %v1827_v44 = vadd.f32 %v5685_v46, %v1807_v62  ;;  %v5859_v62 = vld [vmem:[%s4420_s11 + $0x40] sm:$0xff] }
 0x323   : > { %v1848_v0 = vadd.f32 %v5713_v41, %v1828_v37  ;;  %v1991_v41 = vstv %s3941_s27  ;;  %s3959_s27 = sld [smem:[#allocation2 + $0x7f]] }
 0x324   : > { %v1847_v54 = vadd.f32 %v5718_v35, %v1827_v44  ;;  %v5786_v35 = vld [vmem:[%s4420_s11] sm:$0xff]  ;;  %v1994_v52 = vmul.f32 %v5790_v7, %v1991_v41 }
 0x325   : > { %v1890_v15 = vpop.permute.xlu1 %1889  ;;  %v1992_v5 = vmul.f32 %v5786_v35, %v1991_v41  ;;  %v2012_v21 = vmul.f32 %v5786_v35, %v2011_v55 }
 0x326   : > { %v1888_v27 = vpop.permute.xlu0 %1887  ;;  %v1896_v36 = vadd.f32 %v1890_v15, %v1876_v61  ;;  %v5808_v61 = vld [vmem:[%s4420_s11 + $0x18] sm:$0xff] }
 0x327   : > { %v1895_v8 = vadd.f32 %v1888_v27, %v1875_v43  ;;  %v5795_v27 = vld [vmem:[%s4420_s11 + $0x8] sm:$0xff]  ;;  %v2042_v43 = vmul.f32 %v5808_v61, %v2039_v23  ;;  %v2062_v63 = vmul.f32 %v5808_v61, %v2059_v18 }
 0x328   : > { %v1938_v1 = vrot.slane %v1896_v36, 7  ;;  %v1993_v47 = vmul.f32 %v5795_v27, %v1991_v41  ;;  %v2013_v42 = vmul.f32 %v5795_v27, %v2011_v55  ;;  %v2040_v45 = vmul.f32 %v5795_v27, %v2039_v23  ;;  %v5895_v41 = vld [vmem:[%s4420_s11 + $0x60] sm:$0xff] }
 0x329   : > { %v1936_v16 = vrot.slane %v1895_v8, 7  ;;  %v2060_v29 = vmul.f32 %v5795_v27, %v2059_v18  ;;  %v2087_v36 = vstv %s3947_s10  ;;  %v2327_v23 = vstv %s3962_s29  ;;  %s3966_s10 = sld [smem:[#allocation2 + $0x86]] }
 0x32a   : > { %v2088_v8 = vmul.f32 %v5790_v7, %v2087_v36  ;;  %v2090_v25 = vmul.f32 %v2087_v36, %v5823_v2  ;;  %v2089_v32 = vmul.f32 %v5808_v61, %v2087_v36  ;;  %v2347_v36 = vstv %s3963_s7  ;;  %s3981_s29 = sld [smem:[#allocation2 + $0x95]] }
 0x32b   : > { %v1939_v58 = vsel %vm1934_vm5, %v1936_v16, %v1938_v1  ;;  %v1937_v49 = vsel %vm1934_vm5, %v1935_v6, %v1936_v16  ;;  %v5846_v1 = vld [vmem:[%s4420_s11 + $0x30] sm:$0xff]  ;;  %s3983_s7 = sld [smem:[#allocation2 + $0x97]] }
 0x32c   : > { %v1945_v40 = vadd.f32 %v1939_v58, %v1848_v0  ;;  %v1944_v50 = vadd.f32 %v1937_v49, %v1847_v54  ;;  %v2137_v16 = vmul.f32 %v5846_v1, %v2135_v60  ;;  %v5874_v49 = vld [vmem:[%s4420_s11 + $0x48] sm:$0x3] }
 0x32d   : > { %v1924_v19 = vpop.permute.xlu1 %1923 }
 0x32e   : > { %v1929_v59 = vadd.f32 %v1924_v19, %v1915_v56  ;;  %v1912_v14 = vpop.permute.xlu0 %1911  ;;  %v2109_v56 = vmul.f32 %v5808_v61, %v2107_v28 }
 0x32f   : > { %v1916_v30 = vadd.f32 %v1912_v14, %v1902_v12  ;;  %v5841_v12 = vld [vmem:[%s4420_s11 + $0x38] sm:$0xff] }
 0x330   : > { %v1948_v33 = vadd.f32 %v1947_v51, %v1929_v59  ;;  %v2138_v6 = vmul.f32 %v5841_v12, %v2135_v60  ;;  %v2155_v59 = vstv %s3951_s25  ;;  %s3971_s25 = sld [smem:[#allocation2 + $0x8b]] }
 0x331   : > { %v1930_v48 = vadd.f32 %v1926_v22, %v1916_v30  ;;  %v2158_v22 = vmul.f32 %v5841_v12, %v2155_v59  ;;  %v2157_v26 = vmul.f32 %v5846_v1, %v2155_v59  ;;  %v2183_v30 = vstv %s3953_s30  ;;  %s3972_s30 = sld [smem:[#allocation2 + $0x8c]] }
 0x332   : > { %v1952_v53 = vrot.slane %v1948_v33, 6  ;;  %v2184_v4 = vmul.f32 %v5846_v1, %v2183_v30  ;;  %v2186_v33 = vmul.f32 %v5859_v62, %v2183_v30  ;;  %v2185_v37 = vmul.f32 %v5841_v12, %v2183_v30 }
 0x333   : > { %v1949_v31 = vadd.f32 %v1947_v51, %v1930_v48  ;;  %v5837_v51 = vld [vmem:[%s4420_s11 + $0x28] sm:$0xff]  ;;  %v2203_v48 = vstv %s3954_s5  ;;  %s3974_s5 = sld [smem:[#allocation2 + $0x8e]] }
 0x334   : > { %v1958_v34 = vadd.f32 %v1952_v53, %v1943_v57  ;;  %7359 = vst [vmem:[#allocation62_spill] sm:$0xff] %v5837_v51  ;;  %v2136_v19 = vmul.f32 %v5837_v51, %v2135_v60  ;;  %v2156_v14 = vmul.f32 %v5837_v51, %v2155_v59  ;;  %v2204_v57 = vmul.f32 %v5846_v1, %v2203_v48 }
 0x335   : > { %v1953_v9 = vrot.slane %v1949_v31, 6  ;;  %v2206_v44 = vmul.f32 %v5859_v62, %v2203_v48  ;;  %v2205_v58 = vmul.f32 %v5841_v12, %v2203_v48 }
 0x336   : > { %v1961_v3 = vmax.f32 %v1958_v34, 0.0  ;;  %v2251_v34 = vstv %s3957_s17  ;;  %s3977_s17 = sld [smem:[#allocation2 + $0x91]] }
 0x337   : > { %v1954_v38 = vsel %vm1098_vm0, %v1952_v53, %v1953_v9  ;;  %v1960_v13 = vadd.f32 %v1953_v9, %v1945_v40  ;;  %v2231_v53 = vstv %s3956_s26  ;;  %v2252_v40 = vmul.f32 %v5841_v12, %v2251_v34  ;;  %s3975_s26 = sld [smem:[#allocation2 + $0x8f]] }
 0x338   : > { %1967 = vrot.lane.b32.xlu0 %v1961_v3, %s4322_s28  ;;  %v1959_v46 = vadd.f32 %v1954_v38, %v1944_v50  ;;  %v2232_v0 = vmul.f32 %v5841_v12, %v2231_v53  ;;  %v2234_v31 = vmul.f32 %v5874_v49, %v2231_v53  ;;  %v2233_v54 = vmul.f32 %v5859_v62, %v2231_v53  ;;  %v5969_v53 = vld [vmem:[%s4420_s11 + $0x78] sm:$0xff] }
 0x339   : > { %v1963_v15 = vmax.f32 %v1960_v13, 0.0  ;;  %v2254_v50 = vmul.f32 %v5874_v49, %v2251_v34  ;;  %v2253_v3 = vmul.f32 %v5859_v62, %v2251_v34  ;;  %v2279_v38 = vstv %s3959_s27  ;;  %v5889_v13 = vld [vmem:[%s4420_s11 + $0x50] sm:$0xff]  ;;  %7366 = vst [vmem:[#allocation64_spill] sm:$0xff] %v5969_v53  ;;  %v5977_v34 = vld [vmem:[%s4420_s11 + $0x88] sm:$0xff]  ;;  %s3978_s27 = sld [smem:[#allocation2 + $0x92]] }
 0x33a   : > { %v1962_v20 = vmax.f32 %v1959_v46, 0.0  ;;  %7360 = vst [vmem:[#allocation72_spill] sm:$0xff] %v5889_v13  ;;  %v2280_v46 = vmul.f32 %v5889_v13, %v2279_v38 }
 0x33b   : > { %1971 = vrot.lane.b32.xlu2 %v1963_v15, %s4322_s28  ;;  %7367 = vst [vmem:[#allocation65_spill] sm:$0xff] %v5977_v34 }
 0x33c   : > { %1969 = vrot.lane.b32.xlu1 %v1962_v20, %s4322_s28  ;;  %s3960_s28 = sld [smem:[#allocation2 + $0x80]]  ;;  %v2282_v20 = vmul.f32 %v5895_v41, %v2279_v38 }
 0x340   : > { %1998 = vrot.lane.b32.xlu0 %v1992_v5, %s4323_s6  ;;  %v5900_v5 = vld [vmem:[%s4420_s11 + $0x58] sm:$0xff] }
 0x343   : > { %2002 = vrot.lane.b32.xlu2 %v1994_v52, %s4323_s6  ;;  %v2281_v52 = vmul.f32 %v5900_v5, %v2279_v38 }
 0x344   : > { %2000 = vrot.lane.b32.xlu1 %v1993_v47, %s4323_s6  ;;  %v2299_v47 = vstv %s3960_s28  ;;  %s3980_s28 = sld [smem:[#allocation2 + $0x94]] }
 0x345   : > { %v2300_v55 = vmul.f32 %v5889_v13, %v2299_v47  ;;  %v2635_v13 = vstv %s3981_s29  ;;  %s6190_s29 = sld [smem:[#allocation2 + $0x75]] }
 0x348   : > { %2018 = vrot.lane.b32.xlu0 %v2012_v21, %s4324_s8 }
 0x34b   : > { %2022 = vrot.lane.b32.xlu2 %v2014_v17, %s4324_s8  ;;  %v2302_v17 = vmul.f32 %v5895_v41, %v2299_v47 }
 0x34c   : > { %2020 = vrot.lane.b32.xlu1 %v2013_v42, %s4324_s8  ;;  %v2301_v42 = vmul.f32 %v5900_v5, %v2299_v47 }
 0x350   : > { %2046 = vrot.lane.b32.xlu0 %v2040_v45, %s4323_s6 }
 0x353   : > { %2050 = vrot.lane.b32.xlu2 %v2042_v43, %s4323_s6  ;;  %v2328_v43 = vmul.f32 %v5900_v5, %v2327_v23 }
 0x354   : > { %2048 = vrot.lane.b32.xlu1 %v2041_v10, %s4323_s6 }
 0x358   : > { %2066 = vrot.lane.b32.xlu0 %v2060_v29, %s4324_s8  ;;  %v5920_v29 = vld [vmem:[%s4420_s11 + $0x68] sm:$0xff] }
 0x359   : > { %7361 = vst [vmem:[#allocation74_spill] sm:$0xff] %v5920_v29 }
 0x35b   : > { %2070 = vrot.lane.b32.xlu2 %v2062_v63, %s4324_s8  ;;  %v2330_v63 = vmul.f32 %v5920_v29, %v2327_v23 }
 0x35c   : > { %2068 = vrot.lane.b32.xlu1 %v2061_v11, %s4324_s8  ;;  %v2329_v11 = vmul.f32 %v5895_v41, %v2327_v23 }
 0x360   : > { %2094 = vrot.lane.b32.xlu0 %v2088_v8, %s4323_s6 }
 0x363   : > { %2098 = vrot.lane.b32.xlu2 %v2090_v25, %s4323_s6  ;;  %v2348_v25 = vmul.f32 %v5900_v5, %v2347_v36 }
 0x364   : > { %2096 = vrot.lane.b32.xlu1 %v2089_v32, %s4323_s6 }
 0x368   : > { %2114 = vrot.lane.b32.xlu0 %v2108_v39, %s4324_s8  ;;  %v2350_v39 = vmul.f32 %v5920_v29, %v2347_v36 }
 0x36b   : > { %2118 = vrot.lane.b32.xlu2 %v2110_v24, %s4324_s8  ;;  %v2349_v24 = vmul.f32 %v5895_v41, %v2347_v36  ;;  %v2491_v36 = vstv %s3972_s30  ;;  %s3987_s30 = sld [smem:[#allocation2 + $0x9b]] }
 0x36c   : > { %2116 = vrot.lane.b32.xlu1 %v2109_v56, %s4324_s8  ;;  %v2375_v56 = vstv %s3965_s9  ;;  %s3943_s9 = sld [smem:[#allocation2 + $0x6f]] }
 0x370   : > { %2142 = vrot.lane.b32.xlu0 %v2136_v19, %s4323_s6  ;;  %v2376_v19 = vmul.f32 %v5895_v41, %v2375_v56 }
 0x373   : > { %2146 = vrot.lane.b32.xlu2 %v2138_v6, %s4323_s6  ;;  %v5943_v6 = vld [vmem:[%s4420_s11 + $0x70] sm:$0x3] }
 0x374   : > { %2144 = vrot.lane.b32.xlu1 %v2137_v16, %s4323_s6 }
 0x378   : > { %2162 = vrot.lane.b32.xlu0 %v2156_v14, %s4324_s8  ;;  %v2378_v14 = vmul.f32 %v5943_v6, %v2375_v56 }
 0x37b   : > { %2166 = vrot.lane.b32.xlu2 %v2158_v22, %s4324_s8  ;;  %v2377_v22 = vmul.f32 %v5920_v29, %v2375_v56 }
 0x37c   : > { %2164 = vrot.lane.b32.xlu1 %v2157_v26, %s4324_s8  ;;  %v2395_v26 = vstv %s3966_s10  ;;  %s3984_s10 = sld [smem:[#allocation2 + $0x98]] }
 0x37d   : > { %v2398_v48 = vmul.f32 %v5943_v6, %v2395_v26 }
 0x380   : > { %2190 = vrot.lane.b32.xlu0 %v2184_v4, %s4323_s6  ;;  %v2396_v4 = vmul.f32 %v5895_v41, %v2395_v26 }
 0x383   : > { %2194 = vrot.lane.b32.xlu2 %v2186_v33, %s4323_s6 }
 0x384   : > { %2192 = vrot.lane.b32.xlu1 %v2185_v37, %s4323_s6 }
 0x388   : > { %2210 = vrot.lane.b32.xlu0 %v2204_v57, %s4324_s8  ;;  %v2397_v57 = vmul.f32 %v5920_v29, %v2395_v26 }
 0x38b   : > { %2214 = vrot.lane.b32.xlu2 %v2206_v44, %s4324_s8  ;;  %v2423_v44 = vstv %s3968_s20  ;;  %s3952_s20 = sld [smem:[#allocation2 + $0x78]] }
 0x38c   : > { %2212 = vrot.lane.b32.xlu1 %v2205_v58, %s4324_s8 }
 0x390   : > { %2238 = vrot.lane.b32.xlu0 %v2232_v0, %s4323_s6  ;;  %v2424_v0 = vmul.f32 %v5969_v53, %v2423_v44 }
 0x393   : > { %2242 = vrot.lane.b32.xlu2 %v2234_v31, %s4323_s6 }
 0x394   : > { %2240 = vrot.lane.b32.xlu1 %v2233_v54, %s4323_s6 }
 0x395   : > { %v1972_v9 = vpop.permute.xlu2 %1971 }
 0x396   : > { %3939 = vst.msk [vmem:[%s5236_s4 + $0x1e] sm:$0x3] %vm1980_vm6, %v1972_v9  ;;  %v5982_v9 = vld [vmem:[%s4420_s11 + $0x80] sm:$0xff] }
 0x398   : > { %2258 = vrot.lane.b32.xlu0 %v2252_v40, %s4324_s8  ;;  %v2426_v40 = vmul.f32 %v5977_v34, %v2423_v44 }
 0x39b   : > { %2262 = vrot.lane.b32.xlu2 %v2254_v50, %s4324_s8  ;;  %v2425_v50 = vmul.f32 %v5982_v9, %v2423_v44 }
 0x39c   : > { %2260 = vrot.lane.b32.xlu1 %v2253_v3, %s4324_s8  ;;  %v2443_v3 = vstv %s3969_s24  ;;  %s3986_s24 = sld [smem:[#allocation2 + $0x9a]] }
 0x39d   : > { %v5892_v15 = vpop.permute.xlu2 %2002  ;;  %v2446_v47 = vmul.f32 %v5977_v34, %v2443_v3 }
 0x3a0   : > { %2286 = vrot.lane.b32.xlu0 %v2280_v46, %s4323_s6  ;;  %v2444_v46 = vmul.f32 %v5969_v53, %v2443_v3 }
 0x3a3   : > { %2290 = vrot.lane.b32.xlu2 %v2282_v20, %s4323_s6 }
 0x3a4   : > { %2288 = vrot.lane.b32.xlu1 %v2281_v52, %s4323_s6 }
 0x3a5   : > { %v5906_v21 = vpop.permute.xlu2 %2022 }
 0x3a8   : > { %2306 = vrot.lane.b32.xlu0 %v2300_v55, %s4324_s8  ;;  %v2445_v55 = vmul.f32 %v5982_v9, %v2443_v3 }
 0x3aa   : > { %v1968_v45 = vpop.permute.xlu0 %1967 }
 0x3ab   : > { %2310 = vrot.lane.b32.xlu2 %v2302_v17, %s4324_s8  ;;  %3937 = vst.msk [vmem:[%s5236_s4 + $0xe] sm:$0xfc] %vm1977_vm7, %v1968_v45  ;;  %v2471_v17 = vstv %s3971_s25  ;;  %s3946_s25 = sld [smem:[#allocation2 + $0x72]] }
 0x3ac   : > { %2308 = vrot.lane.b32.xlu1 %v2301_v42, %s4324_s8  ;;  %v2472_v23 = vmul.f32 %v5982_v9, %v2471_v17 }
 0x3ad   : > { %v5915_v10 = vpop.permute.xlu2 %2050 }
 0x3ae   : > { %v1970_v18 = vpop.permute.xlu1 %1969 }
 0x3af   : > { %3938 = vst.msk [vmem:[%s5236_s4 + $0x16] sm:$0xff] %vm1147_vm3, %v1970_v18  ;;  %v6007_v18 = vld [vmem:[%s4420_s11 + $0x90] sm:$0xff] }
 0x3b0   : > { %2334 = vrot.lane.b32.xlu0 %v2328_v43, %s4323_s6  ;;  %7368 = vst [vmem:[#allocation67_spill] sm:$0xff] %v6007_v18 }
 0x3b1   : > { %v6169_v51 = vstv %s3946_s25  ;;  %s6262_s25 = sld [smem:[#allocation2 + $0xa1]] }
 0x3b2   : > { %v5925_v8 = vpop.permute.xlu0 %1998 }
 0x3b3   : > { %7362 = vst [vmem:[#allocation33_spill] sm:$0xff] %v5925_v8  ;;  %2338 = vrot.lane.b32.xlu2 %v2330_v63, %s4323_s6  ;;  %v2474_v63 = vmul.f32 %v6007_v18, %v2471_v17  ;;  %v2731_v8 = vstv %s3987_s30  ;;  %s6274_s30 = sld [smem:[#allocation2 + $0x87]] }
 0x3b4   : > { %2336 = vrot.lane.b32.xlu1 %v2329_v11, %s4323_s6  ;;  %v2473_v11 = vmul.f32 %v5977_v34, %v2471_v17 }
 0x3b5   : > { %v5930_v32 = vpop.permute.xlu2 %2070 }
 0x3b6   : > { %v5932_v28 = vpop.permute.xlu1 %2000 }
 0x3b7   : > { %7363 = vst [vmem:[#allocation49_spill] sm:$0xff] %v5932_v28 }
 0x3b8   : > { %2354 = vrot.lane.b32.xlu0 %v2348_v25, %s4324_s8 }
 0x3ba   : > { %v5937_v60 = vpop.permute.xlu0 %2018 }
 0x3bb   : > { %7364 = vst [vmem:[#allocation50_spill] sm:$0xff] %v5937_v60  ;;  %2358 = vrot.lane.b32.xlu2 %v2350_v39, %s4324_s8  ;;  %v2492_v39 = vmul.f32 %v5982_v9, %v2491_v36 }
 0x3bc   : > { %2356 = vrot.lane.b32.xlu1 %v2349_v24, %s4324_s8 }
 0x3bd   : > { %v5945_v16 = vpop.permute.xlu2 %2098 }
 0x3be   : > { %v5947_v59 = vpop.permute.xlu1 %2020 }
 0x3bf   : > { %7365 = vst [vmem:[#allocation19_spill] sm:$0xff] %v5947_v59 }
 0x3c0   : > { %2382 = vrot.lane.b32.xlu0 %v2376_v19, %s4323_s6  ;;  %v2494_v19 = vmul.f32 %v6007_v18, %v2491_v36 }
 0x3c2   : > { %v5952_v30 = vpop.permute.xlu0 %2046 }
 0x3c3   : > { %2386 = vrot.lane.b32.xlu2 %v2378_v14, %s4323_s6  ;;  %v2493_v14 = vmul.f32 %v5977_v34, %v2491_v36  ;;  %v6056_v36 = vld [vmem:[%s4420_s11 + $0xa0] sm:$0xff] }
 0x3c4   : > { %2384 = vrot.lane.b32.xlu1 %v2377_v22, %s4323_s6  ;;  %v2519_v22 = vstv %s3974_s5  ;;  %7373 = vst [vmem:[#allocation14_spill] sm:$0xff] %v6056_v36  ;;  %s3961_s5 = sld [smem:[#allocation2 + $0x81]] }
 0x3c5   : > { %v5957_v33 = vpop.permute.xlu2 %2118 }
 0x3c6   : > { %v5959_v37 = vpop.permute.xlu1 %2048 }
 0x3c8   : > { %2402 = vrot.lane.b32.xlu0 %v2396_v4, %s4324_s8  ;;  %v2520_v4 = vmul.f32 %v5977_v34, %v2519_v22 }
 0x3ca   : > { %v5964_v58 = vpop.permute.xlu0 %2066 }
 0x3cb   : > { %2406 = vrot.lane.b32.xlu2 %v2398_v48, %s4324_s8  ;;  %v6030_v48 = vld [vmem:[%s4420_s11 + $0x98] sm:$0x3] }
 0x3cc   : > { %2404 = vrot.lane.b32.xlu1 %v2397_v57, %s4324_s8 }
 0x3cd   : > { %v5972_v31 = vpop.permute.xlu2 %2146 }
 0x3ce   : > { %v5974_v54 = vpop.permute.xlu1 %2068 }
 0x3d0   : > { %2430 = vrot.lane.b32.xlu0 %v2424_v0, %s4323_s6  ;;  %v2522_v0 = vmul.f32 %v6030_v48, %v2519_v22 }
 0x3d2   : > { %v5985_v38 = vpop.permute.xlu0 %2094 }
 0x3d3   : > { %2434 = vrot.lane.b32.xlu2 %v2426_v40, %s4323_s6  ;;  %v2521_v40 = vmul.f32 %v6007_v18, %v2519_v22  ;;  %v6064_v22 = vld [vmem:[%s4420_s11 + $0xb0] sm:$0xff] }
 0x3d4   : > { %2432 = vrot.lane.b32.xlu1 %v2425_v50, %s4323_s6  ;;  %v2539_v50 = vstv %s3975_s26  ;;  %7374 = vst [vmem:[#allocation11_spill] sm:$0xff] %v6064_v22  ;;  %s3940_s26 = sld [smem:[#allocation2 + $0x6c]] }
 0x3d5   : > { %v5990_v20 = vpop.permute.xlu2 %2166  ;;  %v2542_v17 = vmul.f32 %v6030_v48, %v2539_v50 }
 0x3d6   : > { %v5992_v52 = vpop.permute.xlu1 %2096 }
 0x3d8   : > { %2450 = vrot.lane.b32.xlu0 %v2444_v46, %s4324_s8  ;;  %v2540_v46 = vmul.f32 %v5977_v34, %v2539_v50 }
 0x3da   : > { %v5997_v42 = vpop.permute.xlu0 %2114 }
 0x3db   : > { %2454 = vrot.lane.b32.xlu2 %v2446_v47, %s4324_s8 }
 0x3dc   : > { %2452 = vrot.lane.b32.xlu1 %v2445_v55, %s4324_s8 }
 0x3dd   : > { %v6002_v45 = vpop.permute.xlu2 %2194 }
 0x3de   : > { %v6004_v43 = vpop.permute.xlu1 %2116 }
 0x3e0   : > { %2478 = vrot.lane.b32.xlu0 %v2472_v23, %s4323_s6  ;;  %v2541_v23 = vmul.f32 %v6007_v18, %v2539_v50  ;;  %v2587_v50 = vstv %s3978_s27  ;;  %s3989_s27 = sld [smem:[#allocation2 + $0x9d]] }
 0x3e2   : > { %v6012_v25 = vpop.permute.xlu0 %2142 }
 0x3e3   : > { %7369 = vst [vmem:[#allocation68_spill] sm:$0xff] %v6012_v25  ;;  %2482 = vrot.lane.b32.xlu2 %v2474_v63, %s4323_s6  ;;  %v2567_v63 = vstv %s3977_s17  ;;  %s3955_s17 = sld [smem:[#allocation2 + $0x7b]] }
 0x3e4   : > { %2480 = vrot.lane.b32.xlu1 %v2473_v11, %s4323_s6 }
 0x3e5   : > { %v6017_v24 = vpop.permute.xlu2 %2214 }
 0x3e6   : > { %v6019_v56 = vpop.permute.xlu1 %2144 }
 0x3e7   : > { %7370 = vst [vmem:[#allocation36_spill] sm:$0xff] %v6019_v56 }
 0x3e8   : > { %2498 = vrot.lane.b32.xlu0 %v2492_v39, %s4324_s8  ;;  %v2568_v39 = vmul.f32 %v6056_v36, %v2567_v63 }
 0x3ea   : > { %v6024_v26 = vpop.permute.xlu0 %2162 }
 0x3eb   : > { %7371 = vst [vmem:[#allocation25_spill] sm:$0xff] %v6024_v26  ;;  %2502 = vrot.lane.b32.xlu2 %v2494_v19, %s4324_s8  ;;  %v6094_v26 = vld [vmem:[%s4420_s11 + $0xb8] sm:$0xff] }
 0x3ec   : > { %2500 = vrot.lane.b32.xlu1 %v2493_v14, %s4324_s8  ;;  %7381 = vst [vmem:[#allocation37_spill] sm:$0xff] %v6094_v26  ;;  %v2638_v59 = vmul.f32 %v6094_v26, %v2635_v13 }
 0x3ed   : > { %v6032_v57 = vpop.permute.xlu2 %2242 }
 0x3ee   : > { %v6034_v44 = vpop.permute.xlu1 %2164 }
 0x3ef   : > { %7372 = vst [vmem:[#allocation27_spill] sm:$0xff] %v6034_v44  ;;  %v2615_v44 = vstv %s3980_s28  ;;  %s3970_s28 = sld [smem:[#allocation2 + $0x8a]] }
 0x3f0   : > { %2526 = vrot.lane.b32.xlu0 %v2520_v4, %s4323_s6  ;;  %v2570_v4 = vmul.f32 %v6064_v22, %v2567_v63 }
 0x3f2   : > { %v6039_v3 = vpop.permute.xlu0 %2190 }
 0x3f3   : > { %2530 = vrot.lane.b32.xlu2 %v2522_v0, %s4323_s6  ;;  %v6069_v0 = vld [vmem:[%s4420_s11 + $0xa8] sm:$0xff] }
 0x3f4   : > { %2528 = vrot.lane.b32.xlu1 %v2521_v40, %s4323_s6  ;;  %7375 = vst [vmem:[#allocation55_spill] sm:$0xff] %v6069_v0  ;;  %v2569_v40 = vmul.f32 %v6069_v0, %v2567_v63  ;;  %v2589_v63 = vmul.f32 %v6069_v0, %v2587_v50 }
 0x3f5   : > { %v6044_v47 = vpop.permute.xlu2 %2262 }
 0x3f6   : > { %v6046_v55 = vpop.permute.xlu1 %2192 }
 0x3f8   : > { %2546 = vrot.lane.b32.xlu0 %v2540_v46, %s4324_s8 }
 0x3fa   : > { %v6051_v11 = vpop.permute.xlu0 %2210 }
 0x3fb   : > { %2550 = vrot.lane.b32.xlu2 %v2542_v17, %s4324_s8  ;;  %v2588_v17 = vmul.f32 %v6056_v36, %v2587_v50 }
 0x3fc   : > { %2548 = vrot.lane.b32.xlu1 %v2541_v23, %s4324_s8 }
 0x3fd   : > { %v6059_v19 = vpop.permute.xlu2 %2290 }
 0x3fe   : > { %v6061_v14 = vpop.permute.xlu1 %2212 }
 0x400   : > { %2574 = vrot.lane.b32.xlu0 %v2568_v39, %s4323_s6  ;;  %v2590_v39 = vmul.f32 %v6064_v22, %v2587_v50  ;;  %v2617_v50 = vmul.f32 %v6064_v22, %v2615_v44 }
 0x402   : > { %v6072_v46 = vpop.permute.xlu0 %2238 }
 0x403   : > { %7376 = vst [vmem:[#allocation15_spill] sm:$0xff] %v6072_v46  ;;  %2578 = vrot.lane.b32.xlu2 %v2570_v4, %s4323_s6  ;;  %v2616_v4 = vmul.f32 %v6069_v0, %v2615_v44 }
 0x404   : > { %2576 = vrot.lane.b32.xlu1 %v2569_v40, %s4323_s6 }
 0x405   : > { %v6077_v23 = vpop.permute.xlu2 %2310 }
 0x406   : > { %7377 = vst [vmem:[#allocation26_spill] sm:$0xff] %v6077_v23  ;;  %v6079_v53 = vpop.permute.xlu1 %2240 }
 0x407   : > { %7378 = vst [vmem:[#allocation35_spill] sm:$0xff] %v6079_v53 }
 0x408   : > { %2594 = vrot.lane.b32.xlu0 %v2588_v17, %s4324_s8  ;;  %v2618_v17 = vmul.f32 %v6094_v26, %v2615_v44  ;;  %v2637_v44 = vmul.f32 %v6064_v22, %v2635_v13 }
 0x40a   : > { %v6084_v56 = vpop.permute.xlu0 %2258 }
 0x40b   : > { %7379 = vst [vmem:[#allocation23_spill] sm:$0xff] %v6084_v56  ;;  %2598 = vrot.lane.b32.xlu2 %v2590_v39, %s4324_s8  ;;  %v2636_v39 = vmul.f32 %v6069_v0, %v2635_v13 }
 0x40c   : > { %2596 = vrot.lane.b32.xlu1 %v2589_v63, %s4324_s8 }
 0x40d   : > { %v6089_v40 = vpop.permute.xlu2 %2338 }
 0x40e   : > { %v6091_v36 = vpop.permute.xlu1 %2260 }
 0x40f   : > { %7380 = vst [vmem:[#allocation42_spill] sm:$0xff] %v6091_v36 }
 0x410   : > { %2622 = vrot.lane.b32.xlu0 %v2616_v4, %s4323_s6  ;;  %v2663_v4 = vstv %s3983_s7  ;;  %s3990_s7 = sld [smem:[#allocation2 + $0x9e]] }
 0x411   : > { %v2665_v13 = vmul.f32 %v6094_v26, %v2663_v4 }
 0x412   : > { %v6099_v25 = vpop.permute.xlu0 %2286 }
 0x413   : > { %7382 = vst [vmem:[#allocation28_spill] sm:$0xff] %v6099_v25  ;;  %2626 = vrot.lane.b32.xlu2 %v2618_v17, %s4323_s6  ;;  %v2664_v17 = vmul.f32 %v6064_v22, %v2663_v4 }
 0x414   : > { %2624 = vrot.lane.b32.xlu1 %v2617_v50, %s4323_s6  ;;  %v6117_v50 = vld [vmem:[%s4420_s11 + $0xc0] sm:$0x3] }
 0x415   : > { %v6104_v63 = vpop.permute.xlu2 %2358  ;;  %7385 = vst [vmem:[#allocation40_spill] sm:$0xff] %v6117_v50 }
 0x416   : > { %v6106_v36 = vpop.permute.xlu1 %2288 }
 0x417   : > { %7383 = vst [vmem:[#allocation41_spill] sm:$0xff] %v6106_v36 }
 0x418   : > { %2642 = vrot.lane.b32.xlu0 %v2636_v39, %s4324_s8  ;;  %v2666_v39 = vmul.f32 %v6117_v50, %v2663_v4 }
 0x41a   : > { %v6111_v25 = vpop.permute.xlu0 %2306 }
 0x41b   : > { %7384 = vst [vmem:[#allocation45_spill] sm:$0xff] %v6111_v25  ;;  %2646 = vrot.lane.b32.xlu2 %v2638_v59, %s4324_s8  ;;  %v6126_v25 = vstv %s3943_s9  ;;  %v2683_v59 = vstv %s3984_s10  ;;  %s3964_s9 = sld [smem:[#allocation2 + $0x84]] }
 0x41c   : > { %2644 = vrot.lane.b32.xlu1 %v2637_v44, %s4324_s8  ;;  %v2034_v44 = vmul.f32 %v5808_v61, %v6126_v25  ;;  %v2686_v56 = vmul.f32 %v6117_v50, %v2683_v59  ;;  %v2685_v60 = vmul.f32 %v6094_v26, %v2683_v59  ;;  %s3992_s10 = sld [smem:[#allocation2 + $0xa0]] }
 0x41d   : > { %v6119_v0 = vpop.permute.xlu2 %2386 }
 0x41e   : > { %v6121_v36 = vpop.permute.xlu1 %2308  ;;  %v2057_v4 = vadd.f32 %v5915_v10, %v2034_v44 }
 0x41f   : > { %7386 = vst [vmem:[#allocation12_spill] sm:$0xff] %v6121_v36  ;;  %v2684_v36 = vmul.f32 %v6064_v22, %v2683_v59 }
 0x420   : > { %2670 = vrot.lane.b32.xlu0 %v2664_v17, %s4323_s6  ;;  %v2077_v22 = vadd.f32 %v5930_v32, %v2057_v4  ;;  %v6161_v32 = vld [vmem:[%s4420_s11 + $0xd8] sm:$0xff] }
 0x422   : > { %v6130_v53 = vpop.permute.xlu0 %2334 }
 0x423   : > { %2674 = vrot.lane.b32.xlu2 %v2666_v39, %s4323_s6  ;;  %v6143_v39 = vstv %s3952_s20  ;;  %s3958_s20 = sld [smem:[#allocation2 + $0x7e]] }
 0x424   : > { %2672 = vrot.lane.b32.xlu1 %v2665_v13, %s4323_s6  ;;  %v2711_v13 = vstv %s3986_s24  ;;  %v2178_v10 = vmul.f32 %v5859_v62, %v6143_v39  ;;  %s6243_s24 = sld [smem:[#allocation2 + $0x8d]] }
 0x425   : > { %v6135_v28 = vpop.permute.xlu2 %2406  ;;  %v2714_v4 = vmul.f32 %v6161_v32, %v2711_v13 }
 0x426   : > { %v6138_v17 = vpop.permute.xlu1 %2336  ;;  %v2181_v26 = vadd.f32 %v2178_v10, %v2077_v22  ;;  %v2082_v22 = vmul.f32 %v6169_v51, %v5823_v2 }
 0x428   : > { %2690 = vrot.lane.b32.xlu0 %v2684_v36, %s4324_s8  ;;  %v6153_v36 = vld [vmem:[%s4420_s11 + $0xc8] sm:$0xff]  ;;  %v2201_v10 = vadd.f32 %v6002_v45, %v2181_v26  ;;  %v2105_v34 = vadd.f32 %v5945_v16, %v2082_v22  ;;  %v2734_v26 = vmul.f32 %v6161_v32, %v2731_v8  ;;  %v2759_v16 = vstv %s3989_s27  ;;  %s3991_s27 = sld [smem:[#allocation2 + $0x9f]] }
 0x429   : > { %7387 = vst [vmem:[#allocation22_spill] sm:$0xff] %v6153_v36  ;;  %v2712_v59 = vmul.f32 %v6153_v36, %v2711_v13 }
 0x42a   : > { %v6148_v44 = vpop.permute.xlu0 %2354  ;;  %v2221_v23 = vadd.f32 %v6017_v24, %v2201_v10  ;;  %v2125_v22 = vadd.f32 %v5957_v33, %v2105_v34  ;;  %v2032_v33 = vmul.f32 %v5795_v27, %v6126_v25 }
 0x42b   : > { %2694 = vrot.lane.b32.xlu2 %v2686_v56, %s4324_s8  ;;  %v6166_v56 = vld [vmem:[%s4420_s11 + $0xd0] sm:$0xff] }
 0x42c   : > { %2692 = vrot.lane.b32.xlu1 %v2685_v60, %s4324_s8  ;;  %v2713_v60 = vmul.f32 %v6166_v56, %v2711_v13  ;;  %v2732_v13 = vmul.f32 %v6153_v36, %v2731_v8  ;;  %v6196_v36 = vstv %s3955_s17  ;;  %s3982_s17 = sld [smem:[#allocation2 + $0x96]] }
 0x42d   : > { %v6156_v50 = vpop.permute.xlu2 %2434  ;;  %v2226_v10 = vmul.f32 %v5874_v49, %v6196_v36 }
 0x42e   : > { %7388 = vst [vmem:[#allocation63_spill] sm:$0xff] %v6156_v50  ;;  %v6158_v46 = vpop.permute.xlu1 %2356 }
 0x42f   : > { %7389 = vst [vmem:[#allocation29_spill] sm:$0xff] %v6158_v46  ;;  %v6176_v46 = vstv %s3961_s5  ;;  %s6318_s5 = sld [smem:[#allocation2 + $0x90]] }
 0x430   : > { %2718 = vrot.lane.b32.xlu0 %v2712_v59, %s4323_s6  ;;  %v2322_v2 = vmul.f32 %v5920_v29, %v6176_v46  ;;  %v2760_v29 = vmul.f32 %v6166_v56, %v2759_v16 }
 0x432   : > { %v6174_v50 = vpop.permute.xlu0 %2382 }
 0x433   : > { %7390 = vst [vmem:[#allocation43_spill] sm:$0xff] %v6174_v50  ;;  %2722 = vrot.lane.b32.xlu2 %v2714_v4, %s4323_s6  ;;  %v2733_v4 = vmul.f32 %v6166_v56, %v2731_v8  ;;  %v6206_v8 = vstv %s3970_s28  ;;  %s3994_s28 = sld [smem:[#allocation5 + $0x2]] }
 0x434   : > { %2720 = vrot.lane.b32.xlu1 %v2713_v60, %s4323_s6  ;;  %v6194_v60 = vstv %s3940_s26  ;;  %s3988_s26 = sld [smem:[#allocation2 + $0x9c]] }
 0x435   : > { %v6181_v59 = vpop.permute.xlu2 %2454  ;;  %v1986_v24 = vmul.f32 %v5790_v7, %v6194_v60 }
 0x436   : > { %7391 = vst [vmem:[#allocation18_spill] sm:$0xff] %v6181_v59  ;;  %v6187_v45 = vpop.permute.xlu1 %2384  ;;  %v2055_v59 = vadd.f32 %v5952_v30, %v2032_v33 }
 0x437   : > { %7392 = vst [vmem:[#allocation13_spill] sm:$0xff] %v6187_v45  ;;  %v2325_v45 = vadd.f32 %v2322_v2, %v2221_v23  ;;  %v2009_v34 = vadd.f32 %v5892_v15, %v1986_v24  ;;  %v2229_v23 = vadd.f32 %v2226_v10, %v2125_v22  ;;  %v2033_v15 = vmul.f32 %v5790_v7, %v6126_v25 }
 0x438   : > { %2738 = vrot.lane.b32.xlu0 %v2732_v13, %s4324_s8  ;;  %v6229_v24 = vstv %s6190_s29  ;;  %v2075_v30 = vadd.f32 %v5964_v58, %v2055_v59  ;;  %v2176_v25 = vmul.f32 %v5846_v1, %v6143_v39  ;;  %s6439_s29 = sld [smem:[#allocation2 + $0xa4]] }
 0x439   : > { %v2345_v13 = vadd.f32 %v6089_v40, %v2325_v45  ;;  %v6220_v40 = vld [vmem:[%s4420_s11 + $0xe0] sm:$0xff]  ;;  %v2029_v22 = vadd.f32 %v5906_v21, %v2009_v34  ;;  %v2130_v10 = vmul.f32 %v5841_v12, %v6229_v24  ;;  %v2056_v33 = vadd.f32 %v5959_v37, %v2033_v15 }
 0x43a   : > { %v6203_v50 = vpop.permute.xlu0 %2402  ;;  %v2762_v45 = vmul.f32 %v6220_v40, %v2759_v16 }
 0x43b   : > { %7393 = vst [vmem:[#allocation24_spill] sm:$0xff] %v6203_v50  ;;  %2742 = vrot.lane.b32.xlu2 %v2734_v26, %s4324_s8  ;;  %v2365_v2 = vadd.f32 %v6104_v63, %v2345_v13  ;;  %v2466_v26 = vmul.f32 %v6007_v18, %v6206_v8  ;;  %v2779_v63 = vstv %s3990_s7  ;;  %v2249_v13 = vadd.f32 %v6032_v57, %v2229_v23  ;;  %s4325_s7 = smov 127  }
 0x43c   : > { %2740 = vrot.lane.b32.xlu1 %v2733_v4, %s4324_s8  ;;  %v2761_v4 = vmul.f32 %v6161_v32, %v2759_v16  ;;  %v6240_v16 = vstv %s3964_s9  ;;  %v2780_v57 = vmul.f32 %v6166_v56, %v2779_v63  ;;  %v2133_v23 = vadd.f32 %v2130_v10, %v2029_v22  ;;  %s4002_s9 = sld [smem:[#allocation2 + $0xa6]] }
 0x43d   : > { %v2483_v49 = vpop.permute.xlu2 %2482  ;;  %v2269_v58 = vadd.f32 %v6044_v47, %v2249_v13  ;;  %v2370_v59 = vmul.f32 %v5943_v6, %v6240_v16  ;;  %v2781_v37 = vmul.f32 %v6161_v32, %v2779_v63  ;;  %v2807_v6 = vstv %s3992_s10  ;;  %s4326_s10 = smov 110  }
 0x43e   : > { %v6217_v50 = vpop.permute.xlu1 %2404  ;;  %v2153_v15 = vadd.f32 %v5972_v31, %v2133_v23  ;;  %v6267_v22 = vstv %s3958_s20  ;;  %s4003_s20 = sld [smem:[#allocation2 + $0xa7]] }
 0x440   : > { %2766 = vrot.lane.b32.xlu0 %v2760_v29, %s4323_s6  ;;  %v2469_v29 = vadd.f32 %v2466_v26, %v2365_v2 }
 0x442   : > { %v6235_v18 = vpop.permute.xlu0 %2430  ;;  %v2489_v21 = vadd.f32 %v2483_v49, %v2469_v29  ;;  %v2179_v49 = vadd.f32 %v2176_v25, %v2075_v30  ;;  %v2782_v29 = vmul.f32 %v6220_v40, %v2779_v63  ;;  %v6278_v63 = vstv %s6243_s24  ;;  %v6284_v25 = vld [vmem:[%s4420_s11 + $0xe8] sm:$0x3]  ;;  %s3999_s24 = sld [smem:[#allocation2 + $0xa3]] }
 0x443   : > { %2770 = vrot.lane.b32.xlu2 %v2762_v45, %s4323_s6  ;;  %v2076_v45 = vadd.f32 %v5974_v54, %v2056_v33  ;;  %v2080_v54 = vmul.f32 %v5790_v7, %v6169_v51  ;;  %v2808_v7 = vmul.f32 %v6161_v32, %v2807_v6 }
 0x444   : > { %2768 = vrot.lane.b32.xlu1 %v2761_v4, %s4323_s6  ;;  %v2177_v4 = vmul.f32 %v5841_v12, %v6143_v39  ;;  %v2199_v47 = vadd.f32 %v6039_v3, %v2179_v49  ;;  %v2373_v39 = vadd.f32 %v2370_v59, %v2269_v58  ;;  %v2320_v3 = vmul.f32 %v5900_v5, %v6176_v46 }
 0x445   : > { %v2503_v34 = vpop.permute.xlu2 %2502  ;;  %v2103_v33 = vadd.f32 %v5985_v38, %v2080_v54  ;;  %v2810_v49 = vmul.f32 %v6284_v25, %v2807_v6  ;;  %v2081_v38 = vmul.f32 %v5808_v61, %v6169_v51  ;;  %v6313_v51 = vstv %s6274_s30  ;;  %s4005_s30 = sld [smem:[#allocation2 + $0xa9]] }
 0x446   : > { %v6251_v2 = vadd.f32 %v2503_v34, %v2489_v21  ;;  %v6253_v26 = vpop.permute.xlu1 %2432  ;;  %v2180_v13 = vadd.f32 %v2177_v4, %v2076_v45  ;;  %v2219_v30 = vadd.f32 %v6051_v11, %v2199_v47  ;;  %v2393_v31 = vadd.f32 %v6119_v0, %v2373_v39 }
 0x447   : > { %v2274_v11 = vmul.f32 %v5895_v41, %v6267_v22  ;;  %v2173_v34 = vadd.f32 %v5990_v20, %v2153_v15  ;;  %v2514_v0 = vmul.f32 %v6030_v48, %v6278_v63  ;;  %v2123_v20 = vadd.f32 %v5997_v42, %v2103_v33 }
 0x448   : > { %2786 = vrot.lane.b32.xlu0 %v2780_v57, %s4324_s8  ;;  %v2200_v21 = vadd.f32 %v6046_v55, %v2180_v13  ;;  %v2413_v23 = vadd.f32 %v6135_v28, %v2393_v31  ;;  %v2323_v45 = vadd.f32 %v2320_v3, %v2219_v30  ;;  %v2321_v55 = vmul.f32 %v5895_v41, %v6176_v46  ;;  %v7394_v3 = vld [vmem:[#allocation26_spill] sm:$0xff] }
 0x449   : > { %v2809_v28 = vmul.f32 %v6220_v40, %v2807_v6  ;;  %v2224_v48 = vmul.f32 %v5841_v12, %v6196_v36  ;;  %v2827_v4 = vstv %s6262_s25  ;;  %v1984_v46 = vmul.f32 %v5786_v35, %v6194_v60  ;;  %s4327_s25 = smov 119  }
 0x44a   : > { %v6269_v10 = vpop.permute.xlu0 %2450  ;;  %v2220_v59 = vadd.f32 %v6061_v14, %v2200_v21  ;;  %v2343_v14 = vadd.f32 %v6130_v53, %v2323_v45  ;;  %v2464_v42 = vmul.f32 %v5982_v9, %v6206_v8  ;;  %v2104_v12 = vadd.f32 %v5992_v52, %v2081_v38  ;;  %v7395_v52 = vld [vmem:[#allocation65_spill] sm:$0xff]  ;;  %v7399_v45 = vld [vmem:[#allocation15_spill] sm:$0xff]  ;;  %v7400_v38 = vld [vmem:[#allocation50_spill] sm:$0xff] }
 0x44b   : > { %2790 = vrot.lane.b32.xlu2 %v2782_v29, %s4324_s8  ;;  %v2277_v29 = vadd.f32 %v2274_v11, %v2173_v34  ;;  %v2828_v6 = vmul.f32 %v6161_v32, %v2827_v4  ;;  %v2227_v54 = vadd.f32 %v2224_v48, %v2123_v20  ;;  %v7396_v11 = vld [vmem:[#allocation29_spill] sm:$0xff]  ;;  %v2465_v34 = vmul.f32 %v7395_v52, %v6206_v8 }
 0x44c   : > { %2788 = vrot.lane.b32.xlu1 %v2781_v37, %s4324_s8  ;;  %v2517_v37 = vadd.f32 %v2514_v0, %v2413_v23  ;;  %v2324_v15 = vadd.f32 %v2321_v55, %v2220_v59  ;;  %v2363_v61 = vadd.f32 %v6148_v44, %v2343_v14  ;;  %v2225_v44 = vmul.f32 %v5859_v62, %v6196_v36  ;;  %v7398_v0 = vld [vmem:[#allocation62_spill] sm:$0xff] }
 0x44d   : > { %v2531_v57 = vpop.permute.xlu2 %2530  ;;  %v2297_v53 = vadd.f32 %v6059_v19, %v2277_v29  ;;  %v2124_v30 = vadd.f32 %v6004_v43, %v2104_v12  ;;  %v2830_v62 = vmul.f32 %v6284_v25, %v2827_v4  ;;  %v1985_v43 = vmul.f32 %v5795_v27, %v6194_v60 }
 0x44e   : > { %v6294_v58 = vpop.permute.xlu1 %2452  ;;  %v2537_v35 = vadd.f32 %v2531_v57, %v2517_v37  ;;  %v2344_v39 = vadd.f32 %v6138_v17, %v2324_v15  ;;  %v2467_v33 = vadd.f32 %v2464_v42, %v2363_v61  ;;  %v7397_v17 = vld [vmem:[#allocation33_spill] sm:$0xff]  ;;  %v2829_v23 = vmul.f32 %v6220_v40, %v2827_v4 }
 0x44f   : > { %v2317_v31 = vadd.f32 %v7394_v3, %v2297_v53  ;;  %v2007_v36 = vadd.f32 %v7397_v17, %v1984_v46  ;;  %v2128_v59 = vmul.f32 %v7398_v0, %v6229_v24  ;;  %v2247_v55 = vadd.f32 %v7399_v45, %v2227_v54  ;;  %v7401_v46 = vld [vmem:[#allocation23_spill] sm:$0xff]  ;;  %v7402_v37 = vld [vmem:[#allocation49_spill] sm:$0xff] }
 0x450   : > { %2814 = vrot.lane.b32.xlu0 %v2808_v7, %s4323_s6  ;;  %v2418_v7 = vmul.f32 %v7395_v52, %v6313_v51  ;;  %v2364_v57 = vadd.f32 %v7396_v11, %v2344_v39  ;;  %v2368_v48 = vmul.f32 %v5895_v41, %v6240_v16  ;;  %v6353_v29 = vstv %s6318_s5  ;;  %v7404_v41 = vld [vmem:[#allocation35_spill] sm:$0xff]  ;;  %v7406_v39 = vld [vmem:[#allocation18_spill] sm:$0xff]  ;;  %v7413_v45 = vld [vmem:[#allocation25_spill] sm:$0xff]  ;;  %s4006_s5 = sld [smem:[#allocation2 + $0xaa]] }
 0x451   : > { %v2027_v8 = vadd.f32 %v7400_v38, %v2007_v36  ;;  %v2267_v27 = vadd.f32 %v7401_v46, %v2247_v55  ;;  %v2008_v15 = vadd.f32 %v7402_v37, %v1985_v43  ;;  %v2129_v42 = vmul.f32 %v5846_v1, %v6229_v24  ;;  %v7412_v43 = vld [vmem:[#allocation72_spill] sm:$0xff]  ;;  %v7417_v37 = vld [vmem:[#allocation27_spill] sm:$0xff] }
 0x452   : > { %v2479_v47 = vpop.permute.xlu0 %2478  ;;  %v2421_v20 = vadd.f32 %v2418_v7, %v2317_v31  ;;  %v2468_v60 = vadd.f32 %v2465_v34, %v2364_v57  ;;  %v7408_v7 = vld [vmem:[#allocation42_spill] sm:$0xff]  ;;  %v7414_v38 = vld [vmem:[#allocation24_spill] sm:$0xff] }
 0x453   : > { %2818 = vrot.lane.b32.xlu2 %v2810_v49, %s4323_s6  ;;  %v2487_v49 = vadd.f32 %v2479_v47, %v2467_v33  ;;  %v7403_v47 = vld [vmem:[#allocation63_spill] sm:$0xff]  ;;  %v2371_v57 = vadd.f32 %v2368_v48, %v2267_v27  ;;  %v7409_v33 = vld [vmem:[#allocation74_spill] sm:$0xff] }
 0x454   : > { %2816 = vrot.lane.b32.xlu1 %v2809_v28, %s4323_s6  ;;  %v2228_v28 = vadd.f32 %v2225_v44, %v2124_v30  ;;  %v2441_v61 = vadd.f32 %v7403_v47, %v2421_v20  ;;  %s3979_s6 = sld [smem:[#allocation2 + $0x93]]  ;;  %v2131_v44 = vadd.f32 %v2128_v59, %v2027_v8  ;;  %v7407_v30 = vld [vmem:[#allocation11_spill] sm:$0xff]  ;;  %v2369_v1 = vmul.f32 %v7409_v33, %v6240_v16 }
 0x455   : > { %v2551_v13 = vpop.permute.xlu2 %2550  ;;  %v2562_v3 = vmul.f32 %v7407_v30, %v6353_v29  ;;  %v2512_v16 = vmul.f32 %v7395_v52, %v6278_v63  ;;  %v2273_v47 = vmul.f32 %v5900_v5, %v6267_v22  ;;  %v7418_v52 = vld [vmem:[#allocation67_spill] sm:$0xff]  ;;  %v7422_v5 = vld [vmem:[#allocation64_spill] sm:$0xff] }
 0x456   : > { %v6331_v19 = vadd.f32 %v2551_v13, %v2537_v35  ;;  %v2481_v21 = vpop.permute.xlu1 %2480  ;;  %v2248_v12 = vadd.f32 %v7404_v41, %v2228_v28  ;;  %v2461_v13 = vadd.f32 %v7406_v39, %v2441_v61  ;;  %v7415_v28 = vld [vmem:[#allocation36_spill] sm:$0xff] }
 0x457   : > { %v2488_v53 = vadd.f32 %v2481_v21, %v2468_v60  ;;  %v7410_v21 = vld [vmem:[#allocation68_spill] sm:$0xff] }
 0x458   : > { %2834 = vrot.lane.b32.xlu0 %v2828_v6, %s4324_s8  ;;  %v7405_v6 = vld [vmem:[#allocation19_spill] sm:$0xff]  ;;  %v2268_v11 = vadd.f32 %v7408_v7, %v2248_v12  ;;  %v2151_v34 = vadd.f32 %v7410_v21, %v2131_v44  ;;  %v2565_v0 = vadd.f32 %v2562_v3, %v2461_v13  ;;  %v7420_v44 = vld [vmem:[#allocation28_spill] sm:$0xff]  ;;  %v7421_v7 = vld [vmem:[#allocation45_spill] sm:$0xff] }
 0x459   : > { %v2028_v54 = vadd.f32 %v7405_v6, %v2008_v15  ;;  %v2513_v6 = vmul.f32 %v7418_v52, %v6278_v63 }
 0x45a   : > { %v2499_v14 = vpop.permute.xlu0 %2498  ;;  %v2171_v55 = vadd.f32 %v7413_v45, %v2151_v34  ;;  %v2607_v60 = vstv %s3979_s6  ;;  %s6484_s6 = sld [smem:[#allocation2 + $0xac]] }
 0x45b   : > { %2838 = vrot.lane.b32.xlu2 %v2830_v62, %s4324_s8  ;;  %v6350_v4 = vadd.f32 %v2499_v14, %v2487_v49  ;;  %v7411_v62 = vld [vmem:[#allocation43_spill] sm:$0xff]  ;;  %v2132_v36 = vadd.f32 %v2129_v42, %v2028_v54  ;;  %v2372_v49 = vadd.f32 %v2369_v1, %v2268_v11  ;;  %v7416_v14 = vld [vmem:[#allocation13_spill] sm:$0xff] }
 0x45c   : > { %2836 = vrot.lane.b32.xlu1 %v2829_v23, %s4324_s8  ;;  %v2391_v17 = vadd.f32 %v7411_v62, %v2371_v57  ;;  %v2272_v23 = vmul.f32 %v7412_v43, %v6267_v22  ;;  %v2416_v22 = vmul.f32 %v7422_v5, %v6313_v51  ;;  %v7423_v1 = vld [vmem:[#allocation41_spill] sm:$0xff]  ;;  %s3985_s8 = sld [smem:[#allocation2 + $0x99]] }
 0x45d   : > { %v2579_v35 = vpop.permute.xlu2 %2578  ;;  %v2152_v20 = vadd.f32 %v7415_v28, %v2132_v36  ;;  %v2392_v46 = vadd.f32 %v7416_v14, %v2372_v49  ;;  %v7424_v36 = vld [vmem:[#allocation12_spill] sm:$0xff] }
 0x45e   : > { %v2501_v31 = vpop.permute.xlu1 %2500  ;;  %v2411_v8 = vadd.f32 %v7414_v38, %v2391_v17  ;;  %v2585_v48 = vadd.f32 %v2579_v35, %v2565_v0  ;;  %v2275_v41 = vadd.f32 %v2272_v23, %v2171_v55  ;;  %v7419_v35 = vld [vmem:[#allocation37_spill] sm:$0xff]  ;;  %v2417_v0 = vmul.f32 %v5982_v9, %v6313_v51  ;;  %v7425_v38 = vld [vmem:[#allocation14_spill] sm:$0xff]  ;;  %v7426_v9 = vld [vmem:[#allocation55_spill] sm:$0xff] }
 0x45f   : > { %v6368_v24 = vadd.f32 %v2501_v31, %v2488_v53  ;;  %v2172_v15 = vadd.f32 %v7417_v37, %v2152_v20  ;;  %v2412_v12 = vadd.f32 %v6217_v50, %v2392_v46  ;;  %v2610_v54 = vmul.f32 %v7419_v35, %v2607_v60 }
 0x460   : > { %v2515_v53 = vadd.f32 %v2512_v16, %v2411_v8  ;;  %v2295_v39 = vadd.f32 %v7420_v44, %v2275_v41  ;;  %v2560_v8 = vmul.f32 %v7425_v38, %v6353_v29  ;;  %v2561_v51 = vmul.f32 %v7426_v9, %v6353_v29 }
 0x461   : > { %v2276_v3 = vadd.f32 %v2273_v47, %v2172_v15  ;;  %v2516_v57 = vadd.f32 %v2513_v6, %v2412_v12  ;;  %v2613_v50 = vadd.f32 %v2610_v54, %v6251_v2  ;;  %v2608_v47 = vmul.f32 %v7426_v9, %v2607_v60 }
 0x462   : > { %v2527_v59 = vpop.permute.xlu0 %2526  ;;  %v2315_v11 = vadd.f32 %v7421_v7, %v2295_v39 }
 0x463   : > { %v2535_v13 = vadd.f32 %v2527_v59, %v2515_v53  ;;  %v2296_v21 = vadd.f32 %v7423_v1, %v2276_v3 }
 0x464   : > { %v2419_v23 = vadd.f32 %v2416_v22, %v2315_v11  ;;  %v2751_v11 = vstv %s3988_s26  ;;  %s4012_s26 = sld [smem:[#allocation2 + $0xb0]] }
 0x465   : > { %v2599_v27 = vpop.permute.xlu2 %2598  ;;  %v2316_v43 = vadd.f32 %v7424_v36, %v2296_v21 }
 0x466   : > { %v6383_v61 = vadd.f32 %v2599_v27, %v2585_v48  ;;  %v2529_v42 = vpop.permute.xlu1 %2528  ;;  %v2439_v45 = vadd.f32 %v6235_v18, %v2419_v23  ;;  %v7427_v23 = vld [vmem:[#allocation40_spill] sm:$0xff] }
 0x467   : > { %v2536_v63 = vadd.f32 %v2529_v42, %v2516_v57  ;;  %v2420_v49 = vadd.f32 %v2417_v0, %v2316_v43  ;;  %v2754_v57 = vmul.f32 %v6220_v40, %v2751_v11 }
 0x468   : > { %v2459_v2 = vadd.f32 %v6269_v10, %v2439_v45 }
 0x469   : > { %v2440_v16 = vadd.f32 %v6253_v26, %v2420_v49  ;;  %v2611_v26 = vadd.f32 %v2608_v47, %v6350_v4  ;;  %v6434_v47 = vstv %s3994_s28  ;;  %s4015_s28 = sld [smem:[#allocation2 + $0xb3]] }
 0x46a   : > { %v2547_v31 = vpop.permute.xlu0 %2546  ;;  %v2563_v14 = vadd.f32 %v2560_v8, %v2459_v2  ;;  %v2799_v8 = vstv %s3991_s27  ;;  %s4009_s27 = sld [smem:[#allocation2 + $0xad]] }
 0x46b   : > { %v6393_v33 = vadd.f32 %v2547_v31, %v2535_v13  ;;  %v2460_v48 = vadd.f32 %v6294_v58, %v2440_v16  ;;  %v2609_v58 = vmul.f32 %v7407_v30, %v2607_v60  ;;  %v2703_v60 = vstv %s3985_s8  ;;  %s4011_s8 = sld [smem:[#allocation2 + $0xaf]] }
 0x46d   : > { %v2627_v34 = vpop.permute.xlu2 %2626  ;;  %v2564_v18 = vadd.f32 %v2561_v51, %v2460_v48  ;;  %v2612_v29 = vadd.f32 %v2609_v58, %v6368_v24  ;;  %v2706_v24 = vmul.f32 %v6161_v32, %v2703_v60 }
 0x46e   : > { %v2633_v62 = vadd.f32 %v2627_v34, %v2613_v50  ;;  %v2549_v17 = vpop.permute.xlu1 %2548  ;;  %v2655_v34 = vstv %s3982_s17  ;;  %s4014_s17 = sld [smem:[#allocation2 + $0xb2]] }
 0x46f   : > { %v6400_v59 = vadd.f32 %v2549_v17, %v2536_v63  ;;  %v2709_v1 = vadd.f32 %v2706_v24, %v6383_v61  ;;  %v2658_v0 = vmul.f32 %v7427_v23, %v2655_v34  ;;  %v2657_v24 = vmul.f32 %v7419_v35, %v2655_v34 }
 0x471   : > { %v2661_v2 = vadd.f32 %v2658_v0, %v6331_v19  ;;  %v2660_v35 = vadd.f32 %v2657_v24, %v6400_v59  ;;  %v2800_v0 = vmul.f32 %v6161_v32, %v2799_v8  ;;  %v6461_v59 = vld [vmem:[%s4420_s11 + $0x10] sm:$0xff]  ;;  %v6518_v24 = vld [vmem:[%s4420_s11 + $0x38] sm:$0xff] }
 0x472   : > { %v2575_v55 = vpop.permute.xlu0 %2574 }
 0x473   : > { %v2583_v46 = vadd.f32 %v2575_v55, %v2563_v14 }
 0x475   : > { %v2647_v28 = vpop.permute.xlu2 %2646 }
 0x476   : > { %v2577_v20 = vpop.permute.xlu1 %2576  ;;  %v2653_v22 = vadd.f32 %v2647_v28, %v2633_v62 }
 0x477   : > { %v2584_v15 = vadd.f32 %v2577_v20, %v2564_v18  ;;  %v2802_v20 = vmul.f32 %v6284_v25, %v2799_v8  ;;  %v2752_v18 = vmul.f32 %v6166_v56, %v2751_v11 }
 0x478   : > { %v2757_v21 = vadd.f32 %v2754_v57, %v2653_v22 }
 0x47a   : > { %v2595_v27 = vpop.permute.xlu0 %2594 }
 0x47b   : > { %v6410_v37 = vadd.f32 %v2595_v27, %v2583_v46  ;;  %v7428_v46 = vld [vmem:[#allocation22_spill] sm:$0xff] }
 0x47c   : > { %v2704_v27 = vmul.f32 %v7428_v46, %v2703_v60 }
 0x47d   : > { %v2675_v10 = vpop.permute.xlu2 %2674 }
 0x47e   : > { %v2597_v42 = vpop.permute.xlu1 %2596  ;;  %v2681_v16 = vadd.f32 %v2675_v10, %v2661_v2 }
 0x47f   : > { %v6413_v41 = vadd.f32 %v2597_v42, %v2584_v15  ;;  %v2705_v42 = vmul.f32 %v6166_v56, %v2703_v60 }
 0x481   : > { %v2708_v56 = vadd.f32 %v2705_v42, %v6413_v41 }
 0x482   : > { %v2623_v12 = vpop.permute.xlu0 %2622 }
 0x483   : > { %v2631_v53 = vadd.f32 %v2623_v12, %v2611_v26  ;;  %v2707_v12 = vadd.f32 %v2704_v27, %v6410_v37 }
 0x485   : > { %v2695_v52 = vpop.permute.xlu2 %2694 }
 0x486   : > { %v2625_v6 = vpop.permute.xlu1 %2624  ;;  %v2701_v61 = vadd.f32 %v2695_v52, %v2681_v16  ;;  %v2753_v52 = vmul.f32 %v6161_v32, %v2751_v11 }
 0x487   : > { %v2632_v54 = vadd.f32 %v2625_v6, %v2612_v29 }
 0x488   : > { %v2805_v14 = vadd.f32 %v2802_v20, %v2701_v61 }
 0x48a   : > { %v2643_v44 = vpop.permute.xlu0 %2642 }
 0x48b   : > { %v2651_v51 = vadd.f32 %v2643_v44, %v2631_v53  ;;  %v2656_v44 = vmul.f32 %v7407_v30, %v2655_v34 }
 0x48d   : > { %v2723_v39 = vpop.permute.xlu2 %2722  ;;  %v2755_v25 = vadd.f32 %v2752_v18, %v2651_v51  ;;  %v2659_v30 = vadd.f32 %v2656_v44, %v6393_v33  ;;  %v2885_v51 = vstv %s3999_s24  ;;  %v2969_v18 = vstv %s4005_s30  ;;  %s4021_s24 = sld [smem:[#allocation2 + $0xb9]] }
 0x48e   : > { %v2645_v13 = vpop.permute.xlu1 %2644  ;;  %v2729_v17 = vadd.f32 %v2723_v39, %v2709_v1  ;;  %s4023_s30 = sld [smem:[#allocation2 + $0xbb]] }
 0x48f   : > { %v2652_v58 = vadd.f32 %v2645_v13, %v2632_v54 }
 0x491   : > { %v2756_v54 = vadd.f32 %v2753_v52, %v2652_v58  ;;  %v3015_v52 = vstv %s6484_s6  ;;  %s4024_s6 = sld [smem:[#allocation2 + $0xbc]] }
 0x492   : > { %v6418_v3 = vpop.permute.xlu0 %2670 }
 0x493   : > { %v2679_v41 = vadd.f32 %v6418_v3, %v2659_v30  ;;  %v6523_v30 = vld [vmem:[%s4420_s11 + $0x28] sm:$0xff] }
 0x495   : > { %v2743_v31 = vpop.permute.xlu2 %2742 }
 0x496   : > { %v6420_v7 = vpop.permute.xlu1 %2672  ;;  %v2749_v45 = vadd.f32 %v2743_v31, %v2729_v17 }
 0x497   : > { %v2680_v33 = vadd.f32 %v6420_v7, %v2660_v35 }
 0x49a   : > { %v6422_v4 = vpop.permute.xlu0 %2690 }
 0x49b   : > { %v2699_v34 = vadd.f32 %v6422_v4, %v2679_v41  ;;  %v3119_v41 = vstv %s4015_s28  ;;  %s6643_s28 = sld [smem:[#allocation2 + $0xab]] }
 0x49d   : > { %v2771_v5 = vpop.permute.xlu2 %2770 }
 0x49e   : > { %v6426_v50 = vpop.permute.xlu1 %2692  ;;  %v2777_v36 = vadd.f32 %v2771_v5, %v2757_v21 }
 0x49f   : > { %v2700_v3 = vadd.f32 %v6426_v50, %v2680_v33  ;;  %v6546_v33 = vld [vmem:[%s4420_s11 + $0x40] sm:$0xff] }
 0x4a2   : > { %v2719_v63 = vpop.permute.xlu0 %2718 }
 0x4a3   : > { %v2727_v29 = vadd.f32 %v2719_v63, %v2707_v12  ;;  %v2899_v63 = vstv %s6439_s29  ;;  %s6529_s29 = sld [smem:[#allocation2 + $0xb5]] }
 0x4a5   : > { %v2791_v43 = vpop.permute.xlu2 %2790 }
 0x4a6   : > { %v2797_v55 = vadd.f32 %v2791_v43, %v2777_v36  ;;  %v2721_v62 = vpop.permute.xlu1 %2720  ;;  %v6450_v43 = vld [vmem:[%s4420_s11] sm:$0xff] }
 0x4a7   : > { %v2728_v5 = vadd.f32 %v2721_v62, %v2708_v56  ;;  %v2900_v23 = vmul.f32 %v6450_v43, %v2899_v63  ;;  %v2801_v62 = vmul.f32 %v6220_v40, %v2799_v8  ;;  %v2941_v8 = vstv %s4003_s20  ;;  %s4001_s20 = sld [smem:[#allocation2 + $0xa5]] }
 0x4a8   : > { %v2848_v49 = vadd.f32 %v2797_v55, %v2749_v45  ;;  %v2803_v55 = vadd.f32 %v2800_v0, %v2699_v34  ;;  %v2886_v27 = vmul.f32 %v6450_v43, %v2885_v51  ;;  %v2970_v56 = vmul.f32 %v6461_v59, %v2969_v18  ;;  %v6541_v34 = vld [vmem:[%s4420_s11 + $0x50] sm:$0xff] }
 0x4a9   : > { %v2804_v32 = vadd.f32 %v2801_v62, %v2700_v3  ;;  %v3145_v35 = vstv %s6529_s29  ;;  %s6645_s29 = sld [smem:[#allocation2 + $0xbe]] }
 0x4aa   : > { %v2739_v38 = vpop.permute.xlu0 %2738  ;;  %v3146_v0 = vmul.f32 %v6541_v34, %v3145_v35 }
 0x4ab   : > { %v2747_v60 = vadd.f32 %v2739_v38, %v2727_v29 }
 0x4ad   : > { %v2819_v28 = vpop.permute.xlu2 %2818 }
 0x4ae   : > { %v2741_v48 = vpop.permute.xlu1 %2740  ;;  %v2825_v15 = vadd.f32 %v2819_v28, %v2805_v14  ;;  %v2943_v14 = vmul.f32 %v6461_v59, %v2941_v8 }
 0x4af   : > { %v2748_v1 = vadd.f32 %v2741_v48, %v2728_v5 }
 0x4b2   : > { %v2767_v9 = vpop.permute.xlu0 %2766 }
 0x4b3   : > { %v2775_v6 = vadd.f32 %v2767_v9, %v2755_v25 }
 0x4b5   : > { %v2839_v19 = vpop.permute.xlu2 %2838 }
 0x4b6   : > { %v2845_v10 = vadd.f32 %v2839_v19, %v2825_v15  ;;  %v2769_v26 = vpop.permute.xlu1 %2768  ;;  %v6473_v15 = vld [vmem:[%s4420_s11 + $0x18] sm:$0xff] }
 0x4b7   : > { %v2776_v11 = vadd.f32 %v2769_v26, %v2756_v54  ;;  %v2971_v19 = vmul.f32 %v6473_v15, %v2969_v18  ;;  %v2989_v26 = vstv %s4006_s5  ;;  %v2944_v44 = vmul.f32 %v6473_v15, %v2941_v8  ;;  %s4004_s5 = sld [smem:[#allocation2 + $0xa8]] }
 0x4b8   : > { %v2853_v53 = vadd.f32 %v6434_v47, %v2845_v10  ;;  %v2991_v58 = vmul.f32 %v6473_v15, %v2989_v26  ;;  %v2990_v5 = vmul.f32 %v6461_v59, %v2989_v26 }
 0x4ba   : > { %v2856_v39 = vadd.f32 %v2853_v53, %v2848_v49  ;;  %v2787_v31 = vpop.permute.xlu0 %2786  ;;  %v2921_v49 = vstv %s4002_s9  ;;  %v6494_v53 = vld [vmem:[%s4420_s11 + $0x30] sm:$0xff]  ;;  %s4020_s9 = sld [smem:[#allocation2 + $0xb8]] }
 0x4bb   : > { %v2795_v13 = vadd.f32 %v2787_v31, %v2775_v6  ;;  %v2923_v4 = vmul.f32 %v6461_v59, %v2921_v49  ;;  %v2924_v25 = vmul.f32 %v6473_v15, %v2921_v49  ;;  %v3017_v29 = vmul.f32 %v6494_v53, %v3015_v52 }
 0x4bc   : > { %v2859_v37 = vmax.f32 %v2856_v39, 0.0  ;;  %v3051_v39 = vstv %s4011_s8  ;;  %s6600_s8 = sld [smem:[#allocation2 + $0xbf]] }
 0x4bd   : > { %v2846_v22 = vadd.f32 %v2795_v13, %v2747_v60  ;;  %v3052_v31 = vmul.f32 %v6494_v53, %v3051_v39  ;;  %v6508_v60 = vld [vmem:[%s4420_s11 + $0x20] sm:$0x3]  ;;  %v3071_v13 = vstv %s4012_s26  ;;  %s4029_s26 = sld [smem:[#allocation2 + $0xc1]] }
 0x4be   : > { %2867 = vrot.lane.b32.xlu2 %v2859_v37, %s4325_s7  ;;  %v2789_v57 = vpop.permute.xlu1 %2788  ;;  %v2972_v54 = vmul.f32 %v6508_v60, %v2969_v18  ;;  %v3072_v37 = vmul.f32 %v6494_v53, %v3071_v13  ;;  %v3073_v3 = vmul.f32 %v6518_v24, %v3071_v13  ;;  %v3229_v18 = vstv %s4023_s30  ;;  %s4013_s30 = sld [smem:[#allocation2 + $0xb1]] }
 0x4bf   : > { %v2796_v21 = vadd.f32 %v2789_v57, %v2776_v11  ;;  %v2992_v11 = vmul.f32 %v6508_v60, %v2989_v26 }
 0x4c1   : > { %v2847_v17 = vadd.f32 %v2796_v21, %v2748_v1  ;;  %v3016_v1 = vmul.f32 %v6523_v30, %v3015_v52  ;;  %v3029_v21 = vstv %s4009_s27  ;;  %v3249_v52 = vstv %s4024_s6  ;;  %s4030_s27 = sld [smem:[#allocation2 + $0xc2]] }
 0x4c2   : > { %v2815_v36 = vpop.permute.xlu0 %2814  ;;  %s4039_s6 = sld [smem:[#allocation2 + $0xcb]] }
 0x4c3   : > { %v2823_v2 = vadd.f32 %v2815_v36, %v2803_v55  ;;  %v3031_v36 = vmul.f32 %v6494_v53, %v3029_v21 }
 0x4c6   : > { %2904 = vrot.lane.b32.xlu2 %v2900_v23, %s4326_s10  ;;  %v2817_v45 = vpop.permute.xlu1 %2816  ;;  %v3053_v23 = vmul.f32 %v6518_v24, %v3051_v39 }
 0x4c7   : > { %v2824_v7 = vadd.f32 %v2817_v45, %v2804_v32  ;;  %v3054_v45 = vmul.f32 %v6546_v33, %v3051_v39  ;;  %v3181_v32 = vstv %s4020_s9  ;;  %v6607_v39 = vld [vmem:[%s4420_s11 + $0x60] sm:$0xff]  ;;  %s4010_s9 = sld [smem:[#allocation2 + $0xae]] }
 0x4ca   : > { %v2835_v38 = vpop.permute.xlu0 %2834 }
 0x4cb   : > { %v2843_v16 = vadd.f32 %v2835_v38, %v2823_v2  ;;  %v3074_v38 = vmul.f32 %v6546_v33, %v3071_v13  ;;  %v3289_v13 = vstv %s6600_s8  ;;  %s6736_s8 = sld [smem:[#allocation2 + $0xb4]] }
 0x4cd   : > { %v2851_v28 = vadd.f32 %v6434_v47, %v2843_v16 }
 0x4ce   : > { %2930 = vrot.lane.b32.xlu2 %v2923_v4, %s4327_s25  ;;  %v2837_v50 = vpop.permute.xlu1 %2836 }
 0x4cf   : > { %v2854_v61 = vadd.f32 %v2851_v28, %v2846_v22  ;;  %v2844_v40 = vadd.f32 %v2837_v50, %v2824_v7  ;;  %v3099_v22 = vstv %s4014_s17  ;;  %v6566_v7 = vld [vmem:[%s4420_s11 + $0x68] sm:$0xff]  ;;  %s6614_s17 = sld [smem:[#allocation2 + $0xa2]] }
 0x4d0   : > { %v3100_v57 = vmul.f32 %v6518_v24, %v3099_v22  ;;  %v3101_v4 = vmul.f32 %v6546_v33, %v3099_v22  ;;  %v3184_v28 = vmul.f32 %v6566_v7, %v3181_v32  ;;  %v6571_v50 = vld [vmem:[%s4420_s11 + $0x48] sm:$0x3] }
 0x4d1   : > { %v2857_v20 = vmax.f32 %v2854_v61, 0.0  ;;  %v2852_v48 = vadd.f32 %v6434_v47, %v2844_v40  ;;  %v6478_v47 = vld [vmem:[%s4420_s11 + $0x8] sm:$0xff]  ;;  %v3102_v61 = vmul.f32 %v6571_v50, %v3099_v22  ;;  %v6575_v40 = vstv %s4001_s20  ;;  %s4033_s20 = sld [smem:[#allocation2 + $0xc5]] }
 0x4d2   : > { %v2887_v42 = vmul.f32 %v6478_v47, %v2885_v51  ;;  %v2901_v10 = vmul.f32 %v6478_v47, %v2899_v63  ;;  %v2922_v12 = vmul.f32 %v6478_v47, %v2921_v49  ;;  %v2942_v6 = vmul.f32 %v6478_v47, %v2941_v8  ;;  %v6555_v49 = vld [vmem:[%s4420_s11 + $0x58] sm:$0xff] }
 0x4d3   : > { %v2855_v9 = vadd.f32 %v2852_v48, %v2847_v17  ;;  %2863 = vrot.lane.b32.xlu0 %v2857_v20, %s4325_s7  ;;  %v3030_v63 = vmul.f32 %v6523_v30, %v3029_v21  ;;  %v3120_v17 = vmul.f32 %v6518_v24, %v3119_v41  ;;  %v3121_v8 = vmul.f32 %v6546_v33, %v3119_v41 }
 0x4d4   : > { %v3201_v20 = vstv %s4021_s24  ;;  %v3122_v51 = vmul.f32 %v6571_v50, %v3119_v41  ;;  %v3230_v21 = vmul.f32 %v6607_v39, %v3229_v18  ;;  %s6693_s24 = sld [smem:[#allocation2 + $0xc7]] }
 0x4d5   : > { %v2858_v46 = vmax.f32 %v2855_v9, 0.0  ;;  %v3204_v9 = vmul.f32 %v6566_v7, %v3201_v20  ;;  %v2879_v41 = vstv %s6614_s17  ;;  %s6771_s17 = sld [smem:[#allocation2 + $0xc8]] }
 0x4d6   : > { %2950 = vrot.lane.b32.xlu2 %v2943_v14, %s4326_s10  ;;  %v2915_v14 = vmul.f32 %v6461_v59, %v6575_v40 }
 0x4d7   : > { %2865 = vrot.lane.b32.xlu1 %v2858_v46, %s4325_s7  ;;  %s6538_s7 = sld [smem:[#allocation2 + $0xb6]] }
 0x4db   : > { %2890 = vrot.lane.b32.xlu0 %v2886_v27, %s4327_s25  ;;  %v3147_v27 = vmul.f32 %v6555_v49, %v3145_v35 }
 0x4dd   : > { %v3159_v55 = vstv %s6538_s7  ;;  %s4032_s7 = sld [smem:[#allocation2 + $0xc4]] }
 0x4de   : > { %2978 = vrot.lane.b32.xlu2 %v2971_v19, %s4327_s25  ;;  %v3161_v2 = vmul.f32 %v6555_v49, %v3159_v55 }
 0x4df   : > { %2892 = vrot.lane.b32.xlu1 %v2887_v42, %s4327_s25 }
 0x4e3   : > { %2906 = vrot.lane.b32.xlu0 %v2901_v10, %s4326_s10  ;;  %v6590_v10 = vld [vmem:[%s4420_s11 + $0x70] sm:$0x3] }
 0x4e4   : > { %v3232_v26 = vmul.f32 %v6590_v10, %v3229_v18 }
 0x4e6   : > { %2998 = vrot.lane.b32.xlu2 %v2991_v58, %s4326_s10  ;;  %v3160_v58 = vmul.f32 %v6541_v34, %v3159_v55 }
 0x4e7   : > { %2928 = vrot.lane.b32.xlu1 %v2922_v12, %s4327_s25  ;;  %v6596_v12 = vstv %s4004_s5  ;;  %s4038_s5 = sld [smem:[#allocation2 + $0xca]] }
 0x4eb   : > { %2932 = vrot.lane.b32.xlu0 %v2924_v25, %s4327_s25  ;;  %v3182_v25 = vmul.f32 %v6555_v49, %v3181_v32 }
 0x4ee   : > { %3022 = vrot.lane.b32.xlu2 %v3017_v29, %s4327_s25 }
 0x4ef   : > { %2948 = vrot.lane.b32.xlu1 %v2942_v6, %s4326_s10  ;;  %v2963_v6 = vmul.f32 %v6473_v15, %v6596_v12 }
 0x4f3   : > { %2952 = vrot.lane.b32.xlu0 %v2944_v44, %s4326_s10  ;;  %v3252_v44 = vmul.f32 %v6590_v10, %v3249_v52 }
 0x4f6   : > { %3058 = vrot.lane.b32.xlu2 %v3052_v31, %s4327_s25  ;;  %v3183_v31 = vmul.f32 %v6607_v39, %v3181_v32 }
 0x4f7   : > { %2976 = vrot.lane.b32.xlu1 %v2970_v56, %s4327_s25 }
 0x4fb   : > { %2980 = vrot.lane.b32.xlu0 %v2972_v54, %s4327_s25  ;;  %v3202_v54 = vmul.f32 %v6555_v49, %v3201_v20 }
 0x4fe   : > { %3078 = vrot.lane.b32.xlu2 %v3072_v37, %s4326_s10 }
 0x4ff   : > { %2996 = vrot.lane.b32.xlu1 %v2990_v5, %s4326_s10 }
 0x503   : > { %3000 = vrot.lane.b32.xlu0 %v2992_v11, %s4326_s10  ;;  %v6619_v11 = vld [vmem:[%s4420_s11 + $0x78] sm:$0xff] }
 0x504   : > { %v3290_v22 = vmul.f32 %v6619_v11, %v3289_v13 }
 0x506   : > { %3106 = vrot.lane.b32.xlu2 %v3100_v57, %s4327_s25  ;;  %v3203_v57 = vmul.f32 %v6607_v39, %v3201_v20 }
 0x507   : > { %3020 = vrot.lane.b32.xlu1 %v3016_v1, %s4327_s25 }
 0x50b   : > { %3034 = vrot.lane.b32.xlu0 %v3030_v63, %s4326_s10  ;;  %v6630_v63 = vstv %s4029_s26  ;;  %s4041_s26 = sld [smem:[#allocation2 + $0xcd]] }
 0x50e   : > { %3126 = vrot.lane.b32.xlu2 %v3120_v17, %s4326_s10 }
 0x50f   : > { %3036 = vrot.lane.b32.xlu1 %v3031_v36, %s4326_s10 }
 0x513   : > { %3060 = vrot.lane.b32.xlu0 %v3053_v23, %s4327_s25  ;;  %v6636_v23 = vld [vmem:[%s4420_s11 + $0x88] sm:$0xff] }
 0x514   : > { %v3313_v35 = vmul.f32 %v6636_v23, %v6630_v63 }
 0x516   : > { %3150 = vrot.lane.b32.xlu2 %v3146_v0, %s4327_s25  ;;  %v2880_v0 = vmul.f32 %v6450_v43, %v2879_v41  ;;  %v6650_v43 = vstv %s4030_s27  ;;  %s4042_s27 = sld [smem:[#allocation2 + $0xce]] }
 0x517   : > { %3062 = vrot.lane.b32.xlu1 %v3054_v45, %s4327_s25  ;;  %v3231_v45 = vmul.f32 %v6566_v7, %v3229_v18 }
 0x518   : > { %v2868_v62 = vpop.permute.xlu2 %2867 }
 0x519   : > { %3997 = vst.msk [vmem:[%s5236_s4 + $0x2f] sm:$0x1] %vm2876_vm8, %v2868_v62  ;;  %v3250_v62 = vmul.f32 %v6607_v39, %v3249_v52 }
 0x51b   : > { %3080 = vrot.lane.b32.xlu0 %v3073_v3, %s4326_s10 }
 0x51e   : > { %3166 = vrot.lane.b32.xlu2 %v3161_v2, %s4326_s10 }
 0x51f   : > { %3082 = vrot.lane.b32.xlu1 %v3074_v38, %s4326_s10 }
 0x520   : > { %v6563_v16 = vpop.permute.xlu2 %2904 }
 0x523   : > { %3108 = vrot.lane.b32.xlu0 %v3101_v4, %s4327_s25  ;;  %v2881_v4 = vmul.f32 %v6478_v47, %v2879_v41 }
 0x526   : > { %3192 = vrot.lane.b32.xlu2 %v3184_v28, %s4327_s25  ;;  %v3333_v28 = vmul.f32 %v6636_v23, %v6650_v43 }
 0x527   : > { %3110 = vrot.lane.b32.xlu1 %v3102_v61, %s4327_s25  ;;  %v3009_v61 = vstv %s6643_s28  ;;  %s4019_s28 = sld [smem:[#allocation2 + $0xb7]] }
 0x528   : > { %v2931_v48 = vpop.permute.xlu2 %2930 }
 0x529   : > { %v2938_v46 = vadd.f32 %v2931_v48, %v2915_v14  ;;  %v3011_v48 = vmul.f32 %v6494_v53, %v3009_v61  ;;  %v3275_v14 = vstv %s6645_s29  ;;  %s4047_s29 = sld [smem:[#allocation2 + $0xd3]] }
 0x52b   : > { %3128 = vrot.lane.b32.xlu0 %v3121_v8, %s4326_s10  ;;  %v3251_v8 = vmul.f32 %v6566_v7, %v3249_v52  ;;  %v6679_v52 = vld [vmem:[%s4420_s11 + $0x80] sm:$0xff] }
 0x52e   : > { %3212 = vrot.lane.b32.xlu2 %v3204_v9, %s4326_s10 }
 0x52f   : > { %3130 = vrot.lane.b32.xlu1 %v3122_v51, %s4326_s10  ;;  %v3276_v51 = vmul.f32 %v6619_v11, %v3275_v14 }
 0x530   : > { %v2951_v19 = vpop.permute.xlu2 %2950 }
 0x531   : > { %v6587_v42 = vadd.f32 %v2951_v19, %v2938_v46  ;;  %v6668_v46 = vstv %s4032_s7  ;;  %s4050_s7 = sld [smem:[#allocation2 + $0xd6]] }
 0x533   : > { %3152 = vrot.lane.b32.xlu0 %v3147_v27, %s4327_s25 }
 0x536   : > { %3240 = vrot.lane.b32.xlu2 %v3232_v26, %s4327_s25  ;;  %v6671_v26 = vld [vmem:[%s4420_s11 + $0x90] sm:$0xff] }
 0x537   : > { %3164 = vrot.lane.b32.xlu1 %v3160_v58, %s4326_s10  ;;  %v3361_v58 = vmul.f32 %v6671_v26, %v6668_v46 }
 0x538   : > { %v2979_v29 = vpop.permute.xlu2 %2978 }
 0x539   : > { %v2986_v56 = vadd.f32 %v2979_v29, %v2963_v6  ;;  %v3277_v29 = vmul.f32 %v6679_v52, %v3275_v14  ;;  %v2914_v6 = vmul.f32 %v6478_v47, %v6575_v40  ;;  %v2964_v14 = vmul.f32 %v6508_v60, %v6596_v12 }
 0x53b   : > { %3188 = vrot.lane.b32.xlu0 %v3182_v25, %s4327_s25 }
 0x53e   : > { %3260 = vrot.lane.b32.xlu2 %v3252_v44, %s4326_s10 }
 0x53f   : > { %3190 = vrot.lane.b32.xlu1 %v3183_v31, %s4327_s25  ;;  %v6686_v31 = vstv %s4010_s9  ;;  %s4022_s9 = sld [smem:[#allocation2 + $0xba]] }
 0x540   : > { %v2999_v37 = vpop.permute.xlu2 %2998  ;;  %v3044_v47 = vmul.f32 %v6494_v53, %v6686_v31  ;;  %v3314_v53 = vmul.f32 %v6671_v26, %v6630_v63 }
 0x541   : > { %v6616_v5 = vadd.f32 %v2999_v37, %v2986_v56  ;;  %v3291_v56 = vmul.f32 %v6679_v52, %v3289_v13  ;;  %v3312_v13 = vmul.f32 %v6679_v52, %v6630_v63 }
 0x543   : > { %3208 = vrot.lane.b32.xlu0 %v3202_v54, %s4326_s10  ;;  %v6691_v54 = vstv %s4033_s20  ;;  %s4048_s20 = sld [smem:[#allocation2 + $0xd4]] }
 0x544   : > { %v3381_v41 = vmul.f32 %v6671_v26, %v6691_v54 }
 0x545   : > { %v2864_v1 = vpop.permute.xlu0 %2863 }
 0x546   : > { %3294 = vrot.lane.b32.xlu2 %v3290_v22, %s4326_s10  ;;  %3995 = vst.msk [vmem:[%s5236_s4 + $0x1f] sm:$0xfe] %vm2873_vm9, %v2864_v1  ;;  %v2916_v22 = vmul.f32 %v6473_v15, %v6575_v40 }
 0x547   : > { %3210 = vrot.lane.b32.xlu1 %v3203_v57, %s4326_s10 }
 0x548   : > { %v3023_v17 = vpop.permute.xlu2 %3022 }
 0x549   : > { %v2866_v36 = vpop.permute.xlu1 %2865 }
 0x54a   : > { %3996 = vst.msk [vmem:[%s5236_s4 + $0x27] sm:$0xff] %vm1147_vm3, %v2866_v36 }
 0x54b   : > { %3236 = vrot.lane.b32.xlu0 %v3230_v21, %s4327_s25 }
 0x54d   : > { %v2891_v3 = vpop.permute.xlu0 %2890 }
 0x54e   : > { %3320 = vrot.lane.b32.xlu2 %v3313_v35, %s4327_s25  ;;  %v2896_v55 = vadd.f32 %v2891_v3, %v2880_v0  ;;  %v3405_v0 = vstv %s6693_s24  ;;  %s4051_s24 = sld [smem:[#allocation2 + $0xd7]] }
 0x54f   : > { %3238 = vrot.lane.b32.xlu1 %v3231_v45, %s4327_s25 }
 0x550   : > { %v6653_v2 = vadd.f32 %v6563_v16, %v2896_v55  ;;  %v3059_v38 = vpop.permute.xlu2 %3058 }
 0x551   : > { %v2893_v32 = vpop.permute.xlu1 %2892 }
 0x552   : > { %v2897_v20 = vadd.f32 %v2893_v32, %v2881_v4  ;;  %v3332_v4 = vmul.f32 %v6679_v52, %v6650_v43  ;;  %v2962_v32 = vmul.f32 %v6461_v59, %v6596_v12  ;;  %v3010_v12 = vmul.f32 %v6523_v30, %v3009_v61 }
 0x553   : > { %3256 = vrot.lane.b32.xlu0 %v3250_v62, %s4326_s10  ;;  %v6714_v62 = vld [vmem:[%s4420_s11 + $0xa8] sm:$0xff] }
 0x554   : > { %v3012_v30 = vadd.f32 %v3010_v12, %v6653_v2 }
 0x555   : > { %v2907_v16 = vpop.permute.xlu0 %2906 }
 0x556   : > { %3340 = vrot.lane.b32.xlu2 %v3333_v28, %s4326_s10  ;;  %v2911_v9 = vadd.f32 %v2907_v16, %v2897_v20  ;;  %v6726_v28 = vstv %s4013_s30  ;;  %v6730_v20 = vstv %s4038_s5  ;;  %s6889_s30 = sld [smem:[#allocation2 + $0xd0]] }
 0x557   : > { %3258 = vrot.lane.b32.xlu1 %v3251_v8, %s4326_s10  ;;  %v3334_v8 = vmul.f32 %v6671_v26, %v6650_v43  ;;  %v3092_v59 = vmul.f32 %v6518_v24, %v6726_v28  ;;  %v3360_v43 = vmul.f32 %v6636_v23, %v6668_v46  ;;  %v3093_v12 = vmul.f32 %v6546_v33, %v6726_v28  ;;  %s4028_s5 = sld [smem:[#allocation2 + $0xc0]] }
 0x558   : > { %v3013_v27 = vadd.f32 %v3011_v48, %v2911_v9  ;;  %v3079_v18 = vpop.permute.xlu2 %3078 }
 0x559   : > { %v2929_v19 = vpop.permute.xlu1 %2928 }
 0x55a   : > { %v6675_v25 = vadd.f32 %v3023_v17, %v3013_v27  ;;  %v2937_v37 = vadd.f32 %v2929_v19, %v2914_v6  ;;  %v3442_v27 = vmul.f32 %v6714_v62, %v6730_v20  ;;  %v6751_v6 = vld [vmem:[%s4420_s11 + $0x98] sm:$0x3] }
 0x55b   : > { %3280 = vrot.lane.b32.xlu0 %v3276_v51, %s4327_s25 }
 0x55d   : > { %v2933_v44 = vpop.permute.xlu0 %2932 }
 0x55e   : > { %3368 = vrot.lane.b32.xlu2 %v3361_v58, %s4327_s25  ;;  %v2939_v17 = vadd.f32 %v2933_v44, %v2916_v22  ;;  %v3362_v44 = vmul.f32 %v6751_v6, %v6668_v46  ;;  %v3380_v46 = vmul.f32 %v6636_v23, %v6691_v54 }
 0x55f   : > { %3282 = vrot.lane.b32.xlu1 %v3277_v29, %s4327_s25 }
 0x560   : > { %v3107_v57 = vpop.permute.xlu2 %3106 }
 0x561   : > { %v2949_v1 = vpop.permute.xlu1 %2948 }
 0x562   : > { %v2957_v21 = vadd.f32 %v2949_v1, %v2937_v37 }
 0x563   : > { %3296 = vrot.lane.b32.xlu0 %v3291_v56, %s4326_s10  ;;  %v6755_v56 = vstv %s4039_s6  ;;  %s6948_s6 = sld [smem:[#allocation2 + $0xbd]] }
 0x564   : > { %v3047_v36 = vadd.f32 %v3044_v47, %v2957_v21  ;;  %v3462_v1 = vmul.f32 %v6714_v62, %v6755_v56 }
 0x565   : > { %v2953_v15 = vpop.permute.xlu0 %2952 }
 0x566   : > { %v3067_v40 = vadd.f32 %v3059_v38, %v3047_v36  ;;  %3388 = vrot.lane.b32.xlu2 %v3381_v41, %s4326_s10  ;;  %v6705_v35 = vadd.f32 %v2953_v15, %v2939_v17  ;;  %v3407_v38 = vmul.f32 %v6714_v62, %v3405_v0  ;;  %v6777_v17 = vstv %s4041_s26  ;;  %s6972_s26 = sld [smem:[#allocation2 + $0xc6]] }
 0x567   : > { %3318 = vrot.lane.b32.xlu1 %v3312_v13, %s4327_s25  ;;  %v3382_v13 = vmul.f32 %v6751_v6, %v6691_v54  ;;  %v6793_v54 = vld [vmem:[%s4420_s11 + $0xa0] sm:$0xff] }
 0x568   : > { %v3127_v45 = vpop.permute.xlu2 %3126  ;;  %v6711_v3 = vadd.f32 %v3079_v18, %v3067_v40 }
 0x569   : > { %v2977_v55 = vpop.permute.xlu1 %2976 }
 0x56a   : > { %v2985_v48 = vadd.f32 %v2977_v55, %v2962_v32  ;;  %v3419_v32 = vstv %s6771_s17  ;;  %s4046_s17 = sld [smem:[#allocation2 + $0xd2]] }
 0x56b   : > { %3322 = vrot.lane.b32.xlu0 %v3314_v53, %s4327_s25 }
 0x56d   : > { %v2981_v63 = vpop.permute.xlu0 %2980 }
 0x56e   : > { %3412 = vrot.lane.b32.xlu2 %v3407_v38, %s4327_s25  ;;  %v2987_v18 = vadd.f32 %v2981_v63, %v2964_v14  ;;  %v6805_v14 = vstv %s4042_s27  ;;  %s4049_s27 = sld [smem:[#allocation2 + $0xd5]] }
 0x56f   : > { %3338 = vrot.lane.b32.xlu1 %v3332_v4, %s4326_s10  ;;  %v3406_v4 = vmul.f32 %v6793_v54, %v3405_v0 }
 0x570   : > { %v3151_v16 = vpop.permute.xlu2 %3150 }
 0x571   : > { %v2997_v9 = vpop.permute.xlu1 %2996 }
 0x572   : > { %v3005_v51 = vadd.f32 %v2997_v9, %v2985_v48  ;;  %v3420_v48 = vmul.f32 %v6793_v54, %v3419_v32  ;;  %v3421_v9 = vmul.f32 %v6714_v62, %v3419_v32 }
 0x573   : > { %3342 = vrot.lane.b32.xlu0 %v3334_v8, %s4326_s10 }
 0x574   : > { %v3095_v60 = vadd.f32 %v3092_v59, %v3005_v51 }
 0x575   : > { %v3001_v19 = vpop.permute.xlu0 %3000 }
 0x576   : > { %v3115_v58 = vadd.f32 %v3107_v57, %v3095_v60  ;;  %3448 = vrot.lane.b32.xlu2 %v3442_v27, %s4327_s25  ;;  %v6747_v29 = vadd.f32 %v3001_v19, %v2987_v18  ;;  %v3139_v57 = vstv %s6736_s8  ;;  %v6820_v18 = vstv %s4047_s29  ;;  %s6956_s8 = sld [smem:[#allocation2 + $0xd1]] }
 0x577   : > { %3366 = vrot.lane.b32.xlu1 %v3360_v43, %s4327_s25  ;;  %v3140_v21 = vmul.f32 %v6541_v34, %v3139_v57  ;;  %v3045_v34 = vmul.f32 %v6518_v24, %v6686_v31  ;;  %s4043_s29 = sld [smem:[#allocation2 + $0xcf]] }
 0x578   : > { %v6757_v37 = vpop.permute.xlu2 %3166  ;;  %v6760_v61 = vadd.f32 %v3127_v45, %v3115_v58  ;;  %v6785_v45 = vld [vmem:[%s4420_s11 + $0xb0] sm:$0xff] }
 0x579   : > { %v3021_v22 = vpop.permute.xlu1 %3020  ;;  %v3490_v55 = vmul.f32 %v6785_v45, %v6777_v17  ;;  %v3048_v24 = vadd.f32 %v3045_v34, %v6587_v42  ;;  %v3443_v43 = vmul.f32 %v6785_v45, %v6730_v20  ;;  %v6844_v34 = vstv %s4050_s7  ;;  %s4060_s7 = sshll.u32 %s4371_s16, 6  ;;  %s3695_s16 = scalar_lea.sflag [#allocation3], %s188_s19 }
 0x57a   : > { %v3026_v47 = vadd.f32 %v3021_v22, %v3012_v30 }
 0x57b   : > { %3370 = vrot.lane.b32.xlu0 %v3362_v44, %s4327_s25  ;;  %v6827_v44 = vld [vmem:[%s4420_s11 + $0xd0] sm:$0xff] }
 0x57c   : > { %v3572_v30 = vmul.f32 %v6827_v44, %v6820_v18 }
 0x57d   : > { %v3035_v2 = vpop.permute.xlu0 %3034 }
 0x57e   : > { %3468 = vrot.lane.b32.xlu2 %v3462_v1, %s4326_s10  ;;  %v3040_v41 = vadd.f32 %v3035_v2, %v3026_v47  ;;  %v6833_v47 = vld [vmem:[%s4420_s11 + $0xb8] sm:$0xff] }
 0x57f   : > { %3386 = vrot.lane.b32.xlu1 %v3380_v46, %s4326_s10  ;;  %v3444_v1 = vmul.f32 %v6833_v47, %v6730_v20  ;;  %v3491_v32 = vmul.f32 %v6833_v47, %v6777_v17 }
 0x580   : > { %v3142_v36 = vadd.f32 %v3140_v21, %v3040_v41  ;;  %v3193_v15 = vpop.permute.xlu2 %3192  ;;  %v3096_v21 = vadd.f32 %v3093_v12, %v6616_v5  ;;  %v6887_v12 = vstv %s4051_s24  ;;  %s3706_s24 = scalar_lea.hbm %s7070_s3, %s4060_s7 }
 0x581   : > { %v3037_v40 = vpop.permute.xlu1 %3036 }
 0x582   : > { %v6782_v53 = vadd.f32 %v3037_v40, %v6675_v25  ;;  %v6789_v38 = vadd.f32 %v3151_v16, %v3142_v36  ;;  %v3046_v25 = vmul.f32 %v6546_v33, %v6686_v31  ;;  %v3510_v31 = vmul.f32 %v6785_v45, %v6805_v14 }
 0x583   : > { %3390 = vrot.lane.b32.xlu0 %v3382_v13, %s4326_s10  ;;  %v3094_v33 = vmul.f32 %v6571_v50, %v6726_v28  ;;  %v3463_v36 = vmul.f32 %v6785_v45, %v6755_v56  ;;  %v6850_v28 = vld [vmem:[%s4420_s11 + $0xd8] sm:$0xff] }
 0x584   : > { %v3049_v0 = vadd.f32 %v3046_v25, %v6705_v35  ;;  %v6816_v35 = vstv %s4019_s28  ;;  %v6861_v25 = vstv %s4022_s9  ;;  %s4052_s28 = sld [smem:[#allocation5 + $0x3]] }
 0x585   : > { %v3061_v63 = vpop.permute.xlu0 %3060  ;;  %v3176_v60 = vmul.f32 %v6566_v7, %v6816_v35  ;;  %v3097_v20 = vadd.f32 %v3094_v33, %v6747_v29  ;;  %v3535_v33 = vstv %s6889_s30  ;;  %s3707_s30 = sshll.u32 %s5236_s4, 4  ;;  %s3708_s30 = int_to_ptr.vmem [resolvable:$true] %s3707_s30 }
 0x586   : > { %3496 = vrot.lane.b32.xlu2 %v3490_v55, %s4327_s25  ;;  %v3068_v8 = vadd.f32 %v3061_v63, %v3048_v24  ;;  %v3464_v55 = vmul.f32 %v6833_v47, %v6755_v56  ;;  %v6865_v63 = vstv %s4048_s20  ;;  %v3224_v56 = vmul.f32 %v6590_v10, %v6861_v25 }
 0x587   : > { %3410 = vrot.lane.b32.xlu1 %v3406_v4, %s4327_s25 }
 0x588   : > { %v3213_v16 = vpop.permute.xlu2 %3212 }
 0x589   : > { %v3063_v42 = vpop.permute.xlu1 %3062 }
 0x58a   : > { %v3069_v59 = vadd.f32 %v3063_v42, %v3049_v0  ;;  %v6876_v42 = vld [vmem:[%s4420_s11 + $0xc0] sm:$0x3] }
 0x58b   : > { %3424 = vrot.lane.b32.xlu0 %v3420_v48, %s4326_s10 }
 0x58d   : > { %v3081_v51 = vpop.permute.xlu0 %3080 }
 0x58e   : > { %3516 = vrot.lane.b32.xlu2 %v3510_v31, %s4326_s10  ;;  %v6813_v27 = vadd.f32 %v3081_v51, %v3068_v8  ;;  %v3141_v8 = vmul.f32 %v6555_v49, %v3139_v57 }
 0x58f   : > { %3426 = vrot.lane.b32.xlu1 %v3421_v9, %s4326_s10 }
 0x590   : > { %v3241_v22 = vpop.permute.xlu2 %3240  ;;  %v3143_v9 = vadd.f32 %v3141_v8, %v6782_v53  ;;  %v3174_v53 = vmul.f32 %v6555_v49, %v6816_v35  ;;  %v3175_v49 = vmul.f32 %v6607_v39, %v6816_v35 }
 0x591   : > { %v3083_v19 = vpop.permute.xlu1 %3082 }
 0x592   : > { %v3089_v58 = vadd.f32 %v3083_v19, %v3069_v59  ;;  %v3492_v59 = vmul.f32 %v6876_v42, %v6777_v17 }
 0x593   : > { %3450 = vrot.lane.b32.xlu0 %v3443_v43, %s4327_s25 }
 0x594   : > { %v3179_v46 = vadd.f32 %v3176_v60, %v3089_v58  ;;  %v3511_v60 = vmul.f32 %v6833_v47, %v6805_v14 }
 0x595   : > { %v3109_v2 = vpop.permute.xlu0 %3108 }
 0x596   : > { %v3199_v41 = vadd.f32 %v3193_v15, %v3179_v46  ;;  %3578 = vrot.lane.b32.xlu2 %v3572_v30, %s4327_s25  ;;  %v3116_v13 = vadd.f32 %v3109_v2, %v3096_v21  ;;  %v3620_v15 = vmul.f32 %v6850_v28, %v6844_v34  ;;  %v3573_v21 = vmul.f32 %v6850_v28, %v6820_v18 }
 0x597   : > { %3452 = vrot.lane.b32.xlu1 %v3444_v1, %s4327_s25  ;;  %v3177_v1 = vadd.f32 %v3174_v53, %v6711_v3  ;;  %v3178_v2 = vadd.f32 %v3175_v49, %v6813_v27  ;;  %v3549_v49 = vstv %s6956_s8 }
 0x598   : > { %v6847_v5 = vadd.f32 %v3213_v16, %v3199_v41  ;;  %v3261_v4 = vpop.permute.xlu2 %3260  ;;  %v3592_v16 = vmul.f32 %v6827_v44, %v6865_v63 }
 0x599   : > { %v3111_v40 = vpop.permute.xlu1 %3110 }
 0x59a   : > { %v3117_v50 = vadd.f32 %v3111_v40, %v3097_v20 }
 0x59b   : > { %3470 = vrot.lane.b32.xlu0 %v3463_v36, %s4326_s10  ;;  %v6923_v36 = vld [vmem:[%s4420_s11 + $0xe0] sm:$0xff] }
 0x59c   : > { %v3574_v20 = vmul.f32 %v6923_v36, %v6820_v18 }
 0x59d   : > { %v3129_v24 = vpop.permute.xlu0 %3128 }
 0x59e   : > { %3626 = vrot.lane.b32.xlu2 %v3620_v15, %s4327_s25  ;;  %v6858_v29 = vadd.f32 %v3129_v24, %v3116_v13  ;;  %v6916_v13 = vld [vmem:[%s4420_s11 + $0xc8] sm:$0xff]  ;;  %v3621_v15 = vmul.f32 %v6923_v36, %v6844_v34 }
 0x59f   : > { %3472 = vrot.lane.b32.xlu1 %v3464_v55, %s4326_s10  ;;  %v3536_v35 = vmul.f32 %v6916_v13, %v3535_v33 }
 0x5a0   : > { %v6882_v43 = vpop.permute.xlu2 %3294 }
 0x5a1   : > { %v3131_v48 = vpop.permute.xlu1 %3130 }
 0x5a2   : > { %v3137_v0 = vadd.f32 %v3131_v48, %v3117_v50  ;;  %v6931_v50 = vstv %s4028_s5  ;;  %s3709_s5 = sshll.u32 %s3706_s24, 4  ;;  %s3710_s5 = int_to_ptr.hbm [resolvable:$true] %s3709_s5 }
 0x5a3   : > { %3498 = vrot.lane.b32.xlu0 %v3491_v32, %s4327_s25  ;;  %v3305_v55 = vmul.f32 %v6636_v23, %v6931_v50 }
 0x5a4   : > { %v3227_v31 = vadd.f32 %v3224_v56, %v3137_v0  ;;  %v6941_v56 = vld [vmem:[%s4420_s11 + $0xe8] sm:$0x3]  ;;  %s4031_s11 = sld [smem:[#allocation2 + $0xc3]] }
 0x5a5   : > { %v3153_v51 = vpop.permute.xlu0 %3152  ;;  %v3622_v8 = vmul.f32 %v6941_v56, %v6844_v34 }
 0x5a6   : > { %v3247_v10 = vadd.f32 %v3241_v22, %v3227_v31  ;;  %3598 = vrot.lane.b32.xlu2 %v3592_v16, %s4326_s10  ;;  %v3157_v57 = vadd.f32 %v3153_v51, %v3143_v9  ;;  %v3640_v22 = vmul.f32 %v6850_v28, %v6887_v12  ;;  %v3223_v16 = vmul.f32 %v6566_v7, %v6861_v25 }
 0x5a7   : > { %3500 = vrot.lane.b32.xlu1 %v3492_v59, %s4327_s25  ;;  %v3593_v9 = vmul.f32 %v6850_v28, %v6865_v63 }
 0x5a8   : > { %v6892_v17 = vadd.f32 %v6757_v37, %v3157_v57  ;;  %v6896_v19 = vadd.f32 %v3261_v4, %v3247_v10  ;;  %v3512_v37 = vmul.f32 %v6876_v42, %v6805_v14  ;;  %v3321_v14 = vpop.permute.xlu2 %3320  ;;  %v3222_v4 = vmul.f32 %v6607_v39, %v6861_v25 }
 0x5a9   : > { %v3165_v58 = vpop.permute.xlu1 %3164  ;;  %v3226_v34 = vadd.f32 %v3223_v16, %v6858_v29  ;;  %v3594_v25 = vmul.f32 %v6923_v36, %v6865_v63  ;;  %v3641_v29 = vmul.f32 %v6923_v36, %v6887_v12  ;;  %v3551_v63 = vmul.f32 %v6827_v44, %v3549_v49 }
 0x5aa   : > { %v6899_v30 = vadd.f32 %v3165_v58, %v6789_v38  ;;  %v3225_v0 = vadd.f32 %v3222_v4, %v6760_v61  ;;  %v3351_v58 = vstv %s4031_s11  ;;  %v3399_v4 = vstv %s6972_s26 }
 0x5ab   : > { %3518 = vrot.lane.b32.xlu0 %v3511_v60, %s4326_s10  ;;  %v3269_v60 = vstv %s6948_s6  ;;  %s4257_s6 = sshra.s32 %s3710_s5, 4  ;;  %s4258_s6 = int_to_ptr.hbm [resolvable:$true] %s4257_s6 }
 0x5ac   : > { %s4259_s11 = scalar_lea.hbm %s4258_s6, 64  ;;  %p4264_p3 = scmp.lt.s32.totalorder %s4258_s6, %s7070_s3 }
 0x5ad   : > { %v3189_v46 = vpop.permute.xlu0 %3188  ;;  %p4260_p0 = scmp.ne.s32.totalorder %s4258_s6, %s4259_s11 }
 0x5ae   : > { %3646 = vrot.lane.b32.xlu2 %v3640_v22, %s4326_s10  ;;  %v3197_v38 = vadd.f32 %v3189_v46, %v3177_v1  ;;  %v3353_v22 = vmul.f32 %v6671_v26, %v3351_v58 }
 0x5af   : > { %3520 = vrot.lane.b32.xlu1 %v3512_v37, %s4326_s10  ;;  %v3270_v37 = vmul.f32 %v6619_v11, %v3269_v60  ;;  %p4261_p1 = pnand %p4260_p0, %p4388_p5 }
 0x5b0   : > { %v3341_v32 = vpop.permute.xlu2 %3340 }
 0x5b1   : > { %v3191_v41 = vpop.permute.xlu1 %3190  ;;  %p4262_p2 = pneg %p4261_p1 }
 0x5b2   : > { %v3198_v3 = vadd.f32 %v3191_v41, %v3178_v2  ;;  %v3272_v2 = vadd.f32 %v3270_v37, %v6899_v30 }
 0x5b3   : > { %3580 = vrot.lane.b32.xlu0 %v3573_v21, %s4327_s25 }
 0x5b5   : > { %v3209_v40 = vpop.permute.xlu0 %3208 }
 0x5b6   : > { %3540 = vrot.lane.b32.xlu2 %v3536_v35, %s4327_s25  ;;  %v6928_v27 = vadd.f32 %v3209_v40, %v3197_v38  ;;  %v3642_v38 = vmul.f32 %v6941_v56, %v6887_v12 }
 0x5b7   : > { %3582 = vrot.lane.b32.xlu1 %v3574_v20, %s4327_s25  ;;  %v3537_v20 = vmul.f32 %v6827_v44, %v3535_v33 }
 0x5b8   : > { %v3369_v10 = vpop.permute.xlu2 %3368 }
 0x5b9   : > { %v3211_v24 = vpop.permute.xlu1 %3210 }
 0x5ba   : > { %v3218_v18 = vadd.f32 %v3211_v24, %v3198_v3  ;;  %v3550_v24 = vmul.f32 %v6916_v13, %v3549_v49  ;;  %v3400_v49 = vmul.f32 %v6793_v54, %v3399_v4 }
 0x5bb   : > { %3628 = vrot.lane.b32.xlu0 %v3621_v15, %s4327_s25 }
 0x5bc   : > { %v3308_v48 = vadd.f32 %v3305_v55, %v3218_v18  ;;  %v3401_v18 = vmul.f32 %v6714_v62, %v3399_v4 }
 0x5bd   : > { %v3237_v59 = vpop.permute.xlu0 %3236 }
 0x5be   : > { %v3328_v39 = vadd.f32 %v3321_v14, %v3308_v48  ;;  %v3245_v31 = vadd.f32 %v3237_v59, %v3225_v0  ;;  %v3271_v14 = vmul.f32 %v6679_v52, %v3269_v60  ;;  %3556 = vrot.lane.b32.xlu2 %v3551_v63, %s4326_s10  ;;  %v3306_v48 = vmul.f32 %v6671_v26, %v6931_v50 }
 0x5bf   : > { %3630 = vrot.lane.b32.xlu1 %v3622_v8, %s4327_s25 }
 0x5c0   : > { %v6954_v51 = vadd.f32 %v3341_v32, %v3328_v39  ;;  %v3389_v35 = vpop.permute.xlu2 %3388  ;;  %v3273_v40 = vadd.f32 %v3271_v14, %v6892_v17  ;;  %v3304_v32 = vmul.f32 %v6679_v52, %v6931_v50 }
 0x5c1   : > { %v3239_v61 = vpop.permute.xlu1 %3238 }
 0x5c2   : > { %v3246_v7 = vadd.f32 %v3239_v61, %v3226_v34  ;;  %v3307_v17 = vadd.f32 %v3304_v32, %v6928_v27  ;;  %v3354_v27 = vmul.f32 %v6751_v6, %v3351_v58 }
 0x5c3   : > { %3600 = vrot.lane.b32.xlu0 %v3593_v9, %s4326_s10 }
 0x5c4   : > { %v3357_v26 = vadd.f32 %v3354_v27, %v6896_v19 }
 0x5c5   : > { %v3257_v57 = vpop.permute.xlu0 %3256 }
 0x5c6   : > { %v3265_v53 = vadd.f32 %v3257_v57, %v3245_v31  ;;  %v3309_v31 = vadd.f32 %v3306_v48, %v6847_v5 }
 0x5c7   : > { %3602 = vrot.lane.b32.xlu1 %v3594_v25, %s4326_s10 }
 0x5c8   : > { %v3413_v0 = vpop.permute.xlu2 %3412 }
 0x5c9   : > { %v3259_v1 = vpop.permute.xlu1 %3258 }
 0x5ca   : > { %v3266_v46 = vadd.f32 %v3259_v1, %v3246_v7  ;;  %v3352_v7 = vmul.f32 %v6636_v23, %v3351_v58 }
 0x5cb   : > { %3648 = vrot.lane.b32.xlu0 %v3641_v29, %s4326_s10 }
 0x5cc   : > { %v3356_v21 = vadd.f32 %v3353_v22, %v3266_v46  ;;  %v3355_v57 = vadd.f32 %v3352_v7, %v3265_v53  ;;  %v3611_v7 = vstv %s4049_s27 }
 0x5cd   : > { %v3281_v11 = vpop.permute.xlu0 %3280 }
 0x5ce   : > { %v3376_v41 = vadd.f32 %v3369_v10, %v3356_v21  ;;  %v3286_v3 = vadd.f32 %v3281_v11, %v3272_v2 }
 0x5cf   : > { %3650 = vrot.lane.b32.xlu1 %v3642_v38, %s4326_s10 }
 0x5d0   : > { %v3300_v12 = vadd.f32 %v6882_v43, %v3286_v3  ;;  %v6983_v15 = vadd.f32 %v3389_v35, %v3376_v41  ;;  %v3449_v50 = vpop.permute.xlu2 %3448 }
 0x5d1   : > { %v3283_v30 = vpop.permute.xlu1 %3282 }
 0x5d2   : > { %v3287_v55 = vadd.f32 %v3283_v30, %v3273_v40  ;;  %v3402_v38 = vadd.f32 %v3400_v49, %v3300_v12 }
 0x5d3   : > { %3542 = vrot.lane.b32.xlu0 %v3537_v20, %s4327_s25  ;;  %s4040_s25 = sld [smem:[#allocation2 + $0xcc]] }
 0x5d5   : > { %v3297_v8 = vpop.permute.xlu0 %3296 }
 0x5d6   : > { %v3301_v33 = vadd.f32 %v3297_v8, %v3287_v55 }
 0x5d7   : > { %3554 = vrot.lane.b32.xlu1 %v3550_v24, %s4326_s10  ;;  %s4037_s10 = sld [smem:[#allocation2 + $0xc9]] }
 0x5d8   : > { %v3403_v43 = vadd.f32 %v3401_v18, %v3301_v33  ;;  %v3469_v23 = vpop.permute.xlu2 %3468 }
 0x5d9   : > { %v3319_v16 = vpop.permute.xlu1 %3318  ;;  %v3481_v32 = vstv %s4040_s25 }
 0x5da   : > { %v3327_v59 = vadd.f32 %v3319_v16, %v3307_v17  ;;  %v3417_v39 = vadd.f32 %v3413_v0, %v3403_v43  ;;  %v3482_v8 = vmul.f32 %v6785_v45, %v3481_v32  ;;  %v3563_v16 = vstv %s4046_s17 }
 0x5dd   : > { %v3323_v9 = vpop.permute.xlu0 %3322  ;;  %v3433_v55 = vstv %s4037_s10  ;;  %s4263_s10 = scalar_lea.hbm %s7070_s3, 128 }
 0x5de   : > { %v3329_v34 = vadd.f32 %v3323_v9, %v3309_v31  ;;  %v3434_v24 = vmul.f32 %v6714_v62, %v3433_v55  ;;  %v3435_v17 = vmul.f32 %v6785_v45, %v3433_v55  ;;  %v3436_v9 = vmul.f32 %v6833_v47, %v3433_v55  ;;  %p4265_p4 = scmp.lt.s32.totalorder %s4263_s10, %s4259_s11 }
 0x5df   : > { %v3614_v55 = vmul.f32 %v6941_v56, %v3611_v7 }
 0x5e0   : > { %v3497_v58 = vpop.permute.xlu2 %3496  ;;  %v3438_v31 = vadd.f32 %v3435_v17, %v6954_v51  ;;  %p4266_p7 = por %p4265_p4, %p4264_p3 }
 0x5e1   : > { %v3339_v61 = vpop.permute.xlu1 %3338 }
 0x5e2   : > { %v3347_v52 = vadd.f32 %v3339_v61, %v3327_v59  ;;  %p4267_p8 = pnand %p4266_p7, %p4262_p2 }
 0x5e4   : > { %v3437_v33 = vadd.f32 %v3434_v24, %v3347_v52  ;;  %v3483_v52 = vmul.f32 %v6833_v47, %v3481_v32  ;;  %v3566_v47 = vmul.f32 %v6923_v36, %v3563_v16 }
 0x5e5   : > { %v3343_v25 = vpop.permute.xlu0 %3342 }
 0x5e6   : > { %v3349_v10 = vadd.f32 %v3343_v25, %v3329_v34  ;;  %v3457_v0 = vadd.f32 %v3449_v50, %v3437_v33  ;;  %v3564_v34 = vmul.f32 %v6827_v44, %v3563_v16 }
 0x5e8   : > { %v3517_v3 = vpop.permute.xlu2 %3516  ;;  %v3477_v61 = vadd.f32 %v3469_v23, %v3457_v0  ;;  %v3439_v27 = vadd.f32 %v3436_v9, %v3349_v10 }
 0x5e9   : > { %v3367_v60 = vpop.permute.xlu1 %3366 }
 0x5ea   : > { %v3375_v29 = vadd.f32 %v3367_v60, %v3355_v57  ;;  %v3565_v60 = vmul.f32 %v6850_v28, %v3563_v16  ;;  %v3567_v50 = vadd.f32 %v3564_v34, %v3477_v61  ;;  %v3529_v16 = vstv %s4043_s29 }
 0x5eb   : > { %v3531_v56 = vmul.f32 %v6827_v44, %v3529_v16  ;;  %v3530_v9 = vmul.f32 %v6916_v13, %v3529_v16 }
 0x5ed   : > { %v3371_v22 = vpop.permute.xlu0 %3370 }
 0x5ee   : > { %v3377_v37 = vadd.f32 %v3371_v22, %v3357_v26  ;;  %v3486_v22 = vadd.f32 %v3483_v52, %v6983_v15  ;;  %v3613_v15 = vmul.f32 %v6923_v36, %v3611_v7 }
 0x5f0   : > { %v3579_v54 = vpop.permute.xlu2 %3578 }
 0x5f1   : > { %v3387_v1 = vpop.permute.xlu1 %3386 }
 0x5f2   : > { %v3395_v5 = vadd.f32 %v3387_v1, %v3375_v29  ;;  %v3612_v29 = vmul.f32 %v6850_v28, %v3611_v7 }
 0x5f4   : > { %v3485_v48 = vadd.f32 %v3482_v8, %v3395_v5  ;;  %v3587_v5 = vadd.f32 %v3579_v54, %v3567_v50  ;;  %v3672_v8 = vstv %s4052_s28 }
 0x5f5   : > { %v3391_v46 = vpop.permute.xlu0 %3390 }
 0x5f6   : > { %v7000_v63 = vadd.f32 %v3391_v46, %v3377_v37  ;;  %v3505_v62 = vadd.f32 %v3497_v58, %v3485_v48  ;;  %v3484_v37 = vmul.f32 %v6876_v42, %v3481_v32 }
 0x5f8   : > { %v3627_v4 = vpop.permute.xlu2 %3626  ;;  %v3525_v26 = vadd.f32 %v3517_v3, %v3505_v62  ;;  %v3487_v28 = vadd.f32 %v3484_v37, %v7000_v63 }
 0x5f9   : > { %v3411_v21 = vpop.permute.xlu1 %3410 }
 0x5fa   : > { %v3416_v53 = vadd.f32 %v3411_v21, %v3402_v38  ;;  %v3615_v23 = vadd.f32 %v3612_v29, %v3525_v26 }
 0x5fd   : > { %v3425_v2 = vpop.permute.xlu0 %3424 }
 0x5fe   : > { %v7002_v6 = vadd.f32 %v3425_v2, %v3416_v53 }
 0x600   : > { %v3599_v59 = vpop.permute.xlu2 %3598 }
 0x601   : > { %v3427_v14 = vpop.permute.xlu1 %3426  ;;  %v3607_v38 = vadd.f32 %v3599_v59, %v3587_v5 }
 0x602   : > { %v7004_v19 = vadd.f32 %v3427_v14, %v3417_v39 }
 0x604   : > { %v3533_v7 = vadd.f32 %v3531_v56, %v7004_v19 }
 0x605   : > { %v3451_v11 = vpop.permute.xlu0 %3450 }
 0x606   : > { %v3458_v25 = vadd.f32 %v3451_v11, %v3438_v31  ;;  %v3635_v11 = vadd.f32 %v3627_v4, %v3615_v23 }
 0x608   : > { %v3647_v10 = vpop.permute.xlu2 %3646 }
 0x609   : > { %v3453_v41 = vpop.permute.xlu1 %3452  ;;  %v3655_v54 = vadd.f32 %v3647_v10, %v3635_v11 }
 0x60a   : > { %v3459_v51 = vadd.f32 %v3453_v41, %v3439_v27  ;;  %v3662_v41 = vrot.slane %v3607_v38, 1  ;;  %v3532_v27 = vadd.f32 %v3530_v9, %v7002_v6 }
 0x60b   : > { %v3673_v17 = vadd.f32 %v3672_v8, %v3655_v54 }
 0x60d   : > { %v3471_v35 = vpop.permute.xlu0 %3470  ;;  %v3680_v31 = vrot.slane %v3673_v17, 2 }
 0x60e   : > { %v3478_v45 = vadd.f32 %v3471_v35, %v3458_v25 }
 0x610   : > { %v3568_v46 = vadd.f32 %v3565_v60, %v3478_v45 }
 0x611   : > { %v3473_v20 = vpop.permute.xlu1 %3472 }
 0x612   : > { %v3479_v49 = vadd.f32 %v3473_v20, %v3459_v51 }
 0x614   : > { %v3569_v14 = vadd.f32 %v3566_v47, %v3479_v49 }
 0x615   : > { %v3499_v40 = vpop.permute.xlu0 %3498 }
 0x616   : > { %v3506_v21 = vadd.f32 %v3499_v40, %v3486_v22 }
 0x619   : > { %v3501_v30 = vpop.permute.xlu1 %3500 }
 0x61a   : > { %v3507_v3 = vadd.f32 %v3501_v30, %v3487_v28 }
 0x61d   : > { %v3519_v12 = vpop.permute.xlu0 %3518 }
 0x61e   : > { %v3526_v58 = vadd.f32 %v3519_v12, %v3506_v21 }
 0x620   : > { %v3616_v32 = vadd.f32 %v3613_v15, %v3526_v58 }
 0x621   : > { %v3521_v18 = vpop.permute.xlu1 %3520 }
 0x622   : > { %v3527_v24 = vadd.f32 %v3521_v18, %v3507_v3 }
 0x624   : > { %v3617_v48 = vadd.f32 %v3614_v55, %v3527_v24 }
 0x625   : > { %v3581_v43 = vpop.permute.xlu0 %3580 }
 0x626   : > { %v3588_v53 = vadd.f32 %v3581_v43, %v3568_v46  ;;  %v3541_v43 = vpop.permute.xlu2 %3540 }
 0x627   : > { %v3546_v44 = vadd.f32 %v3541_v43, %v3532_v27 }
 0x629   : > { %v3583_v39 = vpop.permute.xlu1 %3582 }
 0x62a   : > { %v3589_v35 = vadd.f32 %v3583_v39, %v3569_v14 }
 0x62d   : > { %v3629_v57 = vpop.permute.xlu0 %3628 }
 0x62e   : > { %v3636_v33 = vadd.f32 %v3629_v57, %v3616_v32  ;;  %v3557_v57 = vpop.permute.xlu2 %3556 }
 0x631   : > { %v3631_v1 = vpop.permute.xlu1 %3630 }
 0x632   : > { %v3637_v59 = vadd.f32 %v3631_v1, %v3617_v48 }
 0x635   : > { %v3601_v2 = vpop.permute.xlu0 %3600 }
 0x636   : > { %v3608_v42 = vadd.f32 %v3601_v2, %v3588_v53 }
 0x638   : > { %v3663_v20 = vrot.slane %v3608_v42, 1 }
 0x639   : > { %v3603_v40 = vpop.permute.xlu1 %3602 }
 0x63a   : > { %v3609_v63 = vadd.f32 %v3603_v40, %v3589_v35  ;;  %v3664_v12 = vsel %vm3661_vm10, %v3662_v41, %v3663_v20 }
 0x63c   : > { %v3665_v36 = vrot.slane %v3609_v63, 1 }
 0x63d   : > { %v3649_v4 = vpop.permute.xlu0 %3648 }
 0x63e   : > { %v3656_v0 = vadd.f32 %v3649_v4, %v3636_v33  ;;  %v3666_v30 = vsel %vm3661_vm10, %v3663_v20, %v3665_v36 }
 0x640   : > { %v3674_v39 = vadd.f32 %v3672_v8, %v3656_v0 }
 0x641   : > { %v3651_v18 = vpop.permute.xlu1 %3650 }
 0x642   : > { %v3681_v62 = vrot.slane %v3674_v39, 2  ;;  %v3657_v34 = vadd.f32 %v3651_v18, %v3637_v59 }
 0x644   : > { %v3675_v61 = vadd.f32 %v3672_v8, %v3657_v34  ;;  %v3682_v25 = vsel %vm3679_vm11, %v3680_v31, %v3681_v62 }
 0x645   : > { %v3543_v52 = vpop.permute.xlu0 %3542 }
 0x646   : > { %v3683_v45 = vrot.slane %v3675_v61, 2  ;;  %v3547_v60 = vadd.f32 %v3543_v52, %v3533_v7 }
 0x648   : > { %v3561_v29 = vadd.f32 %v3557_v57, %v3547_v60  ;;  %v3684_v13 = vsel %vm3679_vm11, %v3681_v62, %v3683_v45 }
 0x649   : > { %v3555_v26 = vpop.permute.xlu1 %3554 }
 0x64a   : > { %v3670_v19 = vadd.f32 %v3666_v30, %v3561_v29  ;;  %v3560_v50 = vadd.f32 %v3555_v26, %v3546_v44 }
 0x64c   : > { %v3688_v51 = vadd.f32 %v3684_v13, %v3670_v19  ;;  %v3669_v6 = vadd.f32 %v3664_v12, %v3560_v50 }
 0x64e   : > { %v3690_v22 = vmax.f32 %v3688_v51, 0.0  ;;  %v3687_v37 = vadd.f32 %v3682_v25, %v3669_v6 }
 0x650   : > { %4054 = vst.msk [vmem:[%s5236_s4 + $0x38] sm:$0xff] %vm1147_vm3, %v3690_v22  ;;  %v3689_v1 = vmax.f32 %v3687_v37, 0.0 }
 0x652   : > { %4053 = vst.msk [vmem:[%s5236_s4 + $0x30] sm:$0xff] %vm1147_vm3, %v3689_v1 }
 0x653   : > { %4270 = shalt.err (!%p4267_p8)
}
 0x654   : > { %s4328_s19 = smov 128   ;;  %s4329_s4 = smov 8  }
 0x655   : > { %4070 = dma.vmem_to_hbm [thread:$0]  (%p4388_p5), %s3708_s30, 1024, %s3710_s5, %s3695_s16, %s4328_s19, %s4328_s19, %s4329_s4  }
 0x656 PF: > { %p4087_p9 = scmp.ge.s32.totalorder %s4313_s15, 2  ;;  %s3724_s27 = sand.u32 1, %s4301_s12  }
 0x657   : > { %s3725_s28 = scalar_lea.sflag [#allocation3], %s3724_s27 }
 0x658   : > { %p4080_p10 = pnand %p4087_p9, %p4392_p6 }
 0x65a   : > { %p4081_p11 = pneg %p4080_p10 }
 0x65c   : > { %4296 = dma.done.wait (%p4081_p11), %s3725_s28, 1024  }
 0x65d   : > { %4298 = vsyncadd (%p4081_p11), %s3725_s28, 4294966272  ;;  %p15_p12 = scmp.ge.s32.totalorder %s4375_s18, 4   ;;  %s7429_s12 = smov %s4305_s13 }
 0x65e   : > { %s7430_s13 = smov %s4309_s14  ;;  %s7431_s14 = smov %s4386_s21 }
 0x65f   : > { %s7432_s15 = smov %s4375_s18  ;;  %17 = sbr.rel (!%p15_p12) target bundleno = 5 (0x5), region = 84 }
 0x664   :  { %3731 = vsyncpa [#allocation3], 1 }
 0x665   :  { %3733 = vsyncpa [#allocation3 + $0x1], 1 }
 0x666   :  { %3734 = vsyncpa [#allocation4], 1 }
 0x667   :  { %3736 = vsyncpa [#allocation4 + $0x1], 1 }
 0x668   :  { %3737 = vsyncpa [#allocation6], 1 }

</bundles_post_ra>
